<compile_context>
chip_gen: v5e
topology: v5e:2x2
jax: 0.10.0
libtpu: 0.0.40
codegen_flags: <defaults>
</compile_context>

<pallas_src>
import functools

import jax
import jax.numpy as jnp
from jax.experimental import pallas as pl
from jax.experimental.pallas import tpu as pltpu

EPS = 1e-5


def _round_up(x, m):
    return ((x + m - 1) // m) * m


def _make_kernels(k, stride, oh, ow, cin_p, cout, cp):
    """Build the two kernel bodies with all conv geometry baked in as Python statics."""
    taps = [(dy, dx) for dy in range(k) for dx in range(k)]
    m = oh * ow

    def conv_acc(x_ref, w_ref):
        # Fused im2col: k*k unrolled tap windows of the padded image, each a small MXU matmul,
        # accumulated in f32.  Zero-padded channels contribute exactly 0.
        acc = jnp.zeros((m, cp), jnp.float32)
        for t, (dy, dx) in enumerate(taps):
            if stride == 1:
                xt = x_ref[0, dy:dy + oh, dx:dx + ow, :]          # (OH, OW, Cin_p) bf16
            else:
                xt = x_ref[0, pl.ds(dy, oh, stride=stride),
                           pl.ds(dx, ow, stride=stride), :]
            acc = acc + jnp.dot(xt.reshape(m, cin_p), w_ref[t],
                                preferred_element_type=jnp.float32)
        return acc

    def stats_kernel(x_ref, w_ref, sum_ref, sq_ref):
        """Pass 1: conv (recomputed, never stored) -> per-channel partial sum / sumsq."""
        acc = conv_acc(x_ref, w_ref)
        sum_ref[0] = jnp.sum(acc, axis=0, keepdims=True)           # (1, Cp)
        sq_ref[0] = jnp.sum(acc * acc, axis=0, keepdims=True)      # (1, Cp)

    def bn_relu_kernel(x_ref, w_ref, scale_ref, shift_ref, o_ref):
        """Pass 2: recompute conv, apply folded BN affine + ReLU, store channel-major (NCHW)."""
        acc = conv_acc(x_ref, w_ref)
        y = jnp.maximum(acc * scale_ref[...] + shift_ref[...], 0.0)
        # Lane-dense store: (OH*OW, Cp) -> (Cout, OH*OW); output array is (N, Cout, OH*OW).
        o_ref[0] = y.T[:cout, :].astype(o_ref.dtype)

    return stats_kernel, bn_relu_kernel


def conv_bn_relu(x_nchw, weight_oikk, gamma, beta, kernel_size, stride, *, eps=EPS):
    """x_nchw: (N, Cin, H, W); weight: (Cout, Cin, k, k). Returns (N, Cout, OH, OW) f32."""
    n, cin, h, w = x_nchw.shape
    cout = weight_oikk.shape[0]
    k = kernel_size
    pad = (k - 1) // 2
    oh = (h + 2 * pad - k) // stride + 1
    ow = (w + 2 * pad - k) // stride + 1
    hp, wp = h + 2 * pad, w + 2 * pad
    kk = k * k

    cin_p = _round_up(cin, 8)      # sublane-friendly rhs contraction dim (zeros contribute 0)
    cp = _round_up(cout, 128)      # lane-dense compute / stat width (in-register + tiny stats only)

    # ---- input glue: NCHW -> NHWC, bf16, spatial + channel zero-pad (one fused XLA copy) ----
    xp = jnp.pad(jnp.transpose(x_nchw, (0, 2, 3, 1)).astype(jnp.bfloat16),
                 ((0, 0), (pad, pad), (pad, pad), (0, cin_p - cin)))   # (N, Hp, Wp, Cin_p)

    # ---- weights: (Cout, Cin, k, k) -> (k*k, Cin_p, Cp) bf16, tap-major (dy, dx) ----
    w_taps = jnp.transpose(weight_oikk, (2, 3, 1, 0)).reshape(kk, cin, cout)
    w_taps = jnp.pad(w_taps, ((0, 0), (0, cin_p - cin), (0, cp - cout))).astype(jnp.bfloat16)

    stats_kernel, bn_relu_kernel = _make_kernels(k, stride, oh, ow, cin_p, cout, cp)

    x_spec = pl.BlockSpec((1, hp, wp, cin_p), lambda i: (i, 0, 0, 0))
    # Grid-invariant weight block (tiny: k*k*Cin_p*Cp bf16); single-buffering it (pl.Buffered(1))
    # only matters for multi-MiB weights on v7x, so the default is kept here.
    w_spec = pl.BlockSpec((kk, cin_p, cp), lambda i: (0, 0, 0))

    # ---- pass 1: per-image conv -> per-channel partial stats (only stats hit HBM) ----
    psum, psq = pl.pallas_call(
        stats_kernel,
        out_shape=(jax.ShapeDtypeStruct((n, 1, cp), jnp.float32),
                   jax.ShapeDtypeStruct((n, 1, cp), jnp.float32)),
        grid=(n,),
        in_specs=[x_spec, w_spec],
        out_specs=(pl.BlockSpec((1, 1, cp), lambda i: (i, 0, 0)),
                   pl.BlockSpec((1, 1, cp), lambda i: (i, 0, 0))),
        compiler_params=pltpu.CompilerParams(dimension_semantics=("parallel",)),
    )(xp, w_taps)

    # ---- tiny JAX combine: global batch stats -> folded scale/shift ----
    count = n * oh * ow                                       # true element count per channel
    total_sum = jnp.sum(psum[:, 0, :], axis=0)                # (Cp,)
    total_sq = jnp.sum(psq[:, 0, :], axis=0)                  # (Cp,)
    mean = total_sum / count
    var = jnp.maximum(total_sq / count - mean * mean, 0.0)    # biased var (PyTorch train-mode norm)
    inv = jax.lax.rsqrt(var + eps)
    gpad = jnp.pad(gamma.astype(jnp.float32), (0, cp - cout))
    bpad = jnp.pad(beta.astype(jnp.float32), (0, cp - cout))
    scale = (gpad * inv).reshape(1, cp)
    shift = (bpad - mean * gpad * inv).reshape(1, cp)

    # ---- pass 2: recompute conv, fused BN + ReLU, channel-major store -> NCHW for free ----
    out3 = pl.pallas_call(
        bn_relu_kernel,
        out_shape=jax.ShapeDtypeStruct((n, cout, oh * ow), jnp.float32),
        grid=(n,),
        in_specs=[x_spec, w_spec,
                  pl.BlockSpec((1, cp), lambda i: (0, 0)),
                  pl.BlockSpec((1, cp), lambda i: (0, 0))],
        out_specs=pl.BlockSpec((1, cout, oh * ow), lambda i: (i, 0, 0)),
        compiler_params=pltpu.CompilerParams(dimension_semantics=("parallel",)),
    )(xp, w_taps, scale, shift)

    return out3.reshape(n, cout, oh, ow)                      # metadata-only reshape, no transpose


def _reference(x, weight, gamma, beta, kernel_size, stride, eps=EPS):
    """Pure-JAX f32 reference: Conv2d(bias=False) -> BatchNorm2d(train) -> ReLU."""
    pad = (kernel_size - 1) // 2
    y = jax.lax.conv_general_dilated(
        x, weight, window_strides=(stride, stride),
        padding=[(pad, pad), (pad, pad)],
        dimension_numbers=("NCHW", "OIHW", "NCHW"))
    mean = jnp.mean(y, axis=(0, 2, 3), keepdims=True)
    var = jnp.mean((y - mean) ** 2, axis=(0, 2, 3), keepdims=True)
    g = gamma.reshape(1, -1, 1, 1)
    b = beta.reshape(1, -1, 1, 1)
    return jnp.maximum((y - mean) * jax.lax.rsqrt(var + eps) * g + b, 0.0)


if __name__ == "__main__":
    key = jax.random.PRNGKey(0)

    # Module config (small shapes consistent with ConvBN forward)
    in_channels, out_channels, kernel_size, stride = 4, 8, 3, 1
    N, H, W = 2, 16, 16

    kx, kw = jax.random.split(key)
    x = jax.random.normal(kx, (N, in_channels, H, W), dtype=jnp.float32)

    # Deterministic parameter init (Conv2d weight ~ kaiming-ish normal,
    # BatchNorm2d defaults: gamma=1, beta=0).
    fan_in = in_channels * kernel_size * kernel_size
    weight = jax.random.normal(
        kw, (out_channels, in_channels, kernel_size, kernel_size),
        dtype=jnp.float32) * (2.0 / fan_in) ** 0.5
    gamma = jnp.ones((out_channels,), dtype=jnp.float32)
    beta = jnp.zeros((out_channels,), dtype=jnp.float32)

    fwd = jax.jit(functools.partial(conv_bn_relu, kernel_size=kernel_size, stride=stride))
    out = fwd(x, weight, gamma, beta)
    jax.block_until_ready(out)
    assert out.shape == (N, out_channels, H, W)

    # Loose tolerance: kernel uses bf16 MXU operands (f32 accumulation / BN math).
    ref = _reference(x, weight, gamma, beta, kernel_size, stride)
    max_err = float(jnp.max(jnp.abs(out - ref)))
    assert max_err < 0.25, f"max abs error vs reference too large: {max_err}"

    print("KERNEL_OK")
</pallas_src>

<mosaic_0001>
module attributes {stable_mosaic.version = 11 : i64} {
  func.func @stats_kernel(%arg0: i32, %arg1: memref<1x18x18x8xbf16, #tpu.memory_space<vmem>>, %arg2: memref<9x8x128xbf16, #tpu.memory_space<vmem>>, %arg3: memref<1x1x128xf32, #tpu.memory_space<vmem>>, %arg4: memref<1x1x128xf32, #tpu.memory_space<vmem>>) attributes {dimension_semantics = [#tpu.dimension_semantics<parallel>], iteration_bounds = array<i64: 2>, scalar_prefetch = 0 : i64, scratch_operands = 0 : i64, tpu.core_type = #tpu.core_type<tc>, window_params = [{transform_indices = @transform_0, window_bounds = array<i64: 1, 18, 18, 8>}, {pipeline_mode = #tpu.pipeline_mode<synchronous>, transform_indices = @transform_1, window_bounds = array<i64: 9, 8, 128>}, {transform_indices = @transform_2, window_bounds = array<i64: 1, 1, 128>}, {transform_indices = @transform_3, window_bounds = array<i64: 1, 1, 128>}]} {
    %cst = arith.constant 0.000000e+00 : f32
    %0 = vector.broadcast %cst : f32 to vector<256x128xf32>
    %c0 = arith.constant 0 : index
    %c0_0 = arith.constant 0 : index
    %c0_1 = arith.constant 0 : index
    %c0_2 = arith.constant 0 : index
    %1 = vector.load %arg1[%c0, %c0_0, %c0_1, %c0_2] : memref<1x18x18x8xbf16, #tpu.memory_space<vmem>>, vector<1x16x16x8xbf16>
    %2 = vector.shape_cast %1 : vector<1x16x16x8xbf16> to vector<16x16x8xbf16>
    %3 = vector.shape_cast %2 : vector<16x16x8xbf16> to vector<256x8xbf16>
    %c0_3 = arith.constant 0 : index
    %c0_4 = arith.constant 0 : index
    %c0_5 = arith.constant 0 : index
    %4 = vector.load %arg2[%c0_3, %c0_4, %c0_5] : memref<9x8x128xbf16, #tpu.memory_space<vmem>>, vector<1x8x128xbf16>
    %5 = vector.shape_cast %4 : vector<1x8x128xbf16> to vector<8x128xbf16>
    %cst_6 = arith.constant dense<0.000000e+00> : vector<256x128xf32>
    %6 = tpu.matmul %3, %5, %cst_6 {dimension_numbers = #tpu.dot_dimension_numbers<[1], [0], [0], [1], [0, 0, 1, 1], [], []>} : vector<256x8xbf16>, vector<8x128xbf16>, vector<256x128xf32> -> vector<256x128xf32>
    %7 = arith.addf %0, %6 : vector<256x128xf32>
    %c0_7 = arith.constant 0 : index
    %c0_8 = arith.constant 0 : index
    %c1 = arith.constant 1 : index
    %c0_9 = arith.constant 0 : index
    %8 = vector.load %arg1[%c0_7, %c0_8, %c1, %c0_9] : memref<1x18x18x8xbf16, #tpu.memory_space<vmem>>, vector<1x16x16x8xbf16>
    %9 = vector.shape_cast %8 : vector<1x16x16x8xbf16> to vector<16x16x8xbf16>
    %10 = vector.shape_cast %9 : vector<16x16x8xbf16> to vector<256x8xbf16>
    %c1_10 = arith.constant 1 : index
    %c0_11 = arith.constant 0 : index
    %c0_12 = arith.constant 0 : index
    %11 = vector.load %arg2[%c1_10, %c0_11, %c0_12] : memref<9x8x128xbf16, #tpu.memory_space<vmem>>, vector<1x8x128xbf16>
    %12 = vector.shape_cast %11 : vector<1x8x128xbf16> to vector<8x128xbf16>
    %cst_13 = arith.constant dense<0.000000e+00> : vector<256x128xf32>
    %13 = tpu.matmul %10, %12, %cst_13 {dimension_numbers = #tpu.dot_dimension_numbers<[1], [0], [0], [1], [0, 0, 1, 1], [], []>} : vector<256x8xbf16>, vector<8x128xbf16>, vector<256x128xf32> -> vector<256x128xf32>
    %14 = arith.addf %7, %13 : vector<256x128xf32>
    %c0_14 = arith.constant 0 : index
    %c0_15 = arith.constant 0 : index
    %c2 = arith.constant 2 : index
    %c0_16 = arith.constant 0 : index
    %15 = vector.load %arg1[%c0_14, %c0_15, %c2, %c0_16] : memref<1x18x18x8xbf16, #tpu.memory_space<vmem>>, vector<1x16x16x8xbf16>
    %16 = vector.shape_cast %15 : vector<1x16x16x8xbf16> to vector<16x16x8xbf16>
    %17 = vector.shape_cast %16 : vector<16x16x8xbf16> to vector<256x8xbf16>
    %c2_17 = arith.constant 2 : index
    %c0_18 = arith.constant 0 : index
    %c0_19 = arith.constant 0 : index
    %18 = vector.load %arg2[%c2_17, %c0_18, %c0_19] : memref<9x8x128xbf16, #tpu.memory_space<vmem>>, vector<1x8x128xbf16>
    %19 = vector.shape_cast %18 : vector<1x8x128xbf16> to vector<8x128xbf16>
    %cst_20 = arith.constant dense<0.000000e+00> : vector<256x128xf32>
    %20 = tpu.matmul %17, %19, %cst_20 {dimension_numbers = #tpu.dot_dimension_numbers<[1], [0], [0], [1], [0, 0, 1, 1], [], []>} : vector<256x8xbf16>, vector<8x128xbf16>, vector<256x128xf32> -> vector<256x128xf32>
    %21 = arith.addf %14, %20 : vector<256x128xf32>
    %c0_21 = arith.constant 0 : index
    %c1_22 = arith.constant 1 : index
    %c0_23 = arith.constant 0 : index
    %c0_24 = arith.constant 0 : index
    %22 = vector.load %arg1[%c0_21, %c1_22, %c0_23, %c0_24] : memref<1x18x18x8xbf16, #tpu.memory_space<vmem>>, vector<1x16x16x8xbf16>
    %23 = vector.shape_cast %22 : vector<1x16x16x8xbf16> to vector<16x16x8xbf16>
    %24 = vector.shape_cast %23 : vector<16x16x8xbf16> to vector<256x8xbf16>
    %c3 = arith.constant 3 : index
    %c0_25 = arith.constant 0 : index
    %c0_26 = arith.constant 0 : index
    %25 = vector.load %arg2[%c3, %c0_25, %c0_26] : memref<9x8x128xbf16, #tpu.memory_space<vmem>>, vector<1x8x128xbf16>
    %26 = vector.shape_cast %25 : vector<1x8x128xbf16> to vector<8x128xbf16>
    %cst_27 = arith.constant dense<0.000000e+00> : vector<256x128xf32>
    %27 = tpu.matmul %24, %26, %cst_27 {dimension_numbers = #tpu.dot_dimension_numbers<[1], [0], [0], [1], [0, 0, 1, 1], [], []>} : vector<256x8xbf16>, vector<8x128xbf16>, vector<256x128xf32> -> vector<256x128xf32>
    %28 = arith.addf %21, %27 : vector<256x128xf32>
    %c0_28 = arith.constant 0 : index
    %c1_29 = arith.constant 1 : index
    %c1_30 = arith.constant 1 : index
    %c0_31 = arith.constant 0 : index
    %29 = vector.load %arg1[%c0_28, %c1_29, %c1_30, %c0_31] : memref<1x18x18x8xbf16, #tpu.memory_space<vmem>>, vector<1x16x16x8xbf16>
    %30 = vector.shape_cast %29 : vector<1x16x16x8xbf16> to vector<16x16x8xbf16>
    %31 = vector.shape_cast %30 : vector<16x16x8xbf16> to vector<256x8xbf16>
    %c4 = arith.constant 4 : index
    %c0_32 = arith.constant 0 : index
    %c0_33 = arith.constant 0 : index
    %32 = vector.load %arg2[%c4, %c0_32, %c0_33] : memref<9x8x128xbf16, #tpu.memory_space<vmem>>, vector<1x8x128xbf16>
    %33 = vector.shape_cast %32 : vector<1x8x128xbf16> to vector<8x128xbf16>
    %cst_34 = arith.constant dense<0.000000e+00> : vector<256x128xf32>
    %34 = tpu.matmul %31, %33, %cst_34 {dimension_numbers = #tpu.dot_dimension_numbers<[1], [0], [0], [1], [0, 0, 1, 1], [], []>} : vector<256x8xbf16>, vector<8x128xbf16>, vector<256x128xf32> -> vector<256x128xf32>
    %35 = arith.addf %28, %34 : vector<256x128xf32>
    %c0_35 = arith.constant 0 : index
    %c1_36 = arith.constant 1 : index
    %c2_37 = arith.constant 2 : index
    %c0_38 = arith.constant 0 : index
    %36 = vector.load %arg1[%c0_35, %c1_36, %c2_37, %c0_38] : memref<1x18x18x8xbf16, #tpu.memory_space<vmem>>, vector<1x16x16x8xbf16>
    %37 = vector.shape_cast %36 : vector<1x16x16x8xbf16> to vector<16x16x8xbf16>
    %38 = vector.shape_cast %37 : vector<16x16x8xbf16> to vector<256x8xbf16>
    %c5 = arith.constant 5 : index
    %c0_39 = arith.constant 0 : index
    %c0_40 = arith.constant 0 : index
    %39 = vector.load %arg2[%c5, %c0_39, %c0_40] : memref<9x8x128xbf16, #tpu.memory_space<vmem>>, vector<1x8x128xbf16>
    %40 = vector.shape_cast %39 : vector<1x8x128xbf16> to vector<8x128xbf16>
    %cst_41 = arith.constant dense<0.000000e+00> : vector<256x128xf32>
    %41 = tpu.matmul %38, %40, %cst_41 {dimension_numbers = #tpu.dot_dimension_numbers<[1], [0], [0], [1], [0, 0, 1, 1], [], []>} : vector<256x8xbf16>, vector<8x128xbf16>, vector<256x128xf32> -> vector<256x128xf32>
    %42 = arith.addf %35, %41 : vector<256x128xf32>
    %c0_42 = arith.constant 0 : index
    %c2_43 = arith.constant 2 : index
    %c0_44 = arith.constant 0 : index
    %c0_45 = arith.constant 0 : index
    %43 = vector.load %arg1[%c0_42, %c2_43, %c0_44, %c0_45] : memref<1x18x18x8xbf16, #tpu.memory_space<vmem>>, vector<1x16x16x8xbf16>
    %44 = vector.shape_cast %43 : vector<1x16x16x8xbf16> to vector<16x16x8xbf16>
    %45 = vector.shape_cast %44 : vector<16x16x8xbf16> to vector<256x8xbf16>
    %c6 = arith.constant 6 : index
    %c0_46 = arith.constant 0 : index
    %c0_47 = arith.constant 0 : index
    %46 = vector.load %arg2[%c6, %c0_46, %c0_47] : memref<9x8x128xbf16, #tpu.memory_space<vmem>>, vector<1x8x128xbf16>
    %47 = vector.shape_cast %46 : vector<1x8x128xbf16> to vector<8x128xbf16>
    %cst_48 = arith.constant dense<0.000000e+00> : vector<256x128xf32>
    %48 = tpu.matmul %45, %47, %cst_48 {dimension_numbers = #tpu.dot_dimension_numbers<[1], [0], [0], [1], [0, 0, 1, 1], [], []>} : vector<256x8xbf16>, vector<8x128xbf16>, vector<256x128xf32> -> vector<256x128xf32>
    %49 = arith.addf %42, %48 : vector<256x128xf32>
    %c0_49 = arith.constant 0 : index
    %c2_50 = arith.constant 2 : index
    %c1_51 = arith.constant 1 : index
    %c0_52 = arith.constant 0 : index
    %50 = vector.load %arg1[%c0_49, %c2_50, %c1_51, %c0_52] : memref<1x18x18x8xbf16, #tpu.memory_space<vmem>>, vector<1x16x16x8xbf16>
    %51 = vector.shape_cast %50 : vector<1x16x16x8xbf16> to vector<16x16x8xbf16>
    %52 = vector.shape_cast %51 : vector<16x16x8xbf16> to vector<256x8xbf16>
    %c7 = arith.constant 7 : index
    %c0_53 = arith.constant 0 : index
    %c0_54 = arith.constant 0 : index
    %53 = vector.load %arg2[%c7, %c0_53, %c0_54] : memref<9x8x128xbf16, #tpu.memory_space<vmem>>, vector<1x8x128xbf16>
    %54 = vector.shape_cast %53 : vector<1x8x128xbf16> to vector<8x128xbf16>
    %cst_55 = arith.constant dense<0.000000e+00> : vector<256x128xf32>
    %55 = tpu.matmul %52, %54, %cst_55 {dimension_numbers = #tpu.dot_dimension_numbers<[1], [0], [0], [1], [0, 0, 1, 1], [], []>} : vector<256x8xbf16>, vector<8x128xbf16>, vector<256x128xf32> -> vector<256x128xf32>
    %56 = arith.addf %49, %55 : vector<256x128xf32>
    %c0_56 = arith.constant 0 : index
    %c2_57 = arith.constant 2 : index
    %c2_58 = arith.constant 2 : index
    %c0_59 = arith.constant 0 : index
    %57 = vector.load %arg1[%c0_56, %c2_57, %c2_58, %c0_59] : memref<1x18x18x8xbf16, #tpu.memory_space<vmem>>, vector<1x16x16x8xbf16>
    %58 = vector.shape_cast %57 : vector<1x16x16x8xbf16> to vector<16x16x8xbf16>
    %59 = vector.shape_cast %58 : vector<16x16x8xbf16> to vector<256x8xbf16>
    %c8 = arith.constant 8 : index
    %c0_60 = arith.constant 0 : index
    %c0_61 = arith.constant 0 : index
    %60 = vector.load %arg2[%c8, %c0_60, %c0_61] : memref<9x8x128xbf16, #tpu.memory_space<vmem>>, vector<1x8x128xbf16>
    %61 = vector.shape_cast %60 : vector<1x8x128xbf16> to vector<8x128xbf16>
    %cst_62 = arith.constant dense<0.000000e+00> : vector<256x128xf32>
    %62 = tpu.matmul %59, %61, %cst_62 {dimension_numbers = #tpu.dot_dimension_numbers<[1], [0], [0], [1], [0, 0, 1, 1], [], []>} : vector<256x8xbf16>, vector<8x128xbf16>, vector<256x128xf32> -> vector<256x128xf32>
    %63 = arith.addf %56, %62 : vector<256x128xf32>
    %cst_63 = arith.constant dense<0.000000e+00> : vector<128xf32>
    %64 = vector.multi_reduction <add>, %63, %cst_63 [0] : vector<256x128xf32> to vector<128xf32>
    %65 = vector.shape_cast %64 : vector<128xf32> to vector<1x128xf32>
    %c0_64 = arith.constant 0 : index
    %c0_65 = arith.constant 0 : index
    %c0_66 = arith.constant 0 : index
    %66 = vector.load %arg3[%c0_64, %c0_65, %c0_66] : memref<1x1x128xf32, #tpu.memory_space<vmem>>, vector<1x1x128xf32>
    %67 = vector.shape_cast %66 : vector<1x1x128xf32> to vector<1x128xf32>
    %68 = vector.shape_cast %65 : vector<1x128xf32> to vector<1x1x128xf32>
    tpu.vector_store %arg3[%c0_64, %c0_65, %c0_66], %68 {strides = array<i32>} : memref<1x1x128xf32, #tpu.memory_space<vmem>>, vector<1x1x128xf32>,
    %69 = arith.mulf %63, %63 : vector<256x128xf32>
    %cst_67 = arith.constant dense<0.000000e+00> : vector<128xf32>
    %70 = vector.multi_reduction <add>, %69, %cst_67 [0] : vector<256x128xf32> to vector<128xf32>
    %71 = vector.shape_cast %70 : vector<128xf32> to vector<1x128xf32>
    %c0_68 = arith.constant 0 : index
    %c0_69 = arith.constant 0 : index
    %c0_70 = arith.constant 0 : index
    %72 = vector.load %arg4[%c0_68, %c0_69, %c0_70] : memref<1x1x128xf32, #tpu.memory_space<vmem>>, vector<1x1x128xf32>
    %73 = vector.shape_cast %72 : vector<1x1x128xf32> to vector<1x128xf32>
    %74 = vector.shape_cast %71 : vector<1x128xf32> to vector<1x1x128xf32>
    tpu.vector_store %arg4[%c0_68, %c0_69, %c0_70], %74 {strides = array<i32>} : memref<1x1x128xf32, #tpu.memory_space<vmem>>, vector<1x1x128xf32>,
    return
  }
  func.func @transform_0(%arg0: i32) -> (i32, i32, i32, i32) {
    %c0_i32 = arith.constant 0 : i32
    %c0_i32_0 = arith.constant 0 : i32
    %c0_i32_1 = arith.constant 0 : i32
    %c0_i32_2 = arith.constant 0 : i32
    return %arg0, %c0_i32, %c0_i32_0, %c0_i32_1 : i32, i32, i32, i32
  }
  func.func @transform_1(%arg0: i32) -> (i32, i32, i32) {
    %c0_i32 = arith.constant 0 : i32
    %c0_i32_0 = arith.constant 0 : i32
    %c0_i32_1 = arith.constant 0 : i32
    %c0_i32_2 = arith.constant 0 : i32
    return %c0_i32, %c0_i32_0, %c0_i32_1 : i32, i32, i32
  }
  func.func @transform_2(%arg0: i32) -> (i32, i32, i32) {
    %c0_i32 = arith.constant 0 : i32
    %c0_i32_0 = arith.constant 0 : i32
    %c0_i32_1 = arith.constant 0 : i32
    return %arg0, %c0_i32, %c0_i32_0 : i32, i32, i32
  }
  func.func @transform_3(%arg0: i32) -> (i32, i32, i32) {
    %c0_i32 = arith.constant 0 : i32
    %c0_i32_0 = arith.constant 0 : i32
    %c0_i32_1 = arith.constant 0 : i32
    return %arg0, %c0_i32, %c0_i32_0 : i32, i32, i32
  }
}

module attributes {stable_mosaic.version = 11 : i64} {
  func.func @bn_relu_kernel(%arg0: i32, %arg1: memref<1x18x18x8xbf16, #tpu.memory_space<vmem>>, %arg2: memref<9x8x128xbf16, #tpu.memory_space<vmem>>, %arg3: memref<1x128xf32, #tpu.memory_space<vmem>>, %arg4: memref<1x128xf32, #tpu.memory_space<vmem>>, %arg5: memref<1x8x256xf32, #tpu.memory_space<vmem>>) attributes {dimension_semantics = [#tpu.dimension_semantics<parallel>], iteration_bounds = array<i64: 2>, scalar_prefetch = 0 : i64, scratch_operands = 0 : i64, tpu.core_type = #tpu.core_type<tc>, window_params = [{transform_indices = @transform_0, window_bounds = array<i64: 1, 18, 18, 8>}, {pipeline_mode = #tpu.pipeline_mode<synchronous>, transform_indices = @transform_1, window_bounds = array<i64: 9, 8, 128>}, {pipeline_mode = #tpu.pipeline_mode<synchronous>, transform_indices = @transform_2, window_bounds = array<i64: 1, 128>}, {pipeline_mode = #tpu.pipeline_mode<synchronous>, transform_indices = @transform_3, window_bounds = array<i64: 1, 128>}, {transform_indices = @transform_4, window_bounds = array<i64: 1, 8, 256>}]} {
    %cst = arith.constant 0.000000e+00 : f32
    %0 = vector.broadcast %cst : f32 to vector<256x128xf32>
    %c0 = arith.constant 0 : index
    %c0_0 = arith.constant 0 : index
    %c0_1 = arith.constant 0 : index
    %c0_2 = arith.constant 0 : index
    %1 = vector.load %arg1[%c0, %c0_0, %c0_1, %c0_2] : memref<1x18x18x8xbf16, #tpu.memory_space<vmem>>, vector<1x16x16x8xbf16>
    %2 = vector.shape_cast %1 : vector<1x16x16x8xbf16> to vector<16x16x8xbf16>
    %3 = vector.shape_cast %2 : vector<16x16x8xbf16> to vector<256x8xbf16>
    %c0_3 = arith.constant 0 : index
    %c0_4 = arith.constant 0 : index
    %c0_5 = arith.constant 0 : index
    %4 = vector.load %arg2[%c0_3, %c0_4, %c0_5] : memref<9x8x128xbf16, #tpu.memory_space<vmem>>, vector<1x8x128xbf16>
    %5 = vector.shape_cast %4 : vector<1x8x128xbf16> to vector<8x128xbf16>
    %cst_6 = arith.constant dense<0.000000e+00> : vector<256x128xf32>
    %6 = tpu.matmul %3, %5, %cst_6 {dimension_numbers = #tpu.dot_dimension_numbers<[1], [0], [0], [1], [0, 0, 1, 1], [], []>} : vector<256x8xbf16>, vector<8x128xbf16>, vector<256x128xf32> -> vector<256x128xf32>
    %7 = arith.addf %0, %6 : vector<256x128xf32>
    %c0_7 = arith.constant 0 : index
    %c0_8 = arith.constant 0 : index
    %c1 = arith.constant 1 : index
    %c0_9 = arith.constant 0 : index
    %8 = vector.load %arg1[%c0_7, %c0_8, %c1, %c0_9] : memref<1x18x18x8xbf16, #tpu.memory_space<vmem>>, vector<1x16x16x8xbf16>
    %9 = vector.shape_cast %8 : vector<1x16x16x8xbf16> to vector<16x16x8xbf16>
    %10 = vector.shape_cast %9 : vector<16x16x8xbf16> to vector<256x8xbf16>
    %c1_10 = arith.constant 1 : index
    %c0_11 = arith.constant 0 : index
    %c0_12 = arith.constant 0 : index
    %11 = vector.load %arg2[%c1_10, %c0_11, %c0_12] : memref<9x8x128xbf16, #tpu.memory_space<vmem>>, vector<1x8x128xbf16>
    %12 = vector.shape_cast %11 : vector<1x8x128xbf16> to vector<8x128xbf16>
    %cst_13 = arith.constant dense<0.000000e+00> : vector<256x128xf32>
    %13 = tpu.matmul %10, %12, %cst_13 {dimension_numbers = #tpu.dot_dimension_numbers<[1], [0], [0], [1], [0, 0, 1, 1], [], []>} : vector<256x8xbf16>, vector<8x128xbf16>, vector<256x128xf32> -> vector<256x128xf32>
    %14 = arith.addf %7, %13 : vector<256x128xf32>
    %c0_14 = arith.constant 0 : index
    %c0_15 = arith.constant 0 : index
    %c2 = arith.constant 2 : index
    %c0_16 = arith.constant 0 : index
    %15 = vector.load %arg1[%c0_14, %c0_15, %c2, %c0_16] : memref<1x18x18x8xbf16, #tpu.memory_space<vmem>>, vector<1x16x16x8xbf16>
    %16 = vector.shape_cast %15 : vector<1x16x16x8xbf16> to vector<16x16x8xbf16>
    %17 = vector.shape_cast %16 : vector<16x16x8xbf16> to vector<256x8xbf16>
    %c2_17 = arith.constant 2 : index
    %c0_18 = arith.constant 0 : index
    %c0_19 = arith.constant 0 : index
    %18 = vector.load %arg2[%c2_17, %c0_18, %c0_19] : memref<9x8x128xbf16, #tpu.memory_space<vmem>>, vector<1x8x128xbf16>
    %19 = vector.shape_cast %18 : vector<1x8x128xbf16> to vector<8x128xbf16>
    %cst_20 = arith.constant dense<0.000000e+00> : vector<256x128xf32>
    %20 = tpu.matmul %17, %19, %cst_20 {dimension_numbers = #tpu.dot_dimension_numbers<[1], [0], [0], [1], [0, 0, 1, 1], [], []>} : vector<256x8xbf16>, vector<8x128xbf16>, vector<256x128xf32> -> vector<256x128xf32>
    %21 = arith.addf %14, %20 : vector<256x128xf32>
    %c0_21 = arith.constant 0 : index
    %c1_22 = arith.constant 1 : index
    %c0_23 = arith.constant 0 : index
    %c0_24 = arith.constant 0 : index
    %22 = vector.load %arg1[%c0_21, %c1_22, %c0_23, %c0_24] : memref<1x18x18x8xbf16, #tpu.memory_space<vmem>>, vector<1x16x16x8xbf16>
    %23 = vector.shape_cast %22 : vector<1x16x16x8xbf16> to vector<16x16x8xbf16>
    %24 = vector.shape_cast %23 : vector<16x16x8xbf16> to vector<256x8xbf16>
    %c3 = arith.constant 3 : index
    %c0_25 = arith.constant 0 : index
    %c0_26 = arith.constant 0 : index
    %25 = vector.load %arg2[%c3, %c0_25, %c0_26] : memref<9x8x128xbf16, #tpu.memory_space<vmem>>, vector<1x8x128xbf16>
    %26 = vector.shape_cast %25 : vector<1x8x128xbf16> to vector<8x128xbf16>
    %cst_27 = arith.constant dense<0.000000e+00> : vector<256x128xf32>
    %27 = tpu.matmul %24, %26, %cst_27 {dimension_numbers = #tpu.dot_dimension_numbers<[1], [0], [0], [1], [0, 0, 1, 1], [], []>} : vector<256x8xbf16>, vector<8x128xbf16>, vector<256x128xf32> -> vector<256x128xf32>
    %28 = arith.addf %21, %27 : vector<256x128xf32>
    %c0_28 = arith.constant 0 : index
    %c1_29 = arith.constant 1 : index
    %c1_30 = arith.constant 1 : index
    %c0_31 = arith.constant 0 : index
    %29 = vector.load %arg1[%c0_28, %c1_29, %c1_30, %c0_31] : memref<1x18x18x8xbf16, #tpu.memory_space<vmem>>, vector<1x16x16x8xbf16>
    %30 = vector.shape_cast %29 : vector<1x16x16x8xbf16> to vector<16x16x8xbf16>
    %31 = vector.shape_cast %30 : vector<16x16x8xbf16> to vector<256x8xbf16>
    %c4 = arith.constant 4 : index
    %c0_32 = arith.constant 0 : index
    %c0_33 = arith.constant 0 : index
    %32 = vector.load %arg2[%c4, %c0_32, %c0_33] : memref<9x8x128xbf16, #tpu.memory_space<vmem>>, vector<1x8x128xbf16>
    %33 = vector.shape_cast %32 : vector<1x8x128xbf16> to vector<8x128xbf16>
    %cst_34 = arith.constant dense<0.000000e+00> : vector<256x128xf32>
    %34 = tpu.matmul %31, %33, %cst_34 {dimension_numbers = #tpu.dot_dimension_numbers<[1], [0], [0], [1], [0, 0, 1, 1], [], []>} : vector<256x8xbf16>, vector<8x128xbf16>, vector<256x128xf32> -> vector<256x128xf32>
    %35 = arith.addf %28, %34 : vector<256x128xf32>
    %c0_35 = arith.constant 0 : index
    %c1_36 = arith.constant 1 : index
    %c2_37 = arith.constant 2 : index
    %c0_38 = arith.constant 0 : index
    %36 = vector.load %arg1[%c0_35, %c1_36, %c2_37, %c0_38] : memref<1x18x18x8xbf16, #tpu.memory_space<vmem>>, vector<1x16x16x8xbf16>
    %37 = vector.shape_cast %36 : vector<1x16x16x8xbf16> to vector<16x16x8xbf16>
    %38 = vector.shape_cast %37 : vector<16x16x8xbf16> to vector<256x8xbf16>
    %c5 = arith.constant 5 : index
    %c0_39 = arith.constant 0 : index
    %c0_40 = arith.constant 0 : index
    %39 = vector.load %arg2[%c5, %c0_39, %c0_40] : memref<9x8x128xbf16, #tpu.memory_space<vmem>>, vector<1x8x128xbf16>
    %40 = vector.shape_cast %39 : vector<1x8x128xbf16> to vector<8x128xbf16>
    %cst_41 = arith.constant dense<0.000000e+00> : vector<256x128xf32>
    %41 = tpu.matmul %38, %40, %cst_41 {dimension_numbers = #tpu.dot_dimension_numbers<[1], [0], [0], [1], [0, 0, 1, 1], [], []>} : vector<256x8xbf16>, vector<8x128xbf16>, vector<256x128xf32> -> vector<256x128xf32>
    %42 = arith.addf %35, %41 : vector<256x128xf32>
    %c0_42 = arith.constant 0 : index
    %c2_43 = arith.constant 2 : index
    %c0_44 = arith.constant 0 : index
    %c0_45 = arith.constant 0 : index
    %43 = vector.load %arg1[%c0_42, %c2_43, %c0_44, %c0_45] : memref<1x18x18x8xbf16, #tpu.memory_space<vmem>>, vector<1x16x16x8xbf16>
    %44 = vector.shape_cast %43 : vector<1x16x16x8xbf16> to vector<16x16x8xbf16>
    %45 = vector.shape_cast %44 : vector<16x16x8xbf16> to vector<256x8xbf16>
    %c6 = arith.constant 6 : index
    %c0_46 = arith.constant 0 : index
    %c0_47 = arith.constant 0 : index
    %46 = vector.load %arg2[%c6, %c0_46, %c0_47] : memref<9x8x128xbf16, #tpu.memory_space<vmem>>, vector<1x8x128xbf16>
    %47 = vector.shape_cast %46 : vector<1x8x128xbf16> to vector<8x128xbf16>
    %cst_48 = arith.constant dense<0.000000e+00> : vector<256x128xf32>
    %48 = tpu.matmul %45, %47, %cst_48 {dimension_numbers = #tpu.dot_dimension_numbers<[1], [0], [0], [1], [0, 0, 1, 1], [], []>} : vector<256x8xbf16>, vector<8x128xbf16>, vector<256x128xf32> -> vector<256x128xf32>
    %49 = arith.addf %42, %48 : vector<256x128xf32>
    %c0_49 = arith.constant 0 : index
    %c2_50 = arith.constant 2 : index
    %c1_51 = arith.constant 1 : index
    %c0_52 = arith.constant 0 : index
    %50 = vector.load %arg1[%c0_49, %c2_50, %c1_51, %c0_52] : memref<1x18x18x8xbf16, #tpu.memory_space<vmem>>, vector<1x16x16x8xbf16>
    %51 = vector.shape_cast %50 : vector<1x16x16x8xbf16> to vector<16x16x8xbf16>
    %52 = vector.shape_cast %51 : vector<16x16x8xbf16> to vector<256x8xbf16>
    %c7 = arith.constant 7 : index
    %c0_53 = arith.constant 0 : index
    %c0_54 = arith.constant 0 : index
    %53 = vector.load %arg2[%c7, %c0_53, %c0_54] : memref<9x8x128xbf16, #tpu.memory_space<vmem>>, vector<1x8x128xbf16>
    %54 = vector.shape_cast %53 : vector<1x8x128xbf16> to vector<8x128xbf16>
    %cst_55 = arith.constant dense<0.000000e+00> : vector<256x128xf32>
    %55 = tpu.matmul %52, %54, %cst_55 {dimension_numbers = #tpu.dot_dimension_numbers<[1], [0], [0], [1], [0, 0, 1, 1], [], []>} : vector<256x8xbf16>, vector<8x128xbf16>, vector<256x128xf32> -> vector<256x128xf32>
    %56 = arith.addf %49, %55 : vector<256x128xf32>
    %c0_56 = arith.constant 0 : index
    %c2_57 = arith.constant 2 : index
    %c2_58 = arith.constant 2 : index
    %c0_59 = arith.constant 0 : index
    %57 = vector.load %arg1[%c0_56, %c2_57, %c2_58, %c0_59] : memref<1x18x18x8xbf16, #tpu.memory_space<vmem>>, vector<1x16x16x8xbf16>
    %58 = vector.shape_cast %57 : vector<1x16x16x8xbf16> to vector<16x16x8xbf16>
    %59 = vector.shape_cast %58 : vector<16x16x8xbf16> to vector<256x8xbf16>
    %c8 = arith.constant 8 : index
    %c0_60 = arith.constant 0 : index
    %c0_61 = arith.constant 0 : index
    %60 = vector.load %arg2[%c8, %c0_60, %c0_61] : memref<9x8x128xbf16, #tpu.memory_space<vmem>>, vector<1x8x128xbf16>
    %61 = vector.shape_cast %60 : vector<1x8x128xbf16> to vector<8x128xbf16>
    %cst_62 = arith.constant dense<0.000000e+00> : vector<256x128xf32>
    %62 = tpu.matmul %59, %61, %cst_62 {dimension_numbers = #tpu.dot_dimension_numbers<[1], [0], [0], [1], [0, 0, 1, 1], [], []>} : vector<256x8xbf16>, vector<8x128xbf16>, vector<256x128xf32> -> vector<256x128xf32>
    %63 = arith.addf %56, %62 : vector<256x128xf32>
    %c0_63 = arith.constant 0 : index
    %c0_64 = arith.constant 0 : index
    %64 = vector.load %arg3[%c0_63, %c0_64] : memref<1x128xf32, #tpu.memory_space<vmem>>, vector<1x128xf32>
    %65 = vector.broadcast %64 : vector<1x128xf32> to vector<256x128xf32>
    %66 = arith.mulf %63, %65 : vector<256x128xf32>
    %c0_65 = arith.constant 0 : index
    %c0_66 = arith.constant 0 : index
    %67 = vector.load %arg4[%c0_65, %c0_66] : memref<1x128xf32, #tpu.memory_space<vmem>>, vector<1x128xf32>
    %68 = vector.broadcast %67 : vector<1x128xf32> to vector<256x128xf32>
    %69 = arith.addf %66, %68 : vector<256x128xf32>
    %cst_67 = arith.constant 0.000000e+00 : f32
    %70 = vector.broadcast %cst_67 : f32 to vector<256x128xf32>
    %71 = arith.maximumf %69, %70 : vector<256x128xf32>
    %72 = tpu.transpose %71, [1, 0] : vector<256x128xf32> -> vector<128x256xf32>
    %73 = vector.extract_strided_slice %72 {offsets = [0, 0], sizes = [8, 256], strides = [1, 1]} : vector<128x256xf32> to vector<8x256xf32>
    %c0_68 = arith.constant 0 : index
    %c0_69 = arith.constant 0 : index
    %c0_70 = arith.constant 0 : index
    %74 = vector.load %arg5[%c0_68, %c0_69, %c0_70] : memref<1x8x256xf32, #tpu.memory_space<vmem>>, vector<1x8x256xf32>
    %75 = vector.shape_cast %74 : vector<1x8x256xf32> to vector<8x256xf32>
    %76 = vector.shape_cast %73 : vector<8x256xf32> to vector<1x8x256xf32>
    tpu.vector_store %arg5[%c0_68, %c0_69, %c0_70], %76 {strides = array<i32>} : memref<1x8x256xf32, #tpu.memory_space<vmem>>, vector<1x8x256xf32>,
    return
  }
  func.func @transform_0(%arg0: i32) -> (i32, i32, i32, i32) {
    %c0_i32 = arith.constant 0 : i32
    %c0_i32_0 = arith.constant 0 : i32
    %c0_i32_1 = arith.constant 0 : i32
    %c0_i32_2 = arith.constant 0 : i32
    return %arg0, %c0_i32, %c0_i32_0, %c0_i32_1 : i32, i32, i32, i32
  }
  func.func @transform_1(%arg0: i32) -> (i32, i32, i32) {
    %c0_i32 = arith.constant 0 : i32
    %c0_i32_0 = arith.constant 0 : i32
    %c0_i32_1 = arith.constant 0 : i32
    %c0_i32_2 = arith.constant 0 : i32
    return %c0_i32, %c0_i32_0, %c0_i32_1 : i32, i32, i32
  }
  func.func @transform_2(%arg0: i32) -> (i32, i32) {
    %c0_i32 = arith.constant 0 : i32
    %c0_i32_0 = arith.constant 0 : i32
    %c0_i32_1 = arith.constant 0 : i32
    return %c0_i32, %c0_i32_0 : i32, i32
  }
  func.func @transform_3(%arg0: i32) -> (i32, i32) {
    %c0_i32 = arith.constant 0 : i32
    %c0_i32_0 = arith.constant 0 : i32
    %c0_i32_1 = arith.constant 0 : i32
    return %c0_i32, %c0_i32_0 : i32, i32
  }
  func.func @transform_4(%arg0: i32) -> (i32, i32, i32) {
    %c0_i32 = arith.constant 0 : i32
    %c0_i32_0 = arith.constant 0 : i32
    %c0_i32_1 = arith.constant 0 : i32
    return %arg0, %c0_i32, %c0_i32_0 : i32, i32, i32
  }
}

</mosaic_0001>

<bundles_post_ra>
// kernel: conv_bn_relu.2
= control target key start
LH: loop header
LB: loop body
LE: loop exit
PB: predicated region body
PF: predicated region fallthrough
CT: control target
= control target key end

     0   :  { %s4998_s12 = smov 0   ;;  %s6335_s0 = inlined_call_operand.vmem [shape: bf16[2,18,18,8], index: 0, kind: input, shape index: {}]   ;;  %s6336_s1 = inlined_call_operand.vmem [shape: bf16[9,8,128], index: 1, kind: input, shape index: {}]   ;;  %s6337_s2 = inlined_call_operand.vmem [shape: f32[2,1,128], index: 2, kind: output, shape index: {0}]   ;;  %s6338_s3 = inlined_call_operand.vmem [shape: f32[2,1,128], index: 3, kind: output, shape index: {1}]  }
   0x1 LB: > { %s4268_s13 = sadd.s32 4294967295, %s4976_s12   ;;  %p4272_p0 = scmp.ge.s32.totalorder %s4976_s12, 1  ;;  %s4976_s12 = sphi %s4998_s12, %s14_s12  }
   0x2   : > { %p140_p1 = scmp.lt.s32.totalorder %s4976_s12, 3 }
   0x4   : > { %p141_p2 = pnand %p4272_p0, %p140_p1 }
   0x6   : > { %144 = sbr.rel (%p141_p2) target bundleno = 770 (0x302), region = 28 }
   0xb   : > { %v4274_v0 = vld [vmem:[%s6336_s1 + $0x4] sm:$0xf]  ;;  %vm712_vm0 = vcmask 1043456   ;;  %p165_p3 = scmp.lt.s32.totalorder %s4268_s13, 1  ;;  %v4387_v2 = vld [vmem:[%s6336_s1 + $0x8] sm:$0xf] }
   0xc   : > { %v714_v1 = vsel %vm712_vm0, %v4274_v0, 0  ;;  %v1287_v3 = vsel %vm712_vm0, %v4387_v2, 0  ;;  %v4436_v4 = vld [vmem:[%s6336_s1 + $0xc] sm:$0xf]  ;;  %v209_v5 = vld [vmem:[%s6336_s1] sm:$0xf] }
   0xd   : > { %4908 = vmatpush.bf16.msra.mxu1 %v714_v1  ;;  %4909 = vmatpush.bf16.msra.mxu2 %v714_v1  ;;  %s6350_s13 = smov (!%p165_p3, %s4268_s13), 1  ;;  %v4565_v6 = vld [vmem:[%s6336_s1 + $0x10] sm:$0xf]  ;;  %v1574_v7 = vsel %vm712_vm0, %v4436_v4, 0  ;;  %v934_v8 = vsel %vm712_vm0, %v209_v5, 0  ;;  %vm663_vm4 = vcmask 64512  }
   0xe   : > { %4910 = vmatpush.bf16.msra.mxu3 %v714_v1  ;;  %723 = vmatpush.bf16.msra.mxu0 %v714_v1  ;;  %s4911_s24 = smul.u32 216, %s6350_s13  ;;  %v2228_v9 = vsel %vm712_vm0, %v4565_v6, 0  ;;  %vm226_vm1 = vsmask.f32 3328  ;;  %vm227_vm2 = vsmask.f32 7440  ;;  %s172_s11 = scalar_lea.vmem %s6337_s2, %s6350_s13 }
   0xf   : > { %vm5044_vm3 = vmor %vm226_vm1, %vm227_vm2  ;;  %vm1073_vm5 = vcmask 1042432   ;;  %vm1074_vm6 = vcmask 1046532   ;;  %s175_s16 = scalar_lea.vmem %s6338_s3, %s6350_s13 }
  0x10   : > { %s5032_s27 = scalar_lea.vmem %s6335_s0, %s4911_s24  ;;  %vm5218_vm7 = vmor %vm1073_vm5, %vm1074_vm6 }
  0x11   : > { %1296 = vmatpush.bf16.msrb.mxu2 %v1287_v3  ;;  %943 = vmatpush.bf16.msrb.mxu1 %v934_v8  ;;  %v185_v10 = vld [vmem:[%s5032_s27 + $0x30] sm:$0xf]  ;;  %v186_v11 = vld [vmem:[%s5032_s27 + $0x34] sm:$0xf]  ;;  %v214_v12 = vld [vmem:[%s5032_s27 + $0x38] sm:$0x1] }
  0x12   : > { %1583 = vmatpush.bf16.msrb.mxu3 %v1574_v7  ;;  %2237 = vmatpush.bf16.msrb.mxu0 %v2228_v9  ;;  %v326_v13 = vshrl.u32 %v185_v10, 16  ;;  %v329_v14 = vshll.u32 %v185_v10, 16  ;;  %v335_v15 = vshll.u32 %v186_v11, 16  ;;  %v339_v16 = vshrl.u32 %v186_v11, 16  ;;  %v193_v17 = vld [vmem:[%s5032_s27 + $0x60] sm:$0xf] }
  0x13   : > { %v345_v18 = vshll.u32 %v214_v12, 16  ;;  %v194_v19 = vld [vmem:[%s5032_s27 + $0x64] sm:$0xf]  ;;  %v218_v20 = vld [vmem:[%s5032_s27 + $0x68] sm:$0x1]  ;;  %v422_v21 = vshrl.u32 %v193_v17, 16 }
  0x14   : > { %v328_v22 = vrot.slane %v326_v13, 4  ;;  %v331_v23 = vrot.slane %v329_v14, 5  ;;  %v337_v24 = vrot.slane %v335_v15, 5  ;;  %v341_v25 = vrot.slane %v339_v16, 4  ;;  %v201_v26 = vld [vmem:[%s5032_s27 + $0x90] sm:$0xf] }
  0x15   : > { %v347_v27 = vrot.slane %v345_v18, 5  ;;  %v424_v28 = vrot.slane %v422_v21, 4  ;;  %v425_v29 = vshll.u32 %v193_v17, 16  ;;  %v431_v30 = vshll.u32 %v194_v19, 16  ;;  %v202_v35 = vld [vmem:[%s5032_s27 + $0x94] sm:$0xf] }
  0x16   : > { %v332_v31 = vor.u32 %v331_v23, %v328_v22  ;;  %v342_v32 = vor.u32 %v341_v25, %v337_v24  ;;  %v435_v33 = vshrl.u32 %v194_v19, 16  ;;  %v441_v34 = vshll.u32 %v218_v20, 16  ;;  %v222_v45 = vld [vmem:[%s5032_s27 + $0x98] sm:$0x1]  ;;  %v177_v61 = vld [vmem:[%s5032_s27] sm:$0xf] }
  0x17   : > { %v427_v37 = vrot.slane %v425_v29, 5  ;;  %v433_v38 = vrot.slane %v431_v30, 5  ;;  %v518_v39 = vshrl.u32 %v201_v26, 16  ;;  %v521_v47 = vshll.u32 %v201_v26, 16  ;;  %v5057_v1 = vld [vmem:[%s5032_s27 + $0x4] sm:$0xf] }
  0x18   : > { %v333_v40 = vrot.slane %v332_v31, 4  ;;  %v343_v41 = vrot.slane %v342_v32, 4  ;;  %v437_v42 = vrot.slane %v435_v33, 4  ;;  %v443_v43 = vrot.slane %v441_v34, 5  ;;  %v5060_v2 = vld [vmem:[%s5032_s27 + $0x8] sm:$0x1] }
  0x19   : > { %v428_v44 = vor.u32 %v427_v37, %v424_v28  ;;  %v520_v46 = vrot.slane %v518_v39, 4  ;;  %v527_v48 = vshll.u32 %v202_v35, 16  ;;  %v531_v52 = vshrl.u32 %v202_v35, 16  ;;  %v187_v19 = vld [vmem:[%s5032_s27 + $0x3c] sm:$0xf] }
  0x1a   : > { %v338_v49 = vsel %vm5044_vm3, %v333_v40, %v337_v24  ;;  %v348_v50 = vsel %vm5044_vm3, %v343_v41, %v347_v27  ;;  %v438_v51 = vor.u32 %v437_v42, %v433_v38  ;;  %v523_v56 = vrot.slane %v521_v47, 5  ;;  %v5072_v20 = vld [vmem:[%s5032_s27 + $0x40] sm:$0xf]  ;;  %v5077_v25 = vld [vmem:[%s5032_s27 + $0x44] sm:$0x1] }
  0x1b   : > { %v623_v53 = vunpack.c.l.b16 %v338_v49  ;;  %v624_v54 = vunpack.c.l.b16 %v348_v50  ;;  %v429_v55 = vrot.slane %v428_v44, 4  ;;  %v529_v58 = vrot.slane %v527_v48, 5  ;;  %v195_v33 = vld [vmem:[%s5032_s27 + $0x6c] sm:$0xf]  ;;  %v219_v47 = vld [vmem:[%s5032_s27 + $0x74] sm:$0x1] }
  0x1c   : > { %v439_v57 = vrot.slane %v438_v51, 4  ;;  %v533_v59 = vrot.slane %v531_v52, 4  ;;  %v537_v60 = vshll.u32 %v222_v45, 16  ;;  %v524_v0 = vor.u32 %v523_v56, %v520_v46 }
  0x1d   : > { %v651_v62 = vpack.c.b16 %v624_v54, %v623_v53  ;;  %v434_v63 = vsel %vm5044_vm3, %v429_v55, %v433_v38  ;;  %v230_v9 = vshrl.u32 %v177_v61, 16  ;;  %v233_v10 = vshll.u32 %v177_v61, 16  ;;  %v203_v61 = vld [vmem:[%s5032_s27 + $0x9c] sm:$0xf] }
  0x1e   : > { %v444_v3 = vsel %vm5044_vm3, %v439_v57, %v443_v43  ;;  %v631_v4 = vunpack.c.l.b16 %v434_v63  ;;  %v534_v5 = vor.u32 %v533_v59, %v529_v58  ;;  %v539_v6 = vrot.slane %v537_v60, 5  ;;  %v196_v43 = vld [vmem:[%s5032_s27 + $0x70] sm:$0xf] }
  0x1f   : > { %4279 = vmatmul.msk.bf16.vlgmr.msra.gmra.mxu1 %vm663_vm4, %v651_v62  ;;  %v632_v7 = vunpack.c.l.b16 %v444_v3  ;;  %v525_v8 = vrot.slane %v524_v0, 4  ;;  %v239_v12 = vshll.u32 %v5057_v1, 16  ;;  %v243_v13 = vshrl.u32 %v5057_v1, 16  ;;  %v204_v3 = vld [vmem:[%s5032_s27 + $0xa0] sm:$0xf] }
  0x20   : > { %v535_v11 = vrot.slane %v534_v5, 4  ;;  %v249_v14 = vshll.u32 %v5060_v2, 16  ;;  %v232_v17 = vrot.slane %v230_v9, 4  ;;  %v235_v18 = vrot.slane %v233_v10, 5 }
  0x21   : > { %v655_v15 = vpack.c.b16 %v632_v7, %v631_v4  ;;  %v530_v16 = vsel %vm5044_vm3, %v525_v8, %v529_v58  ;;  %v241_v23 = vrot.slane %v239_v12, 5  ;;  %v245_v24 = vrot.slane %v243_v13, 4  ;;  %v223_v8 = vld [vmem:[%s5032_s27 + $0xa4] sm:$0x1] }
  0x22   : > { %v540_v21 = vsel %vm5044_vm3, %v535_v11, %v539_v6  ;;  %v639_v22 = vunpack.c.l.b16 %v530_v16  ;;  %v236_v27 = vor.u32 %v235_v18, %v232_v17  ;;  %v251_v28 = vrot.slane %v249_v14, 5 }
  0x23   : > { %4283 = vmatmul.msk.bf16.vlgmr.msra.gmra.mxu2 %vm663_vm4, %v655_v15  ;;  %v640_v26 = vunpack.c.l.b16 %v540_v21  ;;  %v246_v29 = vor.u32 %v245_v24, %v241_v23  ;;  %v350_v30 = vshrl.u32 %v187_v19, 16  ;;  %v353_v31 = vshll.u32 %v187_v19, 16 }
  0x24   : > { %v359_v32 = vshll.u32 %v5072_v20, 16  ;;  %v237_v35 = vrot.slane %v236_v27, 4  ;;  %v363_v37 = vshrl.u32 %v5072_v20, 16  ;;  %v369_v38 = vshll.u32 %v5077_v25, 16 }
  0x25   : > { %v659_v34 = vpack.c.b16 %v640_v26, %v639_v22  ;;  %v247_v39 = vrot.slane %v246_v29, 4  ;;  %v352_v40 = vrot.slane %v350_v30, 4  ;;  %v355_v41 = vrot.slane %v353_v31, 5  ;;  %v179_v22 = vld [vmem:[%s5032_s27 + $0xc] sm:$0xf] }
  0x26   : > { %v361_v42 = vrot.slane %v359_v32, 5  ;;  %v242_v44 = vsel %vm5044_vm3, %v237_v35, %v241_v23  ;;  %v365_v45 = vrot.slane %v363_v37, 4  ;;  %v371_v46 = vrot.slane %v369_v38, 5  ;;  %v5106_v32 = vld [vmem:[%s5032_s27 + $0x14] sm:$0x1] }
  0x27   : > { %4287 = vmatmul.msk.bf16.vlgmr.msra.gmra.mxu3 %vm663_vm4, %v659_v34  ;;  %v446_v48 = vshrl.u32 %v195_v33, 16  ;;  %v252_v49 = vsel %vm5044_vm3, %v247_v39, %v251_v28  ;;  %v615_v50 = vunpack.c.l.b16 %v242_v44  ;;  %v356_v51 = vor.u32 %v355_v41, %v352_v40  ;;  %v5103_v28 = vld [vmem:[%s5032_s27 + $0x10] sm:$0xf] }
  0x28   : > { %v449_v52 = vshll.u32 %v195_v33, 16  ;;  %v616_v53 = vunpack.c.l.b16 %v252_v49  ;;  %v366_v54 = vor.u32 %v365_v45, %v361_v42  ;;  %v455_v56 = vshll.u32 %v196_v43, 16 }
  0x29   : > { %v448_v55 = vrot.slane %v446_v48, 4  ;;  %v357_v57 = vrot.slane %v356_v51, 4  ;;  %v459_v59 = vshrl.u32 %v196_v43, 16  ;;  %v465_v60 = vshll.u32 %v219_v47, 16  ;;  %v5116_v47 = vld [vmem:[%s5032_s27 + $0x4c] sm:$0xf] }
  0x2a   : > { %v451_v58 = vrot.slane %v449_v52, 5  ;;  %v647_v62 = vpack.c.b16 %v616_v53, %v615_v50  ;;  %v367_v63 = vrot.slane %v366_v54, 4  ;;  %v457_v0 = vrot.slane %v455_v56, 5  ;;  %v5121_v56 = vld [vmem:[%s5032_s27 + $0x50] sm:$0x1] }
  0x2b   : > { %v362_v4 = vsel %vm5044_vm3, %v357_v57, %v361_v42  ;;  %v461_v6 = vrot.slane %v459_v59, 4  ;;  %v467_v7 = vrot.slane %v465_v60, 5  ;;  %v542_v11 = vshrl.u32 %v203_v61, 16  ;;  %v189_v42 = vld [vmem:[%s5032_s27 + $0x48] sm:$0xf] }
  0x2c   : > { %v452_v5 = vor.u32 %v451_v58, %v448_v55  ;;  %4275 = vmatmul.msk.bf16.vlgmr.msra.gmra.mxu0 %vm663_vm4, %v647_v62  ;;  %v372_v9 = vsel %vm5044_vm3, %v367_v63, %v371_v46  ;;  %v625_v10 = vunpack.c.l.b16 %v362_v4  ;;  %v545_v12 = vshll.u32 %v203_v61, 16 }
  0x2d   : > { %v626_v13 = vunpack.c.l.b16 %v372_v9  ;;  %v462_v15 = vor.u32 %v461_v6, %v457_v0  ;;  %v551_v16 = vshll.u32 %v204_v3, 16  ;;  %v544_v17 = vrot.slane %v542_v11, 4 }
  0x2e   : > { %v453_v14 = vrot.slane %v452_v5, 4  ;;  %v547_v18 = vrot.slane %v545_v12, 5  ;;  %v555_v19 = vshrl.u32 %v204_v3, 16  ;;  %v561_v21 = vshll.u32 %v223_v8, 16  ;;  %v197_v3 = vld [vmem:[%s5032_s27 + $0x78] sm:$0xf] }
  0x2f   : > { %v652_v23 = vpack.c.b16 %v626_v13, %v625_v10  ;;  %v463_v26 = vrot.slane %v462_v15, 4  ;;  %v553_v27 = vrot.slane %v551_v16, 5  ;;  %v254_v35 = vshrl.u32 %v179_v22, 16  ;;  %v198_v8 = vld [vmem:[%s5032_s27 + $0x7c] sm:$0xf] }
  0x30   : > { %v458_v24 = vsel %vm5044_vm3, %v453_v14, %v457_v0  ;;  %v548_v30 = vor.u32 %v547_v18, %v544_v17  ;;  %v557_v31 = vrot.slane %v555_v19, 4  ;;  %v563_v34 = vrot.slane %v561_v21, 5  ;;  %v220_v16 = vld [vmem:[%s5032_s27 + $0x80] sm:$0x1] }
  0x31   : > { %v633_v29 = vunpack.c.l.b16 %v458_v24  ;;  %4280 = vmatmul.msk.bf16.gmra.mxu1 %vm663_vm4, %v652_v23  ;;  %v468_v33 = vsel %vm5044_vm3, %v463_v26, %v467_v7  ;;  %v257_v37 = vshll.u32 %v179_v22, 16  ;;  %v263_v41 = vshll.u32 %v5103_v28, 16 }
  0x32   : > { %v634_v38 = vunpack.c.l.b16 %v468_v33  ;;  %v549_v39 = vrot.slane %v548_v30, 4  ;;  %v558_v40 = vor.u32 %v557_v31, %v553_v27  ;;  %v256_v43 = vrot.slane %v254_v35, 4 }
  0x33   : > { %v259_v44 = vrot.slane %v257_v37, 5  ;;  %v267_v45 = vshrl.u32 %v5103_v28, 16  ;;  %v273_v46 = vshll.u32 %v5106_v32, 16  ;;  %v265_v51 = vrot.slane %v263_v41, 5 }
  0x34   : > { %v656_v48 = vpack.c.b16 %v634_v38, %v633_v29  ;;  %v554_v49 = vsel %vm5044_vm3, %v549_v39, %v553_v27  ;;  %v559_v50 = vrot.slane %v558_v40, 4  ;;  %v374_v58 = vshrl.u32 %v189_v42, 16  ;;  %v206_v39 = vld [vmem:[%s5032_s27 + $0xac] sm:$0xf]  ;;  %v224_v40 = vld [vmem:[%s5032_s27 + $0xb0] sm:$0x1] }
  0x35   : > { %v641_v52 = vunpack.c.l.b16 %v554_v49  ;;  %v260_v53 = vor.u32 %v259_v44, %v256_v43  ;;  %v269_v54 = vrot.slane %v267_v45, 4  ;;  %v275_v55 = vrot.slane %v273_v46, 5 }
  0x36   : > { %4284 = vmatmul.msk.bf16.gmra.mxu2 %vm663_vm4, %v656_v48  ;;  %v564_v57 = vsel %vm5044_vm3, %v559_v50, %v563_v34  ;;  %v377_v59 = vshll.u32 %v189_v42, 16  ;;  %v383_v60 = vshll.u32 %v5116_v47, 16  ;;  %v387_v0 = vshrl.u32 %v5116_v47, 16  ;;  %v205_v34 = vld [vmem:[%s5032_s27 + $0xa8] sm:$0xf] }
  0x37   : > { %v642_v61 = vunpack.c.l.b16 %v564_v57  ;;  %v261_v62 = vrot.slane %v260_v53, 4  ;;  %v270_v63 = vor.u32 %v269_v54, %v265_v51  ;;  %v376_v4 = vrot.slane %v374_v58, 4 }
  0x38   : > { %v379_v5 = vrot.slane %v377_v59, 5  ;;  %v385_v6 = vrot.slane %v383_v60, 5  ;;  %v393_v7 = vshll.u32 %v5121_v56, 16  ;;  %v389_v12 = vrot.slane %v387_v0, 4  ;;  %v181_v59 = vld [vmem:[%s5032_s27 + $0x18] sm:$0xf] }
  0x39   : > { %v660_v9 = vpack.c.b16 %v642_v61, %v641_v52  ;;  %v266_v10 = vsel %vm5044_vm3, %v261_v62, %v265_v51  ;;  %v271_v11 = vrot.slane %v270_v63, 4  ;;  %v470_v17 = vshrl.u32 %v197_v3, 16  ;;  %v5149_v63 = vld [vmem:[%s5032_s27 + $0x1c] sm:$0xf]  ;;  %v5152_v0 = vld [vmem:[%s5032_s27 + $0x20] sm:$0x1] }
  0x3a   : > { %v617_v13 = vunpack.c.l.b16 %v266_v10  ;;  %v380_v14 = vor.u32 %v379_v5, %v376_v4  ;;  %v395_v15 = vrot.slane %v393_v7, 5  ;;  %v390_v19 = vor.u32 %v389_v12, %v385_v6 }
  0x3b   : > { %4288 = vmatmul.msk.bf16.gmra.mxu3 %vm663_vm4, %v660_v9  ;;  %v276_v18 = vsel %vm5044_vm3, %v271_v11, %v275_v55  ;;  %v473_v21 = vshll.u32 %v197_v3, 16  ;;  %v479_v22 = vshll.u32 %v198_v8, 16  ;;  %v472_v26 = vrot.slane %v470_v17, 4 }
  0x3c   : > { %v618_v23 = vunpack.c.l.b16 %v276_v18  ;;  %v381_v24 = vrot.slane %v380_v14, 4  ;;  %v483_v27 = vshrl.u32 %v198_v8, 16  ;;  %v391_v29 = vrot.slane %v390_v19, 4 }
  0x3d   : > { %v475_v30 = vrot.slane %v473_v21, 5  ;;  %v481_v31 = vrot.slane %v479_v22, 5  ;;  %v489_v33 = vshll.u32 %v220_v16, 16  ;;  %v566_v48 = vshrl.u32 %v205_v34, 16  ;;  %v5162_v21 = vld [vmem:[%s5032_s27 + $0x58] sm:$0xf] }
  0x3e   : > { %v648_v35 = vpack.c.b16 %v618_v23, %v617_v13  ;;  %v386_v37 = vsel %vm5044_vm3, %v381_v24, %v385_v6  ;;  %v485_v38 = vrot.slane %v483_v27, 4  ;;  %v396_v41 = vsel %vm5044_vm3, %v391_v29, %v395_v15  ;;  %v191_v15 = vld [vmem:[%s5032_s27 + $0x54] sm:$0xf]  ;;  %v5167_v27 = vld [vmem:[%s5032_s27 + $0x5c] sm:$0x1] }
  0x3f   : > { %v627_v42 = vunpack.c.l.b16 %v386_v37  ;;  %v476_v43 = vor.u32 %v475_v30, %v472_v26  ;;  %v491_v44 = vrot.slane %v489_v33, 5  ;;  %v628_v45 = vunpack.c.l.b16 %v396_v41 }
  0x40   : > { %4276 = vmatmul.msk.bf16.gmra.mxu0 %vm663_vm4, %v648_v35  ;;  %v486_v46 = vor.u32 %v485_v38, %v481_v31  ;;  %v569_v49 = vshll.u32 %v205_v34, 16  ;;  %v575_v51 = vshll.u32 %v206_v39, 16  ;;  %v579_v52 = vshrl.u32 %v206_v39, 16  ;;  %v199_v39 = vld [vmem:[%s5032_s27 + $0x84] sm:$0xf] }
  0x41   : > { %v477_v50 = vrot.slane %v476_v43, 4  ;;  %v585_v53 = vshll.u32 %v224_v40, 16  ;;  %v653_v54 = vpack.c.b16 %v628_v45, %v627_v42  ;;  %v568_v57 = vrot.slane %v566_v48, 4 }
  0x42   : > { %v487_v55 = vrot.slane %v486_v46, 4  ;;  %v571_v58 = vrot.slane %v569_v49, 5  ;;  %v577_v61 = vrot.slane %v575_v51, 5  ;;  %v581_v62 = vrot.slane %v579_v52, 4  ;;  %v200_v49 = vld [vmem:[%s5032_s27 + $0x88] sm:$0xf] }
  0x43   : > { %v482_v60 = vsel %vm5044_vm3, %v477_v50, %v481_v31  ;;  %4281 = vmatmul.msk.bf16.gmra.mxu1 %vm663_vm4, %v653_v54  ;;  %v587_v6 = vrot.slane %v585_v53, 5  ;;  %v278_v9 = vshrl.u32 %v181_v59, 16  ;;  %v281_v10 = vshll.u32 %v181_v59, 16  ;;  %v221_v53 = vld [vmem:[%s5032_s27 + $0x8c] sm:$0x1] }
  0x44   : > { %v492_v3 = vsel %vm5044_vm3, %v487_v55, %v491_v44  ;;  %v635_v4 = vunpack.c.l.b16 %v482_v60  ;;  %v572_v5 = vor.u32 %v571_v58, %v568_v57  ;;  %v582_v8 = vor.u32 %v581_v62, %v577_v61 }
  0x45   : > { %v636_v7 = vunpack.c.l.b16 %v492_v3  ;;  %v287_v12 = vshll.u32 %v5149_v63, 16  ;;  %v291_v13 = vshrl.u32 %v5149_v63, 16  ;;  %v297_v14 = vshll.u32 %v5152_v0, 16 }
  0x46   : > { %v573_v11 = vrot.slane %v572_v5, 4  ;;  %v583_v17 = vrot.slane %v582_v8, 4  ;;  %v280_v18 = vrot.slane %v278_v9, 4  ;;  %v283_v19 = vrot.slane %v281_v10, 5  ;;  %v207_v8 = vld [vmem:[%s5032_s27 + $0xb4] sm:$0xf] }
  0x47   : > { %v657_v16 = vpack.c.b16 %v636_v7, %v635_v4  ;;  %v289_v23 = vrot.slane %v287_v12, 5  ;;  %v293_v24 = vrot.slane %v291_v13, 4  ;;  %v299_v26 = vrot.slane %v297_v14, 5  ;;  %v208_v12 = vld [vmem:[%s5032_s27 + $0xb8] sm:$0xf] }
  0x48   : > { %v578_v22 = vsel %vm5044_vm3, %v573_v11, %v577_v61  ;;  %v588_v29 = vsel %vm5044_vm3, %v583_v17, %v587_v6  ;;  %v284_v31 = vor.u32 %v283_v19, %v280_v18  ;;  %v398_v33 = vshrl.u32 %v191_v15, 16  ;;  %v225_v17 = vld [vmem:[%s5032_s27 + $0xbc] sm:$0x1] }
  0x49   : > { %4285 = vmatmul.msk.bf16.gmra.mxu2 %vm663_vm4, %v657_v16  ;;  %v643_v30 = vunpack.c.l.b16 %v578_v22  ;;  %v644_v34 = vunpack.c.l.b16 %v588_v29  ;;  %v294_v35 = vor.u32 %v293_v24, %v289_v23  ;;  %v401_v37 = vshll.u32 %v191_v15, 16 }
  0x4a   : > { %v407_v38 = vshll.u32 %v5162_v21, 16  ;;  %v285_v40 = vrot.slane %v284_v31, 4  ;;  %v400_v41 = vrot.slane %v398_v33, 4  ;;  %v411_v42 = vshrl.u32 %v5162_v21, 16 }
  0x4b   : > { %v417_v43 = vshll.u32 %v5167_v27, 16  ;;  %v661_v44 = vpack.c.b16 %v644_v34, %v643_v30  ;;  %v295_v45 = vrot.slane %v294_v35, 4  ;;  %v403_v46 = vrot.slane %v401_v37, 5  ;;  %v183_v37 = vld [vmem:[%s5032_s27 + $0x24] sm:$0xf] }
  0x4c   : > { %v409_v48 = vrot.slane %v407_v38, 5  ;;  %v290_v50 = vsel %vm5044_vm3, %v285_v40, %v289_v23  ;;  %v413_v51 = vrot.slane %v411_v42, 4  ;;  %v494_v54 = vshrl.u32 %v199_v39, 16  ;;  %v5195_v42 = vld [vmem:[%s5032_s27 + $0x28] sm:$0xf] }
  0x4d   : > { %v419_v52 = vrot.slane %v417_v43, 5  ;;  %4289 = vmatmul.msk.bf16.gmra.mxu3 %vm663_vm4, %v661_v44  ;;  %v300_v55 = vsel %vm5044_vm3, %v295_v45, %v299_v26  ;;  %v619_v57 = vunpack.c.l.b16 %v290_v50  ;;  %v404_v58 = vor.u32 %v403_v46, %v400_v41 }
  0x4e   : > { %v497_v59 = vshll.u32 %v199_v39, 16  ;;  %v620_v60 = vunpack.c.l.b16 %v300_v55  ;;  %v414_v61 = vor.u32 %v413_v51, %v409_v48  ;;  %v496_v62 = vrot.slane %v494_v54, 4 }
  0x4f   : > { %v503_v3 = vshll.u32 %v200_v49, 16  ;;  %v405_v4 = vrot.slane %v404_v58, 4  ;;  %v507_v6 = vshrl.u32 %v200_v49, 16  ;;  %v513_v7 = vshll.u32 %v221_v53, 16 }
  0x50   : > { %v499_v5 = vrot.slane %v497_v59, 5  ;;  %v649_v9 = vpack.c.b16 %v620_v60, %v619_v57  ;;  %v415_v10 = vrot.slane %v414_v61, 4  ;;  %v590_v22 = vshrl.u32 %v207_v8, 16  ;;  %v1025_v61 = vld [vmem:[%s5032_s27] sm:$0xe] }
  0x51   : > { %v505_v11 = vrot.slane %v503_v3, 5  ;;  %v410_v13 = vsel %vm5044_vm3, %v405_v4, %v409_v48  ;;  %v509_v15 = vrot.slane %v507_v6, 4  ;;  %v515_v16 = vrot.slane %v513_v7, 5  ;;  %v5199_v48 = vld [vmem:[%s5032_s27 + $0x2c] sm:$0x1] }
  0x52   : > { %v500_v14 = vor.u32 %v499_v5, %v496_v62  ;;  %4277 = vmatmul.msk.bf16.gmra.mxu0 %vm663_vm4, %v649_v9  ;;  %v420_v18 = vsel %vm5044_vm3, %v415_v10, %v419_v52  ;;  %v629_v19 = vunpack.c.l.b16 %v410_v13  ;;  %v593_v23 = vshll.u32 %v207_v8, 16  ;;  %v4517_v6 = vld [vmem:[%s5032_s27 + $0xc] sm:$0xf] }
  0x53   : > { %v630_v24 = vunpack.c.l.b16 %v420_v18  ;;  %v510_v29 = vor.u32 %v509_v15, %v505_v11  ;;  %v599_v30 = vshll.u32 %v208_v12, 16  ;;  %v592_v31 = vrot.slane %v590_v22, 4 }
  0x54   : > { %v501_v26 = vrot.slane %v500_v14, 4  ;;  %v595_v33 = vrot.slane %v593_v23, 5  ;;  %v603_v34 = vshrl.u32 %v208_v12, 16  ;;  %v609_v35 = vshll.u32 %v225_v17, 16  ;;  %v4518_v12 = vld [vmem:[%s5032_s27 + $0x10] sm:$0xf] }
  0x55   : > { %v654_v38 = vpack.c.b16 %v630_v24, %v629_v19  ;;  %v511_v40 = vrot.slane %v510_v29, 4  ;;  %v601_v41 = vrot.slane %v599_v30, 5  ;;  %v1081_v43 = vrot.slane %v5060_v2, 5 }
  0x56   : > { %v506_v39 = vsel %vm5044_vm3, %v501_v26, %v505_v11  ;;  %v596_v45 = vor.u32 %v595_v33, %v592_v31  ;;  %v605_v46 = vrot.slane %v603_v34, 4  ;;  %v611_v50 = vrot.slane %v609_v35, 5  ;;  %v4663_v11 = vld [vmem:[%s6336_s1 + $0x18] sm:$0xf] }
  0x57   : > { %v637_v44 = vunpack.c.l.b16 %v506_v39  ;;  %4282 = vmatmul.msk.bf16.gmra.mxu1 %vm663_vm4, %v654_v38  ;;  %v516_v49 = vsel %vm5044_vm3, %v511_v40, %v515_v16  ;;  %v302_v51 = vshrl.u32 %v183_v37, 16  ;;  %v305_v52 = vshll.u32 %v183_v37, 16  ;;  %v4519_v38 = vld [vmem:[%s5032_s27 + $0x14] sm:$0x1] }
  0x58   : > { %v638_v53 = vunpack.c.l.b16 %v516_v49  ;;  %v597_v54 = vrot.slane %v596_v45, 4  ;;  %v606_v55 = vor.u32 %v605_v46, %v601_v41  ;;  %v311_v2 = vshll.u32 %v5195_v42, 16  ;;  %v4792_v45 = vld [vmem:[%s6336_s1 + $0x1c] sm:$0xf] }
  0x59   : > { %v304_v57 = vrot.slane %v302_v51, 4  ;;  %v307_v58 = vrot.slane %v305_v52, 5  ;;  %v315_v59 = vshrl.u32 %v5195_v42, 16  ;;  %v321_v60 = vshll.u32 %v5199_v48, 16  ;;  %v4860_v51 = vld [vmem:[%s5032_s27] sm:$0xff] }
  0x5a   : > { %v658_v62 = vpack.c.b16 %v638_v53, %v637_v44  ;;  %v602_v3 = vsel %vm5044_vm3, %v597_v54, %v601_v41  ;;  %v607_v4 = vrot.slane %v606_v55, 4  ;;  %v313_v5 = vrot.slane %v311_v2, 5  ;;  %v4841_v2 = vld [vmem:[%s6336_s1 + $0x20] sm:$0xf] }
  0x5b   : > { %v645_v7 = vunpack.c.l.b16 %v602_v3  ;;  %v308_v8 = vor.u32 %v307_v58, %v304_v57  ;;  %v317_v9 = vrot.slane %v315_v59, 4  ;;  %v323_v10 = vrot.slane %v321_v60, 5 }
  0x5c   : > { %4286 = vmatmul.msk.bf16.gmra.mxu2 %vm663_vm4, %v658_v62  ;;  %v612_v13 = vsel %vm5044_vm3, %v607_v4, %v611_v50  ;;  %v4371_v14 = vrot.slane %v1025_v61, 9  ;;  %v1078_v19 = vrot.slane %v5057_v1, 5  ;;  %v2913_v22 = vsel %vm712_vm0, %v4663_v11, 0  ;;  %v4614_v50 = vld [vmem:[%s6336_s1 + $0x14] sm:$0xf] }
  0x5d   : > { %v646_v15 = vunpack.c.l.b16 %v612_v13  ;;  %v309_v16 = vrot.slane %v308_v8, 4  ;;  %v318_v17 = vor.u32 %v317_v9, %v313_v5  ;;  %v1746_v23 = vshrl.u32 %v4517_v6, 16  ;;  %2922 = vmatpush.bf16.msra.mxu2 %v2913_v22  ;;  %v1026_v8 = vld [vmem:[%s5032_s27 + $0xc] sm:$0xe] }
  0x5e   : > { %v1749_v24 = vshll.u32 %v4517_v6, 16  ;;  %v1755_v26 = vshll.u32 %v4518_v12, 16  ;;  %v1079_v33 = vsel %vm5218_vm7, %v4371_v14, %v1078_v19  ;;  %v1080_v35 = vrot.slane %v1078_v19, 4  ;;  %v4521_v6 = vld [vmem:[%s5032_s27 + $0x1c] sm:$0xf] }
  0x5f   : > { %v662_v29 = vpack.c.b16 %v646_v15, %v645_v7  ;;  %v314_v30 = vsel %vm5044_vm3, %v309_v16, %v313_v5  ;;  %v319_v31 = vrot.slane %v318_v17, 4  ;;  %v1190_v37 = vunpack.c.l.b16 %v1079_v33  ;;  %v4520_v5 = vld [vmem:[%s5032_s27 + $0x18] sm:$0xf]  ;;  %v4876_v15 = vld [vmem:[%s5032_s27 + $0xc] sm:$0xff] }
  0x60   : > { %v621_v34 = vunpack.c.l.b16 %v314_v30  ;;  %v1748_v1 = vrot.slane %v1746_v23, 4  ;;  %v1751_v40 = vrot.slane %v1749_v24, 5  ;;  %v1757_v41 = vrot.slane %v1755_v26, 5  ;;  %v4522_v30 = vld [vmem:[%s5032_s27 + $0x20] sm:$0x1] }
  0x61   : > { %4290 = vmatmul.msk.bf16.gmra.mxu3 %vm663_vm4, %v662_v29  ;;  %v324_v39 = vsel %vm5044_vm3, %v319_v31, %v323_v10  ;;  %v1759_v44 = vshrl.u32 %v4518_v12, 16  ;;  %v1082_v49 = vsel %vm5218_vm7, %v1080_v35, %v1081_v43  ;;  %v1765_v55 = vshll.u32 %v4519_v38, 16  ;;  %v4861_v35 = vld [vmem:[%s5032_s27 + $0xc] sm:$0xff] }
  0x62   : > { %v622_v46 = vunpack.c.l.b16 %v324_v39  ;;  %v1191_v52 = vunpack.c.l.b16 %v1082_v49  ;;  %v1752_v53 = vor.u32 %v1751_v40, %v1748_v1  ;;  %v3567_v58 = vsel %vm712_vm0, %v4792_v45, 0 }
  0x63   : > { %v1761_v54 = vrot.slane %v1759_v44, 4  ;;  %3576 = vmatpush.bf16.msra.mxu3 %v3567_v58  ;;  %v2626_v60 = vsel %vm712_vm0, %v4614_v50, 0  ;;  %v3965_v61 = vsel %vm712_vm0, %v4841_v2, 0  ;;  %v1767_v4 = vrot.slane %v1765_v55, 5  ;;  %v1027_v50 = vld [vmem:[%s5032_s27 + $0x18] sm:$0xe] }
  0x64   : > { %v650_v57 = vpack.c.b16 %v622_v46, %v621_v34  ;;  %v1222_v43 = vpack.c.b16 %v1191_v52, %v1190_v37  ;;  %2635 = vmatpush.bf16.msra.mxu1 %v2626_v60  ;;  %v1753_v62 = vrot.slane %v1752_v53, 4  ;;  %3974 = vmatpush.bf16.msra.mxu0 %v3965_v61  ;;  %v1085_v7 = vrot.slane %v5103_v28, 5  ;;  %v4524_v46 = vld [vmem:[%s5032_s27 + $0x28] sm:$0xf] }
  0x65   : > { %v1762_v59 = vor.u32 %v1761_v54, %v1757_v41  ;;  %v1770_v9 = vshrl.u32 %v4520_v5, 16  ;;  %v1773_v10 = vshll.u32 %v4520_v5, 16  ;;  %v1779_v13 = vshll.u32 %v4521_v6, 16 }
  0x66   : > { %4278 = vmatmul.msk.bf16.gmra.mxu0 %vm663_vm4, %v650_v57  ;;  %v1758_v11 = vsel %vm5044_vm3, %v1753_v62, %v1757_v41  ;;  %v1783_v14 = vshrl.u32 %v4521_v6, 16  ;;  %v4372_v16 = vrot.slane %v1026_v8, 9  ;;  %v1087_v17 = vrot.slane %v1085_v7, 4  ;;  %v4523_v41 = vld [vmem:[%s5032_s27 + $0x24] sm:$0xf] }
  0x67   : > { %4355 = vmatmul.msk.bf16.vlgmr.msrb.gmra.mxu1 %vm663_vm4, %v4860_v51  ;;  %v1763_v3 = vrot.slane %v1762_v59, 4  ;;  %v1088_v28 = vrot.slane %v5106_v32, 5  ;;  %v2131_v19 = vunpack.c.l.b16 %v1758_v11  ;;  %v1772_v23 = vrot.slane %v1770_v9, 4  ;;  %v4525_v6 = vld [vmem:[%s5032_s27 + $0x2c] sm:$0x1] }
  0x68   : > { %v1775_v24 = vrot.slane %v1773_v10, 5  ;;  %v1781_v26 = vrot.slane %v1779_v13, 5  ;;  %v1785_v29 = vrot.slane %v1783_v14, 4  ;;  %v1086_v31 = vsel %vm5218_vm7, %v4372_v16, %v1085_v7 }
  0x69   : > { %v1768_v12 = vsel %vm5044_vm3, %v1763_v3, %v1767_v4  ;;  %v1089_v33 = vsel %vm5218_vm7, %v1087_v17, %v1088_v28  ;;  %v1789_v38 = vshll.u32 %v4522_v30, 16  ;;  %v1192_v1 = vunpack.c.l.b16 %v1086_v31 }
  0x6a   : > { %v2132_v22 = vunpack.c.l.b16 %v1768_v12  ;;  %v1776_v32 = vor.u32 %v1775_v24, %v1772_v23  ;;  %v1786_v37 = vor.u32 %v1785_v29, %v1781_v26  ;;  %v1193_v39 = vunpack.c.l.b16 %v1089_v33  ;;  %v4862_v12 = vld [vmem:[%s5032_s27 + $0x18] sm:$0xff]  ;;  %v1028_v29 = vld [vmem:[%s5032_s27 + $0x24] sm:$0xe] }
  0x6b   : > { %v1791_v45 = vrot.slane %v1789_v38, 5  ;;  %v1092_v51 = vrot.slane %v5149_v63, 5  ;;  %v1794_v52 = vshrl.u32 %v4523_v41, 16  ;;  %v1797_v54 = vshll.u32 %v4523_v41, 16 }
  0x6c   : > { %4388 = vmatmul.msk.bf16.vlgmr.msrb.gmra.mxu2 %vm663_vm4, %v1222_v43  ;;  %v2163_v34 = vpack.c.b16 %v2132_v22, %v2131_v19  ;;  %v1777_v40 = vrot.slane %v1776_v32, 4  ;;  %v1787_v44 = vrot.slane %v1786_v37, 4  ;;  %v1223_v49 = vpack.c.b16 %v1193_v39, %v1192_v1  ;;  %v4877_v43 = vld [vmem:[%s5032_s27 + $0x18] sm:$0xff]  ;;  %v4526_v19 = vld [vmem:[%s5032_s27 + $0x30] sm:$0xf]  ;;  %v4878_v32 = vld [vmem:[%s5032_s27 + $0x24] sm:$0xff] }
  0x6d   : > { %v1803_v55 = vshll.u32 %v4524_v46, 16  ;;  %v1807_v2 = vshrl.u32 %v4524_v46, 16  ;;  %v4373_v58 = vrot.slane %v1027_v50, 9  ;;  %v1094_v60 = vrot.slane %v1092_v51, 4  ;;  %v4527_v22 = vld [vmem:[%s5032_s27 + $0x34] sm:$0xf] }
  0x6e   : > { %v1782_v53 = vsel %vm5044_vm3, %v1777_v40, %v1781_v26  ;;  %v1792_v57 = vsel %vm5044_vm3, %v1787_v44, %v1791_v45  ;;  %v1095_v63 = vrot.slane %v5152_v0, 5  ;;  %v1796_v61 = vrot.slane %v1794_v52, 4  ;;  %v4528_v45 = vld [vmem:[%s5032_s27 + $0x38] sm:$0x1] }
  0x6f   : > { %v2133_v59 = vunpack.c.l.b16 %v1782_v53  ;;  %v2134_v62 = vunpack.c.l.b16 %v1792_v57  ;;  %v1799_v3 = vrot.slane %v1797_v54, 5  ;;  %v1805_v4 = vrot.slane %v1803_v55, 5  ;;  %v4530_v57 = vld [vmem:[%s5032_s27 + $0x40] sm:$0xf] }
  0x70   : > { %v1809_v5 = vrot.slane %v1807_v2, 4  ;;  %v1093_v7 = vsel %vm5218_vm7, %v4373_v58, %v1092_v51  ;;  %v1096_v8 = vsel %vm5218_vm7, %v1094_v60, %v1095_v63  ;;  %v1813_v0 = vshll.u32 %v4525_v6, 16  ;;  %v4529_v2 = vld [vmem:[%s5032_s27 + $0x3c] sm:$0xf]  ;;  %v4920_v63 = vld [vmem:[%s5032_s27 + $0x34] sm:$0xf] }
  0x71   : > { %4501 = vmatmul.msk.bf16.vlgmr.msrb.gmra.mxu3 %vm663_vm4, %v4876_v15  ;;  %v2164_v9 = vpack.c.b16 %v2134_v62, %v2133_v59  ;;  %v1800_v10 = vor.u32 %v1799_v3, %v1796_v61  ;;  %v1194_v13 = vunpack.c.l.b16 %v1093_v7  ;;  %v1195_v14 = vunpack.c.l.b16 %v1096_v8  ;;  %v1029_v62 = vld [vmem:[%s5032_s27 + $0x30] sm:$0xe] }
  0x72   : > { %v1810_v11 = vor.u32 %v1809_v5, %v1805_v4  ;;  %v1815_v17 = vrot.slane %v1813_v0, 5  ;;  %v1099_v23 = vrot.slane %v5195_v42, 5  ;;  %v1818_v30 = vshrl.u32 %v4526_v19, 16  ;;  %v4921_v0 = vld [vmem:[%s5032_s27 + $0x38] sm:$0x1] }
  0x73   : > { %v1801_v15 = vrot.slane %v1800_v10, 4  ;;  %v1224_v28 = vpack.c.b16 %v1195_v14, %v1194_v13  ;;  %v1821_v31 = vshll.u32 %v4526_v19, 16  ;;  %v1827_v33 = vshll.u32 %v4527_v22, 16  ;;  %v4879_v13 = vld [vmem:[%s5032_s27 + $0x30] sm:$0xff] }
  0x74   : > { %v1811_v16 = vrot.slane %v1810_v11, 4  ;;  %v1101_v37 = vrot.slane %v1099_v23, 4  ;;  %v1102_v42 = vrot.slane %v5199_v48, 5  ;;  %v1820_v39 = vrot.slane %v1818_v30, 4  ;;  %v4863_v48 = vld [vmem:[%s5032_s27 + $0x24] sm:$0xff] }
  0x75   : > { %v1806_v24 = vsel %vm5044_vm3, %v1801_v15, %v1805_v4  ;;  %v1823_v40 = vrot.slane %v1821_v31, 5  ;;  %v1829_v41 = vrot.slane %v1827_v33, 5  ;;  %v1837_v53 = vshll.u32 %v4528_v45, 16  ;;  %v4864_v33 = vld [vmem:[%s5032_s27 + $0x30] sm:$0xff] }
  0x76   : > { %4566 = vmatmul.msk.bf16.vlgmr.msrb.gmra.mxu0 %vm663_vm4, %v2163_v34  ;;  %v1816_v26 = vsel %vm5044_vm3, %v1811_v16, %v1815_v17  ;;  %v1831_v34 = vshrl.u32 %v4527_v22, 16  ;;  %v2135_v38 = vunpack.c.l.b16 %v1806_v24  ;;  %v1106_v61 = vrot.slane %v4920_v63, 5  ;;  %v4531_v22 = vld [vmem:[%s5032_s27 + $0x44] sm:$0x1] }
  0x77   : > { %4356 = vmatmul.msk.bf16.gmra.mxu1 %vm663_vm4, %v4861_v35  ;;  %v4374_v35 = vrot.slane %v1028_v29, 9  ;;  %v2136_v1 = vunpack.c.l.b16 %v1816_v26  ;;  %v1824_v51 = vor.u32 %v1823_v40, %v1820_v39  ;;  %v1839_v59 = vrot.slane %v1837_v53, 5  ;;  %v4532_v39 = vld [vmem:[%s5032_s27 + $0x48] sm:$0xf]  ;;  %v4533_v40 = vld [vmem:[%s5032_s27 + $0x4c] sm:$0xf] }
  0x78   : > { %v1833_v44 = vrot.slane %v1831_v34, 4  ;;  %v1842_v3 = vshrl.u32 %v4529_v2, 16  ;;  %v1845_v4 = vshll.u32 %v4529_v2, 16  ;;  %v1851_v5 = vshll.u32 %v4530_v57, 16  ;;  %v4880_v2 = vld [vmem:[%s5032_s27 + $0x3c] sm:$0xff] }
  0x79   : > { %v1100_v46 = vsel %vm5218_vm7, %v4374_v35, %v1099_v23  ;;  %v2165_v50 = vpack.c.b16 %v2136_v1, %v2135_v38  ;;  %v1825_v58 = vrot.slane %v1824_v51, 4  ;;  %v1855_v6 = vshrl.u32 %v4530_v57, 16 }
  0x7a   : > { %v1834_v52 = vor.u32 %v1833_v44, %v1829_v41  ;;  %v1196_v54 = vunpack.c.l.b16 %v1100_v46  ;;  %v4375_v10 = vrot.slane %v1029_v62, 9  ;;  %v1108_v11 = vrot.slane %v1106_v61, 4 }
  0x7b   : > { %v1830_v8 = vsel %vm5044_vm3, %v1825_v58, %v1829_v41  ;;  %v1844_v14 = vrot.slane %v1842_v3, 4  ;;  %v1847_v15 = vrot.slane %v1845_v4, 5  ;;  %v1853_v16 = vrot.slane %v1851_v5, 5  ;;  %v4534_v4 = vld [vmem:[%s5032_s27 + $0x50] sm:$0x1] }
  0x7c   : > { %4389 = vmatmul.msk.bf16.gmra.mxu2 %vm663_vm4, %v1223_v49  ;;  %v1103_v49 = vsel %vm5218_vm7, %v1101_v37, %v1102_v42  ;;  %v1857_v17 = vrot.slane %v1855_v6, 4  ;;  %v1107_v23 = vsel %vm5218_vm7, %v4375_v10, %v1106_v61  ;;  %v1861_v30 = vshll.u32 %v4531_v22, 16 }
  0x7d   : > { %v1197_v55 = vunpack.c.l.b16 %v1103_v49  ;;  %v1848_v26 = vor.u32 %v1847_v15, %v1844_v14  ;;  %v1866_v51 = vshrl.u32 %v4532_v39, 16  ;;  %v1875_v53 = vshll.u32 %v4533_v40, 16 }
  0x7e   : > { %v1858_v29 = vor.u32 %v1857_v17, %v1853_v16  ;;  %v1863_v1 = vrot.slane %v1861_v30, 5 }
  0x7f   : > { %v1225_v60 = vpack.c.b16 %v1197_v55, %v1196_v54  ;;  %v1849_v42 = vrot.slane %v1848_v26, 4  ;;  %v1879_v54 = vshrl.u32 %v4533_v40, 16  ;;  %v1877_v62 = vrot.slane %v1875_v53, 5 }
  0x80   : > { %v1859_v38 = vrot.slane %v1858_v29, 4  ;;  %v1120_v26 = vrot.slane %v5116_v47, 5 }
  0x81   : > { %4502 = vmatmul.msk.bf16.gmra.mxu3 %vm663_vm4, %v4877_v43  ;;  %v1835_v43 = vrot.slane %v1834_v52, 4  ;;  %v1854_v45 = vsel %vm5044_vm3, %v1849_v42, %v1853_v16  ;;  %v1869_v52 = vshll.u32 %v4532_v39, 16  ;;  %v1881_v3 = vrot.slane %v1879_v54, 4  ;;  %v4537_v54 = vld [vmem:[%s5032_s27 + $0x5c] sm:$0x1] }
  0x82   : > { %v1864_v46 = vsel %vm5044_vm3, %v1859_v38, %v1863_v1  ;;  %v2139_v55 = vunpack.c.l.b16 %v1854_v45  ;;  %v4881_v1 = vld [vmem:[%s5032_s27 + $0x48] sm:$0xff]  ;;  %v1122_v40 = vrot.slane %v1120_v26, 4 }
  0x83   : > { %v2140_v57 = vunpack.c.l.b16 %v1864_v46  ;;  %v1871_v61 = vrot.slane %v1869_v52, 5  ;;  %v1882_v10 = vor.u32 %v1881_v3, %v1877_v62 }
  0x85   : > { %v1883_v16 = vrot.slane %v1882_v10, 4 }
  0x86   : > { %4567 = vmatmul.msk.bf16.gmra.mxu0 %vm663_vm4, %v2164_v9  ;;  %v1840_v9 = vsel %vm5044_vm3, %v1835_v43, %v1839_v59 }
  0x87   : > { %4357 = vmatmul.msk.bf16.gmra.mxu1 %vm663_vm4, %v4862_v12  ;;  %v1109_v12 = vrot.slane %v4921_v0, 5  ;;  %v2138_v19 = vunpack.c.l.b16 %v1840_v9 }
  0x89   : > { %v1110_v24 = vsel %vm5218_vm7, %v1108_v11, %v1109_v12  ;;  %v1885_v11 = vshll.u32 %v4534_v4, 16  ;;  %v4865_v12 = vld [vmem:[%s5032_s27 + $0x3c] sm:$0xff] }
  0x8a   : > { %v1199_v35 = vunpack.c.l.b16 %v1110_v24  ;;  %v4536_v24 = vld [vmem:[%s5032_s27 + $0x58] sm:$0xf]  ;;  %v4538_v4 = vld [vmem:[%s5032_s27 + $0x60] sm:$0xf] }
  0x8b   : > { %v1887_v17 = vrot.slane %v1885_v11, 5  ;;  %v1903_v42 = vshrl.u32 %v4536_v24, 16 }
  0x8c   : > { %4390 = vmatmul.msk.bf16.gmra.mxu2 %vm663_vm4, %v1224_v28  ;;  %v2137_v28 = vunpack.c.l.b16 %v1830_v8  ;;  %v2167_v8 = vpack.c.b16 %v2140_v57, %v2139_v55 }
  0x8d   : > { %v1888_v30 = vsel %vm5044_vm3, %v1883_v16, %v1887_v17  ;;  %v1905_v52 = vrot.slane %v1903_v42, 4 }
  0x8e   : > { %v2166_v31 = vpack.c.b16 %v2138_v19, %v2137_v28  ;;  %v2142_v46 = vunpack.c.l.b16 %v1888_v30 }
  0x91   : > { %4503 = vmatmul.msk.bf16.gmra.mxu3 %vm663_vm4, %v4878_v32  ;;  %v1198_v32 = vunpack.c.l.b16 %v1107_v23  ;;  %v4535_v23 = vld [vmem:[%s5032_s27 + $0x54] sm:$0xf] }
  0x93   : > { %v1226_v44 = vpack.c.b16 %v1199_v35, %v1198_v32  ;;  %v1893_v32 = vshll.u32 %v4535_v23, 16  ;;  %v1899_v35 = vshll.u32 %v4536_v24, 16 }
  0x96   : > { %4568 = vmatmul.msk.bf16.gmra.mxu0 %vm663_vm4, %v2165_v50  ;;  %v1113_v50 = vrot.slane %v5072_v20, 5  ;;  %v1868_v20 = vrot.slane %v1866_v51, 4  ;;  %v1901_v51 = vrot.slane %v1899_v35, 5  ;;  %v1130_v35 = vrot.slane %v5167_v27, 5 }
  0x97   : > { %4358 = vmatmul.msk.bf16.gmra.mxu1 %vm663_vm4, %v4863_v48  ;;  %v1030_v48 = vld [vmem:[%s5032_s27 + $0x3c] sm:$0xe] }
  0x98   : > { %v4376_v43 = vrot.slane %v1030_v48, 9  ;;  %v1115_v59 = vrot.slane %v1113_v50, 4  ;;  %v1895_v48 = vrot.slane %v1893_v32, 5 }
  0x9a   : > { %v1114_v5 = vsel %vm5218_vm7, %v4376_v43, %v1113_v50  ;;  %v4866_v43 = vld [vmem:[%s5032_s27 + $0x48] sm:$0xff] }
  0x9c   : > { %v5313_v7 = vpop.f32.mrf.mxu1  ;;  %4391 = vmatmul.msk.bf16.gmra.mxu2 %vm663_vm4, %v1225_v60  ;;  %v1116_v60 = vrot.slane %v5077_v25, 5  ;;  %v1872_v25 = vor.u32 %v1871_v61, %v1868_v20  ;;  %v1909_v20 = vshll.u32 %v4537_v54, 16  ;;  %v4867_v54 = vld [vmem:[%s5032_s27 + $0x54] sm:$0xff] }
  0x9e   : > { %v1117_v6 = vsel %vm5218_vm7, %v1115_v59, %v1116_v60  ;;  %v1873_v15 = vrot.slane %v1872_v25, 4  ;;  %v1906_v60 = vor.u32 %v1905_v52, %v1901_v51  ;;  %v1911_v10 = vrot.slane %v1909_v20, 5 }
  0x9f   : > { %v1201_v14 = vunpack.c.l.b16 %v1117_v6 }
  0xa0   : > { %v1878_v29 = vsel %vm5044_vm3, %v1873_v15, %v1877_v62  ;;  %v1907_v25 = vrot.slane %v1906_v60, 4  ;;  %v1127_v15 = vrot.slane %v5162_v21, 5 }
  0xa1   : > { %4504 = vmatmul.msk.bf16.gmra.mxu3 %vm663_vm4, %v4879_v13  ;;  %v1200_v13 = vunpack.c.l.b16 %v1114_v5  ;;  %v2141_v45 = vunpack.c.l.b16 %v1878_v29  ;;  %v4539_v5 = vld [vmem:[%s5032_s27 + $0x64] sm:$0xf] }
  0xa2   : > { %v1927_v16 = vshrl.u32 %v4539_v5, 16  ;;  %v1912_v24 = vsel %vm5044_vm3, %v1907_v25, %v1911_v10  ;;  %v1129_v32 = vrot.slane %v1127_v15, 4  ;;  %v4922_v10 = vld [vmem:[%s5032_s27 + $0x64] sm:$0xf] }
  0xa3   : > { %v1227_v19 = vpack.c.b16 %v1201_v14, %v1200_v13  ;;  %v2168_v57 = vpack.c.b16 %v2142_v46, %v2141_v45  ;;  %v1917_v13 = vshll.u32 %v4538_v4, 16  ;;  %v1923_v14 = vshll.u32 %v4539_v5, 16 }
  0xa4   : > { %v5329_v34 = vpop.f32.mrf.mxu1  ;;  %v1929_v42 = vrot.slane %v1927_v16, 4 }
  0xa5   : > { %v1919_v30 = vrot.slane %v1917_v13, 5  ;;  %v1033_v13 = vld [vmem:[%s5032_s27 + $0x60] sm:$0xe] }
  0xa6   : > { %v5331_v37 = vpop.f32.mrf.mxu2  ;;  %4569 = vmatmul.msk.bf16.gmra.mxu0 %vm663_vm4, %v2166_v31  ;;  %v1031_v31 = vld [vmem:[%s5032_s27 + $0x48] sm:$0xe] }
  0xa7   : > { %4359 = vmatmul.msk.bf16.gmra.mxu1 %vm663_vm4, %v4864_v33  ;;  %v1890_v33 = vshrl.u32 %v4535_v23, 16  ;;  %v4377_v47 = vrot.slane %v1031_v31, 9  ;;  %v1925_v31 = vrot.slane %v1923_v14, 5 }
  0xa9   : > { %v5337_v41 = vpop.f32.mrf.mxu0  ;;  %v1892_v50 = vrot.slane %v1890_v33, 4  ;;  %v4882_v33 = vld [vmem:[%s5032_s27 + $0x54] sm:$0xff]  ;;  %v1930_v27 = vor.u32 %v1929_v42, %v1925_v31 }
  0xaa   : > { %v5343_v49 = vpop.f32.mrf.mxu3 }
  0xab   : > { %v1896_v59 = vor.u32 %v1895_v48, %v1892_v50  ;;  %v1131_v48 = vsel %vm5218_vm7, %v1129_v32, %v1130_v35  ;;  %v1931_v60 = vrot.slane %v1930_v27, 4 }
  0xac   : > { %4392 = vmatmul.msk.bf16.gmra.mxu2 %vm663_vm4, %v1226_v44  ;;  %v1123_v44 = vrot.slane %v5121_v56, 5 }
  0xae   : > { %v5349_v58 = vpop.f32.mrf.mxu1  ;;  %v5352_v63 = vpop.f32.mrf.mxu2  ;;  %v1124_v56 = vsel %vm5218_vm7, %v1122_v40, %v1123_v44  ;;  %v4540_v40 = vld [vmem:[%s5032_s27 + $0x68] sm:$0x1] }
  0xaf   : > { %v1203_v62 = vunpack.c.l.b16 %v1124_v56 }
  0xb1   : > { %4505 = vmatmul.msk.bf16.gmra.mxu3 %vm663_vm4, %v4880_v2  ;;  %v5360_v9 = vpop.f32.mrf.mxu0  ;;  %v1121_v2 = vsel %vm5218_vm7, %v4377_v47, %v1120_v26  ;;  %v2144_v47 = vunpack.c.l.b16 %v1912_v24 }
  0xb2   : > { %v5362_v0 = vpop.f32.mrf.mxu3  ;;  %v1202_v61 = vunpack.c.l.b16 %v1121_v2 }
  0xb4   : > { %v1228_v11 = vpack.c.b16 %v1203_v62, %v1202_v61  ;;  %v4541_v61 = vld [vmem:[%s5032_s27 + $0x6c] sm:$0xf]  ;;  %v4542_v62 = vld [vmem:[%s5032_s27 + $0x70] sm:$0xf] }
  0xb5   : > { %v1938_v14 = vshrl.u32 %v4541_v61, 16  ;;  %v1947_v16 = vshll.u32 %v4542_v62, 16 }
  0xb6   : > { %4570 = vmatmul.msk.bf16.gmra.mxu0 %vm663_vm4, %v2167_v8  ;;  %v5366_v28 = vpop.f32.mrf.mxu1  ;;  %v1897_v8 = vrot.slane %v1896_v59, 4 }
  0xb7   : > { %4360 = vmatmul.msk.bf16.gmra.mxu1 %vm663_vm4, %v4865_v12  ;;  %v1914_v12 = vshrl.u32 %v4538_v4, 16  ;;  %v1940_v35 = vrot.slane %v1938_v14, 4  ;;  %v4545_v14 = vld [vmem:[%s5032_s27 + $0x7c] sm:$0xf] }
  0xb8   : > { %v1902_v23 = vsel %vm5044_vm3, %v1897_v8, %v1901_v51  ;;  %v1933_v51 = vshll.u32 %v4540_v40, 16 }
  0xb9   : > { %v5369_v22 = vpop.f32.mrf.mxu2  ;;  %v1916_v29 = vrot.slane %v1914_v12, 4 }
  0xba   : > { %v1935_v20 = vrot.slane %v1933_v51, 5 }
  0xbb   : > { %v1920_v46 = vor.u32 %v1919_v30, %v1916_v29  ;;  %v4883_v30 = vld [vmem:[%s5032_s27 + $0x60] sm:$0xff] }
  0xbc   : > { %4393 = vmatmul.msk.bf16.gmra.mxu2 %vm663_vm4, %v1227_v19  ;;  %v1032_v19 = vld [vmem:[%s5032_s27 + $0x54] sm:$0xe]  ;;  %v1936_v25 = vsel %vm5044_vm3, %v1931_v60, %v1935_v20 }
  0xbd   : > { %v5379_v38 = vpop.f32.mrf.mxu0  ;;  %v4378_v21 = vrot.slane %v1032_v19, 9  ;;  %v1921_v59 = vrot.slane %v1920_v46, 4  ;;  %v1951_v19 = vshrl.u32 %v4542_v62, 16  ;;  %v4543_v46 = vld [vmem:[%s5032_s27 + $0x74] sm:$0x1] }
  0xbe   : > { %v5383_v39 = vpop.f32.mrf.mxu3 }
  0xbf   : > { %v1128_v50 = vsel %vm5218_vm7, %v4378_v21, %v1127_v15  ;;  %v1926_v8 = vsel %vm5044_vm3, %v1921_v59, %v1925_v31  ;;  %v1941_v15 = vshll.u32 %v4541_v61, 16  ;;  %v4379_v21 = vrot.slane %v1033_v13, 9  ;;  %v4544_v13 = vld [vmem:[%s5032_s27 + $0x78] sm:$0xf] }
  0xc0   : > { %v5386_v53 = vpop.f32.mrf.mxu1  ;;  %v1204_v56 = vunpack.c.l.b16 %v1128_v50  ;;  %v2145_v31 = vunpack.c.l.b16 %v1926_v8 }
  0xc1   : > { %4506 = vmatmul.msk.bf16.gmra.mxu3 %vm663_vm4, %v4881_v1  ;;  %v5390_v55 = vpop.f32.mrf.mxu2  ;;  %v2143_v1 = vunpack.c.l.b16 %v1902_v23  ;;  %v4923_v23 = vld [vmem:[%s5032_s27 + $0x68] sm:$0x1]  ;;  %v1943_v42 = vrot.slane %v1941_v15, 5  ;;  %v4924_v15 = vld [vmem:[%s5032_s27 + $0x70] sm:$0xf] }
  0xc2   : > { %v1137_v24 = vrot.slane %v4923_v23, 5  ;;  %v1034_v23 = vld [vmem:[%s5032_s27 + $0x6c] sm:$0xe] }
  0xc3   : > { %v2169_v52 = vpack.c.b16 %v2144_v47, %v2143_v1  ;;  %v1949_v1 = vrot.slane %v1947_v16, 5  ;;  %v1953_v47 = vrot.slane %v1951_v19, 4  ;;  %v1944_v51 = vor.u32 %v1943_v42, %v1940_v35  ;;  %v4925_v42 = vld [vmem:[%s5032_s27 + $0x74] sm:$0x1] }
  0xc4   : > { %v1141_v16 = vrot.slane %v4924_v15, 5 }
  0xc5   : > { %v5397_v3 = vpop.f32.mrf.mxu0 }
  0xc6   : > { %4571 = vmatmul.msk.bf16.gmra.mxu0 %vm663_vm4, %v2168_v57  ;;  %v5402_v6 = vpop.f32.mrf.mxu3  ;;  %v1205_v57 = vunpack.c.l.b16 %v1131_v48 }
  0xc7   : > { %4361 = vmatmul.msk.bf16.gmra.mxu1 %vm663_vm4, %v4866_v43 }
  0xc8   : > { %v5406_v17 = vpop.f32.mrf.mxu1  ;;  %v1229_v4 = vpack.c.b16 %v1205_v57, %v1204_v56  ;;  %v4868_v57 = vld [vmem:[%s5032_s27 + $0x60] sm:$0xff] }
  0xcc   : > { %v5413_v26 = vpop.f32.mrf.mxu2  ;;  %4394 = vmatmul.msk.bf16.gmra.mxu2 %vm663_vm4, %v1228_v11  ;;  %v1134_v11 = vrot.slane %v4922_v10, 5 }
  0xce   : > { %v1136_v32 = vrot.slane %v1134_v11, 4  ;;  %v1135_v50 = vsel %vm5218_vm7, %v4379_v21, %v1134_v11  ;;  %v1975_v21 = vshrl.u32 %v4545_v14, 16 }
  0xcf   : > { %v5419_v44 = vpop.f32.mrf.mxu0  ;;  %v1206_v20 = vunpack.c.l.b16 %v1135_v50  ;;  %v4380_v50 = vrot.slane %v1034_v23, 9 }
  0xd0   : > { %v5421_v45 = vpop.f32.mrf.mxu3  ;;  %v1138_v48 = vsel %vm5218_vm7, %v1136_v32, %v1137_v24 }
  0xd1   : > { %4507 = vmatmul.msk.bf16.gmra.mxu3 %vm663_vm4, %v4882_v33  ;;  %v2146_v33 = vunpack.c.l.b16 %v1936_v25  ;;  %v1207_v61 = vunpack.c.l.b16 %v1138_v48  ;;  %v1143_v48 = vrot.slane %v1141_v16, 4 }
  0xd3   : > { %v2170_v27 = vpack.c.b16 %v2146_v33, %v2145_v31  ;;  %v1230_v11 = vpack.c.b16 %v1207_v61, %v1206_v20  ;;  %v1965_v31 = vshll.u32 %v4544_v13, 16  ;;  %v1971_v33 = vshll.u32 %v4545_v14, 16 }
  0xd4   : > { %v5429_v2 = vpop.f32.mrf.mxu1  ;;  %v5431_v43 = vpop.f32.mrf.mxu2  ;;  %v1977_v20 = vrot.slane %v1975_v21, 4 }
  0xd6   : > { %4572 = vmatmul.msk.bf16.gmra.mxu0 %vm663_vm4, %v2169_v52  ;;  %v1954_v52 = vor.u32 %v1953_v47, %v1949_v1  ;;  %v1144_v47 = vrot.slane %v4925_v42, 5 }
  0xd7   : > { %4362 = vmatmul.msk.bf16.gmra.mxu1 %vm663_vm4, %v4867_v54  ;;  %v5437_v5 = vpop.f32.mrf.mxu0  ;;  %v1957_v54 = vshll.u32 %v4543_v46, 16  ;;  %v4884_v46 = vld [vmem:[%s5032_s27 + $0x6c] sm:$0xff] }
  0xd8   : > { %v5444_v12 = vpop.f32.mrf.mxu3  ;;  %v1955_v8 = vrot.slane %v1954_v52, 4 }
  0xd9   : > { %v1959_v25 = vrot.slane %v1957_v54, 5 }
  0xdc   : > { %4395 = vmatmul.msk.bf16.gmra.mxu2 %vm663_vm4, %v1229_v4  ;;  %v5449_v29 = vpop.f32.mrf.mxu1  ;;  %v1945_v4 = vrot.slane %v1944_v51, 4 }
  0xde   : > { %v1950_v19 = vsel %vm5044_vm3, %v1945_v4, %v1949_v1  ;;  %v4546_v4 = vld [vmem:[%s5032_s27 + $0x80] sm:$0x1] }
  0xdf   : > { %v5452_v40 = vpop.f32.mrf.mxu2 }
  0xe1   : > { %4508 = vmatmul.msk.bf16.gmra.mxu3 %vm663_vm4, %v4883_v30  ;;  %v1962_v30 = vshrl.u32 %v4544_v13, 16  ;;  %v4869_v13 = vld [vmem:[%s5032_s27 + $0x6c] sm:$0xff] }
  0xe3   : > { %v5460_v56 = vpop.f32.mrf.mxu0  ;;  %v1964_v54 = vrot.slane %v1962_v30, 4 }
  0xe4   : > { %v5463_v59 = vpop.f32.mrf.mxu3  ;;  %v945_v60 = vpop.f32.mrf.mxu1 }
  0xe5   : > { %v946_v62 = vadd.f32 %v945_v60, %v5337_v41  ;;  %v1960_v41 = vsel %vm5044_vm3, %v1955_v8, %v1959_v25  ;;  %v1973_v60 = vrot.slane %v1971_v33, 5  ;;  %v1142_v8 = vsel %vm5218_vm7, %v4380_v50, %v1141_v16 }
  0xe6   : > { %4573 = vmatmul.msk.bf16.gmra.mxu0 %vm663_vm4, %v2170_v27  ;;  %v2147_v27 = vunpack.c.l.b16 %v1950_v19  ;;  %v2148_v51 = vunpack.c.l.b16 %v1960_v41  ;;  %v1981_v19 = vshll.u32 %v4546_v4, 16 }
  0xe7   : > { %v5467_v10 = vpop.f32.mrf.mxu2  ;;  %4363 = vmatmul.msk.bf16.gmra.mxu1 %vm663_vm4, %v4868_v57  ;;  %v1967_v57 = vrot.slane %v1965_v31, 5  ;;  %v1978_v15 = vor.u32 %v1977_v20, %v1973_v60 }
  0xe8   : > { %v2171_v25 = vpack.c.b16 %v2148_v51, %v2147_v27  ;;  %v1983_v42 = vrot.slane %v1981_v19, 5  ;;  %v4548_v27 = vld [vmem:[%s5032_s27 + $0x88] sm:$0xf]  ;;  %v4926_v51 = vld [vmem:[%s5032_s27 + $0x7c] sm:$0xf] }
  0xe9   : > { %v1968_v14 = vor.u32 %v1967_v57, %v1964_v54  ;;  %v1035_v54 = vld [vmem:[%s5032_s27 + $0x78] sm:$0xe] }
  0xeb   : > { %v5478_v24 = vpop.f32.mrf.mxu0  ;;  %v1969_v21 = vrot.slane %v1968_v14, 4 }
  0xec   : > { %v5480_v32 = vpop.f32.mrf.mxu3  ;;  %4396 = vmatmul.msk.bf16.gmra.mxu2 %vm663_vm4, %v1230_v11  ;;  %v947_v35 = vpop.f32.mrf.mxu1 }
  0xed   : > { %v948_v1 = vadd.f32 %v947_v35, %v5360_v9  ;;  %v1145_v9 = vsel %vm5218_vm7, %v1143_v48, %v1144_v47  ;;  %v1979_v35 = vrot.slane %v1978_v15, 4  ;;  %v4547_v47 = vld [vmem:[%s5032_s27 + $0x84] sm:$0xf]  ;;  %v4885_v15 = vld [vmem:[%s5032_s27 + $0x78] sm:$0xff] }
  0xee   : > { %v1209_v30 = vunpack.c.l.b16 %v1145_v9  ;;  %v1989_v57 = vshll.u32 %v4547_v47, 16  ;;  %v1999_v9 = vshrl.u32 %v4548_v27, 16 }
  0xef   : > { %v1298_v52 = vpop.f32.mrf.mxu2  ;;  %v1984_v4 = vsel %vm5044_vm3, %v1979_v35, %v1983_v42 }
  0xf0   : > { %v1378_v61 = vadd.f32 %v1298_v52, %v946_v62  ;;  %v1208_v62 = vunpack.c.l.b16 %v1142_v8  ;;  %v1148_v52 = vrot.slane %v4926_v51, 5  ;;  %v1995_v8 = vshll.u32 %v4548_v27, 16 }
  0xf1   : > { %4509 = vmatmul.msk.bf16.gmra.mxu3 %vm663_vm4, %v4884_v46  ;;  %v2001_v35 = vrot.slane %v1999_v9, 4 }
  0xf2   : > { %v1231_v48 = vpack.c.b16 %v1209_v30, %v1208_v62 }
  0xf3   : > { %v2239_v11 = vpop.f32.mrf.mxu0 }
  0xf4   : > { %v1585_v41 = vpop.f32.mrf.mxu3  ;;  %v950_v23 = vpop.f32.mrf.mxu1 }
  0xf5   : > { %v1665_v31 = vadd.f32 %v1585_v41, %v1378_v61  ;;  %v951_v16 = vadd.f32 %v950_v23, %v5379_v38  ;;  %v1986_v38 = vshrl.u32 %v4547_v47, 16  ;;  %v1974_v61 = vsel %vm5044_vm3, %v1969_v21, %v1973_v60 }
  0xf6   : > { %4574 = vmatmul.msk.bf16.gmra.mxu0 %vm663_vm4, %v2171_v25  ;;  %v4927_v25 = vld [vmem:[%s5032_s27 + $0x80] sm:$0x1]  ;;  %v4381_v41 = vrot.slane %v1035_v54, 9  ;;  %v1150_v23 = vrot.slane %v1148_v52, 4  ;;  %v2149_v62 = vunpack.c.l.b16 %v1974_v61  ;;  %v2150_v60 = vunpack.c.l.b16 %v1984_v4 }
  0xf7   : > { %v1300_v33 = vpop.f32.mrf.mxu2  ;;  %4364 = vmatmul.msk.bf16.gmra.mxu1 %vm663_vm4, %v4869_v13  ;;  %v5497_v46 = vadd.f32 %v2239_v11, %v1665_v31  ;;  %v1151_v11 = vrot.slane %v4927_v25, 5  ;;  %v1988_v30 = vrot.slane %v1986_v38, 4  ;;  %v1991_v31 = vrot.slane %v1989_v57, 5  ;;  %v4870_v38 = vld [vmem:[%s5032_s27 + $0x78] sm:$0xff] }
  0xf8   : > { %v1379_v50 = vadd.f32 %v1300_v33, %v948_v1  ;;  %v1997_v21 = vrot.slane %v1995_v8, 5  ;;  %v2172_v27 = vpack.c.b16 %v2150_v60, %v2149_v62  ;;  %v4551_v62 = vld [vmem:[%s5032_s27 + $0x94] sm:$0xf]  ;;  %v4928_v60 = vld [vmem:[%s5032_s27 + $0x88] sm:$0xf] }
  0xf9   : > { %v1992_v51 = vor.u32 %v1991_v31, %v1988_v30  ;;  %v1155_v30 = vrot.slane %v4928_v60, 5  ;;  %v1036_v31 = vld [vmem:[%s5032_s27 + $0x84] sm:$0xe] }
  0xfa   : > { %v2002_v57 = vor.u32 %v2001_v35, %v1997_v21 }
  0xfb   : > { %v2241_v20 = vpop.f32.mrf.mxu0  ;;  %v1993_v25 = vrot.slane %v1992_v51, 4 }
  0xfc   : > { %v1587_v1 = vpop.f32.mrf.mxu3  ;;  %4397 = vmatmul.msk.bf16.gmra.mxu2 %vm663_vm4, %v1231_v48  ;;  %v952_v13 = vpop.f32.mrf.mxu1  ;;  %v4549_v48 = vld [vmem:[%s5032_s27 + $0x8c] sm:$0x1] }
  0xfd   : > { %v1666_v14 = vadd.f32 %v1587_v1, %v1379_v50  ;;  %v953_v19 = vadd.f32 %v952_v13, %v5397_v3  ;;  %v1149_v50 = vsel %vm5218_vm7, %v4381_v41, %v1148_v52  ;;  %v1152_v3 = vsel %vm5218_vm7, %v1150_v23, %v1151_v11 }
  0xfe   : > { %v2005_v61 = vshll.u32 %v4549_v48, 16  ;;  %v1211_v8 = vunpack.c.l.b16 %v1152_v3  ;;  %v2003_v1 = vrot.slane %v2002_v57, 4  ;;  %v2023_v3 = vshrl.u32 %v4551_v62, 16  ;;  %v4886_v57 = vld [vmem:[%s5032_s27 + $0x84] sm:$0xff] }
  0xff   : > { %v1303_v33 = vpop.f32.mrf.mxu2  ;;  %v5510_v42 = vadd.f32 %v2241_v20, %v1666_v14  ;;  %v4550_v14 = vld [vmem:[%s5032_s27 + $0x90] sm:$0xf] }
 0x100   : > { %v1380_v47 = vadd.f32 %v1303_v33, %v951_v16  ;;  %v1210_v16 = vunpack.c.l.b16 %v1149_v50  ;;  %v2007_v13 = vrot.slane %v2005_v61, 5  ;;  %v2010_v33 = vshrl.u32 %v4550_v14, 16 }
 0x101   : > { %4510 = vmatmul.msk.bf16.gmra.mxu3 %vm663_vm4, %v4885_v15  ;;  %v2013_v48 = vshll.u32 %v4550_v14, 16  ;;  %v2019_v50 = vshll.u32 %v4551_v62, 16  ;;  %v4382_v61 = vrot.slane %v1036_v31, 9 }
 0x102   : > { %v1232_v23 = vpack.c.b16 %v1211_v8, %v1210_v16  ;;  %v2012_v8 = vrot.slane %v2010_v33, 4 }
 0x103   : > { %v2244_v54 = vpop.f32.mrf.mxu0 }
 0x104   : > { %v1590_v4 = vpop.f32.mrf.mxu3  ;;  %v955_v20 = vpop.f32.mrf.mxu1 }
 0x105   : > { %v1667_v9 = vadd.f32 %v1590_v4, %v1380_v47  ;;  %v956_v52 = vadd.f32 %v955_v20, %v5419_v44  ;;  %v1998_v44 = vsel %vm5044_vm3, %v1993_v25, %v1997_v21  ;;  %v2008_v47 = vsel %vm5044_vm3, %v2003_v1, %v2007_v13 }
 0x106   : > { %4575 = vmatmul.msk.bf16.gmra.mxu0 %vm663_vm4, %v2172_v27  ;;  %v4929_v27 = vld [vmem:[%s5032_s27 + $0x8c] sm:$0x1]  ;;  %v1157_v4 = vrot.slane %v1155_v30, 4  ;;  %v2151_v20 = vunpack.c.l.b16 %v1998_v44  ;;  %v2152_v16 = vunpack.c.l.b16 %v2008_v47  ;;  %v2015_v25 = vrot.slane %v2013_v48, 5  ;;  %v4871_v44 = vld [vmem:[%s5032_s27 + $0x84] sm:$0xff] }
 0x107   : > { %v1305_v11 = vpop.f32.mrf.mxu2  ;;  %4365 = vmatmul.msk.bf16.gmra.mxu1 %vm663_vm4, %v4870_v38  ;;  %v5523_v15 = vadd.f32 %v2244_v54, %v1667_v9  ;;  %v1158_v51 = vrot.slane %v4929_v27, 5  ;;  %v2025_v1 = vrot.slane %v2023_v3, 4 }
 0x108   : > { %v1381_v41 = vadd.f32 %v1305_v11, %v953_v19  ;;  %v2021_v11 = vrot.slane %v2019_v50, 5  ;;  %v2173_v62 = vpack.c.b16 %v2152_v16, %v2151_v20  ;;  %v2016_v31 = vor.u32 %v2015_v25, %v2012_v8  ;;  %v4554_v20 = vld [vmem:[%s5032_s27 + $0xa0] sm:$0xf]  ;;  %v4930_v16 = vld [vmem:[%s5032_s27 + $0x94] sm:$0xf] }
 0x109   : > { %v1162_v8 = vrot.slane %v4930_v16, 5 }
 0x10a   : > { %v2026_v33 = vor.u32 %v2025_v1, %v2021_v11 }
 0x10b   : > { %v2246_v35 = vpop.f32.mrf.mxu0 }
 0x10c   : > { %v1592_v19 = vpop.f32.mrf.mxu3  ;;  %4398 = vmatmul.msk.bf16.gmra.mxu2 %vm663_vm4, %v1232_v23  ;;  %v957_v54 = vpop.f32.mrf.mxu1  ;;  %v4552_v23 = vld [vmem:[%s5032_s27 + $0x98] sm:$0x1] }
 0x10d   : > { %v1668_v38 = vadd.f32 %v1592_v19, %v1381_v41  ;;  %v958_v21 = vadd.f32 %v957_v54, %v5437_v5  ;;  %v1156_v41 = vsel %vm5218_vm7, %v4382_v61, %v1155_v30  ;;  %v1159_v5 = vsel %vm5218_vm7, %v1157_v4, %v1158_v51 }
 0x10e   : > { %v2029_v47 = vshll.u32 %v4552_v23, 16  ;;  %v1213_v50 = vunpack.c.l.b16 %v1159_v5  ;;  %v2017_v51 = vrot.slane %v2016_v31, 4  ;;  %v2027_v19 = vrot.slane %v2026_v33, 4  ;;  %v4887_v33 = vld [vmem:[%s5032_s27 + $0x90] sm:$0xff] }
 0x10f   : > { %v1308_v9 = vpop.f32.mrf.mxu2  ;;  %v5536_v13 = vadd.f32 %v2246_v35, %v1668_v38  ;;  %v4553_v38 = vld [vmem:[%s5032_s27 + $0x9c] sm:$0xf]  ;;  %v2047_v5 = vshrl.u32 %v4554_v20, 16 }
 0x110   : > { %v1382_v14 = vadd.f32 %v1308_v9, %v956_v52  ;;  %v1212_v52 = vunpack.c.l.b16 %v1156_v41  ;;  %v2031_v54 = vrot.slane %v2029_v47, 5  ;;  %v1037_v9 = vld [vmem:[%s5032_s27 + $0x90] sm:$0xe]  ;;  %v2037_v25 = vshll.u32 %v4553_v38, 16 }
 0x111   : > { %4511 = vmatmul.msk.bf16.gmra.mxu3 %vm663_vm4, %v4886_v57  ;;  %v2043_v41 = vshll.u32 %v4554_v20, 16 }
 0x112   : > { %v1233_v4 = vpack.c.b16 %v1213_v50, %v1212_v52  ;;  %v2032_v23 = vsel %vm5044_vm3, %v2027_v19, %v2031_v54  ;;  %v2049_v19 = vrot.slane %v2047_v5, 4 }
 0x113   : > { %v2249_v60 = vpop.f32.mrf.mxu0 }
 0x114   : > { %v1595_v48 = vpop.f32.mrf.mxu3  ;;  %v960_v35 = vpop.f32.mrf.mxu1 }
 0x115   : > { %v1669_v3 = vadd.f32 %v1595_v48, %v1382_v14  ;;  %v961_v30 = vadd.f32 %v960_v35, %v5460_v56  ;;  %v2034_v56 = vshrl.u32 %v4553_v38, 16  ;;  %v2022_v14 = vsel %vm5044_vm3, %v2017_v51, %v2021_v11 }
 0x116   : > { %4576 = vmatmul.msk.bf16.gmra.mxu0 %vm663_vm4, %v2173_v62  ;;  %v4931_v62 = vld [vmem:[%s5032_s27 + $0x98] sm:$0x1]  ;;  %v4383_v48 = vrot.slane %v1037_v9, 9  ;;  %v1164_v35 = vrot.slane %v1162_v8, 4  ;;  %v2153_v52 = vunpack.c.l.b16 %v2022_v14  ;;  %v2154_v11 = vunpack.c.l.b16 %v2032_v23 }
 0x117   : > { %v1310_v27 = vpop.f32.mrf.mxu2  ;;  %4366 = vmatmul.msk.bf16.gmra.mxu1 %vm663_vm4, %v4871_v44  ;;  %v5549_v57 = vadd.f32 %v2249_v60, %v1669_v3  ;;  %v1165_v60 = vrot.slane %v4931_v62, 5  ;;  %v2036_v50 = vrot.slane %v2034_v56, 4  ;;  %v2039_v3 = vrot.slane %v2037_v25, 5  ;;  %v4872_v56 = vld [vmem:[%s5032_s27 + $0x90] sm:$0xff] }
 0x118   : > { %v1383_v61 = vadd.f32 %v1310_v27, %v958_v21  ;;  %v2045_v51 = vrot.slane %v2043_v41, 5  ;;  %v2174_v20 = vpack.c.b16 %v2154_v11, %v2153_v52  ;;  %v4557_v11 = vld [vmem:[%s5032_s27 + $0xac] sm:$0xf] }
 0x119   : > { %v2040_v16 = vor.u32 %v2039_v3, %v2036_v50  ;;  %v1038_v50 = vld [vmem:[%s5032_s27 + $0x9c] sm:$0xe] }
 0x11a   : > { %v2050_v25 = vor.u32 %v2049_v19, %v2045_v51 }
 0x11b   : > { %v2251_v1 = vpop.f32.mrf.mxu0 }
 0x11c   : > { %v1597_v21 = vpop.f32.mrf.mxu3  ;;  %4399 = vmatmul.msk.bf16.gmra.mxu2 %vm663_vm4, %v1233_v4  ;;  %v962_v44 = vpop.f32.mrf.mxu1  ;;  %v4555_v4 = vld [vmem:[%s5032_s27 + $0xa4] sm:$0x1] }
 0x11d   : > { %v1670_v31 = vadd.f32 %v1597_v21, %v1383_v61  ;;  %v963_v47 = vadd.f32 %v962_v44, %v5478_v24  ;;  %v1163_v61 = vsel %vm5218_vm7, %v4383_v48, %v1162_v8  ;;  %v1166_v24 = vsel %vm5218_vm7, %v1164_v35, %v1165_v60  ;;  %v4556_v44 = vld [vmem:[%s5032_s27 + $0xa8] sm:$0xf]  ;;  %v4932_v35 = vld [vmem:[%s5032_s27 + $0xa0] sm:$0xf] }
 0x11e   : > { %v2053_v14 = vshll.u32 %v4555_v4, 16  ;;  %v1215_v41 = vunpack.c.l.b16 %v1166_v24  ;;  %v2041_v8 = vrot.slane %v2040_v16, 4  ;;  %v2051_v60 = vrot.slane %v2050_v25, 4 }
 0x11f   : > { %v1313_v27 = vpop.f32.mrf.mxu2  ;;  %v5562_v54 = vadd.f32 %v2251_v1, %v1670_v31  ;;  %v1169_v52 = vrot.slane %v4932_v35, 5  ;;  %v2061_v19 = vshll.u32 %v4556_v44, 16  ;;  %v2071_v24 = vshrl.u32 %v4557_v11, 16 }
 0x120   : > { %v1384_v38 = vadd.f32 %v1313_v27, %v961_v30  ;;  %v1214_v30 = vunpack.c.l.b16 %v1163_v61  ;;  %v2055_v21 = vrot.slane %v2053_v14, 5  ;;  %v2046_v3 = vsel %vm5044_vm3, %v2041_v8, %v2045_v51 }
 0x121   : > { %4512 = vmatmul.msk.bf16.gmra.mxu3 %vm663_vm4, %v4887_v33  ;;  %v2058_v27 = vshrl.u32 %v4556_v44, 16  ;;  %v2067_v61 = vshll.u32 %v4557_v11, 16  ;;  %v1171_v25 = vrot.slane %v1169_v52, 4  ;;  %v2155_v51 = vunpack.c.l.b16 %v2046_v3  ;;  %v4558_v11 = vld [vmem:[%s5032_s27 + $0xb0] sm:$0x1]  ;;  %v4873_v3 = vld [vmem:[%s5032_s27 + $0x9c] sm:$0xff] }
 0x122   : > { %v1234_v48 = vpack.c.b16 %v1215_v41, %v1214_v30  ;;  %v2056_v4 = vsel %vm5044_vm3, %v2051_v60, %v2055_v21  ;;  %v2063_v8 = vrot.slane %v2061_v19, 5  ;;  %v2073_v21 = vrot.slane %v2071_v24, 4 }
 0x123   : > { %v2254_v9 = vpop.f32.mrf.mxu0  ;;  %v2156_v41 = vunpack.c.l.b16 %v2056_v4  ;;  %v2069_v60 = vrot.slane %v2067_v61, 5  ;;  %v2077_v4 = vshll.u32 %v4558_v11, 16 }
 0x124   : > { %v1600_v1 = vpop.f32.mrf.mxu3  ;;  %v965_v23 = vpop.f32.mrf.mxu1 }
 0x125   : > { %v1671_v5 = vadd.f32 %v1600_v1, %v1384_v38  ;;  %v4888_v1 = vld [vmem:[%s5032_s27 + $0x9c] sm:$0xff]  ;;  %v966_v30 = vadd.f32 %v965_v23, %v5313_v7  ;;  %v2175_v7 = vpack.c.b16 %v2156_v41, %v2155_v51  ;;  %v2079_v51 = vrot.slane %v2077_v4, 5 }
 0x126   : > { %4577 = vmatmul.msk.bf16.gmra.mxu0 %vm663_vm4, %v2174_v20  ;;  %v4933_v20 = vld [vmem:[%s5032_s27 + $0xa4] sm:$0x1] }
 0x127   : > { %v1315_v62 = vpop.f32.mrf.mxu2  ;;  %4367 = vmatmul.msk.bf16.gmra.mxu1 %vm663_vm4, %v4872_v56  ;;  %v5574_v31 = vadd.f32 %v2254_v9, %v1671_v5  ;;  %v1172_v16 = vrot.slane %v4933_v20, 5  ;;  %v4384_v56 = vrot.slane %v1038_v50, 9  ;;  %v2060_v5 = vrot.slane %v2058_v27, 4 }
 0x128   : > { %v1385_v33 = vadd.f32 %v1315_v62, %v963_v47 }
 0x129   : > { %v2064_v23 = vor.u32 %v2063_v8, %v2060_v5 }
 0x12b   : > { %v2256_v38 = vpop.f32.mrf.mxu0 }
 0x12c   : > { %v1602_v47 = vpop.f32.mrf.mxu3  ;;  %4400 = vmatmul.msk.bf16.gmra.mxu2 %vm663_vm4, %v1234_v48  ;;  %v967_v9 = vpop.f32.mrf.mxu1  ;;  %v1170_v48 = vsel %vm5218_vm7, %v4384_v56, %v1169_v52  ;;  %v4559_v52 = vld [vmem:[%s5032_s27 + $0xb4] sm:$0xf]  ;;  %v2065_v56 = vrot.slane %v2064_v23, 4 }
 0x12d   : > { %v1672_v14 = vadd.f32 %v1602_v47, %v1385_v33  ;;  %v1173_v33 = vsel %vm5218_vm7, %v1171_v25, %v1172_v16  ;;  %v1216_v27 = vunpack.c.l.b16 %v1170_v48  ;;  %v4560_v47 = vld [vmem:[%s5032_s27 + $0xb8] sm:$0xf]  ;;  %v968_v16 = vadd.f32 %v967_v9, %v5329_v34 }
 0x12e   : > { %v1217_v19 = vunpack.c.l.b16 %v1173_v33  ;;  %v2082_v5 = vshrl.u32 %v4559_v52, 16  ;;  %v2085_v8 = vshll.u32 %v4559_v52, 16  ;;  %v2095_v48 = vshrl.u32 %v4560_v47, 16  ;;  %v1039_v33 = vld [vmem:[%s5032_s27 + $0xa8] sm:$0xe] }
 0x12f   : > { %v1318_v62 = vpop.f32.mrf.mxu2  ;;  %v5587_v44 = vadd.f32 %v2256_v38, %v1672_v14  ;;  %v2074_v38 = vor.u32 %v2073_v21, %v2069_v60  ;;  %v4934_v21 = vld [vmem:[%s5032_s27 + $0xac] sm:$0xf]  ;;  %v2070_v9 = vsel %vm5044_vm3, %v2065_v56, %v2069_v60 }
 0x130   : > { %v1386_v35 = vadd.f32 %v1318_v62, %v966_v30  ;;  %v1235_v14 = vpack.c.b16 %v1217_v19, %v1216_v27  ;;  %v2091_v62 = vshll.u32 %v4560_v47, 16  ;;  %v2084_v27 = vrot.slane %v2082_v5, 4 }
 0x131   : > { %4513 = vmatmul.msk.bf16.gmra.mxu3 %vm663_vm4, %v4888_v1  ;;  %v2075_v1 = vrot.slane %v2074_v38, 4  ;;  %v2087_v19 = vrot.slane %v2085_v8, 5  ;;  %v2097_v47 = vrot.slane %v2095_v48, 4  ;;  %v4874_v48 = vld [vmem:[%s5032_s27 + $0xa8] sm:$0xff] }
 0x132   : > { %v2093_v38 = vrot.slane %v2091_v62, 5 }
 0x133   : > { %v2259_v50 = vpop.f32.mrf.mxu0  ;;  %v2080_v11 = vsel %vm5044_vm3, %v2075_v1, %v2079_v51 }
 0x134   : > { %v1605_v61 = vpop.f32.mrf.mxu3  ;;  %v970_v24 = vpop.f32.mrf.mxu1  ;;  %v2158_v56 = vunpack.c.l.b16 %v2080_v11  ;;  %v2098_v8 = vor.u32 %v2097_v47, %v2093_v38 }
 0x135   : > { %v1673_v20 = vadd.f32 %v1605_v61, %v1386_v35  ;;  %v1176_v35 = vrot.slane %v4934_v21, 5  ;;  %v4889_v61 = vld [vmem:[%s5032_s27 + $0xa8] sm:$0xff]  ;;  %v971_v60 = vadd.f32 %v970_v24, %v5349_v58 }
 0x136   : > { %4578 = vmatmul.msk.bf16.gmra.mxu0 %vm663_vm4, %v2175_v7  ;;  %v4935_v7 = vld [vmem:[%s5032_s27 + $0xb0] sm:$0x1] }
 0x137   : > { %v1320_v25 = vpop.f32.mrf.mxu2  ;;  %4368 = vmatmul.msk.bf16.gmra.mxu1 %vm663_vm4, %v4873_v3  ;;  %v5601_v30 = vadd.f32 %v2259_v50, %v1673_v20  ;;  %v1179_v23 = vrot.slane %v4935_v7, 5  ;;  %v4385_v20 = vrot.slane %v1039_v33, 9  ;;  %v1178_v52 = vrot.slane %v1176_v35, 4 }
 0x138   : > { %v1387_v41 = vadd.f32 %v1320_v25, %v968_v16  ;;  %v2157_v16 = vunpack.c.l.b16 %v2070_v9  ;;  %v4561_v25 = vld [vmem:[%s5032_s27 + $0xbc] sm:$0x1] }
 0x139   : > { %v1180_v5 = vsel %vm5218_vm7, %v1178_v52, %v1179_v23  ;;  %v2101_v58 = vshll.u32 %v4561_v25, 16  ;;  %v4563_v52 = vld [vmem:[%s5032_s27 + $0xc4] sm:$0xf] }
 0x13a   : > { %v2176_v24 = vpack.c.b16 %v2158_v56, %v2157_v16  ;;  %v1219_v11 = vunpack.c.l.b16 %v1180_v5  ;;  %v1040_v16 = vld [vmem:[%s5032_s27 + $0xb4] sm:$0xe]  ;;  %v4937_v56 = vld [vmem:[%s5032_s27 + $0xb8] sm:$0xf]  ;;  %v2119_v5 = vshrl.u32 %v4563_v52, 16 }
 0x13b   : > { %v2261_v34 = vpop.f32.mrf.mxu0  ;;  %v1183_v25 = vrot.slane %v4937_v56, 5 }
 0x13c   : > { %v1607_v50 = vpop.f32.mrf.mxu3  ;;  %4401 = vmatmul.msk.bf16.gmra.mxu2 %vm663_vm4, %v1235_v14  ;;  %v972_v3 = vpop.f32.mrf.mxu1  ;;  %v2088_v14 = vor.u32 %v2087_v19, %v2084_v27  ;;  %v2103_v27 = vrot.slane %v2101_v58, 5  ;;  %v4562_v19 = vld [vmem:[%s5032_s27 + $0xc0] sm:$0xf]  ;;  %v4938_v58 = vld [vmem:[%s5032_s27 + $0x14] sm:$0x1] }
 0x13d   : > { %v1674_v4 = vadd.f32 %v1607_v50, %v1387_v41  ;;  %v1177_v41 = vsel %vm5218_vm7, %v4385_v20, %v1176_v35  ;;  %v2099_v35 = vrot.slane %v2098_v8, 4  ;;  %v973_v23 = vadd.f32 %v972_v3, %v5366_v28 }
 0x13e   : > { %v1218_v9 = vunpack.c.l.b16 %v1177_v41  ;;  %v2089_v50 = vrot.slane %v2088_v14, 4  ;;  %v2106_v3 = vshrl.u32 %v4562_v19, 16  ;;  %v2109_v14 = vshll.u32 %v4562_v19, 16  ;;  %v4890_v19 = vld [vmem:[%s5032_s27 + $0xb4] sm:$0xff] }
 0x13f   : > { %v1323_v1 = vpop.f32.mrf.mxu2  ;;  %v5614_v51 = vadd.f32 %v2261_v34, %v1674_v4  ;;  %v4936_v4 = vld [vmem:[%s5032_s27 + $0x10] sm:$0xf]  ;;  %v2104_v28 = vsel %vm5044_vm3, %v2099_v35, %v2103_v27  ;;  %v2115_v41 = vshll.u32 %v4563_v52, 16  ;;  %v1185_v35 = vrot.slane %v1183_v25, 4  ;;  %v4582_v27 = vld [vmem:[%s5032_s27 + $0xc] sm:$0xe] }
 0x140   : > { %v1388_v21 = vadd.f32 %v1323_v1, %v971_v60  ;;  %v1236_v60 = vpack.c.b16 %v1219_v11, %v1218_v9  ;;  %v4939_v9 = vld [vmem:[%s5032_s27 + $0xbc] sm:$0x1]  ;;  %v4598_v52 = vrot.slane %v4582_v27, 9 }
 0x141   : > { %4514 = vmatmul.msk.bf16.gmra.mxu3 %vm663_vm4, %v4889_v61  ;;  %v2417_v61 = vrot.slane %v4936_v4, 5  ;;  %v2108_v4 = vrot.slane %v2106_v3, 4 }
 0x143   : > { %v2264_v62 = vpop.f32.mrf.mxu0  ;;  %v2419_v8 = vrot.slane %v2417_v61, 4 }
 0x144   : > { %v1610_v33 = vpop.f32.mrf.mxu3  ;;  %v975_v34 = vpop.f32.mrf.mxu1 }
 0x145   : > { %v1675_v7 = vadd.f32 %v1610_v33, %v1388_v21  ;;  %v2094_v21 = vsel %vm5044_vm3, %v2089_v50, %v2093_v38  ;;  %v4386_v33 = vrot.slane %v1040_v16, 9  ;;  %v976_v56 = vadd.f32 %v975_v34, %v5386_v53 }
 0x146   : > { %4579 = vmatmul.msk.bf16.gmra.mxu0 %vm663_vm4, %v2176_v24  ;;  %v2420_v24 = vrot.slane %v4938_v58, 5  ;;  %v2159_v38 = vunpack.c.l.b16 %v2094_v21  ;;  %v2117_v16 = vrot.slane %v2115_v41, 5  ;;  %v2121_v58 = vrot.slane %v2119_v5, 4  ;;  %v4564_v21 = vld [vmem:[%s5032_s27 + $0xc8] sm:$0x1] }
 0x147   : > { %v1325_v20 = vpop.f32.mrf.mxu2  ;;  %4369 = vmatmul.msk.bf16.gmra.mxu1 %vm663_vm4, %v4874_v48  ;;  %v5630_v1 = vadd.f32 %v2264_v62, %v1675_v7  ;;  %v1186_v62 = vrot.slane %v4939_v9, 5  ;;  %v2160_v7 = vunpack.c.l.b16 %v2104_v28  ;;  %v2418_v28 = vsel %vm5218_vm7, %v4598_v52, %v2417_v61  ;;  %v4744_v41 = vld [vmem:[%s5032_s27 + $0x18] sm:$0xf] }
 0x148   : > { %v1389_v47 = vadd.f32 %v1325_v20, %v973_v23  ;;  %v2111_v20 = vrot.slane %v2109_v14, 5  ;;  %v2529_v53 = vunpack.c.l.b16 %v2418_v28  ;;  %v2125_v27 = vshll.u32 %v4564_v21, 16 }
 0x149   : > { %v1187_v14 = vsel %vm5218_vm7, %v1185_v35, %v1186_v62  ;;  %v2177_v5 = vpack.c.b16 %v2160_v7, %v2159_v38  ;;  %v3085_v62 = vshrl.u32 %v4744_v41, 16  ;;  %v3088_v35 = vshll.u32 %v4744_v41, 16 }
 0x14b   : > { %v2266_v48 = vpop.f32.mrf.mxu0  ;;  %v3087_v21 = vrot.slane %v3085_v62, 4 }
 0x14c   : > { %v1612_v11 = vpop.f32.mrf.mxu3  ;;  %4402 = vmatmul.msk.bf16.gmra.mxu2 %vm663_vm4, %v1236_v60  ;;  %v977_v50 = vpop.f32.mrf.mxu1  ;;  %v1184_v60 = vsel %vm5218_vm7, %v4386_v33, %v1183_v25  ;;  %v5654_v25 = vld [vmem:[%s5032_s27 + $0x1c] sm:$0xf]  ;;  %v2122_v33 = vor.u32 %v2121_v58, %v2117_v16 }
 0x14d   : > { %v1676_v23 = vadd.f32 %v1612_v11, %v1389_v47  ;;  %v2421_v47 = vsel %vm5218_vm7, %v2419_v8, %v2420_v24  ;;  %v2112_v11 = vor.u32 %v2111_v20, %v2108_v4  ;;  %v4875_v24 = vld [vmem:[%s5032_s27 + $0xb4] sm:$0xff]  ;;  %v3098_v38 = vshrl.u32 %v5654_v25, 16 }
 0x14e   : > { %v2530_v34 = vunpack.c.l.b16 %v2421_v47  ;;  %v978_v4 = vadd.f32 %v977_v50, %v5406_v17 }
 0x14f   : > { %v1328_v9 = vpop.f32.mrf.mxu2  ;;  %v5658_v52 = vadd.f32 %v2266_v48, %v1676_v23  ;;  %v2113_v48 = vrot.slane %v2112_v11, 4  ;;  %v2123_v23 = vrot.slane %v2122_v33, 4  ;;  %v3100_v41 = vrot.slane %v3098_v38, 4 }
 0x150   : > { %v1390_v3 = vadd.f32 %v1328_v9, %v976_v56  ;;  %v5656_v61 = vpack.c.b16 %v2530_v34, %v2529_v53  ;;  %v1220_v56 = vunpack.c.l.b16 %v1184_v60  ;;  %v1221_v9 = vunpack.c.l.b16 %v1187_v14 }
 0x151   : > { %4515 = vmatmul.msk.bf16.gmra.mxu3 %vm663_vm4, %v4890_v19  ;;  %6343 = vst [vmem:[#allocation2_spill] sm:$0xff] %v5658_v52  ;;  %v3094_v19 = vshll.u32 %v5654_v25, 16  ;;  %v2127_v60 = vrot.slane %v2125_v27, 5  ;;  %v3090_v14 = vrot.slane %v3088_v35, 5  ;;  %v2118_v17 = vsel %vm5044_vm3, %v2113_v48, %v2117_v16  ;;  %v4809_v48 = vld [vmem:[%s5032_s27 + $0x18] sm:$0xe] }
 0x152   : > { %v1237_v58 = vpack.c.b16 %v1221_v9, %v1220_v56  ;;  %v4891_v9 = vld [vmem:[%s5032_s27 + $0xc0] sm:$0xff]  ;;  %v2161_v16 = vunpack.c.l.b16 %v2118_v17 }
 0x153   : > { %v2269_v8 = vpop.f32.mrf.mxu0  ;;  %v3096_v34 = vrot.slane %v3094_v19, 5  ;;  %v2128_v50 = vsel %vm5044_vm3, %v2123_v23, %v2127_v60  ;;  %v3091_v27 = vor.u32 %v3090_v14, %v3087_v21  ;;  %v4747_v23 = vld [vmem:[%s5032_s27 + $0x24] sm:$0xf]  ;;  %v5684_v60 = vld [vmem:[%s5032_s27 + $0x28] sm:$0xf] }
 0x154   : > { %v1615_v28 = vpop.f32.mrf.mxu3  ;;  %v980_v47 = vpop.f32.mrf.mxu1  ;;  %v2162_v35 = vunpack.c.l.b16 %v2128_v50 }
 0x155   : > { %v1677_v7 = vadd.f32 %v1615_v28, %v1390_v3  ;;  %v5669_v3 = vld [vmem:[%s5032_s27 + $0x20] sm:$0x1]  ;;  %v981_v62 = vadd.f32 %v980_v47, %v5429_v2  ;;  %v3092_v38 = vrot.slane %v3091_v27, 4  ;;  %v4940_v47 = vld [vmem:[%s5032_s27 + $0x1c] sm:$0xf] }
 0x156   : > { %4580 = vmatmul.msk.bf16.gmra.mxu0 %vm663_vm4, %v2177_v5  ;;  %v2424_v14 = vrot.slane %v4940_v47, 5  ;;  %v4583_v27 = vld [vmem:[%s5032_s27 + $0x18] sm:$0xe] }
 0x157   : > { %v1330_v20 = vpop.f32.mrf.mxu2  ;;  %4370 = vmatmul.msk.bf16.gmra.mxu1 %vm663_vm4, %v4875_v24  ;;  %v5666_v52 = vadd.f32 %v2269_v8, %v1677_v7  ;;  %v3101_v24 = vor.u32 %v3100_v41, %v3096_v34  ;;  %v3104_v8 = vshll.u32 %v5669_v3, 16  ;;  %v3097_v17 = vsel %vm5044_vm3, %v3092_v38, %v3096_v34 }
 0x158   : > { %v1391_v53 = vadd.f32 %v1330_v20, %v978_v4  ;;  %v2178_v20 = vpack.c.b16 %v2162_v35, %v2161_v16  ;;  %v3759_v34 = vrot.slane %v5669_v3, 5  ;;  %v4941_v16 = vld [vmem:[%s5032_s27 + $0x20] sm:$0x1]  ;;  %v4599_v38 = vrot.slane %v4583_v27, 9 }
 0x159   : > { %v3102_v7 = vrot.slane %v3101_v24, 4  ;;  %v3106_v4 = vrot.slane %v3104_v8, 5  ;;  %v3109_v24 = vshrl.u32 %v4747_v23, 16  ;;  %v3112_v8 = vshll.u32 %v4747_v23, 16 }
 0x15a   : > { %v2427_v35 = vrot.slane %v4941_v16, 5  ;;  %v2425_v27 = vsel %vm5218_vm7, %v4599_v38, %v2424_v14  ;;  %v4750_v38 = vld [vmem:[%s5032_s27 + $0x30] sm:$0xf] }
 0x15b   : > { %v2271_v5 = vpop.f32.mrf.mxu0  ;;  %v3107_v50 = vsel %vm5044_vm3, %v3102_v7, %v3106_v4  ;;  %v2426_v7 = vrot.slane %v2424_v14, 4  ;;  %v3114_v3 = vrot.slane %v3112_v8, 5 }
 0x15c   : > { %v1617_v11 = vpop.f32.mrf.mxu3  ;;  %4403 = vmatmul.msk.bf16.gmra.mxu2 %vm663_vm4, %v1237_v58  ;;  %v982_v33 = vpop.f32.mrf.mxu1  ;;  %v3756_v58 = vrot.slane %v5654_v25, 5  ;;  %v3471_v23 = vunpack.c.l.b16 %v3107_v50 }
 0x15d   : > { %v1678_v56 = vadd.f32 %v1617_v11, %v1391_v53  ;;  %v4825_v11 = vrot.slane %v4809_v48, 9  ;;  %v4892_v48 = vld [vmem:[%s5032_s27 + $0x18] sm:$0xff]  ;;  %v2428_v50 = vsel %vm5218_vm7, %v2426_v7, %v2427_v35  ;;  %v5724_v7 = vld [vmem:[%s5032_s27 + $0x34] sm:$0xf] }
 0x15f   : > { %v1333_v28 = vpop.f32.mrf.mxu2  ;;  %v5686_v21 = vadd.f32 %v2271_v5, %v1678_v56  ;;  %v3118_v5 = vshll.u32 %v5684_v60, 16  ;;  %v3122_v56 = vshrl.u32 %v5684_v60, 16 }
 0x160   : > { %v1392_v19 = vadd.f32 %v1333_v28, %v981_v62  ;;  %v3758_v62 = vrot.slane %v3756_v58, 4 }
 0x161   : > { %4516 = vmatmul.msk.bf16.gmra.mxu3 %vm663_vm4, %v4891_v9  ;;  %v983_v9 = vadd.f32 %v982_v33, %v5449_v29  ;;  %v3111_v33 = vrot.slane %v3109_v24, 4  ;;  %v5707_v47 = vrot.slane %v3118_v5, 5 }
 0x163   : > { %v2274_v2 = vpop.f32.mrf.mxu0  ;;  %v3115_v5 = vor.u32 %v3114_v3, %v3111_v33  ;;  %v4810_v33 = vld [vmem:[%s5032_s27 + $0x24] sm:$0xe] }
 0x164   : > { %v1620_v53 = vpop.f32.mrf.mxu3  ;;  %v985_v41 = vpop.f32.mrf.mxu1 }
 0x165   : > { %v1679_v25 = vadd.f32 %v1620_v53, %v1392_v19  ;;  %v3470_v19 = vunpack.c.l.b16 %v3097_v17  ;;  %v3124_v53 = vrot.slane %v3122_v56, 4  ;;  %v986_v14 = vadd.f32 %v985_v41, %v5331_v37 }
 0x166   : > { %4581 = vmatmul.msk.bf16.gmra.mxu0 %vm663_vm4, %v2178_v20  ;;  %v3757_v20 = vsel %vm5218_vm7, %v4825_v11, %v3756_v58  ;;  %v3763_v37 = vrot.slane %v5684_v60, 5 }
 0x167   : > { %v1335_v28 = vpop.f32.mrf.mxu2  ;;  %4615 = vmatmul.msk.bf16.vlgmr.msra.gmra.mxu1 %vm663_vm4, %v5656_v61  ;;  %v5705_v29 = vadd.f32 %v2274_v2, %v1679_v25  ;;  %v3760_v61 = vsel %vm5218_vm7, %v3758_v62, %v3759_v34  ;;  %v3502_v2 = vpack.c.b16 %v3471_v23, %v3470_v19  ;;  %v3868_v11 = vunpack.c.l.b16 %v3757_v20 }
 0x168   : > { %v1393_v4 = vadd.f32 %v1335_v28, %v983_v9  ;;  %v5716_v9 = vld [vmem:[%s5032_s27 + $0x2c] sm:$0x1]  ;;  %v3869_v8 = vunpack.c.l.b16 %v3760_v61  ;;  %v3125_v56 = vor.u32 %v3124_v53, %v5707_v47  ;;  %v2531_v62 = vunpack.c.l.b16 %v2425_v27 }
 0x169   : > { %v2532_v34 = vunpack.c.l.b16 %v2428_v50  ;;  %v3128_v16 = vshll.u32 %v5716_v9, 16  ;;  %v3133_v53 = vshrl.u32 %v4750_v38, 16  ;;  %v3136_v61 = vshll.u32 %v4750_v38, 16 }
 0x16a   : > { %v3900_v19 = vpack.c.b16 %v3869_v8, %v3868_v11  ;;  %v3142_v27 = vshll.u32 %v5724_v7, 16  ;;  %v3146_v50 = vshrl.u32 %v5724_v7, 16  ;;  %v4942_v11 = vld [vmem:[%s5032_s27 + $0x28] sm:$0xf]  ;;  %v3766_v60 = vrot.slane %v5716_v9, 5 }
 0x16b   : > { %v2276_v17 = vpop.f32.mrf.mxu0  ;;  %v2562_v23 = vpack.c.b16 %v2532_v34, %v2531_v62  ;;  %v3130_v20 = vrot.slane %v3128_v16, 5  ;;  %v2431_v8 = vrot.slane %v4942_v11, 5  ;;  %v4826_v62 = vrot.slane %v4810_v33, 9  ;;  %v4893_v11 = vld [vmem:[%s5032_s27 + $0x24] sm:$0xff] }
 0x16c   : > { %v1622_v58 = vpop.f32.mrf.mxu3  ;;  %4728 = vmatmul.msk.bf16.vlgmr.msra.gmra.mxu2 %vm663_vm4, %v4892_v48  ;;  %v987_v24 = vpop.f32.mrf.mxu1  ;;  %v3126_v48 = vrot.slane %v3125_v56, 4  ;;  %v3138_v33 = vrot.slane %v3136_v61, 5  ;;  %v5745_v9 = vrot.slane %v3142_v27, 5 }
 0x16d   : > { %v1680_v25 = vadd.f32 %v1622_v58, %v1393_v4  ;;  %v3116_v4 = vrot.slane %v3115_v5, 4  ;;  %v4943_v5 = vld [vmem:[%s5032_s27 + $0x2c] sm:$0x1] }
 0x16e   : > { %v2434_v56 = vrot.slane %v4943_v5, 5  ;;  %v3131_v16 = vsel %vm5044_vm3, %v3126_v48, %v3130_v20  ;;  %v3764_v20 = vsel %vm5218_vm7, %v4826_v62, %v3763_v37 }
 0x16f   : > { %v1338_v35 = vpop.f32.mrf.mxu2  ;;  %v5729_v41 = vadd.f32 %v2276_v17, %v1680_v25  ;;  %v4584_v17 = vld [vmem:[%s5032_s27 + $0x24] sm:$0xe]  ;;  %v988_v25 = vadd.f32 %v987_v24, %v5352_v63  ;;  %v3121_v34 = vsel %vm5044_vm3, %v3116_v4, %v5707_v47  ;;  %v2433_v24 = vrot.slane %v2431_v8, 4 }
 0x170   : > { %v1394_v28 = vadd.f32 %v1338_v35, %v986_v14  ;;  %v3765_v35 = vrot.slane %v3763_v37, 4  ;;  %v4600_v63 = vrot.slane %v4584_v17, 9  ;;  %v3472_v47 = vunpack.c.l.b16 %v3121_v34 }
 0x171   : > { %4793 = vmatmul.msk.bf16.vlgmr.msra.gmra.mxu3 %vm663_vm4, %v3502_v2  ;;  %6344 = vst [vmem:[#allocation3_spill] sm:$0xff] %v5729_v41  ;;  %v3473_v4 = vunpack.c.l.b16 %v3131_v16  ;;  %v5751_v41 = vld [vmem:[%s5032_s27 + $0x38] sm:$0x1] }
 0x172   : > { %v3152_v37 = vshll.u32 %v5751_v41, 16 }
 0x173   : > { %v2279_v3 = vpop.f32.mrf.mxu0  ;;  %v3503_v17 = vpack.c.b16 %v3473_v4, %v3472_v47  ;;  %v4944_v4 = vld [vmem:[%s5032_s27 + $0x34] sm:$0xf] }
 0x174   : > { %v1625_v58 = vpop.f32.mrf.mxu3  ;;  %v990_v2 = vpop.f32.mrf.mxu1 }
 0x175   : > { %v1681_v14 = vadd.f32 %v1625_v58, %v1394_v28  ;;  %v3135_v28 = vrot.slane %v3133_v53, 4  ;;  %v3148_v58 = vrot.slane %v3146_v50, 4  ;;  %v2435_v50 = vsel %vm5218_vm7, %v2433_v24, %v2434_v56  ;;  %v5770_v24 = vld [vmem:[%s5032_s27 + $0x40] sm:$0xf] }
 0x176   : > { %4842 = vmatmul.msk.bf16.vlgmr.msra.gmra.mxu0 %vm663_vm4, %v3900_v19 }
 0x177   : > { %v1340_v38 = vpop.f32.mrf.mxu2  ;;  %4616 = vmatmul.msk.bf16.gmra.mxu1 %vm663_vm4, %v2562_v23  ;;  %v5748_v5 = vadd.f32 %v2279_v3, %v1681_v14  ;;  %v3767_v23 = vsel %vm5218_vm7, %v3765_v35, %v3766_v60  ;;  %v3139_v53 = vor.u32 %v3138_v33, %v3135_v28  ;;  %v2432_v3 = vsel %vm5218_vm7, %v4600_v63, %v2431_v8 }
 0x178   : > { %v1395_v19 = vadd.f32 %v1340_v38, %v988_v25  ;;  %v3149_v14 = vor.u32 %v3148_v58, %v5745_v9  ;;  %v991_v60 = vadd.f32 %v990_v2, %v5369_v22  ;;  %v3870_v25 = vunpack.c.l.b16 %v3764_v20  ;;  %v4811_v58 = vld [vmem:[%s5032_s27 + $0x30] sm:$0xe] }
 0x179   : > { %v3871_v34 = vunpack.c.l.b16 %v3767_v23  ;;  %v2533_v35 = vunpack.c.l.b16 %v2432_v3  ;;  %v2534_v8 = vunpack.c.l.b16 %v2435_v50  ;;  %v3140_v28 = vrot.slane %v3139_v53, 4 }
 0x17a   : > { %v3150_v56 = vrot.slane %v3149_v14, 4  ;;  %v3154_v33 = vrot.slane %v3152_v37, 5  ;;  %v3770_v63 = vrot.slane %v5724_v7, 5  ;;  %v2438_v20 = vrot.slane %v4944_v4, 5  ;;  %v4585_v7 = vld [vmem:[%s5032_s27 + $0x30] sm:$0xe] }
 0x17b   : > { %v2281_v48 = vpop.f32.mrf.mxu0  ;;  %v2563_v47 = vpack.c.b16 %v2534_v8, %v2533_v35  ;;  %v4827_v50 = vrot.slane %v4811_v58, 9 }
 0x17c   : > { %v1627_v61 = vpop.f32.mrf.mxu3  ;;  %4729 = vmatmul.msk.bf16.gmra.mxu2 %vm663_vm4, %v4893_v11  ;;  %v992_v27 = vpop.f32.mrf.mxu1  ;;  %v4753_v11 = vld [vmem:[%s5032_s27 + $0x3c] sm:$0xf]  ;;  %v3155_v3 = vsel %vm5044_vm3, %v3150_v56, %v3154_v33  ;;  %v4894_v33 = vld [vmem:[%s5032_s27 + $0x30] sm:$0xff] }
 0x17d   : > { %v1682_v62 = vadd.f32 %v1627_v61, %v1395_v19  ;;  %v3901_v19 = vpack.c.b16 %v3871_v34, %v3870_v25  ;;  %v3145_v61 = vsel %vm5044_vm3, %v3140_v28, %v5745_v9  ;;  %v3157_v14 = vshrl.u32 %v4753_v11, 16  ;;  %v4945_v34 = vld [vmem:[%s5032_s27 + $0x38] sm:$0x1] }
 0x17e   : > { %v3772_v25 = vrot.slane %v3770_v63, 4  ;;  %v3773_v9 = vrot.slane %v5751_v41, 5  ;;  %v3474_v8 = vunpack.c.l.b16 %v3145_v61  ;;  %v2440_v28 = vrot.slane %v2438_v20, 4 }
 0x17f   : > { %v1343_v16 = vpop.f32.mrf.mxu2  ;;  %v5772_v22 = vadd.f32 %v2281_v48, %v1682_v62  ;;  %v3160_v48 = vshll.u32 %v4753_v11, 16  ;;  %v3166_v62 = vshll.u32 %v5770_v24, 16  ;;  %v3475_v58 = vunpack.c.l.b16 %v3155_v3 }
 0x180   : > { %v1396_v38 = vadd.f32 %v1343_v16, %v991_v60  ;;  %v993_v60 = vadd.f32 %v992_v27, %v5390_v55  ;;  %v2441_v16 = vrot.slane %v4945_v34, 5  ;;  %v3771_v11 = vsel %vm5218_vm7, %v4827_v50, %v3770_v63 }
 0x181   : > { %4794 = vmatmul.msk.bf16.gmra.mxu3 %vm663_vm4, %v3503_v17  ;;  %v3170_v17 = vshrl.u32 %v5770_v24, 16  ;;  %v3159_v55 = vrot.slane %v3157_v14, 4  ;;  %v3162_v27 = vrot.slane %v3160_v48, 5  ;;  %v5793_v41 = vrot.slane %v3166_v62, 5 }
 0x182   : > { %v2442_v3 = vsel %vm5218_vm7, %v2440_v28, %v2441_v16  ;;  %v3872_v50 = vunpack.c.l.b16 %v3771_v11  ;;  %v4812_v11 = vld [vmem:[%s5032_s27 + $0x3c] sm:$0xe] }
 0x183   : > { %v2284_v2 = vpop.f32.mrf.mxu0  ;;  %v3172_v4 = vrot.slane %v3170_v17, 4  ;;  %v3163_v62 = vor.u32 %v3162_v27, %v3159_v55 }
 0x184   : > { %v1630_v23 = vpop.f32.mrf.mxu3  ;;  %v995_v53 = vpop.f32.mrf.mxu1 }
 0x185   : > { %v1683_v37 = vadd.f32 %v1630_v23, %v1396_v38  ;;  %v4601_v38 = vrot.slane %v4585_v7, 9  ;;  %v5802_v7 = vld [vmem:[%s5032_s27 + $0x44] sm:$0x1]  ;;  %v3173_v17 = vor.u32 %v3172_v4, %v5793_v41  ;;  %v3164_v28 = vrot.slane %v3163_v62, 4 }
 0x186   : > { %4843 = vmatmul.msk.bf16.gmra.mxu0 %vm663_vm4, %v3901_v19 }
 0x187   : > { %v1345_v35 = vpop.f32.mrf.mxu2  ;;  %4617 = vmatmul.msk.bf16.gmra.mxu1 %vm663_vm4, %v2563_v47  ;;  %v5791_v19 = vadd.f32 %v2284_v2, %v1683_v37  ;;  %v3774_v47 = vsel %vm5218_vm7, %v3772_v25, %v3773_v9  ;;  %v2439_v61 = vsel %vm5218_vm7, %v4601_v38, %v2438_v20  ;;  %v3504_v2 = vpack.c.b16 %v3475_v58, %v3474_v8  ;;  %v5810_v38 = vld [vmem:[%s5032_s27 + $0x4c] sm:$0xf] }
 0x188   : > { %v1397_v56 = vadd.f32 %v1345_v35, %v993_v60  ;;  %v3873_v48 = vunpack.c.l.b16 %v3774_v47  ;;  %v996_v20 = vadd.f32 %v995_v53, %v5413_v26  ;;  %v2535_v60 = vunpack.c.l.b16 %v2439_v61  ;;  %v4756_v35 = vld [vmem:[%s5032_s27 + $0x48] sm:$0xf] }
 0x189   : > { %v2536_v25 = vunpack.c.l.b16 %v2442_v3  ;;  %v3176_v9 = vshll.u32 %v5802_v7, 16  ;;  %v3777_v26 = vrot.slane %v5770_v24, 5  ;;  %v3181_v27 = vshrl.u32 %v4756_v35, 16 }
 0x18a   : > { %v3902_v8 = vpack.c.b16 %v3873_v48, %v3872_v50  ;;  %v3184_v4 = vshll.u32 %v4756_v35, 16  ;;  %v3190_v47 = vshll.u32 %v5810_v38, 16  ;;  %v3194_v61 = vshrl.u32 %v5810_v38, 16  ;;  %v4947_v48 = vld [vmem:[%s5032_s27 + $0x44] sm:$0x1] }
 0x18b   : > { %v2286_v23 = vpop.f32.mrf.mxu0  ;;  %v3178_v58 = vrot.slane %v3176_v9, 5  ;;  %v2448_v62 = vrot.slane %v4947_v48, 5  ;;  %v3780_v24 = vrot.slane %v5802_v7, 5  ;;  %v3779_v9 = vrot.slane %v3777_v26, 4  ;;  %v5837_v48 = vld [vmem:[%s5032_s27 + $0x50] sm:$0x1] }
 0x18c   : > { %v1632_v63 = vpop.f32.mrf.mxu3  ;;  %4730 = vmatmul.msk.bf16.gmra.mxu2 %vm663_vm4, %v4894_v33  ;;  %v997_v14 = vpop.f32.mrf.mxu1  ;;  %v2564_v33 = vpack.c.b16 %v2536_v25, %v2535_v60  ;;  %v3169_v60 = vsel %vm5044_vm3, %v3164_v28, %v5793_v41  ;;  %v3186_v35 = vrot.slane %v3184_v4, 5  ;;  %v5831_v7 = vrot.slane %v3190_v47, 5 }
 0x18d   : > { %v1684_v37 = vadd.f32 %v1632_v63, %v1397_v56  ;;  %v3174_v56 = vrot.slane %v3173_v17, 4  ;;  %v3476_v41 = vunpack.c.l.b16 %v3169_v60 }
 0x18f   : > { %v1348_v34 = vpop.f32.mrf.mxu2  ;;  %v5815_v53 = vadd.f32 %v2286_v23, %v1684_v37  ;;  %v4586_v23 = vld [vmem:[%s5032_s27 + $0x3c] sm:$0xe]  ;;  %v998_v37 = vadd.f32 %v997_v14, %v5431_v43  ;;  %v3179_v25 = vsel %vm5044_vm3, %v3174_v56, %v3178_v58 }
 0x190   : > { %v1398_v16 = vadd.f32 %v1348_v34, %v996_v20  ;;  %v4828_v20 = vrot.slane %v4812_v11, 9  ;;  %v3196_v11 = vrot.slane %v3194_v61, 4  ;;  %v4602_v43 = vrot.slane %v4586_v23, 9 }
 0x191   : > { %4795 = vmatmul.msk.bf16.gmra.mxu3 %vm663_vm4, %v3504_v2  ;;  %v4946_v2 = vld [vmem:[%s5032_s27 + $0x40] sm:$0xf]  ;;  %v3477_v28 = vunpack.c.l.b16 %v3179_v25 }
 0x192   : > { %v2445_v50 = vrot.slane %v4946_v2, 5  ;;  %v3778_v58 = vsel %vm5218_vm7, %v4828_v20, %v3777_v26  ;;  %v3200_v26 = vshll.u32 %v5837_v48, 16 }
 0x193   : > { %v2289_v55 = vpop.f32.mrf.mxu0  ;;  %v3505_v23 = vpack.c.b16 %v3477_v28, %v3476_v41  ;;  %v4948_v28 = vld [vmem:[%s5032_s27 + $0x4c] sm:$0xf] }
 0x194   : > { %v1635_v3 = vpop.f32.mrf.mxu3  ;;  %v1000_v63 = vpop.f32.mrf.mxu1  ;;  %v2447_v14 = vrot.slane %v2445_v50, 4 }
 0x195   : > { %v1685_v17 = vadd.f32 %v1635_v3, %v1398_v16  ;;  %v3183_v16 = vrot.slane %v3181_v27, 4  ;;  %v4895_v3 = vld [vmem:[%s5032_s27 + $0x3c] sm:$0xff] }
 0x196   : > { %4844 = vmatmul.msk.bf16.gmra.mxu0 %vm663_vm4, %v3902_v8  ;;  %v2449_v61 = vsel %vm5218_vm7, %v2447_v14, %v2448_v62  ;;  %v5856_v14 = vld [vmem:[%s5032_s27 + $0x58] sm:$0xf] }
 0x197   : > { %v1350_v34 = vpop.f32.mrf.mxu2  ;;  %4618 = vmatmul.msk.bf16.gmra.mxu1 %vm663_vm4, %v2564_v33  ;;  %v5834_v2 = vadd.f32 %v2289_v55, %v1685_v17  ;;  %v3781_v33 = vsel %vm5218_vm7, %v3779_v9, %v3780_v24  ;;  %v3187_v27 = vor.u32 %v3186_v35, %v3183_v16  ;;  %v2446_v55 = vsel %vm5218_vm7, %v4602_v43, %v2445_v50 }
 0x198   : > { %v1399_v8 = vadd.f32 %v1350_v34, %v998_v37  ;;  %v3197_v17 = vor.u32 %v3196_v11, %v5831_v7  ;;  %v1001_v24 = vadd.f32 %v1000_v63, %v5452_v40  ;;  %v3874_v37 = vunpack.c.l.b16 %v3778_v58  ;;  %v4813_v11 = vld [vmem:[%s5032_s27 + $0x48] sm:$0xe] }
 0x199   : > { %v3875_v60 = vunpack.c.l.b16 %v3781_v33  ;;  %v2537_v9 = vunpack.c.l.b16 %v2446_v55  ;;  %v2538_v50 = vunpack.c.l.b16 %v2449_v61  ;;  %v3188_v16 = vrot.slane %v3187_v27, 4 }
 0x19a   : > { %v3198_v62 = vrot.slane %v3197_v17, 4  ;;  %v3202_v35 = vrot.slane %v3200_v26, 5  ;;  %v3784_v43 = vrot.slane %v5810_v38, 5  ;;  %v2452_v58 = vrot.slane %v4948_v28, 5  ;;  %v4587_v38 = vld [vmem:[%s5032_s27 + $0x48] sm:$0xe] }
 0x19b   : > { %v2291_v56 = vpop.f32.mrf.mxu0  ;;  %v2565_v41 = vpack.c.b16 %v2538_v50, %v2537_v9  ;;  %v4829_v61 = vrot.slane %v4813_v11, 9 }
 0x19c   : > { %v1637_v4 = vpop.f32.mrf.mxu3  ;;  %4731 = vmatmul.msk.bf16.gmra.mxu2 %vm663_vm4, %v4895_v3  ;;  %v1002_v47 = vpop.f32.mrf.mxu1  ;;  %v4759_v3 = vld [vmem:[%s5032_s27 + $0x54] sm:$0xf]  ;;  %v3203_v55 = vsel %vm5044_vm3, %v3198_v62, %v3202_v35  ;;  %v4896_v35 = vld [vmem:[%s5032_s27 + $0x48] sm:$0xff] }
 0x19d   : > { %v1686_v20 = vadd.f32 %v1637_v4, %v1399_v8  ;;  %v3903_v8 = vpack.c.b16 %v3875_v60, %v3874_v37  ;;  %v3193_v4 = vsel %vm5044_vm3, %v3188_v16, %v5831_v7  ;;  %v3205_v17 = vshrl.u32 %v4759_v3, 16  ;;  %v4949_v60 = vld [vmem:[%s5032_s27 + $0x50] sm:$0x1] }
 0x19e   : > { %v3786_v37 = vrot.slane %v3784_v43, 4  ;;  %v3787_v7 = vrot.slane %v5837_v48, 5  ;;  %v3478_v50 = vunpack.c.l.b16 %v3193_v4  ;;  %v2454_v16 = vrot.slane %v2452_v58, 4 }
 0x19f   : > { %v1353_v25 = vpop.f32.mrf.mxu2  ;;  %v5858_v40 = vadd.f32 %v2291_v56, %v1686_v20  ;;  %v3208_v56 = vshll.u32 %v4759_v3, 16  ;;  %v3214_v20 = vshll.u32 %v5856_v14, 16  ;;  %v3479_v11 = vunpack.c.l.b16 %v3203_v55 }
 0x1a0   : > { %v1400_v34 = vadd.f32 %v1353_v25, %v1001_v24  ;;  %v1003_v24 = vadd.f32 %v1002_v47, %v5467_v10  ;;  %v2455_v25 = vrot.slane %v4949_v60, 5  ;;  %v3785_v3 = vsel %vm5218_vm7, %v4829_v61, %v3784_v43 }
 0x1a1   : > { %4796 = vmatmul.msk.bf16.gmra.mxu3 %vm663_vm4, %v3505_v23  ;;  %v3218_v23 = vshrl.u32 %v5856_v14, 16  ;;  %v3207_v10 = vrot.slane %v3205_v17, 4  ;;  %v3210_v47 = vrot.slane %v3208_v56, 5  ;;  %v5879_v48 = vrot.slane %v3214_v20, 5 }
 0x1a2   : > { %v2456_v55 = vsel %vm5218_vm7, %v2454_v16, %v2455_v25  ;;  %v3876_v61 = vunpack.c.l.b16 %v3785_v3  ;;  %v4814_v3 = vld [vmem:[%s5032_s27 + $0x54] sm:$0xe] }
 0x1a3   : > { %v2294_v63 = vpop.f32.mrf.mxu0  ;;  %v3220_v28 = vrot.slane %v3218_v23, 4  ;;  %v3211_v20 = vor.u32 %v3210_v47, %v3207_v10 }
 0x1a4   : > { %v1640_v33 = vpop.f32.mrf.mxu3  ;;  %v1005_v27 = vpop.f32.mrf.mxu1 }
 0x1a5   : > { %v1687_v26 = vadd.f32 %v1640_v33, %v1400_v34  ;;  %v4603_v34 = vrot.slane %v4587_v38, 9  ;;  %v5888_v38 = vld [vmem:[%s5032_s27 + $0x5c] sm:$0x1]  ;;  %v3221_v23 = vor.u32 %v3220_v28, %v5879_v48  ;;  %v3212_v16 = vrot.slane %v3211_v20, 4 }
 0x1a6   : > { %4845 = vmatmul.msk.bf16.gmra.mxu0 %vm663_vm4, %v3903_v8 }
 0x1a7   : > { %v1355_v9 = vpop.f32.mrf.mxu2  ;;  %4619 = vmatmul.msk.bf16.gmra.mxu1 %vm663_vm4, %v2565_v41  ;;  %v5877_v8 = vadd.f32 %v2294_v63, %v1687_v26  ;;  %v3788_v41 = vsel %vm5218_vm7, %v3786_v37, %v3787_v7  ;;  %v2453_v4 = vsel %vm5218_vm7, %v4603_v34, %v2452_v58  ;;  %v3506_v63 = vpack.c.b16 %v3479_v11, %v3478_v50  ;;  %v5896_v34 = vld [vmem:[%s5032_s27 + $0x64] sm:$0xf] }
 0x1a8   : > { %v1401_v62 = vadd.f32 %v1355_v9, %v1003_v24  ;;  %v3877_v56 = vunpack.c.l.b16 %v3788_v41  ;;  %v1006_v58 = vadd.f32 %v1005_v27, %v5343_v49  ;;  %v2539_v24 = vunpack.c.l.b16 %v2453_v4  ;;  %v4762_v9 = vld [vmem:[%s5032_s27 + $0x60] sm:$0xf] }
 0x1a9   : > { %v2540_v37 = vunpack.c.l.b16 %v2456_v55  ;;  %v3224_v7 = vshll.u32 %v5888_v38, 16  ;;  %v3791_v49 = vrot.slane %v5856_v14, 5  ;;  %v3229_v47 = vshrl.u32 %v4762_v9, 16 }
 0x1aa   : > { %v3904_v50 = vpack.c.b16 %v3877_v56, %v3876_v61  ;;  %v3232_v28 = vshll.u32 %v4762_v9, 16  ;;  %v3238_v41 = vshll.u32 %v5896_v34, 16  ;;  %v3242_v4 = vshrl.u32 %v5896_v34, 16  ;;  %v4951_v56 = vld [vmem:[%s5032_s27 + $0x5c] sm:$0x1] }
 0x1ab   : > { %v2296_v33 = vpop.f32.mrf.mxu0  ;;  %v3226_v11 = vrot.slane %v3224_v7, 5  ;;  %v2462_v20 = vrot.slane %v4951_v56, 5  ;;  %v3794_v14 = vrot.slane %v5888_v38, 5  ;;  %v3793_v7 = vrot.slane %v3791_v49, 4  ;;  %v5923_v56 = vld [vmem:[%s5032_s27 + $0x68] sm:$0x1] }
 0x1ac   : > { %v1642_v43 = vpop.f32.mrf.mxu3  ;;  %4732 = vmatmul.msk.bf16.gmra.mxu2 %vm663_vm4, %v4896_v35  ;;  %v1007_v17 = vpop.f32.mrf.mxu1  ;;  %v2566_v35 = vpack.c.b16 %v2540_v37, %v2539_v24  ;;  %v3217_v24 = vsel %vm5044_vm3, %v3212_v16, %v5879_v48  ;;  %v3234_v9 = vrot.slane %v3232_v28, 5  ;;  %v5917_v38 = vrot.slane %v3238_v41, 5 }
 0x1ad   : > { %v1688_v26 = vadd.f32 %v1642_v43, %v1401_v62  ;;  %v3222_v62 = vrot.slane %v3221_v23, 4  ;;  %v3480_v48 = vunpack.c.l.b16 %v3217_v24 }
 0x1af   : > { %v1358_v60 = vpop.f32.mrf.mxu2  ;;  %v5901_v27 = vadd.f32 %v2296_v33, %v1688_v26  ;;  %v4588_v33 = vld [vmem:[%s5032_s27 + $0x54] sm:$0xe]  ;;  %v1008_v26 = vadd.f32 %v1007_v17, %v5362_v0  ;;  %v3227_v37 = vsel %vm5044_vm3, %v3222_v62, %v3226_v11 }
 0x1b0   : > { %v1402_v25 = vadd.f32 %v1358_v60, %v1006_v58  ;;  %v4830_v58 = vrot.slane %v4814_v3, 9  ;;  %v3244_v3 = vrot.slane %v3242_v4, 4  ;;  %v4604_v0 = vrot.slane %v4588_v33, 9 }
 0x1b1   : > { %4797 = vmatmul.msk.bf16.gmra.mxu3 %vm663_vm4, %v3506_v63  ;;  %v4950_v63 = vld [vmem:[%s5032_s27 + $0x58] sm:$0xf]  ;;  %v3481_v16 = vunpack.c.l.b16 %v3227_v37 }
 0x1b2   : > { %v2459_v61 = vrot.slane %v4950_v63, 5  ;;  %v3792_v11 = vsel %vm5218_vm7, %v4830_v58, %v3791_v49  ;;  %v3248_v49 = vshll.u32 %v5923_v56, 16 }
 0x1b3   : > { %v2299_v10 = vpop.f32.mrf.mxu0  ;;  %v3507_v33 = vpack.c.b16 %v3481_v16, %v3480_v48 }
 0x1b4   : > { %v1645_v55 = vpop.f32.mrf.mxu3  ;;  %v1010_v43 = vpop.f32.mrf.mxu1  ;;  %v2461_v17 = vrot.slane %v2459_v61, 4 }
 0x1b5   : > { %v1689_v23 = vadd.f32 %v1645_v55, %v1402_v25  ;;  %v3231_v25 = vrot.slane %v3229_v47, 4  ;;  %v4897_v55 = vld [vmem:[%s5032_s27 + $0x54] sm:$0xff] }
 0x1b6   : > { %4846 = vmatmul.msk.bf16.gmra.mxu0 %vm663_vm4, %v3904_v50  ;;  %v2463_v4 = vsel %vm5218_vm7, %v2461_v17, %v2462_v20  ;;  %v3250_v20 = vrot.slane %v3248_v49, 5  ;;  %v5942_v17 = vld [vmem:[%s5032_s27 + $0x70] sm:$0xf]  ;;  %v4589_v49 = vld [vmem:[%s5032_s27 + $0x60] sm:$0xe] }
 0x1b7   : > { %v1360_v60 = vpop.f32.mrf.mxu2  ;;  %4620 = vmatmul.msk.bf16.gmra.mxu1 %vm663_vm4, %v2566_v35  ;;  %v5920_v63 = vadd.f32 %v2299_v10, %v1689_v23  ;;  %v3795_v35 = vsel %vm5218_vm7, %v3793_v7, %v3794_v14  ;;  %v3235_v47 = vor.u32 %v3234_v9, %v3231_v25  ;;  %v2460_v10 = vsel %vm5218_vm7, %v4604_v0, %v2459_v61 }
 0x1b8   : > { %v1403_v50 = vadd.f32 %v1360_v60, %v1008_v26  ;;  %v3245_v23 = vor.u32 %v3244_v3, %v5917_v38  ;;  %v1011_v14 = vadd.f32 %v1010_v43, %v5383_v39  ;;  %v3878_v26 = vunpack.c.l.b16 %v3792_v11  ;;  %v4765_v3 = vld [vmem:[%s5032_s27 + $0x6c] sm:$0xf] }
 0x1b9   : > { %v3879_v24 = vunpack.c.l.b16 %v3795_v35  ;;  %v2541_v7 = vunpack.c.l.b16 %v2460_v10  ;;  %v2542_v60 = vunpack.c.l.b16 %v2463_v4  ;;  %v3236_v25 = vrot.slane %v3235_v47, 4  ;;  %v4952_v10 = vld [vmem:[%s5032_s27 + $0x64] sm:$0xf] }
 0x1ba   : > { %v3246_v9 = vrot.slane %v3245_v23, 4  ;;  %v3798_v0 = vrot.slane %v5896_v34, 5  ;;  %v2466_v4 = vrot.slane %v4952_v10, 5  ;;  %v3253_v34 = vshrl.u32 %v4765_v3, 16 }
 0x1bb   : > { %v2301_v62 = vpop.f32.mrf.mxu0  ;;  %v2567_v48 = vpack.c.b16 %v2542_v60, %v2541_v7  ;;  %v3241_v47 = vsel %vm5044_vm3, %v3236_v25, %v5917_v38  ;;  %v3801_v38 = vrot.slane %v5923_v56, 5 }
 0x1bc   : > { %v1647_v28 = vpop.f32.mrf.mxu3  ;;  %4733 = vmatmul.msk.bf16.gmra.mxu2 %vm663_vm4, %v4897_v55  ;;  %v1012_v41 = vpop.f32.mrf.mxu1  ;;  %v4815_v55 = vld [vmem:[%s5032_s27 + $0x60] sm:$0xe]  ;;  %v3482_v60 = vunpack.c.l.b16 %v3241_v47  ;;  %v5970_v47 = vld [vmem:[%s5032_s27 + $0x74] sm:$0x1] }
 0x1bd   : > { %v1690_v58 = vadd.f32 %v1647_v28, %v1403_v50  ;;  %v3905_v50 = vpack.c.b16 %v3879_v24, %v3878_v26  ;;  %v4831_v16 = vrot.slane %v4815_v55, 9  ;;  %v3251_v28 = vsel %vm5044_vm3, %v3246_v9, %v3250_v20  ;;  %v4953_v24 = vld [vmem:[%s5032_s27 + $0x68] sm:$0x1]  ;;  %v4898_v20 = vld [vmem:[%s5032_s27 + $0x60] sm:$0xff] }
 0x1be   : > { %v3800_v26 = vrot.slane %v3798_v0, 4  ;;  %v4605_v55 = vrot.slane %v4589_v49, 9 }
 0x1bf   : > { %v1363_v37 = vpop.f32.mrf.mxu2  ;;  %v5944_v39 = vadd.f32 %v2301_v62, %v1690_v58  ;;  %v3256_v62 = vshll.u32 %v4765_v3, 16  ;;  %v3262_v58 = vshll.u32 %v5942_v17, 16  ;;  %v3799_v25 = vsel %vm5218_vm7, %v4831_v16, %v3798_v0 }
 0x1c0   : > { %v1404_v61 = vadd.f32 %v1363_v37, %v1011_v14  ;;  %v1013_v14 = vadd.f32 %v1012_v41, %v5402_v6  ;;  %v2469_v37 = vrot.slane %v4953_v24, 5  ;;  %v2468_v3 = vrot.slane %v2466_v4, 4 }
 0x1c1   : > { %4798 = vmatmul.msk.bf16.gmra.mxu3 %vm663_vm4, %v3507_v33  ;;  %v3266_v33 = vshrl.u32 %v5942_v17, 16  ;;  %v3255_v6 = vrot.slane %v3253_v34, 4  ;;  %v3258_v41 = vrot.slane %v3256_v62, 5  ;;  %v5965_v56 = vrot.slane %v3262_v58, 5 }
 0x1c2   : > { %v3802_v10 = vsel %vm5218_vm7, %v3800_v26, %v3801_v38  ;;  %v3880_v16 = vunpack.c.l.b16 %v3799_v25  ;;  %v2467_v34 = vsel %vm5218_vm7, %v4605_v55, %v2466_v4  ;;  %v3272_v26 = vshll.u32 %v5970_v47, 16  ;;  %v5982_v25 = vld [vmem:[%s5032_s27 + $0x7c] sm:$0xf]  ;;  %v4816_v55 = vld [vmem:[%s5032_s27 + $0x6c] sm:$0xe] }
 0x1c3   : > { %v2304_v43 = vpop.f32.mrf.mxu0  ;;  %v3881_v62 = vunpack.c.l.b16 %v3802_v10  ;;  %v3259_v58 = vor.u32 %v3258_v41, %v3255_v6  ;;  %v2543_v24 = vunpack.c.l.b16 %v2467_v34  ;;  %v3286_v10 = vshll.u32 %v5982_v25, 16 }
 0x1c4   : > { %v1650_v11 = vpop.f32.mrf.mxu3  ;;  %v1015_v35 = vpop.f32.mrf.mxu1 }
 0x1c5   : > { %v1691_v23 = vadd.f32 %v1650_v11, %v1404_v61  ;;  %v3483_v61 = vunpack.c.l.b16 %v3251_v28  ;;  %v3268_v11 = vrot.slane %v3266_v33, 4  ;;  %v3906_v4 = vpack.c.b16 %v3881_v62, %v3880_v16  ;;  %v4590_v16 = vld [vmem:[%s5032_s27 + $0x6c] sm:$0xe] }
 0x1c6   : > { %4847 = vmatmul.msk.bf16.gmra.mxu0 %vm663_vm4, %v3905_v50 }
 0x1c7   : > { %v1365_v7 = vpop.f32.mrf.mxu2  ;;  %4621 = vmatmul.msk.bf16.gmra.mxu1 %vm663_vm4, %v2567_v48  ;;  %v5963_v50 = vadd.f32 %v2304_v43, %v1691_v23  ;;  %v3508_v0 = vpack.c.b16 %v3483_v61, %v3482_v60  ;;  %v2470_v23 = vsel %vm5218_vm7, %v2468_v3, %v2469_v37  ;;  %v3269_v33 = vor.u32 %v3268_v11, %v5965_v56  ;;  %v4768_v60 = vld [vmem:[%s5032_s27 + $0x78] sm:$0xf] }
 0x1c8   : > { %v1405_v9 = vadd.f32 %v1365_v7, %v1013_v14  ;;  %v1016_v14 = vadd.f32 %v1015_v35, %v5421_v45  ;;  %v2544_v7 = vunpack.c.l.b16 %v2470_v23  ;;  %v3260_v37 = vrot.slane %v3259_v58, 4  ;;  %v4954_v23 = vld [vmem:[%s5032_s27 + $0x70] sm:$0xf] }
 0x1c9   : > { %v3805_v45 = vrot.slane %v5942_v17, 5  ;;  %v3277_v35 = vshrl.u32 %v4768_v60, 16  ;;  %v3280_v11 = vshll.u32 %v4768_v60, 16  ;;  %v2473_v62 = vrot.slane %v4954_v23, 5 }
 0x1ca   : > { %v2568_v41 = vpack.c.b16 %v2544_v7, %v2543_v24  ;;  %v3265_v17 = vsel %vm5044_vm3, %v3260_v37, %v5965_v56  ;;  %v4606_v7 = vrot.slane %v4590_v16, 9  ;;  %v3288_v56 = vrot.slane %v3286_v10, 5 }
 0x1cb   : > { %v2306_v48 = vpop.f32.mrf.mxu0  ;;  %v3282_v60 = vrot.slane %v3280_v11, 5 }
 0x1cc   : > { %v1652_v28 = vpop.f32.mrf.mxu3  ;;  %4734 = vmatmul.msk.bf16.gmra.mxu2 %vm663_vm4, %v4898_v20  ;;  %v1017_v43 = vpop.f32.mrf.mxu1  ;;  %v3274_v20 = vrot.slane %v3272_v26, 5  ;;  %v3807_v26 = vrot.slane %v3805_v45, 4 }
 0x1cd   : > { %v1692_v49 = vadd.f32 %v1652_v28, %v1405_v9  ;;  %v3270_v9 = vrot.slane %v3269_v33, 4  ;;  %v3290_v28 = vshrl.u32 %v5982_v25, 16  ;;  %v1018_v33 = vadd.f32 %v1017_v43, %v5444_v12 }
 0x1ce   : > { %v3484_v12 = vunpack.c.l.b16 %v3265_v17 }
 0x1cf   : > { %v1368_v38 = vpop.f32.mrf.mxu2  ;;  %v5987_v3 = vadd.f32 %v2306_v48, %v1692_v49  ;;  %v4832_v48 = vrot.slane %v4816_v55, 9  ;;  %v3808_v49 = vrot.slane %v5970_v47, 5  ;;  %v4899_v55 = vld [vmem:[%s5032_s27 + $0x6c] sm:$0xff]  ;;  %v2475_v47 = vrot.slane %v2473_v62, 4 }
 0x1d0   : > { %v1406_v61 = vadd.f32 %v1368_v38, %v1016_v14  ;;  %v3275_v14 = vsel %vm5044_vm3, %v3270_v9, %v3274_v20  ;;  %v3279_v38 = vrot.slane %v3277_v35, 4  ;;  %v6007_v9 = vld [vmem:[%s5032_s27 + $0x80] sm:$0x1] }
 0x1d1   : > { %4799 = vmatmul.msk.bf16.gmra.mxu3 %vm663_vm4, %v3508_v0  ;;  %v3485_v43 = vunpack.c.l.b16 %v3275_v14  ;;  %v3806_v35 = vsel %vm5218_vm7, %v4832_v48, %v3805_v45  ;;  %v3296_v17 = vshll.u32 %v6007_v9, 16 }
 0x1d2   : > { %v3283_v11 = vor.u32 %v3282_v60, %v3279_v38 }
 0x1d3   : > { %v2309_v6 = vpop.f32.mrf.mxu0  ;;  %v3509_v48 = vpack.c.b16 %v3485_v43, %v3484_v12 }
 0x1d4   : > { %v1655_v0 = vpop.f32.mrf.mxu3  ;;  %v1020_v34 = vpop.f32.mrf.mxu1  ;;  %v3284_v60 = vrot.slane %v3283_v11, 4 }
 0x1d5   : > { %v1693_v58 = vadd.f32 %v1655_v0, %v1406_v61  ;;  %v3292_v61 = vrot.slane %v3290_v28, 4  ;;  %v4955_v0 = vld [vmem:[%s5032_s27 + $0x74] sm:$0x1] }
 0x1d6   : > { %4848 = vmatmul.msk.bf16.gmra.mxu0 %vm663_vm4, %v3906_v4  ;;  %v2476_v4 = vrot.slane %v4955_v0, 5  ;;  %v3298_v0 = vrot.slane %v3296_v17, 5  ;;  %v4591_v17 = vld [vmem:[%s5032_s27 + $0x78] sm:$0xe] }
 0x1d7   : > { %v1370_v24 = vpop.f32.mrf.mxu2  ;;  %4622 = vmatmul.msk.bf16.gmra.mxu1 %vm663_vm4, %v2568_v41  ;;  %v6004_v23 = vadd.f32 %v2309_v6, %v1693_v58  ;;  %v3809_v41 = vsel %vm5218_vm7, %v3807_v26, %v3808_v49  ;;  %v2474_v6 = vsel %vm5218_vm7, %v4606_v7, %v2473_v62  ;;  %v3293_v58 = vor.u32 %v3292_v61, %v3288_v56 }
 0x1d8   : > { %v1407_v37 = vadd.f32 %v1370_v24, %v1018_v33  ;;  %v2477_v16 = vsel %vm5218_vm7, %v2475_v47, %v2476_v4  ;;  %v1021_v49 = vadd.f32 %v1020_v34, %v5463_v59  ;;  %v3882_v33 = vunpack.c.l.b16 %v3806_v35  ;;  %v4771_v47 = vld [vmem:[%s5032_s27 + $0x84] sm:$0xf]  ;;  %v6025_v34 = vld [vmem:[%s5032_s27 + $0x88] sm:$0xf] }
 0x1d9   : > { %v3883_v14 = vunpack.c.l.b16 %v3809_v41  ;;  %v2545_v38 = vunpack.c.l.b16 %v2474_v6  ;;  %v2546_v24 = vunpack.c.l.b16 %v2477_v16  ;;  %v3294_v7 = vrot.slane %v3293_v58, 4 }
 0x1da   : > { %v3812_v61 = vrot.slane %v5982_v25, 5  ;;  %v3289_v35 = vsel %vm5044_vm3, %v3284_v60, %v3288_v56  ;;  %v3301_v41 = vshrl.u32 %v4771_v47, 16  ;;  %v3304_v11 = vshll.u32 %v4771_v47, 16  ;;  %v4957_v47 = vld [vmem:[%s5032_s27 + $0x80] sm:$0x1] }
 0x1db   : > { %v2311_v20 = vpop.f32.mrf.mxu0  ;;  %v2569_v43 = vpack.c.b16 %v2546_v24, %v2545_v38  ;;  %v3299_v6 = vsel %vm5044_vm3, %v3294_v7, %v3298_v0  ;;  %v3815_v58 = vrot.slane %v6007_v9, 5  ;;  %v3310_v56 = vshll.u32 %v6025_v34, 16  ;;  %v4900_v7 = vld [vmem:[%s5032_s27 + $0x78] sm:$0xff] }
 0x1dc   : > { %v1657_v10 = vpop.f32.mrf.mxu3  ;;  %4735 = vmatmul.msk.bf16.gmra.mxu2 %vm663_vm4, %v4899_v55  ;;  %v1022_v28 = vpop.f32.mrf.mxu1  ;;  %v4817_v55 = vld [vmem:[%s5032_s27 + $0x78] sm:$0xe]  ;;  %v3814_v16 = vrot.slane %v3812_v61, 4  ;;  %v3487_v24 = vunpack.c.l.b16 %v3299_v6  ;;  %v4607_v60 = vrot.slane %v4591_v17, 9 }
 0x1dd   : > { %v1694_v45 = vadd.f32 %v1657_v10, %v1407_v37  ;;  %v3907_v37 = vpack.c.b16 %v3883_v14, %v3882_v33  ;;  %v4833_v59 = vrot.slane %v4817_v55, 9  ;;  %v3314_v33 = vshrl.u32 %v6025_v34, 16 }
 0x1de   : > { %v1023_v14 = vadd.f32 %v1022_v28, %v5480_v32  ;;  %v3306_v55 = vrot.slane %v3304_v11, 5  ;;  %v3816_v32 = vsel %vm5218_vm7, %v3814_v16, %v3815_v58  ;;  %v6050_v28 = vrot.slane %v3310_v56, 5 }
 0x1df   : > { %v1373_v26 = vpop.f32.mrf.mxu2  ;;  %v6027_v4 = vadd.f32 %v2311_v20, %v1694_v45  ;;  %v3813_v9 = vsel %vm5218_vm7, %v4833_v59, %v3812_v61  ;;  %v3316_v61 = vrot.slane %v3314_v33, 4  ;;  %v6053_v59 = vld [vmem:[%s5032_s27 + $0x8c] sm:$0x1]  ;;  %v4774_v33 = vld [vmem:[%s5032_s27 + $0x90] sm:$0xf] }
 0x1e0   : > { %v1408_v62 = vadd.f32 %v1373_v26, %v1021_v49  ;;  %v3486_v26 = vunpack.c.l.b16 %v3289_v35  ;;  %v3320_v56 = vshll.u32 %v6053_v59, 16 }
 0x1e1   : > { %4800 = vmatmul.msk.bf16.gmra.mxu3 %vm663_vm4, %v3509_v48  ;;  %v4956_v48 = vld [vmem:[%s5032_s27 + $0x7c] sm:$0xf] }
 0x1e2   : > { %v2480_v49 = vrot.slane %v4956_v48, 5  ;;  %v3510_v35 = vpack.c.b16 %v3487_v24, %v3486_v26 }
 0x1e3   : > { %v2314_v12 = vpop.f32.mrf.mxu0 }
 0x1e4   : > { %v1660_v10 = vpop.f32.mrf.mxu3  ;;  %v2637_v25 = vpop.f32.mrf.mxu1  ;;  %v2482_v0 = vrot.slane %v2480_v49, 4 }
 0x1e5   : > { %v1695_v20 = vadd.f32 %v1660_v10, %v1408_v62  ;;  %v2717_v45 = vadd.f32 %v2637_v25, %v5497_v46  ;;  %v3303_v46 = vrot.slane %v3301_v41, 4  ;;  %v2483_v10 = vrot.slane %v4957_v47, 5 }
 0x1e6   : > { %4849 = vmatmul.msk.bf16.gmra.mxu0 %vm663_vm4, %v3907_v37  ;;  %v3884_v41 = vunpack.c.l.b16 %v3813_v9  ;;  %v3885_v25 = vunpack.c.l.b16 %v3816_v32 }
 0x1e7   : > { %v1375_v38 = vpop.f32.mrf.mxu2  ;;  %4623 = vmatmul.msk.bf16.gmra.mxu1 %vm663_vm4, %v2569_v43  ;;  %v6046_v37 = vadd.f32 %v2314_v12, %v1695_v20  ;;  %v2481_v12 = vsel %vm5218_vm7, %v4607_v60, %v2480_v49  ;;  %v2484_v16 = vsel %vm5218_vm7, %v2482_v0, %v2483_v10  ;;  %v3307_v58 = vor.u32 %v3306_v55, %v3303_v46 }
 0x1e8   : > { %v1409_v62 = vadd.f32 %v1375_v38, %v1023_v14  ;;  %v3317_v20 = vor.u32 %v3316_v61, %v6050_v28  ;;  %v2547_v26 = vunpack.c.l.b16 %v2481_v12  ;;  %v2548_v9 = vunpack.c.l.b16 %v2484_v16  ;;  %v6065_v38 = vld [vmem:[%s5032_s27 + $0x94] sm:$0xf] }
 0x1e9   : > { %v3908_v24 = vpack.c.b16 %v3885_v25, %v3884_v41  ;;  %v3308_v60 = vrot.slane %v3307_v58, 4  ;;  %v3322_v55 = vrot.slane %v3320_v56, 5  ;;  %v3334_v0 = vshll.u32 %v6065_v38, 16  ;;  %v4958_v25 = vld [vmem:[%s5032_s27 + $0x88] sm:$0xf] }
 0x1ea   : > { %v3318_v46 = vrot.slane %v3317_v20, 4  ;;  %v3338_v47 = vshrl.u32 %v6065_v38, 16  ;;  %v2570_v61 = vpack.c.b16 %v2548_v9, %v2547_v26  ;;  %v3822_v9 = vrot.slane %v6053_v59, 5 }
 0x1eb   : > { %v2316_v43 = vpop.f32.mrf.mxu0  ;;  %v3313_v58 = vsel %vm5044_vm3, %v3308_v60, %v6050_v28  ;;  %v6083_v56 = vrot.slane %v3334_v0, 5  ;;  %v6088_v28 = vld [vmem:[%s5032_s27 + $0x98] sm:$0x1]  ;;  %v4901_v60 = vld [vmem:[%s5032_s27 + $0x84] sm:$0xff] }
 0x1ec   : > { %v1662_v11 = vpop.f32.mrf.mxu3  ;;  %4736 = vmatmul.msk.bf16.gmra.mxu2 %vm663_vm4, %v4900_v7  ;;  %v2639_v6 = vpop.f32.mrf.mxu1  ;;  %v3328_v7 = vshll.u32 %v4774_v33, 16  ;;  %v3344_v59 = vshll.u32 %v6088_v28, 16 }
 0x1ed   : > { %v1696_v17 = vadd.f32 %v1662_v11, %v1409_v62  ;;  %v2718_v48 = vadd.f32 %v2639_v6, %v5510_v42  ;;  %v4818_v62 = vld [vmem:[%s5032_s27 + $0x84] sm:$0xe]  ;;  %v3325_v42 = vshrl.u32 %v4774_v33, 16  ;;  %v2487_v6 = vrot.slane %v4958_v25, 5 }
 0x1ee   : > { %v4834_v11 = vrot.slane %v4818_v62, 9  ;;  %v3330_v20 = vrot.slane %v3328_v7, 5  ;;  %v3340_v33 = vrot.slane %v3338_v47, 4  ;;  %v4959_v62 = vld [vmem:[%s5032_s27 + $0x8c] sm:$0x1] }
 0x1ef   : > { %v2924_v14 = vpop.f32.mrf.mxu2  ;;  %v6071_v10 = vadd.f32 %v2316_v43, %v1696_v17  ;;  %v3323_v43 = vsel %vm5044_vm3, %v3318_v46, %v3322_v55  ;;  %v4592_v17 = vld [vmem:[%s5032_s27 + $0x84] sm:$0xe]  ;;  %v2489_v55 = vrot.slane %v2487_v6, 4 }
 0x1f0   : > { %v3004_v49 = vadd.f32 %v2924_v14, %v2717_v45  ;;  %v3819_v45 = vrot.slane %v6025_v34, 5  ;;  %v3327_v34 = vrot.slane %v3325_v42, 4  ;;  %v4608_v46 = vrot.slane %v4592_v17, 9  ;;  %v4777_v17 = vld [vmem:[%s5032_s27 + $0x9c] sm:$0xf] }
 0x1f1   : > { %4801 = vmatmul.msk.bf16.gmra.mxu3 %vm663_vm4, %v3510_v35  ;;  %6345 = vst [vmem:[#allocation4_spill] sm:$0xff] %v6071_v10  ;;  %v3488_v42 = vunpack.c.l.b16 %v3313_v58  ;;  %v3489_v7 = vunpack.c.l.b16 %v3323_v43  ;;  %v3826_v10 = vrot.slane %v6065_v38, 5 }
 0x1f2   : > { %v3820_v0 = vsel %vm5218_vm7, %v4834_v11, %v3819_v45  ;;  %v3331_v47 = vor.u32 %v3330_v20, %v3327_v34  ;;  %v2488_v25 = vsel %vm5218_vm7, %v4608_v46, %v2487_v6  ;;  %v6106_v34 = vld [vmem:[%s5032_s27 + $0xa0] sm:$0xf]  ;;  %v4819_v46 = vld [vmem:[%s5032_s27 + $0x90] sm:$0xe] }
 0x1f3   : > { %v3976_v32 = vpop.f32.mrf.mxu0  ;;  %v3886_v58 = vunpack.c.l.b16 %v3820_v0 }
 0x1f4   : > { %v3578_v41 = vpop.f32.mrf.mxu3  ;;  %v2642_v35 = vpop.f32.mrf.mxu1 }
 0x1f5   : > { %v3658_v12 = vadd.f32 %v3578_v41, %v3004_v49  ;;  %v2719_v16 = vadd.f32 %v2642_v35, %v5523_v15  ;;  %v3821_v15 = vrot.slane %v3819_v45, 4 }
 0x1f6   : > { %4850 = vmatmul.msk.bf16.gmra.mxu0 %vm663_vm4, %v3908_v24  ;;  %v2490_v24 = vrot.slane %v4959_v62, 5  ;;  %v2549_v62 = vunpack.c.l.b16 %v2488_v25 }
 0x1f7   : > { %v4056_v14 = vadd.f32 %v3976_v32, %v3658_v12  ;;  %v2926_v26 = vpop.f32.mrf.mxu2  ;;  %4624 = vmatmul.msk.bf16.gmra.mxu1 %vm663_vm4, %v2570_v61  ;;  %v3341_v32 = vor.u32 %v3340_v33, %v6083_v56  ;;  %v3511_v12 = vpack.c.b16 %v3489_v7, %v3488_v42  ;;  %v3332_v33 = vrot.slane %v3331_v47, 4 }
 0x1f8   : > { %v3005_v49 = vadd.f32 %v2926_v26, %v2718_v48  ;;  %v3823_v48 = vsel %vm5218_vm7, %v3821_v15, %v3822_v9  ;;  %v2491_v45 = vsel %vm5218_vm7, %v2489_v55, %v2490_v24  ;;  %v3346_v15 = vrot.slane %v3344_v59, 5 }
 0x1f9   : > { %v3887_v20 = vunpack.c.l.b16 %v3823_v48  ;;  %v3342_v26 = vrot.slane %v3341_v32, 4  ;;  %v2550_v6 = vunpack.c.l.b16 %v2491_v45  ;;  %v3352_v24 = vshll.u32 %v4777_v17, 16 }
 0x1fa   : > { %v4126_v42 = vmul.f32 %v4056_v14, %v4056_v14  ;;  %v3362_v47 = vshrl.u32 %v6106_v34, 16  ;;  %v4835_v59 = vrot.slane %v4819_v46, 9  ;;  %v4961_v46 = vld [vmem:[%s5032_s27 + $0x98] sm:$0x1] }
 0x1fb   : > { %v3978_v61 = vpop.f32.mrf.mxu0  ;;  %v3909_v32 = vpack.c.b16 %v3887_v20, %v3886_v58  ;;  %v4593_v58 = vld [vmem:[%s5032_s27 + $0x90] sm:$0xe] }
 0x1fc   : > { %v3580_v41 = vpop.f32.mrf.mxu3  ;;  %4737 = vmatmul.msk.bf16.gmra.mxu2 %vm663_vm4, %v4901_v60  ;;  %v2644_v35 = vpop.f32.mrf.mxu1 }
 0x1fd   : > { %v3659_v11 = vadd.f32 %v3580_v41, %v3005_v49  ;;  %v2720_v43 = vadd.f32 %v2644_v35, %v5536_v13  ;;  %v3349_v49 = vshrl.u32 %v4777_v17, 16  ;;  %v3358_v13 = vshll.u32 %v6106_v34, 16  ;;  %v4960_v35 = vld [vmem:[%s5032_s27 + $0x94] sm:$0xf] }
 0x1fe   : > { %v3337_v41 = vsel %vm5044_vm3, %v3332_v33, %v6083_v56  ;;  %v2494_v25 = vrot.slane %v4960_v35, 5  ;;  %v3364_v56 = vrot.slane %v3362_v47, 4 }
 0x1ff   : > { %v4057_v9 = vadd.f32 %v3978_v61, %v3659_v11  ;;  %v2929_v60 = vpop.f32.mrf.mxu2  ;;  %v3829_v61 = vrot.slane %v6088_v28, 5  ;;  %v3347_v11 = vsel %vm5044_vm3, %v3342_v26, %v3346_v15  ;;  %v3351_v17 = vrot.slane %v3349_v49, 4  ;;  %v6128_v49 = vld [vmem:[%s5032_s27 + $0xa4] sm:$0x1] }
 0x200   : > { %v3006_v55 = vadd.f32 %v2929_v60, %v2719_v16  ;;  %v2571_v16 = vpack.c.b16 %v2550_v6, %v2549_v62  ;;  %v3354_v28 = vrot.slane %v3352_v24, 5  ;;  %v6122_v60 = vrot.slane %v3358_v13, 5 }
 0x201   : > { %v4088_v7 = vadd.f32 %v4057_v9, %v4056_v14  ;;  %v4127_v0 = vmul.f32 %v4057_v9, %v4057_v9  ;;  %4802 = vmatmul.msk.bf16.gmra.mxu3 %vm663_vm4, %v3511_v12  ;;  %v3828_v12 = vrot.slane %v3826_v10, 4  ;;  %v3490_v33 = vunpack.c.l.b16 %v3337_v41 }
 0x202   : > { %v4609_v26 = vrot.slane %v4593_v58, 9  ;;  %v2496_v15 = vrot.slane %v2494_v25, 4  ;;  %v3368_v41 = vshll.u32 %v6128_v49, 16 }
 0x203   : > { %v4158_v48 = vadd.f32 %v4127_v0, %v4126_v42  ;;  %v3981_v38 = vpop.f32.mrf.mxu0  ;;  %v2497_v42 = vrot.slane %v4961_v46, 5  ;;  %v3491_v0 = vunpack.c.l.b16 %v3347_v11  ;;  %v3830_v13 = vsel %vm5218_vm7, %v3828_v12, %v3829_v61 }
 0x204   : > { %v3583_v14 = vpop.f32.mrf.mxu3  ;;  %v2647_v45 = vpop.f32.mrf.mxu1  ;;  %v3889_v61 = vunpack.c.l.b16 %v3830_v13  ;;  %v6153_v13 = vld [vmem:[%s5032_s27 + $0xac] sm:$0xf] }
 0x205   : > { %v3660_v20 = vadd.f32 %v3583_v14, %v3006_v55  ;;  %v2721_v9 = vadd.f32 %v2647_v45, %v5549_v57  ;;  %v4902_v55 = vld [vmem:[%s5032_s27 + $0x90] sm:$0xff]  ;;  %v3827_v57 = vsel %vm5218_vm7, %v4835_v59, %v3826_v10  ;;  %v2498_v45 = vsel %vm5218_vm7, %v2496_v15, %v2497_v42 }
 0x206   : > { %4851 = vmatmul.msk.bf16.gmra.mxu0 %vm663_vm4, %v3909_v32  ;;  %v3512_v59 = vpack.c.b16 %v3491_v0, %v3490_v33  ;;  %v4780_v33 = vld [vmem:[%s5032_s27 + $0xa8] sm:$0xf] }
 0x207   : > { %v4058_v62 = vadd.f32 %v3981_v38, %v3660_v20  ;;  %v2931_v6 = vpop.f32.mrf.mxu2  ;;  %4625 = vmatmul.msk.bf16.gmra.mxu1 %vm663_vm4, %v2571_v16  ;;  %v3355_v38 = vor.u32 %v3354_v28, %v3351_v17  ;;  %v3365_v16 = vor.u32 %v3364_v56, %v6122_v60  ;;  %v2552_v20 = vunpack.c.l.b16 %v2498_v45 }
 0x208   : > { %v3007_v24 = vadd.f32 %v2931_v6, %v2720_v43  ;;  %v2495_v43 = vsel %vm5218_vm7, %v4609_v26, %v2494_v25  ;;  %v3370_v56 = vrot.slane %v3368_v41, 5  ;;  %v4820_v25 = vld [vmem:[%s5032_s27 + $0x9c] sm:$0xe] }
 0x209   : > { %v4089_v47 = vadd.f32 %v4088_v7, %v4058_v62  ;;  %v4128_v32 = vmul.f32 %v4058_v62, %v4058_v62  ;;  %v3888_v7 = vunpack.c.l.b16 %v3827_v57  ;;  %v3366_v17 = vrot.slane %v3365_v16, 4 }
 0x20a   : > { %v2551_v28 = vunpack.c.l.b16 %v2495_v43  ;;  %v3833_v62 = vrot.slane %v6106_v34, 5  ;;  %v3376_v16 = vshll.u32 %v4780_v33, 16  ;;  %v4962_v43 = vld [vmem:[%s5032_s27 + $0xa0] sm:$0xf] }
 0x20b   : > { %v4159_v35 = vadd.f32 %v4158_v48, %v4128_v32  ;;  %v3983_v14 = vpop.f32.mrf.mxu0  ;;  %v3356_v48 = vrot.slane %v3355_v38, 4  ;;  %v3371_v34 = vsel %vm5044_vm3, %v3366_v17, %v3370_v56  ;;  %v3836_v32 = vrot.slane %v6128_v49, 5  ;;  %v4903_v56 = vld [vmem:[%s5032_s27 + $0x9c] sm:$0xff] }
 0x20c   : > { %v3585_v10 = vpop.f32.mrf.mxu3  ;;  %4738 = vmatmul.msk.bf16.gmra.mxu2 %vm663_vm4, %v4902_v55  ;;  %v2649_v11 = vpop.f32.mrf.mxu1  ;;  %v2572_v55 = vpack.c.b16 %v2552_v20, %v2551_v28  ;;  %v3835_v57 = vrot.slane %v3833_v62, 4  ;;  %v3373_v38 = vshrl.u32 %v4780_v33, 16  ;;  %v2501_v45 = vrot.slane %v4962_v43, 5 }
 0x20d   : > { %v3661_v12 = vadd.f32 %v3585_v10, %v3007_v24  ;;  %v2722_v58 = vadd.f32 %v2649_v11, %v5562_v54  ;;  %v3910_v24 = vpack.c.b16 %v3889_v61, %v3888_v7  ;;  %v4836_v54 = vrot.slane %v4820_v25, 9 }
 0x20e   : > { %v3361_v0 = vsel %vm5044_vm3, %v3356_v48, %v6122_v60  ;;  %v3382_v7 = vshll.u32 %v6153_v13, 16  ;;  %v3386_v61 = vshrl.u32 %v6153_v13, 16  ;;  %v3493_v49 = vunpack.c.l.b16 %v3371_v34 }
 0x20f   : > { %v4059_v6 = vadd.f32 %v3983_v14, %v3661_v12  ;;  %v2934_v26 = vpop.f32.mrf.mxu2  ;;  %v3834_v11 = vsel %vm5218_vm7, %v4836_v54, %v3833_v62  ;;  %v3375_v17 = vrot.slane %v3373_v38, 4  ;;  %v3378_v28 = vrot.slane %v3376_v16, 5  ;;  %v6172_v54 = vld [vmem:[%s5032_s27 + $0xb0] sm:$0x1] }
 0x210   : > { %v3008_v15 = vadd.f32 %v2934_v26, %v2721_v9  ;;  %v4963_v26 = vld [vmem:[%s5032_s27 + $0xa4] sm:$0x1]  ;;  %v3388_v62 = vrot.slane %v3386_v61, 4  ;;  %v3392_v43 = vshll.u32 %v6172_v54, 16 }
 0x211   : > { %v4090_v46 = vadd.f32 %v4089_v47, %v4059_v6  ;;  %v4129_v42 = vmul.f32 %v4059_v6, %v4059_v6  ;;  %4803 = vmatmul.msk.bf16.gmra.mxu3 %vm663_vm4, %v3512_v59  ;;  %v4594_v59 = vld [vmem:[%s5032_s27 + $0x9c] sm:$0xe]  ;;  %v2503_v6 = vrot.slane %v2501_v45, 4  ;;  %v3379_v16 = vor.u32 %v3378_v28, %v3375_v17  ;;  %v4821_v28 = vld [vmem:[%s5032_s27 + $0xa8] sm:$0xe] }
 0x212   : > { %v4610_v25 = vrot.slane %v4594_v59, 9  ;;  %v3394_v17 = vrot.slane %v3392_v43, 5 }
 0x213   : > { %v4160_v9 = vadd.f32 %v4159_v35, %v4129_v42  ;;  %v3986_v47 = vpop.f32.mrf.mxu0  ;;  %v3492_v35 = vunpack.c.l.b16 %v3361_v0 }
 0x214   : > { %v3588_v41 = vpop.f32.mrf.mxu3  ;;  %v2652_v14 = vpop.f32.mrf.mxu1 }
 0x215   : > { %v3662_v10 = vadd.f32 %v3588_v41, %v3008_v15  ;;  %v2723_v60 = vadd.f32 %v2652_v14, %v5574_v31  ;;  %v3837_v31 = vsel %vm5218_vm7, %v3835_v57, %v3836_v32  ;;  %v2504_v15 = vrot.slane %v4963_v26, 5 }
 0x216   : > { %4852 = vmatmul.msk.bf16.gmra.mxu0 %vm663_vm4, %v3910_v24  ;;  %v6169_v24 = vrot.slane %v3382_v7, 5  ;;  %v3513_v34 = vpack.c.b16 %v3493_v49, %v3492_v35  ;;  %v4783_v35 = vld [vmem:[%s5032_s27 + $0xb4] sm:$0xf]  ;;  %v6184_v49 = vld [vmem:[%s5032_s27 + $0xb8] sm:$0xf] }
 0x217   : > { %v4060_v12 = vadd.f32 %v3986_v47, %v3662_v10  ;;  %v2936_v48 = vpop.f32.mrf.mxu2  ;;  %4626 = vmatmul.msk.bf16.gmra.mxu1 %vm663_vm4, %v2572_v55  ;;  %v3890_v47 = vunpack.c.l.b16 %v3834_v11  ;;  %v2505_v38 = vsel %vm5218_vm7, %v2503_v6, %v2504_v15  ;;  %v3410_v6 = vshrl.u32 %v6184_v49, 16 }
 0x218   : > { %v3009_v20 = vadd.f32 %v2936_v48, %v2722_v58  ;;  %v3891_v58 = vunpack.c.l.b16 %v3837_v31  ;;  %v3389_v14 = vor.u32 %v3388_v62, %v6169_v24  ;;  %v2554_v61 = vunpack.c.l.b16 %v2505_v38 }
 0x219   : > { %v4091_v33 = vadd.f32 %v4090_v46, %v4060_v12  ;;  %v4130_v42 = vmul.f32 %v4060_v12, %v4060_v12  ;;  %v2502_v46 = vsel %vm5218_vm7, %v4610_v25, %v2501_v45  ;;  %v3380_v12 = vrot.slane %v3379_v16, 4 }
 0x21a   : > { %v2553_v7 = vunpack.c.l.b16 %v2502_v46  ;;  %v3911_v45 = vpack.c.b16 %v3891_v58, %v3890_v47  ;;  %v3406_v25 = vshll.u32 %v6184_v49, 16  ;;  %v4964_v47 = vld [vmem:[%s5032_s27 + $0xac] sm:$0xf]  ;;  %v4595_v46 = vld [vmem:[%s5032_s27 + $0xa8] sm:$0xe] }
 0x21b   : > { %v4161_v0 = vadd.f32 %v4160_v9, %v4130_v42  ;;  %v3988_v55 = vpop.f32.mrf.mxu0 }
 0x21c   : > { %v3590_v57 = vpop.f32.mrf.mxu3  ;;  %4739 = vmatmul.msk.bf16.gmra.mxu2 %vm663_vm4, %v4903_v56  ;;  %v2654_v32 = vpop.f32.mrf.mxu1  ;;  %v3400_v56 = vshll.u32 %v4783_v35, 16  ;;  %v2573_v42 = vpack.c.b16 %v2554_v61, %v2553_v7  ;;  %v6200_v16 = vrot.slane %v3406_v25, 5  ;;  %v4904_v7 = vld [vmem:[%s5032_s27 + $0xa8] sm:$0xff]  ;;  %v4611_v61 = vrot.slane %v4595_v46, 9 }
 0x21d   : > { %v3663_v41 = vadd.f32 %v3590_v57, %v3009_v20  ;;  %v2724_v9 = vadd.f32 %v2654_v32, %v5587_v44  ;;  %v3390_v44 = vrot.slane %v3389_v14, 4  ;;  %v3397_v20 = vshrl.u32 %v4783_v35, 16 }
 0x21e   : > { %v3385_v32 = vsel %vm5044_vm3, %v3380_v12, %v6169_v24  ;;  %v3402_v38 = vrot.slane %v3400_v56, 5  ;;  %v6205_v24 = vld [vmem:[%s5032_s27 + $0xbc] sm:$0x1] }
 0x21f   : > { %v4061_v10 = vadd.f32 %v3988_v55, %v3663_v41  ;;  %v2939_v59 = vpop.f32.mrf.mxu2  ;;  %v4837_v55 = vrot.slane %v4821_v28, 9  ;;  %v3412_v41 = vrot.slane %v3410_v6, 4 }
 0x220   : > { %v3010_v11 = vadd.f32 %v2939_v59, %v2723_v60  ;;  %v3840_v60 = vrot.slane %v6153_v13, 5  ;;  %v3399_v13 = vrot.slane %v3397_v20, 4 }
 0x221   : > { %v4092_v48 = vadd.f32 %v4091_v33, %v4061_v10  ;;  %v4131_v31 = vmul.f32 %v4061_v10, %v4061_v10  ;;  %4804 = vmatmul.msk.bf16.gmra.mxu3 %vm663_vm4, %v3513_v34  ;;  %v2508_v34 = vrot.slane %v4964_v47, 5  ;;  %v3843_v10 = vrot.slane %v6172_v54, 5 }
 0x222   : > { %v3841_v28 = vsel %vm5218_vm7, %v4837_v55, %v3840_v60  ;;  %v3403_v20 = vor.u32 %v3402_v38, %v3399_v13  ;;  %v3413_v56 = vor.u32 %v3412_v41, %v6200_v16  ;;  %v3416_v54 = vshll.u32 %v6205_v24, 16 }
 0x223   : > { %v4162_v26 = vadd.f32 %v4161_v0, %v4131_v31  ;;  %v3991_v15 = vpop.f32.mrf.mxu0  ;;  %v3395_v0 = vsel %vm5044_vm3, %v3390_v44, %v3394_v17  ;;  %v2510_v35 = vrot.slane %v2508_v34, 4  ;;  %v3494_v44 = vunpack.c.l.b16 %v3385_v32 }
 0x224   : > { %v3593_v33 = vpop.f32.mrf.mxu3  ;;  %v2657_v62 = vpop.f32.mrf.mxu1  ;;  %v3495_v17 = vunpack.c.l.b16 %v3395_v0  ;;  %v3892_v55 = vunpack.c.l.b16 %v3841_v28  ;;  %v3414_v32 = vrot.slane %v3413_v56, 4  ;;  %v3418_v0 = vrot.slane %v3416_v54, 5  ;;  %v4966_v28 = vld [vmem:[%s5032_s27 + $0xb8] sm:$0xf]  ;;  %v4596_v54 = vld [vmem:[%s5032_s27 + $0xb4] sm:$0xe] }
 0x225   : > { %v3664_v57 = vadd.f32 %v3593_v33, %v3010_v11  ;;  %v2725_v58 = vadd.f32 %v2657_v62, %v5601_v30  ;;  %v3842_v30 = vrot.slane %v3840_v60, 4  ;;  %v4965_v11 = vld [vmem:[%s5032_s27 + $0xb0] sm:$0x1] }
 0x226   : > { %4853 = vmatmul.msk.bf16.gmra.mxu0 %vm663_vm4, %v3911_v45  ;;  %v2511_v45 = vrot.slane %v4965_v11, 5  ;;  %v3514_v62 = vpack.c.b16 %v3495_v17, %v3494_v44 }
 0x227   : > { %v4062_v14 = vadd.f32 %v3991_v15, %v3664_v57  ;;  %v2941_v43 = vpop.f32.mrf.mxu2  ;;  %4627 = vmatmul.msk.bf16.gmra.mxu1 %vm663_vm4, %v2573_v42  ;;  %v2509_v42 = vsel %vm5218_vm7, %v4611_v61, %v2508_v34  ;;  %v3404_v57 = vrot.slane %v3403_v20, 4  ;;  %v4786_v34 = vld [vmem:[%s5032_s27 + $0xc0] sm:$0xf]  ;;  %v6230_v61 = vld [vmem:[%s5032_s27 + $0xc4] sm:$0xf]  ;;  %v2515_v20 = vrot.slane %v4966_v28, 5 }
 0x228   : > { %v3011_v59 = vadd.f32 %v2941_v43, %v2724_v9  ;;  %v3844_v9 = vsel %vm5218_vm7, %v3842_v30, %v3843_v10  ;;  %v2512_v60 = vsel %vm5218_vm7, %v2510_v35, %v2511_v45  ;;  %v2555_v38 = vunpack.c.l.b16 %v2509_v42  ;;  %v4822_v45 = vld [vmem:[%s5032_s27 + $0xb4] sm:$0xe] }
 0x229   : > { %v4093_v12 = vadd.f32 %v4092_v48, %v4062_v14  ;;  %v4132_v31 = vmul.f32 %v4062_v14, %v4062_v14  ;;  %v3893_v47 = vunpack.c.l.b16 %v3844_v9  ;;  %v2556_v41 = vunpack.c.l.b16 %v2512_v60 }
 0x22b   : > { %v4163_v25 = vadd.f32 %v4162_v26, %v4132_v31  ;;  %v3993_v6 = vpop.f32.mrf.mxu0  ;;  %v3912_v10 = vpack.c.b16 %v3893_v47, %v3892_v55  ;;  %v2574_v11 = vpack.c.b16 %v2556_v41, %v2555_v38  ;;  %v3424_v31 = vshll.u32 %v4786_v34, 16  ;;  %v4905_v47 = vld [vmem:[%s5032_s27 + $0xb4] sm:$0xff] }
 0x22c   : > { %v3595_v15 = vpop.f32.mrf.mxu3  ;;  %4740 = vmatmul.msk.bf16.gmra.mxu2 %vm663_vm4, %v4904_v7  ;;  %v2659_v48 = vpop.f32.mrf.mxu1  ;;  %v3847_v7 = vrot.slane %v6184_v49, 5  ;;  %v3434_v49 = vshrl.u32 %v6230_v61, 16 }
 0x22d   : > { %v3665_v33 = vadd.f32 %v3595_v15, %v3011_v59  ;;  %v2726_v26 = vadd.f32 %v2659_v48, %v5614_v51  ;;  %v3409_v51 = vsel %vm5044_vm3, %v3404_v57, %v6200_v16  ;;  %v3419_v59 = vsel %vm5044_vm3, %v3414_v32, %v3418_v0  ;;  %v4967_v0 = vld [vmem:[%s5032_s27 + $0xbc] sm:$0x1] }
 0x22e   : > { %v3497_v9 = vunpack.c.l.b16 %v3419_v59  ;;  %v4838_v15 = vrot.slane %v4822_v45, 9  ;;  %v3849_v48 = vrot.slane %v3847_v7, 4  ;;  %v4612_v57 = vrot.slane %v4596_v54, 9 }
 0x22f   : > { %v4063_v46 = vadd.f32 %v3993_v6, %v3665_v33  ;;  %v2944_v13 = vpop.f32.mrf.mxu2  ;;  %v3430_v6 = vshll.u32 %v6230_v61, 16  ;;  %v2517_v32 = vrot.slane %v2515_v20, 4 }
 0x230   : > { %v3012_v14 = vadd.f32 %v2944_v13, %v2725_v58 }
 0x231   : > { %v4094_v43 = vadd.f32 %v4093_v12, %v4063_v46  ;;  %v4133_v30 = vmul.f32 %v4063_v46, %v4063_v46  ;;  %4805 = vmatmul.msk.bf16.gmra.mxu3 %vm663_vm4, %v3514_v62  ;;  %v3421_v12 = vshrl.u32 %v4786_v34, 16  ;;  %v3426_v62 = vrot.slane %v3424_v31, 5  ;;  %v6244_v34 = vld [vmem:[%s5032_s27 + $0xc8] sm:$0x1] }
 0x232   : > { %v2518_v46 = vrot.slane %v4967_v0, 5  ;;  %v3432_v41 = vrot.slane %v3430_v6, 5 }
 0x233   : > { %v4164_v58 = vadd.f32 %v4163_v25, %v4133_v30  ;;  %v3996_v35 = vpop.f32.mrf.mxu0  ;;  %v3496_v25 = vunpack.c.l.b16 %v3409_v51  ;;  %v3423_v33 = vrot.slane %v3421_v12, 4  ;;  %v3848_v51 = vsel %vm5218_vm7, %v4838_v15, %v3847_v7  ;;  %v6346_v12 = vld [vmem:[#allocation2_spill] sm:$0xff] }
 0x234   : > { %v3598_v44 = vpop.f32.mrf.mxu3  ;;  %v2662_v17 = vpop.f32.mrf.mxu1  ;;  %v3440_v7 = vshll.u32 %v6244_v34, 16 }
 0x235   : > { %v3666_v56 = vadd.f32 %v3598_v44, %v3012_v14  ;;  %v2727_v16 = vadd.f32 %v2662_v17, %v5630_v1  ;;  %v3850_v1 = vrot.slane %v6205_v24, 5  ;;  %v3436_v14 = vrot.slane %v3434_v49, 4 }
 0x236   : > { %4854 = vmatmul.msk.bf16.gmra.mxu0 %vm663_vm4, %v3912_v10  ;;  %v3515_v59 = vpack.c.b16 %v3497_v9, %v3496_v25  ;;  %v3427_v45 = vor.u32 %v3426_v62, %v3423_v33  ;;  %v3894_v17 = vunpack.c.l.b16 %v3848_v51 }
 0x237   : > { %v4064_v42 = vadd.f32 %v3996_v35, %v3666_v56  ;;  %v2946_v60 = vpop.f32.mrf.mxu2  ;;  %4628 = vmatmul.msk.bf16.gmra.mxu1 %vm663_vm4, %v2574_v11  ;;  %v3851_v24 = vsel %vm5218_vm7, %v3849_v48, %v3850_v1  ;;  %v2519_v11 = vsel %vm5218_vm7, %v2517_v32, %v2518_v46  ;;  %v3437_v44 = vor.u32 %v3436_v14, %v3432_v41  ;;  %v4823_v1 = vld [vmem:[%s5032_s27 + $0xc0] sm:$0xe]  ;;  %v6262_v32 = vld [vmem:[%s5032_s27 + $0xd0] sm:$0xf] }
 0x238   : > { %v3013_v55 = vadd.f32 %v2946_v60, %v2726_v26  ;;  %v3895_v28 = vunpack.c.l.b16 %v3851_v24  ;;  %v2558_v49 = vunpack.c.l.b16 %v2519_v11  ;;  %v3428_v25 = vrot.slane %v3427_v45, 4  ;;  %v4597_v24 = vld [vmem:[%s5032_s27 + $0xc0] sm:$0xe] }
 0x239   : > { %v4095_v13 = vadd.f32 %v4094_v43, %v4064_v42  ;;  %v4134_v38 = vmul.f32 %v4064_v42, %v4064_v42  ;;  %v2516_v43 = vsel %vm5218_vm7, %v4612_v57, %v2515_v20  ;;  %v3438_v48 = vrot.slane %v3437_v44, 4  ;;  %v4789_v57 = vld [vmem:[%s5032_s27 + $0xcc] sm:$0xf] }
 0x23a   : > { %v2557_v6 = vunpack.c.l.b16 %v2516_v43  ;;  %v3442_v42 = vrot.slane %v3440_v7, 5  ;;  %v3913_v60 = vpack.c.b16 %v3895_v28, %v3894_v17  ;;  %v3433_v46 = vsel %vm5044_vm3, %v3428_v25, %v3432_v41  ;;  %v4969_v17 = vld [vmem:[%s5032_s27 + $0xc8] sm:$0x1] }
 0x23b   : > { %v4165_v30 = vadd.f32 %v4164_v58, %v4134_v38  ;;  %v3998_v10 = vpop.f32.mrf.mxu0  ;;  %v4839_v51 = vrot.slane %v4823_v1, 9  ;;  %v3458_v41 = vshrl.u32 %v6262_v32, 16  ;;  %v3857_v45 = vrot.slane %v6244_v34, 5 }
 0x23c   : > { %v3600_v26 = vpop.f32.mrf.mxu3  ;;  %4741 = vmatmul.msk.bf16.gmra.mxu2 %vm663_vm4, %v4905_v47  ;;  %v2664_v35 = vpop.f32.mrf.mxu1  ;;  %v3854_v47 = vrot.slane %v6230_v61, 5  ;;  %v3445_v61 = vshrl.u32 %v4789_v57, 16  ;;  %v4613_v44 = vrot.slane %v4597_v24, 9  ;;  %v2525_v28 = vrot.slane %v4969_v17, 5 }
 0x23d   : > { %v3667_v58 = vadd.f32 %v3600_v26, %v3013_v55  ;;  %v2728_v31 = vadd.f32 %v2664_v35, %v6346_v12  ;;  %v2575_v55 = vpack.c.b16 %v2558_v49, %v2557_v6  ;;  %v3448_v26 = vshll.u32 %v4789_v57, 16  ;;  %v4906_v12 = vld [vmem:[%s5032_s27 + $0xc0] sm:$0xff] }
 0x23e   : > { %v3856_v11 = vrot.slane %v3854_v47, 4  ;;  %v3855_v49 = vsel %vm5218_vm7, %v4839_v51, %v3854_v47 }
 0x23f   : > { %v4065_v56 = vadd.f32 %v3998_v10, %v3667_v58  ;;  %v2949_v54 = vpop.f32.mrf.mxu2  ;;  %v3450_v25 = vrot.slane %v3448_v26, 5 }
 0x240   : > { %v3014_v20 = vadd.f32 %v2949_v54, %v2727_v16  ;;  %v3858_v34 = vsel %vm5218_vm7, %v3856_v11, %v3857_v45 }
 0x241   : > { %v4096_v9 = vadd.f32 %v4095_v13, %v4065_v56  ;;  %v4135_v15 = vmul.f32 %v4065_v56, %v4065_v56  ;;  %4806 = vmatmul.msk.bf16.gmra.mxu3 %vm663_vm4, %v3515_v59  ;;  %v4968_v13 = vld [vmem:[%s5032_s27 + $0xc4] sm:$0xf]  ;;  %v3454_v59 = vshll.u32 %v6262_v32, 16 }
 0x242   : > { %v2522_v38 = vrot.slane %v4968_v13, 5 }
 0x243   : > { %v4166_v33 = vadd.f32 %v4165_v30, %v4135_v15  ;;  %v4001_v62 = vpop.f32.mrf.mxu0  ;;  %v3443_v30 = vsel %vm5044_vm3, %v3438_v48, %v3442_v42  ;;  %v3456_v15 = vrot.slane %v3454_v59, 5  ;;  %v3460_v48 = vrot.slane %v3458_v41, 4 }
 0x244   : > { %v3603_v16 = vpop.f32.mrf.mxu3  ;;  %v2667_v0 = vpop.f32.mrf.mxu1  ;;  %v2524_v7 = vrot.slane %v2522_v38, 4  ;;  %v3499_v6 = vunpack.c.l.b16 %v3443_v30 }
 0x245   : > { %v3668_v14 = vadd.f32 %v3603_v16, %v3014_v20  ;;  %v2729_v10 = vadd.f32 %v2667_v0, %v5666_v52  ;;  %v3498_v52 = vunpack.c.l.b16 %v3433_v46  ;;  %v3447_v20 = vrot.slane %v3445_v61, 4 }
 0x246   : > { %4855 = vmatmul.msk.bf16.gmra.mxu0 %vm663_vm4, %v3913_v60  ;;  %v3896_v16 = vunpack.c.l.b16 %v3855_v49  ;;  %v3897_v0 = vunpack.c.l.b16 %v3858_v34  ;;  %v3461_v13 = vor.u32 %v3460_v48, %v3456_v15  ;;  %v4907_v48 = vld [vmem:[%s5032_s27 + $0xcc] sm:$0xff] }
 0x247   : > { %v4066_v35 = vadd.f32 %v4001_v62, %v3668_v14  ;;  %v2951_v43 = vpop.f32.mrf.mxu2  ;;  %4629 = vmatmul.msk.bf16.gmra.mxu1 %vm663_vm4, %v2575_v55  ;;  %v2526_v55 = vsel %vm5218_vm7, %v2524_v7, %v2525_v28  ;;  %v3516_v57 = vpack.c.b16 %v3499_v6, %v3498_v52  ;;  %v3451_v46 = vor.u32 %v3450_v25, %v3447_v20  ;;  %v4824_v7 = vld [vmem:[%s5032_s27 + $0xcc] sm:$0xe] }
 0x248   : > { %v3015_v58 = vadd.f32 %v2951_v43, %v2728_v31  ;;  %v4791_v31 = vld [vmem:[%s5032_s27 + $0xd4] sm:$0x1]  ;;  %v2560_v61 = vunpack.c.l.b16 %v2526_v55  ;;  %v3914_v41 = vpack.c.b16 %v3897_v0, %v3896_v16  ;;  %v3462_v43 = vrot.slane %v3461_v13, 4 }
 0x249   : > { %v4097_v56 = vadd.f32 %v4096_v9, %v4066_v35  ;;  %v4136_v54 = vmul.f32 %v4066_v35, %v4066_v35  ;;  %v2523_v9 = vsel %vm5218_vm7, %v4613_v44, %v2522_v38  ;;  %v3464_v14 = vshll.u32 %v4791_v31, 16 }
 0x24a   : > { %v2559_v24 = vunpack.c.l.b16 %v2523_v9  ;;  %v3452_v35 = vrot.slane %v3451_v46, 4  ;;  %v3864_v20 = vrot.slane %v4791_v31, 5 }
 0x24b   : > { %v4167_v42 = vadd.f32 %v4166_v33, %v4136_v54  ;;  %v4003_v60 = vpop.f32.mrf.mxu0  ;;  %v3466_v52 = vrot.slane %v3464_v14, 5 }
 0x24c   : > { %v3605_v1 = vpop.f32.mrf.mxu3  ;;  %4742 = vmatmul.msk.bf16.gmra.mxu2 %vm663_vm4, %v4906_v12  ;;  %v2669_v62 = vpop.f32.mrf.mxu1  ;;  %v2576_v45 = vpack.c.b16 %v2560_v61, %v2559_v24  ;;  %v3457_v28 = vsel %vm5044_vm3, %v3452_v35, %v3456_v15 }
 0x24d   : > { %v3669_v47 = vadd.f32 %v3605_v1, %v3015_v58  ;;  %v2730_v33 = vadd.f32 %v2669_v62, %v5686_v21  ;;  %v3861_v58 = vrot.slane %v6262_v32, 5  ;;  %v4840_v32 = vrot.slane %v4824_v7, 9 }
 0x24f   : > { %v4067_v30 = vadd.f32 %v4003_v60, %v3669_v47  ;;  %v2954_v51 = vpop.f32.mrf.mxu2  ;;  %v3863_v49 = vrot.slane %v3861_v58, 4  ;;  %v3862_v15 = vsel %vm5218_vm7, %v4840_v32, %v3861_v58 }
 0x250   : > { %v3016_v26 = vadd.f32 %v2954_v51, %v2729_v10 }
 0x251   : > { %v4098_v59 = vadd.f32 %v4097_v56, %v4067_v30  ;;  %v4137_v38 = vmul.f32 %v4067_v30, %v4067_v30  ;;  %4807 = vmatmul.msk.bf16.gmra.mxu3 %vm663_vm4, %v3516_v57  ;;  %v3467_v56 = vsel %vm5044_vm3, %v3462_v43, %v3466_v52  ;;  %v3865_v36 = vsel %vm5218_vm7, %v3863_v49, %v3864_v20  ;;  %v6347_v57 = vld [vmem:[#allocation3_spill] sm:$0xff] }
 0x252   : > { %v3501_v34 = vunpack.c.l.b16 %v3467_v56  ;;  %v3899_v0 = vunpack.c.l.b16 %v3865_v36 }
 0x253   : > { %v4168_v11 = vadd.f32 %v4167_v42, %v4137_v38  ;;  %v4006_v21 = vpop.f32.mrf.mxu0 }
 0x254   : > { %v3608_v12 = vpop.f32.mrf.mxu3  ;;  %v2672_v44 = vpop.f32.mrf.mxu1 }
 0x255   : > { %v3670_v17 = vadd.f32 %v3608_v12, %v3016_v26  ;;  %v2731_v10 = vadd.f32 %v2672_v44, %v5705_v29  ;;  %v3500_v29 = vunpack.c.l.b16 %v3457_v28 }
 0x256   : > { %4856 = vmatmul.msk.bf16.gmra.mxu0 %vm663_vm4, %v3914_v41 }
 0x257   : > { %v4068_v54 = vadd.f32 %v4006_v21, %v3670_v17  ;;  %v2956_v6 = vpop.f32.mrf.mxu2  ;;  %4630 = vmatmul.msk.bf16.gmra.mxu1 %vm663_vm4, %v2576_v45  ;;  %v3517_v31 = vpack.c.b16 %v3501_v34, %v3500_v29 }
 0x258   : > { %v3017_v25 = vadd.f32 %v2956_v6, %v2730_v33  ;;  %v3898_v33 = vunpack.c.l.b16 %v3862_v15 }
 0x259   : > { %v4099_v42 = vadd.f32 %v4098_v59, %v4068_v54  ;;  %v4138_v60 = vmul.f32 %v4068_v54, %v4068_v54 }
 0x25a   : > { %v3915_v24 = vpack.c.b16 %v3899_v0, %v3898_v33 }
 0x25b   : > { %v4169_v1 = vadd.f32 %v4168_v11, %v4138_v60  ;;  %v4008_v62 = vpop.f32.mrf.mxu0 }
 0x25c   : > { %v3610_v9 = vpop.f32.mrf.mxu3  ;;  %4743 = vmatmul.msk.bf16.gmra.mxu2 %vm663_vm4, %v4907_v48  ;;  %v2674_v55 = vpop.f32.mrf.mxu1 }
 0x25d   : > { %v3671_v47 = vadd.f32 %v3610_v9, %v3017_v25  ;;  %v2732_v16 = vadd.f32 %v2674_v55, %v6347_v57 }
 0x25f   : > { %v4069_v46 = vadd.f32 %v4008_v62, %v3671_v47  ;;  %v2959_v13 = vpop.f32.mrf.mxu2 }
 0x260   : > { %v3018_v14 = vadd.f32 %v2959_v13, %v2731_v10 }
 0x261   : > { %v4100_v30 = vadd.f32 %v4099_v42, %v4069_v46  ;;  %v4139_v51 = vmul.f32 %v4069_v46, %v4069_v46  ;;  %4808 = vmatmul.msk.bf16.gmra.mxu3 %vm663_vm4, %v3517_v31 }
 0x263   : > { %v4170_v18 = vadd.f32 %v4169_v1, %v4139_v51  ;;  %v4011_v61 = vpop.f32.mrf.mxu0 }
 0x264   : > { %v3613_v26 = vpop.f32.mrf.mxu3  ;;  %v2677_v59 = vpop.f32.mrf.mxu1 }
 0x265   : > { %v3672_v38 = vadd.f32 %v3613_v26, %v3018_v14  ;;  %v2733_v41 = vadd.f32 %v2677_v59, %v5748_v5 }
 0x266   : > { %4857 = vmatmul.msk.bf16.gmra.mxu0 %vm663_vm4, %v3915_v24 }
 0x267   : > { %v4070_v35 = vadd.f32 %v4011_v61, %v3672_v38  ;;  %v2961_v43 = vpop.f32.mrf.mxu2 }
 0x268   : > { %v3019_v52 = vadd.f32 %v2961_v43, %v2732_v16 }
 0x269   : > { %v4101_v11 = vadd.f32 %v4100_v30, %v4070_v35  ;;  %v4140_v21 = vmul.f32 %v4070_v35, %v4070_v35 }
 0x26b   : > { %v4171_v45 = vadd.f32 %v4170_v18, %v4140_v21  ;;  %v4013_v58 = vpop.f32.mrf.mxu0 }
 0x26c   : > { %v3615_v12 = vpop.f32.mrf.mxu3  ;;  %v2679_v44 = vpop.f32.mrf.mxu1 }
 0x26d   : > { %v3673_v7 = vadd.f32 %v3615_v12, %v3019_v52  ;;  %v2734_v17 = vadd.f32 %v2679_v44, %v5772_v22 }
 0x26f   : > { %v4071_v10 = vadd.f32 %v4013_v58, %v3673_v7  ;;  %v2964_v28 = vpop.f32.mrf.mxu2 }
 0x270   : > { %v3020_v56 = vadd.f32 %v2964_v28, %v2733_v41 }
 0x271   : > { %v4102_v54 = vadd.f32 %v4101_v11, %v4071_v10  ;;  %v4141_v6 = vmul.f32 %v4071_v10, %v4071_v10 }
 0x273   : > { %v4172_v5 = vadd.f32 %v4171_v45, %v4141_v6  ;;  %v4016_v32 = vpop.f32.mrf.mxu0 }
 0x274   : > { %v3618_v49 = vpop.f32.mrf.mxu3  ;;  %v2682_v20 = vpop.f32.mrf.mxu1 }
 0x275   : > { %v3674_v25 = vadd.f32 %v3618_v49, %v3020_v56  ;;  %v2735_v48 = vadd.f32 %v2682_v20, %v5791_v19 }
 0x277   : > { %v4072_v42 = vadd.f32 %v4016_v32, %v3674_v25  ;;  %v2966_v60 = vpop.f32.mrf.mxu2 }
 0x278   : > { %v3021_v29 = vadd.f32 %v2966_v60, %v2734_v17 }
 0x279   : > { %v4103_v34 = vadd.f32 %v4102_v54, %v4072_v42  ;;  %v4142_v1 = vmul.f32 %v4072_v42, %v4072_v42 }
 0x27b   : > { %v4173_v62 = vadd.f32 %v4172_v5, %v4142_v1  ;;  %v4018_v15 = vpop.f32.mrf.mxu0 }
 0x27c   : > { %v3620_v22 = vpop.f32.mrf.mxu3  ;;  %v2684_v36 = vpop.f32.mrf.mxu1 }
 0x27d   : > { %v3675_v9 = vadd.f32 %v3620_v22, %v3021_v29  ;;  %v2736_v55 = vadd.f32 %v2684_v36, %v5815_v53 }
 0x27f   : > { %v4073_v47 = vadd.f32 %v4018_v15, %v3675_v9  ;;  %v2969_v31 = vpop.f32.mrf.mxu2 }
 0x280   : > { %v3022_v57 = vadd.f32 %v2969_v31, %v2735_v48 }
 0x281   : > { %v4104_v16 = vadd.f32 %v4103_v34, %v4073_v47  ;;  %v4143_v33 = vmul.f32 %v4073_v47, %v4073_v47 }
 0x283   : > { %v4174_v0 = vadd.f32 %v4173_v62, %v4143_v33  ;;  %v4021_v46 = vpop.f32.mrf.mxu0 }
 0x284   : > { %v3623_v19 = vpop.f32.mrf.mxu3  ;;  %v2687_v13 = vpop.f32.mrf.mxu1 }
 0x285   : > { %v3676_v14 = vadd.f32 %v3623_v19, %v3022_v57  ;;  %v2737_v30 = vadd.f32 %v2687_v13, %v5834_v2 }
 0x287   : > { %v4074_v51 = vadd.f32 %v4021_v46, %v3676_v14  ;;  %v2971_v24 = vpop.f32.mrf.mxu2 }
 0x288   : > { %v3023_v18 = vadd.f32 %v2971_v24, %v2736_v55 }
 0x289   : > { %v4105_v61 = vadd.f32 %v4104_v16, %v4074_v51  ;;  %v4144_v26 = vmul.f32 %v4074_v51, %v4074_v51 }
 0x28b   : > { %v4175_v59 = vadd.f32 %v4174_v0, %v4144_v26  ;;  %v4023_v38 = vpop.f32.mrf.mxu0 }
 0x28c   : > { %v3625_v53 = vpop.f32.mrf.mxu3  ;;  %v2689_v41 = vpop.f32.mrf.mxu1 }
 0x28d   : > { %v3677_v35 = vadd.f32 %v3625_v53, %v3023_v18  ;;  %v2738_v10 = vadd.f32 %v2689_v41, %v5858_v40 }
 0x28f   : > { %v4075_v43 = vadd.f32 %v4023_v38, %v3677_v35  ;;  %v2974_v52 = vpop.f32.mrf.mxu2 }
 0x290   : > { %v3024_v11 = vadd.f32 %v2974_v52, %v2737_v30 }
 0x291   : > { %v4106_v21 = vadd.f32 %v4105_v61, %v4075_v43  ;;  %v4145_v45 = vmul.f32 %v4075_v43, %v4075_v43 }
 0x293   : > { %v4176_v58 = vadd.f32 %v4175_v59, %v4145_v45  ;;  %v4026_v12 = vpop.f32.mrf.mxu0 }
 0x294   : > { %v3628_v44 = vpop.f32.mrf.mxu3  ;;  %v2692_v7 = vpop.f32.mrf.mxu1 }
 0x295   : > { %v3678_v2 = vadd.f32 %v3628_v44, %v3024_v11  ;;  %v2739_v42 = vadd.f32 %v2692_v7, %v5877_v8 }
 0x297   : > { %v4076_v17 = vadd.f32 %v4026_v12, %v3678_v2  ;;  %v2976_v28 = vpop.f32.mrf.mxu2 }
 0x298   : > { %v3025_v6 = vadd.f32 %v2976_v28, %v2738_v10 }
 0x299   : > { %v4107_v56 = vadd.f32 %v4106_v21, %v4076_v17  ;;  %v4146_v54 = vmul.f32 %v4076_v17, %v4076_v17 }
 0x29b   : > { %v4177_v5 = vadd.f32 %v4176_v58, %v4146_v54  ;;  %v4028_v32 = vpop.f32.mrf.mxu0 }
 0x29c   : > { %v3630_v49 = vpop.f32.mrf.mxu3  ;;  %v2694_v20 = vpop.f32.mrf.mxu1 }
 0x29d   : > { %v3679_v25 = vadd.f32 %v3630_v49, %v3025_v6  ;;  %v2740_v55 = vadd.f32 %v2694_v20, %v5901_v27 }
 0x29f   : > { %v4077_v48 = vadd.f32 %v4028_v32, %v3679_v25  ;;  %v2979_v60 = vpop.f32.mrf.mxu2 }
 0x2a0   : > { %v3026_v1 = vadd.f32 %v2979_v60, %v2739_v42 }
 0x2a1   : > { %v4108_v29 = vadd.f32 %v4107_v56, %v4077_v48  ;;  %v4147_v34 = vmul.f32 %v4077_v48, %v4077_v48 }
 0x2a3   : > { %v4178_v62 = vadd.f32 %v4177_v5, %v4147_v34  ;;  %v4031_v15 = vpop.f32.mrf.mxu0 }
 0x2a4   : > { %v3633_v22 = vpop.f32.mrf.mxu3  ;;  %v2697_v40 = vpop.f32.mrf.mxu1 }
 0x2a5   : > { %v3680_v36 = vadd.f32 %v3633_v22, %v3026_v1  ;;  %v2741_v14 = vadd.f32 %v2697_v40, %v5920_v63 }
 0x2a7   : > { %v4078_v9 = vadd.f32 %v4031_v15, %v3680_v36  ;;  %v2981_v47 = vpop.f32.mrf.mxu2 }
 0x2a8   : > { %v3027_v16 = vadd.f32 %v2981_v47, %v2740_v55 }
 0x2a9   : > { %v4109_v31 = vadd.f32 %v4108_v29, %v4078_v9  ;;  %v4148_v57 = vmul.f32 %v4078_v9, %v4078_v9 }
 0x2ab   : > { %v4179_v33 = vadd.f32 %v4178_v62, %v4148_v57  ;;  %v4033_v0 = vpop.f32.mrf.mxu0 }
 0x2ac   : > { %v3635_v46 = vpop.f32.mrf.mxu3  ;;  %v2699_v8 = vpop.f32.mrf.mxu1 }
 0x2ad   : > { %v3681_v19 = vadd.f32 %v3635_v46, %v3027_v16  ;;  %v2742_v41 = vadd.f32 %v2699_v8, %v5944_v39 }
 0x2af   : > { %v4079_v13 = vadd.f32 %v4033_v0, %v3681_v19  ;;  %v2984_v30 = vpop.f32.mrf.mxu2 }
 0x2b0   : > { %v3028_v18 = vadd.f32 %v2984_v30, %v2741_v14 }
 0x2b1   : > { %v4110_v51 = vadd.f32 %v4109_v31, %v4079_v13  ;;  %v4149_v24 = vmul.f32 %v4079_v13, %v4079_v13 }
 0x2b3   : > { %v4180_v61 = vadd.f32 %v4179_v33, %v4149_v24  ;;  %v4036_v26 = vpop.f32.mrf.mxu0 }
 0x2b4   : > { %v3638_v59 = vpop.f32.mrf.mxu3  ;;  %v2702_v27 = vpop.f32.mrf.mxu1 }
 0x2b5   : > { %v3682_v38 = vadd.f32 %v3638_v59, %v3028_v18  ;;  %v2743_v7 = vadd.f32 %v2702_v27, %v5963_v50 }
 0x2b7   : > { %v4080_v53 = vadd.f32 %v4036_v26, %v3682_v38  ;;  %v2986_v35 = vpop.f32.mrf.mxu2 }
 0x2b8   : > { %v3029_v11 = vadd.f32 %v2986_v35, %v2742_v41 }
 0x2b9   : > { %v4111_v43 = vadd.f32 %v4110_v51, %v4080_v53  ;;  %v4150_v52 = vmul.f32 %v4080_v53, %v4080_v53 }
 0x2bb   : > { %v4181_v21 = vadd.f32 %v4180_v61, %v4150_v52  ;;  %v4038_v45 = vpop.f32.mrf.mxu0 }
 0x2bc   : > { %v3640_v58 = vpop.f32.mrf.mxu3  ;;  %v2704_v63 = vpop.f32.mrf.mxu1 }
 0x2bd   : > { %v3683_v12 = vadd.f32 %v3640_v58, %v3029_v11  ;;  %v2744_v49 = vadd.f32 %v2704_v63, %v5987_v3 }
 0x2bf   : > { %v4081_v44 = vadd.f32 %v4038_v45, %v3683_v12  ;;  %v2989_v2 = vpop.f32.mrf.mxu2 }
 0x2c0   : > { %v3030_v28 = vadd.f32 %v2989_v2, %v2743_v7 }
 0x2c1   : > { %v4112_v17 = vadd.f32 %v4111_v43, %v4081_v44  ;;  %v4151_v10 = vmul.f32 %v4081_v44, %v4081_v44  ;;  %v6348_v43 = vld [vmem:[#allocation4_spill] sm:$0xff] }
 0x2c3   : > { %v4182_v56 = vadd.f32 %v4181_v21, %v4151_v10  ;;  %v4041_v54 = vpop.f32.mrf.mxu0 }
 0x2c4   : > { %v3643_v6 = vpop.f32.mrf.mxu3  ;;  %v2707_v5 = vpop.f32.mrf.mxu1 }
 0x2c5   : > { %v3684_v39 = vadd.f32 %v3643_v6, %v3030_v28  ;;  %v2745_v62 = vadd.f32 %v2707_v5, %v6004_v23 }
 0x2c7   : > { %v4082_v32 = vadd.f32 %v4041_v54, %v3684_v39  ;;  %v2991_v20 = vpop.f32.mrf.mxu2 }
 0x2c8   : > { %v3031_v42 = vadd.f32 %v2991_v20, %v2744_v49 }
 0x2c9   : > { %v4113_v25 = vadd.f32 %v4112_v17, %v4082_v32  ;;  %v4152_v48 = vmul.f32 %v4082_v32, %v4082_v32 }
 0x2cb   : > { %v4183_v60 = vadd.f32 %v4182_v56, %v4152_v48  ;;  %v4043_v29 = vpop.f32.mrf.mxu0 }
 0x2cc   : > { %v3645_v34 = vpop.f32.mrf.mxu3  ;;  %v2709_v22 = vpop.f32.mrf.mxu1 }
 0x2cd   : > { %v3685_v50 = vadd.f32 %v3645_v34, %v3031_v42  ;;  %v2746_v16 = vadd.f32 %v2709_v22, %v6027_v4 }
 0x2cf   : > { %v4083_v1 = vadd.f32 %v4043_v29, %v3685_v50  ;;  %v2994_v15 = vpop.f32.mrf.mxu2 }
 0x2d0   : > { %v3032_v9 = vadd.f32 %v2994_v15, %v2745_v62 }
 0x2d1   : > { %v4114_v40 = vadd.f32 %v4113_v25, %v4083_v1  ;;  %v4153_v36 = vmul.f32 %v4083_v1, %v4083_v1 }
 0x2d3   : > { %v4184_v55 = vadd.f32 %v4183_v60, %v4153_v36  ;;  %v4046_v47 = vpop.f32.mrf.mxu0 }
 0x2d4   : > { %v3648_v31 = vpop.f32.mrf.mxu3  ;;  %v2712_v19 = vpop.f32.mrf.mxu1 }
 0x2d5   : > { %v3686_v3 = vadd.f32 %v3648_v31, %v3032_v9  ;;  %v2747_v24 = vadd.f32 %v2712_v19, %v6046_v37 }
 0x2d7   : > { %v4084_v57 = vadd.f32 %v4046_v47, %v3686_v3  ;;  %v2996_v33 = vpop.f32.mrf.mxu2 }
 0x2d8   : > { %v3033_v8 = vadd.f32 %v2996_v33, %v2746_v16 }
 0x2d9   : > { %v4115_v0 = vadd.f32 %v4114_v40, %v4084_v57  ;;  %v4154_v46 = vmul.f32 %v4084_v57, %v4084_v57 }
 0x2db   : > { %v4185_v13 = vadd.f32 %v4184_v55, %v4154_v46  ;;  %v4048_v14 = vpop.f32.mrf.mxu0 }
 0x2dc   : > { %v3650_v23 = vpop.f32.mrf.mxu3  ;;  %v2714_v38 = vpop.f32.mrf.mxu1 }
 0x2dd   : > { %v3687_v30 = vadd.f32 %v3650_v23, %v3033_v8  ;;  %v2748_v52 = vadd.f32 %v2714_v38, %v6348_v43 }
 0x2df   : > { %v4085_v51 = vadd.f32 %v4048_v14, %v3687_v30  ;;  %v2999_v18 = vpop.f32.mrf.mxu2 }
 0x2e0   : > { %v3034_v59 = vadd.f32 %v2999_v18, %v2747_v24 }
 0x2e1   : > { %v4116_v61 = vadd.f32 %v4115_v0, %v4085_v51  ;;  %v4155_v26 = vmul.f32 %v4085_v51, %v4085_v51 }
 0x2e3   : > { %v4186_v27 = vadd.f32 %v4185_v13, %v4155_v26  ;;  %v4051_v53 = vpop.f32.mrf.mxu0 }
 0x2e4   : > { %v3653_v4 = vpop.f32.mrf.mxu3 }
 0x2e5   : > { %v3688_v41 = vadd.f32 %v3653_v4, %v3034_v59 }
 0x2e7   : > { %v4086_v35 = vadd.f32 %v4051_v53, %v3688_v41  ;;  %v3001_v11 = vpop.f32.mrf.mxu2 }
 0x2e8   : > { %v3035_v58 = vadd.f32 %v3001_v11, %v2748_v52 }
 0x2e9   : > { %v4117_v21 = vadd.f32 %v4116_v61, %v4086_v35  ;;  %v4156_v45 = vmul.f32 %v4086_v35, %v4086_v35 }
 0x2eb   : > { %v4187_v63 = vadd.f32 %v4186_v27, %v4156_v45  ;;  %v4053_v44 = vpop.f32.mrf.mxu0 }
 0x2ec   : > { %v3655_v12 = vpop.f32.mrf.mxu3 }
 0x2ed   : > { %v3689_v37 = vadd.f32 %v3655_v12, %v3035_v58 }
 0x2ef   : > { %v4087_v7 = vadd.f32 %v4053_v44, %v3689_v37 }
 0x2f1   : > { %v4118_v2 = vadd.f32 %v4117_v21, %v4087_v7  ;;  %v4157_v17 = vmul.f32 %v4087_v7, %v4087_v7 }
 0x2f3   : > { %v4119_v10 = vrot.slane %v4118_v2, 4  ;;  %v4188_v28 = vadd.f32 %v4187_v63, %v4157_v17 }
 0x2f5   : > { %v4120_v56 = vadd.f32 %v4119_v10, %v4118_v2  ;;  %v4189_v54 = vrot.slane %v4188_v28, 4 }
 0x2f7   : > { %v4121_v6 = vrot.slane %v4120_v56, 2  ;;  %v4190_v39 = vadd.f32 %v4189_v54, %v4188_v28 }
 0x2f9   : > { %v4122_v5 = vadd.f32 %v4121_v6, %v4120_v56  ;;  %v4191_v32 = vrot.slane %v4190_v39, 2 }
 0x2fb   : > { %v4123_v49 = vrot.slane %v4122_v5, 1  ;;  %v4192_v20 = vadd.f32 %v4191_v32, %v4190_v39 }
 0x2fd   : > { %v4124_v25 = vadd.f32 %v4123_v49, %v4122_v5  ;;  %v4193_v48 = vrot.slane %v4192_v20, 1 }
 0x2ff   : > { %4125 = vst [vmem:[%s172_s11] sm:$0x1] %v4124_v25  ;;  %v4194_v42 = vadd.f32 %v4193_v48, %v4192_v20 }
 0x301   : > { %4195 = vst [vmem:[%s175_s16] sm:$0x1] %v4194_v42 }
 0x302 PF: > { %s14_s12 = sadd.s32 1, %s4976_s12  }
 0x303   : > { %p11_p4 = scmp.ge.s32.totalorder %s14_s12, 4  }
 0x305   :  { %13 = sbr.rel (!%p11_p4) target bundleno = 1 (0x1), region = 80 }

// kernel: conv_bn_relu.3
= control target key start
LH: loop header
LB: loop body
LE: loop exit
PB: predicated region body
PF: predicated region fallthrough
CT: control target
= control target key end

     0   :  { %s5077_s15 = smov 0   ;;  %s6462_s0 = inlined_call_operand.vmem [shape: bf16[2,18,18,8], index: 0, kind: input, shape index: {}]   ;;  %s6463_s1 = inlined_call_operand.vmem [shape: bf16[9,8,128], index: 1, kind: input, shape index: {}]   ;;  %s6464_s2 = inlined_call_operand.vmem [shape: f32[1,128], index: 2, kind: input, shape index: {}]   ;;  %s6465_s3 = inlined_call_operand.vmem [shape: f32[1,128], index: 3, kind: input, shape index: {}]   ;;  %s6466_s4 = inlined_call_operand.vmem [shape: f32[2,8,256], index: 4, kind: output, shape index: {}]  }
   0x1 LB: > { %s4335_s16 = sadd.s32 4294967295, %s5050_s15   ;;  %p4339_p0 = scmp.ge.s32.totalorder %s5050_s15, 1  ;;  %s5050_s15 = sphi %s5077_s15, %s14_s15  }
   0x2   : > { %p162_p1 = scmp.lt.s32.totalorder %s5050_s15, 3 }
   0x4   : > { %p163_p2 = pnand %p4339_p0, %p162_p1 }
   0x6   : > { %166 = sbr.rel (%p163_p2) target bundleno = 805 (0x325), region = 36 }
   0xb   : > { %v4343_v0 = vld [vmem:[%s6463_s1 + $0x4] sm:$0xf]  ;;  %vm734_vm0 = vcmask 1043456   ;;  %p188_p3 = scmp.lt.s32.totalorder %s4335_s16, 1  ;;  %v4456_v2 = vld [vmem:[%s6463_s1 + $0x8] sm:$0xf] }
   0xc   : > { %v736_v1 = vsel %vm734_vm0, %v4343_v0, 0  ;;  %v1309_v3 = vsel %vm734_vm0, %v4456_v2, 0  ;;  %v4505_v4 = vld [vmem:[%s6463_s1 + $0xc] sm:$0xf]  ;;  %v231_v5 = vld [vmem:[%s6463_s1] sm:$0xf] }
   0xd   : > { %4978 = vmatpush.bf16.msra.mxu1 %v736_v1  ;;  %4979 = vmatpush.bf16.msra.mxu2 %v736_v1  ;;  %s6478_s16 = smov (!%p188_p3, %s4335_s16), 1  ;;  %v4634_v6 = vld [vmem:[%s6463_s1 + $0x10] sm:$0xf]  ;;  %v1596_v7 = vsel %vm734_vm0, %v4505_v4, 0  ;;  %v956_v8 = vsel %vm734_vm0, %v231_v5, 0  ;;  %vm685_vm4 = vcmask 64512  }
   0xe   : > { %4980 = vmatpush.bf16.msra.mxu3 %v736_v1  ;;  %745 = vmatpush.bf16.msra.mxu0 %v736_v1  ;;  %s4981_s27 = smul.u32 216, %s6478_s16  ;;  %v2250_v9 = vsel %vm734_vm0, %v4634_v6, 0  ;;  %vm248_vm1 = vsmask.f32 3328  ;;  %vm249_vm2 = vsmask.f32 7440 }
   0xf   : > { %vm5123_vm3 = vmor %vm248_vm1, %vm249_vm2  ;;  %vm1095_vm5 = vcmask 1042432   ;;  %vm1096_vm6 = vcmask 1046532   ;;  %s4929_s23 = sshll.u32 %s6478_s16, 4 }
  0x10   : > { %s5111_s30 = scalar_lea.vmem %s6462_s0, %s4981_s27  ;;  %vm5297_vm7 = vmor %vm1095_vm5, %vm1096_vm6  ;;  %s197_s26 = scalar_lea.vmem %s6466_s4, %s4929_s23 }
  0x11   : > { %1318 = vmatpush.bf16.msrb.mxu2 %v1309_v3  ;;  %965 = vmatpush.bf16.msrb.mxu1 %v956_v8  ;;  %v207_v10 = vld [vmem:[%s5111_s30 + $0x30] sm:$0xf]  ;;  %v208_v11 = vld [vmem:[%s5111_s30 + $0x34] sm:$0xf]  ;;  %v236_v12 = vld [vmem:[%s5111_s30 + $0x38] sm:$0x1] }
  0x12   : > { %1605 = vmatpush.bf16.msrb.mxu3 %v1596_v7  ;;  %2259 = vmatpush.bf16.msrb.mxu0 %v2250_v9  ;;  %v348_v13 = vshrl.u32 %v207_v10, 16  ;;  %v351_v14 = vshll.u32 %v207_v10, 16  ;;  %v357_v15 = vshll.u32 %v208_v11, 16  ;;  %v361_v16 = vshrl.u32 %v208_v11, 16  ;;  %v215_v17 = vld [vmem:[%s5111_s30 + $0x60] sm:$0xf] }
  0x13   : > { %v367_v18 = vshll.u32 %v236_v12, 16  ;;  %v216_v19 = vld [vmem:[%s5111_s30 + $0x64] sm:$0xf]  ;;  %v240_v20 = vld [vmem:[%s5111_s30 + $0x68] sm:$0x1]  ;;  %v444_v21 = vshrl.u32 %v215_v17, 16 }
  0x14   : > { %v350_v22 = vrot.slane %v348_v13, 4  ;;  %v353_v23 = vrot.slane %v351_v14, 5  ;;  %v359_v24 = vrot.slane %v357_v15, 5  ;;  %v363_v25 = vrot.slane %v361_v16, 4  ;;  %v223_v26 = vld [vmem:[%s5111_s30 + $0x90] sm:$0xf] }
  0x15   : > { %v369_v27 = vrot.slane %v367_v18, 5  ;;  %v446_v28 = vrot.slane %v444_v21, 4  ;;  %v447_v29 = vshll.u32 %v215_v17, 16  ;;  %v453_v30 = vshll.u32 %v216_v19, 16  ;;  %v224_v35 = vld [vmem:[%s5111_s30 + $0x94] sm:$0xf] }
  0x16   : > { %v354_v31 = vor.u32 %v353_v23, %v350_v22  ;;  %v364_v32 = vor.u32 %v363_v25, %v359_v24  ;;  %v457_v33 = vshrl.u32 %v216_v19, 16  ;;  %v463_v34 = vshll.u32 %v240_v20, 16  ;;  %v244_v45 = vld [vmem:[%s5111_s30 + $0x98] sm:$0x1]  ;;  %v199_v61 = vld [vmem:[%s5111_s30] sm:$0xf] }
  0x17   : > { %v449_v37 = vrot.slane %v447_v29, 5  ;;  %v455_v38 = vrot.slane %v453_v30, 5  ;;  %v540_v39 = vshrl.u32 %v223_v26, 16  ;;  %v543_v47 = vshll.u32 %v223_v26, 16  ;;  %v5136_v1 = vld [vmem:[%s5111_s30 + $0x4] sm:$0xf] }
  0x18   : > { %v355_v40 = vrot.slane %v354_v31, 4  ;;  %v365_v41 = vrot.slane %v364_v32, 4  ;;  %v459_v42 = vrot.slane %v457_v33, 4  ;;  %v465_v43 = vrot.slane %v463_v34, 5  ;;  %v5139_v2 = vld [vmem:[%s5111_s30 + $0x8] sm:$0x1] }
  0x19   : > { %v450_v44 = vor.u32 %v449_v37, %v446_v28  ;;  %v542_v46 = vrot.slane %v540_v39, 4  ;;  %v549_v48 = vshll.u32 %v224_v35, 16  ;;  %v553_v52 = vshrl.u32 %v224_v35, 16  ;;  %v209_v19 = vld [vmem:[%s5111_s30 + $0x3c] sm:$0xf] }
  0x1a   : > { %v360_v49 = vsel %vm5123_vm3, %v355_v40, %v359_v24  ;;  %v370_v50 = vsel %vm5123_vm3, %v365_v41, %v369_v27  ;;  %v460_v51 = vor.u32 %v459_v42, %v455_v38  ;;  %v545_v56 = vrot.slane %v543_v47, 5  ;;  %v5151_v20 = vld [vmem:[%s5111_s30 + $0x40] sm:$0xf]  ;;  %v5156_v25 = vld [vmem:[%s5111_s30 + $0x44] sm:$0x1] }
  0x1b   : > { %v645_v53 = vunpack.c.l.b16 %v360_v49  ;;  %v646_v54 = vunpack.c.l.b16 %v370_v50  ;;  %v451_v55 = vrot.slane %v450_v44, 4  ;;  %v551_v58 = vrot.slane %v549_v48, 5  ;;  %v217_v33 = vld [vmem:[%s5111_s30 + $0x6c] sm:$0xf]  ;;  %v241_v47 = vld [vmem:[%s5111_s30 + $0x74] sm:$0x1] }
  0x1c   : > { %v461_v57 = vrot.slane %v460_v51, 4  ;;  %v555_v59 = vrot.slane %v553_v52, 4  ;;  %v559_v60 = vshll.u32 %v244_v45, 16  ;;  %v546_v0 = vor.u32 %v545_v56, %v542_v46 }
  0x1d   : > { %v673_v62 = vpack.c.b16 %v646_v54, %v645_v53  ;;  %v456_v63 = vsel %vm5123_vm3, %v451_v55, %v455_v38  ;;  %v252_v9 = vshrl.u32 %v199_v61, 16  ;;  %v255_v10 = vshll.u32 %v199_v61, 16  ;;  %v225_v61 = vld [vmem:[%s5111_s30 + $0x9c] sm:$0xf] }
  0x1e   : > { %v466_v3 = vsel %vm5123_vm3, %v461_v57, %v465_v43  ;;  %v653_v4 = vunpack.c.l.b16 %v456_v63  ;;  %v556_v5 = vor.u32 %v555_v59, %v551_v58  ;;  %v561_v6 = vrot.slane %v559_v60, 5  ;;  %v218_v43 = vld [vmem:[%s5111_s30 + $0x70] sm:$0xf] }
  0x1f   : > { %4348 = vmatmul.msk.bf16.vlgmr.msra.gmra.mxu1 %vm685_vm4, %v673_v62  ;;  %v654_v7 = vunpack.c.l.b16 %v466_v3  ;;  %v547_v8 = vrot.slane %v546_v0, 4  ;;  %v261_v12 = vshll.u32 %v5136_v1, 16  ;;  %v265_v13 = vshrl.u32 %v5136_v1, 16  ;;  %v226_v3 = vld [vmem:[%s5111_s30 + $0xa0] sm:$0xf] }
  0x20   : > { %v557_v11 = vrot.slane %v556_v5, 4  ;;  %v271_v14 = vshll.u32 %v5139_v2, 16  ;;  %v254_v17 = vrot.slane %v252_v9, 4  ;;  %v257_v18 = vrot.slane %v255_v10, 5 }
  0x21   : > { %v677_v15 = vpack.c.b16 %v654_v7, %v653_v4  ;;  %v552_v16 = vsel %vm5123_vm3, %v547_v8, %v551_v58  ;;  %v263_v23 = vrot.slane %v261_v12, 5  ;;  %v267_v24 = vrot.slane %v265_v13, 4  ;;  %v245_v8 = vld [vmem:[%s5111_s30 + $0xa4] sm:$0x1] }
  0x22   : > { %v562_v21 = vsel %vm5123_vm3, %v557_v11, %v561_v6  ;;  %v661_v22 = vunpack.c.l.b16 %v552_v16  ;;  %v258_v27 = vor.u32 %v257_v18, %v254_v17  ;;  %v273_v28 = vrot.slane %v271_v14, 5 }
  0x23   : > { %4352 = vmatmul.msk.bf16.vlgmr.msra.gmra.mxu2 %vm685_vm4, %v677_v15  ;;  %v662_v26 = vunpack.c.l.b16 %v562_v21  ;;  %v268_v29 = vor.u32 %v267_v24, %v263_v23  ;;  %v372_v30 = vshrl.u32 %v209_v19, 16  ;;  %v375_v31 = vshll.u32 %v209_v19, 16 }
  0x24   : > { %v381_v32 = vshll.u32 %v5151_v20, 16  ;;  %v259_v35 = vrot.slane %v258_v27, 4  ;;  %v385_v37 = vshrl.u32 %v5151_v20, 16  ;;  %v391_v38 = vshll.u32 %v5156_v25, 16 }
  0x25   : > { %v681_v34 = vpack.c.b16 %v662_v26, %v661_v22  ;;  %v269_v39 = vrot.slane %v268_v29, 4  ;;  %v374_v40 = vrot.slane %v372_v30, 4  ;;  %v377_v41 = vrot.slane %v375_v31, 5  ;;  %v201_v22 = vld [vmem:[%s5111_s30 + $0xc] sm:$0xf] }
  0x26   : > { %v383_v42 = vrot.slane %v381_v32, 5  ;;  %v264_v44 = vsel %vm5123_vm3, %v259_v35, %v263_v23  ;;  %v387_v45 = vrot.slane %v385_v37, 4  ;;  %v393_v46 = vrot.slane %v391_v38, 5  ;;  %v5185_v32 = vld [vmem:[%s5111_s30 + $0x14] sm:$0x1] }
  0x27   : > { %4356 = vmatmul.msk.bf16.vlgmr.msra.gmra.mxu3 %vm685_vm4, %v681_v34  ;;  %v468_v48 = vshrl.u32 %v217_v33, 16  ;;  %v274_v49 = vsel %vm5123_vm3, %v269_v39, %v273_v28  ;;  %v637_v50 = vunpack.c.l.b16 %v264_v44  ;;  %v378_v51 = vor.u32 %v377_v41, %v374_v40  ;;  %v5182_v28 = vld [vmem:[%s5111_s30 + $0x10] sm:$0xf] }
  0x28   : > { %v471_v52 = vshll.u32 %v217_v33, 16  ;;  %v638_v53 = vunpack.c.l.b16 %v274_v49  ;;  %v388_v54 = vor.u32 %v387_v45, %v383_v42  ;;  %v477_v56 = vshll.u32 %v218_v43, 16 }
  0x29   : > { %v470_v55 = vrot.slane %v468_v48, 4  ;;  %v379_v57 = vrot.slane %v378_v51, 4  ;;  %v481_v59 = vshrl.u32 %v218_v43, 16  ;;  %v487_v60 = vshll.u32 %v241_v47, 16  ;;  %v5195_v47 = vld [vmem:[%s5111_s30 + $0x4c] sm:$0xf] }
  0x2a   : > { %v473_v58 = vrot.slane %v471_v52, 5  ;;  %v669_v62 = vpack.c.b16 %v638_v53, %v637_v50  ;;  %v389_v63 = vrot.slane %v388_v54, 4  ;;  %v479_v0 = vrot.slane %v477_v56, 5  ;;  %v5200_v56 = vld [vmem:[%s5111_s30 + $0x50] sm:$0x1] }
  0x2b   : > { %v384_v4 = vsel %vm5123_vm3, %v379_v57, %v383_v42  ;;  %v483_v6 = vrot.slane %v481_v59, 4  ;;  %v489_v7 = vrot.slane %v487_v60, 5  ;;  %v564_v11 = vshrl.u32 %v225_v61, 16  ;;  %v211_v42 = vld [vmem:[%s5111_s30 + $0x48] sm:$0xf] }
  0x2c   : > { %v474_v5 = vor.u32 %v473_v58, %v470_v55  ;;  %4344 = vmatmul.msk.bf16.vlgmr.msra.gmra.mxu0 %vm685_vm4, %v669_v62  ;;  %v394_v9 = vsel %vm5123_vm3, %v389_v63, %v393_v46  ;;  %v647_v10 = vunpack.c.l.b16 %v384_v4  ;;  %v567_v12 = vshll.u32 %v225_v61, 16 }
  0x2d   : > { %v648_v13 = vunpack.c.l.b16 %v394_v9  ;;  %v484_v15 = vor.u32 %v483_v6, %v479_v0  ;;  %v573_v16 = vshll.u32 %v226_v3, 16  ;;  %v566_v17 = vrot.slane %v564_v11, 4 }
  0x2e   : > { %v475_v14 = vrot.slane %v474_v5, 4  ;;  %v569_v18 = vrot.slane %v567_v12, 5  ;;  %v577_v19 = vshrl.u32 %v226_v3, 16  ;;  %v583_v21 = vshll.u32 %v245_v8, 16  ;;  %v219_v3 = vld [vmem:[%s5111_s30 + $0x78] sm:$0xf] }
  0x2f   : > { %v674_v23 = vpack.c.b16 %v648_v13, %v647_v10  ;;  %v485_v26 = vrot.slane %v484_v15, 4  ;;  %v575_v27 = vrot.slane %v573_v16, 5  ;;  %v276_v35 = vshrl.u32 %v201_v22, 16  ;;  %v220_v8 = vld [vmem:[%s5111_s30 + $0x7c] sm:$0xf] }
  0x30   : > { %v480_v24 = vsel %vm5123_vm3, %v475_v14, %v479_v0  ;;  %v570_v30 = vor.u32 %v569_v18, %v566_v17  ;;  %v579_v31 = vrot.slane %v577_v19, 4  ;;  %v585_v34 = vrot.slane %v583_v21, 5  ;;  %v242_v16 = vld [vmem:[%s5111_s30 + $0x80] sm:$0x1] }
  0x31   : > { %v655_v29 = vunpack.c.l.b16 %v480_v24  ;;  %4349 = vmatmul.msk.bf16.gmra.mxu1 %vm685_vm4, %v674_v23  ;;  %v490_v33 = vsel %vm5123_vm3, %v485_v26, %v489_v7  ;;  %v279_v37 = vshll.u32 %v201_v22, 16  ;;  %v285_v41 = vshll.u32 %v5182_v28, 16 }
  0x32   : > { %v656_v38 = vunpack.c.l.b16 %v490_v33  ;;  %v571_v39 = vrot.slane %v570_v30, 4  ;;  %v580_v40 = vor.u32 %v579_v31, %v575_v27  ;;  %v278_v43 = vrot.slane %v276_v35, 4 }
  0x33   : > { %v281_v44 = vrot.slane %v279_v37, 5  ;;  %v289_v45 = vshrl.u32 %v5182_v28, 16  ;;  %v295_v46 = vshll.u32 %v5185_v32, 16  ;;  %v287_v51 = vrot.slane %v285_v41, 5 }
  0x34   : > { %v678_v48 = vpack.c.b16 %v656_v38, %v655_v29  ;;  %v576_v49 = vsel %vm5123_vm3, %v571_v39, %v575_v27  ;;  %v581_v50 = vrot.slane %v580_v40, 4  ;;  %v396_v58 = vshrl.u32 %v211_v42, 16  ;;  %v228_v39 = vld [vmem:[%s5111_s30 + $0xac] sm:$0xf]  ;;  %v246_v40 = vld [vmem:[%s5111_s30 + $0xb0] sm:$0x1] }
  0x35   : > { %v663_v52 = vunpack.c.l.b16 %v576_v49  ;;  %v282_v53 = vor.u32 %v281_v44, %v278_v43  ;;  %v291_v54 = vrot.slane %v289_v45, 4  ;;  %v297_v55 = vrot.slane %v295_v46, 5 }
  0x36   : > { %4353 = vmatmul.msk.bf16.gmra.mxu2 %vm685_vm4, %v678_v48  ;;  %v586_v57 = vsel %vm5123_vm3, %v581_v50, %v585_v34  ;;  %v399_v59 = vshll.u32 %v211_v42, 16  ;;  %v405_v60 = vshll.u32 %v5195_v47, 16  ;;  %v409_v0 = vshrl.u32 %v5195_v47, 16  ;;  %v227_v34 = vld [vmem:[%s5111_s30 + $0xa8] sm:$0xf] }
  0x37   : > { %v664_v61 = vunpack.c.l.b16 %v586_v57  ;;  %v283_v62 = vrot.slane %v282_v53, 4  ;;  %v292_v63 = vor.u32 %v291_v54, %v287_v51  ;;  %v398_v4 = vrot.slane %v396_v58, 4 }
  0x38   : > { %v401_v5 = vrot.slane %v399_v59, 5  ;;  %v407_v6 = vrot.slane %v405_v60, 5  ;;  %v415_v7 = vshll.u32 %v5200_v56, 16  ;;  %v411_v12 = vrot.slane %v409_v0, 4  ;;  %v203_v59 = vld [vmem:[%s5111_s30 + $0x18] sm:$0xf] }
  0x39   : > { %v682_v9 = vpack.c.b16 %v664_v61, %v663_v52  ;;  %v288_v10 = vsel %vm5123_vm3, %v283_v62, %v287_v51  ;;  %v293_v11 = vrot.slane %v292_v63, 4  ;;  %v492_v17 = vshrl.u32 %v219_v3, 16  ;;  %v5228_v63 = vld [vmem:[%s5111_s30 + $0x1c] sm:$0xf]  ;;  %v5231_v0 = vld [vmem:[%s5111_s30 + $0x20] sm:$0x1] }
  0x3a   : > { %v639_v13 = vunpack.c.l.b16 %v288_v10  ;;  %v402_v14 = vor.u32 %v401_v5, %v398_v4  ;;  %v417_v15 = vrot.slane %v415_v7, 5  ;;  %v412_v19 = vor.u32 %v411_v12, %v407_v6 }
  0x3b   : > { %4357 = vmatmul.msk.bf16.gmra.mxu3 %vm685_vm4, %v682_v9  ;;  %v298_v18 = vsel %vm5123_vm3, %v293_v11, %v297_v55  ;;  %v495_v21 = vshll.u32 %v219_v3, 16  ;;  %v501_v22 = vshll.u32 %v220_v8, 16  ;;  %v494_v26 = vrot.slane %v492_v17, 4 }
  0x3c   : > { %v640_v23 = vunpack.c.l.b16 %v298_v18  ;;  %v403_v24 = vrot.slane %v402_v14, 4  ;;  %v505_v27 = vshrl.u32 %v220_v8, 16  ;;  %v413_v29 = vrot.slane %v412_v19, 4 }
  0x3d   : > { %v497_v30 = vrot.slane %v495_v21, 5  ;;  %v503_v31 = vrot.slane %v501_v22, 5  ;;  %v511_v33 = vshll.u32 %v242_v16, 16  ;;  %v588_v48 = vshrl.u32 %v227_v34, 16  ;;  %v5241_v21 = vld [vmem:[%s5111_s30 + $0x58] sm:$0xf] }
  0x3e   : > { %v670_v35 = vpack.c.b16 %v640_v23, %v639_v13  ;;  %v408_v37 = vsel %vm5123_vm3, %v403_v24, %v407_v6  ;;  %v507_v38 = vrot.slane %v505_v27, 4  ;;  %v418_v41 = vsel %vm5123_vm3, %v413_v29, %v417_v15  ;;  %v213_v15 = vld [vmem:[%s5111_s30 + $0x54] sm:$0xf]  ;;  %v5246_v27 = vld [vmem:[%s5111_s30 + $0x5c] sm:$0x1] }
  0x3f   : > { %v649_v42 = vunpack.c.l.b16 %v408_v37  ;;  %v498_v43 = vor.u32 %v497_v30, %v494_v26  ;;  %v513_v44 = vrot.slane %v511_v33, 5  ;;  %v650_v45 = vunpack.c.l.b16 %v418_v41 }
  0x40   : > { %4345 = vmatmul.msk.bf16.gmra.mxu0 %vm685_vm4, %v670_v35  ;;  %v508_v46 = vor.u32 %v507_v38, %v503_v31  ;;  %v591_v49 = vshll.u32 %v227_v34, 16  ;;  %v597_v51 = vshll.u32 %v228_v39, 16  ;;  %v601_v52 = vshrl.u32 %v228_v39, 16  ;;  %v221_v39 = vld [vmem:[%s5111_s30 + $0x84] sm:$0xf] }
  0x41   : > { %v499_v50 = vrot.slane %v498_v43, 4  ;;  %v607_v53 = vshll.u32 %v246_v40, 16  ;;  %v675_v54 = vpack.c.b16 %v650_v45, %v649_v42  ;;  %v590_v57 = vrot.slane %v588_v48, 4 }
  0x42   : > { %v509_v55 = vrot.slane %v508_v46, 4  ;;  %v593_v58 = vrot.slane %v591_v49, 5  ;;  %v599_v61 = vrot.slane %v597_v51, 5  ;;  %v603_v62 = vrot.slane %v601_v52, 4  ;;  %v222_v49 = vld [vmem:[%s5111_s30 + $0x88] sm:$0xf] }
  0x43   : > { %v504_v60 = vsel %vm5123_vm3, %v499_v50, %v503_v31  ;;  %4350 = vmatmul.msk.bf16.gmra.mxu1 %vm685_vm4, %v675_v54  ;;  %v609_v6 = vrot.slane %v607_v53, 5  ;;  %v300_v9 = vshrl.u32 %v203_v59, 16  ;;  %v303_v10 = vshll.u32 %v203_v59, 16  ;;  %v243_v53 = vld [vmem:[%s5111_s30 + $0x8c] sm:$0x1] }
  0x44   : > { %v514_v3 = vsel %vm5123_vm3, %v509_v55, %v513_v44  ;;  %v657_v4 = vunpack.c.l.b16 %v504_v60  ;;  %v594_v5 = vor.u32 %v593_v58, %v590_v57  ;;  %v604_v8 = vor.u32 %v603_v62, %v599_v61 }
  0x45   : > { %v658_v7 = vunpack.c.l.b16 %v514_v3  ;;  %v309_v12 = vshll.u32 %v5228_v63, 16  ;;  %v313_v13 = vshrl.u32 %v5228_v63, 16  ;;  %v319_v14 = vshll.u32 %v5231_v0, 16 }
  0x46   : > { %v595_v11 = vrot.slane %v594_v5, 4  ;;  %v605_v17 = vrot.slane %v604_v8, 4  ;;  %v302_v18 = vrot.slane %v300_v9, 4  ;;  %v305_v19 = vrot.slane %v303_v10, 5  ;;  %v229_v8 = vld [vmem:[%s5111_s30 + $0xb4] sm:$0xf] }
  0x47   : > { %v679_v16 = vpack.c.b16 %v658_v7, %v657_v4  ;;  %v311_v23 = vrot.slane %v309_v12, 5  ;;  %v315_v24 = vrot.slane %v313_v13, 4  ;;  %v321_v26 = vrot.slane %v319_v14, 5  ;;  %v230_v12 = vld [vmem:[%s5111_s30 + $0xb8] sm:$0xf] }
  0x48   : > { %v600_v22 = vsel %vm5123_vm3, %v595_v11, %v599_v61  ;;  %v610_v29 = vsel %vm5123_vm3, %v605_v17, %v609_v6  ;;  %v306_v31 = vor.u32 %v305_v19, %v302_v18  ;;  %v420_v33 = vshrl.u32 %v213_v15, 16  ;;  %v247_v17 = vld [vmem:[%s5111_s30 + $0xbc] sm:$0x1] }
  0x49   : > { %4354 = vmatmul.msk.bf16.gmra.mxu2 %vm685_vm4, %v679_v16  ;;  %v665_v30 = vunpack.c.l.b16 %v600_v22  ;;  %v666_v34 = vunpack.c.l.b16 %v610_v29  ;;  %v316_v35 = vor.u32 %v315_v24, %v311_v23  ;;  %v423_v37 = vshll.u32 %v213_v15, 16 }
  0x4a   : > { %v429_v38 = vshll.u32 %v5241_v21, 16  ;;  %v307_v40 = vrot.slane %v306_v31, 4  ;;  %v422_v41 = vrot.slane %v420_v33, 4  ;;  %v433_v42 = vshrl.u32 %v5241_v21, 16 }
  0x4b   : > { %v439_v43 = vshll.u32 %v5246_v27, 16  ;;  %v683_v44 = vpack.c.b16 %v666_v34, %v665_v30  ;;  %v317_v45 = vrot.slane %v316_v35, 4  ;;  %v425_v46 = vrot.slane %v423_v37, 5  ;;  %v205_v37 = vld [vmem:[%s5111_s30 + $0x24] sm:$0xf] }
  0x4c   : > { %v431_v48 = vrot.slane %v429_v38, 5  ;;  %v312_v50 = vsel %vm5123_vm3, %v307_v40, %v311_v23  ;;  %v435_v51 = vrot.slane %v433_v42, 4  ;;  %v516_v54 = vshrl.u32 %v221_v39, 16  ;;  %v5274_v42 = vld [vmem:[%s5111_s30 + $0x28] sm:$0xf] }
  0x4d   : > { %v441_v52 = vrot.slane %v439_v43, 5  ;;  %4358 = vmatmul.msk.bf16.gmra.mxu3 %vm685_vm4, %v683_v44  ;;  %v322_v55 = vsel %vm5123_vm3, %v317_v45, %v321_v26  ;;  %v641_v57 = vunpack.c.l.b16 %v312_v50  ;;  %v426_v58 = vor.u32 %v425_v46, %v422_v41 }
  0x4e   : > { %v519_v59 = vshll.u32 %v221_v39, 16  ;;  %v642_v60 = vunpack.c.l.b16 %v322_v55  ;;  %v436_v61 = vor.u32 %v435_v51, %v431_v48  ;;  %v518_v62 = vrot.slane %v516_v54, 4 }
  0x4f   : > { %v525_v3 = vshll.u32 %v222_v49, 16  ;;  %v427_v4 = vrot.slane %v426_v58, 4  ;;  %v529_v6 = vshrl.u32 %v222_v49, 16  ;;  %v535_v7 = vshll.u32 %v243_v53, 16 }
  0x50   : > { %v521_v5 = vrot.slane %v519_v59, 5  ;;  %v671_v9 = vpack.c.b16 %v642_v60, %v641_v57  ;;  %v437_v10 = vrot.slane %v436_v61, 4  ;;  %v612_v22 = vshrl.u32 %v229_v8, 16  ;;  %v1047_v61 = vld [vmem:[%s5111_s30] sm:$0xe] }
  0x51   : > { %v527_v11 = vrot.slane %v525_v3, 5  ;;  %v432_v13 = vsel %vm5123_vm3, %v427_v4, %v431_v48  ;;  %v531_v15 = vrot.slane %v529_v6, 4  ;;  %v537_v16 = vrot.slane %v535_v7, 5  ;;  %v5278_v48 = vld [vmem:[%s5111_s30 + $0x2c] sm:$0x1] }
  0x52   : > { %v522_v14 = vor.u32 %v521_v5, %v518_v62  ;;  %4346 = vmatmul.msk.bf16.gmra.mxu0 %vm685_vm4, %v671_v9  ;;  %v442_v18 = vsel %vm5123_vm3, %v437_v10, %v441_v52  ;;  %v651_v19 = vunpack.c.l.b16 %v432_v13  ;;  %v615_v23 = vshll.u32 %v229_v8, 16  ;;  %v4586_v6 = vld [vmem:[%s5111_s30 + $0xc] sm:$0xf] }
  0x53   : > { %v652_v24 = vunpack.c.l.b16 %v442_v18  ;;  %v532_v29 = vor.u32 %v531_v15, %v527_v11  ;;  %v621_v30 = vshll.u32 %v230_v12, 16  ;;  %v614_v31 = vrot.slane %v612_v22, 4 }
  0x54   : > { %v523_v26 = vrot.slane %v522_v14, 4  ;;  %v617_v33 = vrot.slane %v615_v23, 5  ;;  %v625_v34 = vshrl.u32 %v230_v12, 16  ;;  %v631_v35 = vshll.u32 %v247_v17, 16  ;;  %v4587_v12 = vld [vmem:[%s5111_s30 + $0x10] sm:$0xf] }
  0x55   : > { %v676_v38 = vpack.c.b16 %v652_v24, %v651_v19  ;;  %v533_v40 = vrot.slane %v532_v29, 4  ;;  %v623_v41 = vrot.slane %v621_v30, 5  ;;  %v1103_v43 = vrot.slane %v5139_v2, 5 }
  0x56   : > { %v528_v39 = vsel %vm5123_vm3, %v523_v26, %v527_v11  ;;  %v618_v45 = vor.u32 %v617_v33, %v614_v31  ;;  %v627_v46 = vrot.slane %v625_v34, 4  ;;  %v633_v50 = vrot.slane %v631_v35, 5  ;;  %v4732_v11 = vld [vmem:[%s6463_s1 + $0x18] sm:$0xf] }
  0x57   : > { %v659_v44 = vunpack.c.l.b16 %v528_v39  ;;  %4351 = vmatmul.msk.bf16.gmra.mxu1 %vm685_vm4, %v676_v38  ;;  %v538_v49 = vsel %vm5123_vm3, %v533_v40, %v537_v16  ;;  %v324_v51 = vshrl.u32 %v205_v37, 16  ;;  %v327_v52 = vshll.u32 %v205_v37, 16  ;;  %v4588_v38 = vld [vmem:[%s5111_s30 + $0x14] sm:$0x1] }
  0x58   : > { %v660_v53 = vunpack.c.l.b16 %v538_v49  ;;  %v619_v54 = vrot.slane %v618_v45, 4  ;;  %v628_v55 = vor.u32 %v627_v46, %v623_v41  ;;  %v333_v2 = vshll.u32 %v5274_v42, 16  ;;  %v4861_v45 = vld [vmem:[%s6463_s1 + $0x1c] sm:$0xf] }
  0x59   : > { %v326_v57 = vrot.slane %v324_v51, 4  ;;  %v329_v58 = vrot.slane %v327_v52, 5  ;;  %v337_v59 = vshrl.u32 %v5274_v42, 16  ;;  %v343_v60 = vshll.u32 %v5278_v48, 16  ;;  %v4930_v51 = vld [vmem:[%s5111_s30] sm:$0xff] }
  0x5a   : > { %v680_v62 = vpack.c.b16 %v660_v53, %v659_v44  ;;  %v624_v3 = vsel %vm5123_vm3, %v619_v54, %v623_v41  ;;  %v629_v4 = vrot.slane %v628_v55, 4  ;;  %v335_v5 = vrot.slane %v333_v2, 5  ;;  %v4910_v2 = vld [vmem:[%s6463_s1 + $0x20] sm:$0xf] }
  0x5b   : > { %v667_v7 = vunpack.c.l.b16 %v624_v3  ;;  %v330_v8 = vor.u32 %v329_v58, %v326_v57  ;;  %v339_v9 = vrot.slane %v337_v59, 4  ;;  %v345_v10 = vrot.slane %v343_v60, 5 }
  0x5c   : > { %4355 = vmatmul.msk.bf16.gmra.mxu2 %vm685_vm4, %v680_v62  ;;  %v634_v13 = vsel %vm5123_vm3, %v629_v4, %v633_v50  ;;  %v4440_v14 = vrot.slane %v1047_v61, 9  ;;  %v1100_v19 = vrot.slane %v5136_v1, 5  ;;  %v2935_v22 = vsel %vm734_vm0, %v4732_v11, 0  ;;  %v4683_v50 = vld [vmem:[%s6463_s1 + $0x14] sm:$0xf] }
  0x5d   : > { %v668_v15 = vunpack.c.l.b16 %v634_v13  ;;  %v331_v16 = vrot.slane %v330_v8, 4  ;;  %v340_v17 = vor.u32 %v339_v9, %v335_v5  ;;  %v1768_v23 = vshrl.u32 %v4586_v6, 16  ;;  %2944 = vmatpush.bf16.msra.mxu2 %v2935_v22  ;;  %v1048_v8 = vld [vmem:[%s5111_s30 + $0xc] sm:$0xe] }
  0x5e   : > { %v1771_v24 = vshll.u32 %v4586_v6, 16  ;;  %v1777_v26 = vshll.u32 %v4587_v12, 16  ;;  %v1101_v33 = vsel %vm5297_vm7, %v4440_v14, %v1100_v19  ;;  %v1102_v35 = vrot.slane %v1100_v19, 4  ;;  %v4590_v6 = vld [vmem:[%s5111_s30 + $0x1c] sm:$0xf] }
  0x5f   : > { %v684_v29 = vpack.c.b16 %v668_v15, %v667_v7  ;;  %v336_v30 = vsel %vm5123_vm3, %v331_v16, %v335_v5  ;;  %v341_v31 = vrot.slane %v340_v17, 4  ;;  %v1212_v37 = vunpack.c.l.b16 %v1101_v33  ;;  %v4589_v5 = vld [vmem:[%s5111_s30 + $0x18] sm:$0xf]  ;;  %v4946_v15 = vld [vmem:[%s5111_s30 + $0xc] sm:$0xff] }
  0x60   : > { %v643_v34 = vunpack.c.l.b16 %v336_v30  ;;  %v1770_v1 = vrot.slane %v1768_v23, 4  ;;  %v1773_v40 = vrot.slane %v1771_v24, 5  ;;  %v1779_v41 = vrot.slane %v1777_v26, 5  ;;  %v4591_v30 = vld [vmem:[%s5111_s30 + $0x20] sm:$0x1] }
  0x61   : > { %4359 = vmatmul.msk.bf16.gmra.mxu3 %vm685_vm4, %v684_v29  ;;  %v346_v39 = vsel %vm5123_vm3, %v341_v31, %v345_v10  ;;  %v1781_v44 = vshrl.u32 %v4587_v12, 16  ;;  %v1104_v49 = vsel %vm5297_vm7, %v1102_v35, %v1103_v43  ;;  %v1787_v55 = vshll.u32 %v4588_v38, 16 }
  0x62   : > { %v644_v46 = vunpack.c.l.b16 %v346_v39  ;;  %v1213_v52 = vunpack.c.l.b16 %v1104_v49  ;;  %v1774_v53 = vor.u32 %v1773_v40, %v1770_v1  ;;  %v3589_v58 = vsel %vm734_vm0, %v4861_v45, 0  ;;  %v4592_v45 = vld [vmem:[%s5111_s30 + $0x24] sm:$0xf]  ;;  %v4593_v49 = vld [vmem:[%s5111_s30 + $0x28] sm:$0xf] }
  0x63   : > { %v1783_v54 = vrot.slane %v1781_v44, 4  ;;  %3598 = vmatpush.bf16.msra.mxu3 %v3589_v58  ;;  %v2648_v60 = vsel %vm734_vm0, %v4683_v50, 0  ;;  %v3987_v61 = vsel %vm734_vm0, %v4910_v2, 0  ;;  %v1789_v4 = vrot.slane %v1787_v55, 5  ;;  %v4947_v58 = vld [vmem:[%s5111_s30 + $0x18] sm:$0xff] }
  0x64   : > { %v672_v57 = vpack.c.b16 %v644_v46, %v643_v34  ;;  %v1244_v43 = vpack.c.b16 %v1213_v52, %v1212_v37  ;;  %2657 = vmatpush.bf16.msra.mxu1 %v2648_v60  ;;  %v1775_v62 = vrot.slane %v1774_v53, 4  ;;  %3996 = vmatpush.bf16.msra.mxu0 %v3987_v61  ;;  %v1107_v7 = vrot.slane %v5182_v28, 5  ;;  %v1049_v52 = vld [vmem:[%s5111_s30 + $0x18] sm:$0xe] }
  0x65   : > { %v1784_v59 = vor.u32 %v1783_v54, %v1779_v41  ;;  %v1792_v9 = vshrl.u32 %v4589_v5, 16  ;;  %v1795_v10 = vshll.u32 %v4589_v5, 16  ;;  %v1801_v13 = vshll.u32 %v4590_v6, 16 }
  0x66   : > { %4347 = vmatmul.msk.bf16.gmra.mxu0 %vm685_vm4, %v672_v57  ;;  %v1780_v11 = vsel %vm5123_vm3, %v1775_v62, %v1779_v41  ;;  %v1805_v14 = vshrl.u32 %v4590_v6, 16  ;;  %v4441_v16 = vrot.slane %v1048_v8, 9  ;;  %v1109_v17 = vrot.slane %v1107_v7, 4  ;;  %v4594_v6 = vld [vmem:[%s5111_s30 + $0x2c] sm:$0x1] }
  0x67   : > { %4424 = vmatmul.msk.bf16.vlgmr.msrb.gmra.mxu1 %vm685_vm4, %v4930_v51  ;;  %v1785_v3 = vrot.slane %v1784_v59, 4  ;;  %v1110_v28 = vrot.slane %v5185_v32, 5  ;;  %v2153_v19 = vunpack.c.l.b16 %v1780_v11  ;;  %v1794_v23 = vrot.slane %v1792_v9, 4  ;;  %v4931_v32 = vld [vmem:[%s5111_s30 + $0xc] sm:$0xff] }
  0x68   : > { %v1797_v24 = vrot.slane %v1795_v10, 5  ;;  %v1803_v26 = vrot.slane %v1801_v13, 5  ;;  %v1807_v29 = vrot.slane %v1805_v14, 4  ;;  %v1108_v31 = vsel %vm5297_vm7, %v4441_v16, %v1107_v7  ;;  %v4596_v16 = vld [vmem:[%s5111_s30 + $0x34] sm:$0xf] }
  0x69   : > { %v1790_v12 = vsel %vm5123_vm3, %v1785_v3, %v1789_v4  ;;  %v1111_v33 = vsel %vm5297_vm7, %v1109_v17, %v1110_v28  ;;  %v1811_v38 = vshll.u32 %v4591_v30, 16  ;;  %v1214_v1 = vunpack.c.l.b16 %v1108_v31 }
  0x6a   : > { %v2154_v22 = vunpack.c.l.b16 %v1790_v12  ;;  %v1798_v35 = vor.u32 %v1797_v24, %v1794_v23  ;;  %v1808_v37 = vor.u32 %v1807_v29, %v1803_v26  ;;  %v1215_v39 = vunpack.c.l.b16 %v1111_v33  ;;  %v1050_v24 = vld [vmem:[%s5111_s30 + $0x24] sm:$0xe] }
  0x6b   : > { %v1813_v44 = vrot.slane %v1811_v38, 5  ;;  %v1114_v50 = vrot.slane %v5228_v63, 5  ;;  %v1816_v53 = vshrl.u32 %v4592_v45, 16  ;;  %v1819_v55 = vshll.u32 %v4592_v45, 16  ;;  %v4597_v45 = vld [vmem:[%s5111_s30 + $0x38] sm:$0x1] }
  0x6c   : > { %4457 = vmatmul.msk.bf16.vlgmr.msrb.gmra.mxu2 %vm685_vm4, %v1244_v43  ;;  %v2185_v34 = vpack.c.b16 %v2154_v22, %v2153_v19  ;;  %v1799_v40 = vrot.slane %v1798_v35, 4  ;;  %v1809_v41 = vrot.slane %v1808_v37, 4  ;;  %v1245_v46 = vpack.c.b16 %v1215_v39, %v1214_v1 }
  0x6d   : > { %v1825_v2 = vshll.u32 %v4593_v49, 16  ;;  %v1829_v57 = vshrl.u32 %v4593_v49, 16  ;;  %v4442_v43 = vrot.slane %v1049_v52, 9  ;;  %v1116_v59 = vrot.slane %v1114_v50, 4 }
  0x6e   : > { %v1804_v51 = vsel %vm5123_vm3, %v1799_v40, %v1803_v26  ;;  %v1814_v54 = vsel %vm5123_vm3, %v1809_v41, %v1813_v44  ;;  %v1117_v63 = vrot.slane %v5231_v0, 5  ;;  %v1818_v62 = vrot.slane %v1816_v53, 4  ;;  %v4932_v0 = vld [vmem:[%s5111_s30 + $0x18] sm:$0xff]  ;;  %v4933_v53 = vld [vmem:[%s5111_s30 + $0x24] sm:$0xff] }
  0x6f   : > { %v2155_v60 = vunpack.c.l.b16 %v1804_v51  ;;  %v2156_v61 = vunpack.c.l.b16 %v1814_v54  ;;  %v1821_v3 = vrot.slane %v1819_v55, 5  ;;  %v1827_v4 = vrot.slane %v1825_v2, 5 }
  0x70   : > { %v1831_v5 = vrot.slane %v1829_v57, 4  ;;  %v1115_v7 = vsel %vm5297_vm7, %v4442_v43, %v1114_v50  ;;  %v1118_v8 = vsel %vm5297_vm7, %v1116_v59, %v1117_v63  ;;  %v1835_v12 = vshll.u32 %v4594_v6, 16  ;;  %v4598_v43 = vld [vmem:[%s5111_s30 + $0x3c] sm:$0xf]  ;;  %v4599_v59 = vld [vmem:[%s5111_s30 + $0x40] sm:$0xf] }
  0x71   : > { %4570 = vmatmul.msk.bf16.vlgmr.msrb.gmra.mxu3 %vm685_vm4, %v4946_v15  ;;  %v2186_v9 = vpack.c.b16 %v2156_v61, %v2155_v60  ;;  %v1822_v10 = vor.u32 %v1821_v3, %v1818_v62  ;;  %v1216_v13 = vunpack.c.l.b16 %v1115_v7  ;;  %v1217_v14 = vunpack.c.l.b16 %v1118_v8  ;;  %v4595_v15 = vld [vmem:[%s5111_s30 + $0x30] sm:$0xf]  ;;  %v4992_v62 = vld [vmem:[%s5111_s30 + $0x34] sm:$0xf] }
  0x72   : > { %v1832_v11 = vor.u32 %v1831_v5, %v1827_v4  ;;  %v1837_v19 = vrot.slane %v1835_v12, 5  ;;  %v1121_v23 = vrot.slane %v5274_v42, 5  ;;  %v1840_v26 = vshrl.u32 %v4595_v15, 16  ;;  %v4948_v42 = vld [vmem:[%s5111_s30 + $0x24] sm:$0xff]  ;;  %v1051_v5 = vld [vmem:[%s5111_s30 + $0x30] sm:$0xe] }
  0x73   : > { %v1823_v17 = vrot.slane %v1822_v10, 4  ;;  %v1246_v22 = vpack.c.b16 %v1217_v14, %v1216_v13  ;;  %v1843_v29 = vshll.u32 %v4595_v15, 16  ;;  %v1849_v30 = vshll.u32 %v4596_v16, 16  ;;  %v4949_v10 = vld [vmem:[%s5111_s30 + $0x30] sm:$0xff]  ;;  %v4993_v14 = vld [vmem:[%s5111_s30 + $0x38] sm:$0x1] }
  0x74   : > { %v1833_v28 = vrot.slane %v1832_v11, 4  ;;  %v1853_v31 = vshrl.u32 %v4596_v16, 16  ;;  %v4443_v35 = vrot.slane %v1050_v24, 9  ;;  %v1124_v37 = vrot.slane %v5278_v48, 5 }
  0x75   : > { %v1828_v33 = vsel %vm5123_vm3, %v1823_v17, %v1827_v4  ;;  %v1842_v38 = vrot.slane %v1840_v26, 4  ;;  %v1845_v1 = vrot.slane %v1843_v29, 5  ;;  %v1851_v39 = vrot.slane %v1849_v30, 5 }
  0x76   : > { %4635 = vmatmul.msk.bf16.vlgmr.msrb.gmra.mxu0 %vm685_vm4, %v2185_v34  ;;  %v1838_v34 = vsel %vm5123_vm3, %v1833_v28, %v1837_v19  ;;  %v1855_v40 = vrot.slane %v1853_v31, 4  ;;  %v2157_v41 = vunpack.c.l.b16 %v1828_v33  ;;  %v1859_v51 = vshll.u32 %v4597_v45, 16  ;;  %v4934_v33 = vld [vmem:[%s5111_s30 + $0x30] sm:$0xff] }
  0x77   : > { %4425 = vmatmul.msk.bf16.gmra.mxu1 %vm685_vm4, %v4931_v32  ;;  %v1123_v32 = vrot.slane %v1121_v23, 4  ;;  %v2158_v44 = vunpack.c.l.b16 %v1838_v34  ;;  %v1846_v48 = vor.u32 %v1845_v1, %v1842_v38  ;;  %v1128_v3 = vrot.slane %v4992_v62, 5 }
  0x78   : > { %v1856_v50 = vor.u32 %v1855_v40, %v1851_v39  ;;  %v1864_v6 = vshrl.u32 %v4598_v43, 16  ;;  %v1867_v7 = vshll.u32 %v4598_v43, 16  ;;  %v1873_v8 = vshll.u32 %v4599_v59, 16 }
  0x79   : > { %v1125_v49 = vsel %vm5297_vm7, %v1123_v32, %v1124_v37  ;;  %v2187_v52 = vpack.c.b16 %v2158_v44, %v2157_v41  ;;  %v1847_v2 = vrot.slane %v1846_v48, 4  ;;  %v4444_v12 = vrot.slane %v1051_v5, 9  ;;  %v4601_v41 = vld [vmem:[%s5111_s30 + $0x48] sm:$0xf]  ;;  %v4602_v44 = vld [vmem:[%s5111_s30 + $0x4c] sm:$0xf] }
  0x7a   : > { %v1219_v55 = vunpack.c.l.b16 %v1125_v49  ;;  %v1857_v57 = vrot.slane %v1856_v50, 4  ;;  %v1130_v13 = vrot.slane %v1128_v3, 4  ;;  %v1131_v15 = vrot.slane %v4993_v14, 5  ;;  %v1052_v50 = vld [vmem:[%s5111_s30 + $0x3c] sm:$0xe] }
  0x7b   : > { %v1852_v60 = vsel %vm5123_vm3, %v1847_v2, %v1851_v39  ;;  %v1866_v16 = vrot.slane %v1864_v6, 4  ;;  %v1869_v17 = vrot.slane %v1867_v7, 5  ;;  %v1875_v28 = vrot.slane %v1873_v8, 5  ;;  %v4603_v5 = vld [vmem:[%s5111_s30 + $0x50] sm:$0x1] }
  0x7c   : > { %4458 = vmatmul.msk.bf16.gmra.mxu2 %vm685_vm4, %v1245_v46  ;;  %v1122_v46 = vsel %vm5297_vm7, %v4443_v35, %v1121_v23  ;;  %v1129_v23 = vsel %vm5297_vm7, %v4444_v12, %v1128_v3  ;;  %v1132_v24 = vsel %vm5297_vm7, %v1130_v13, %v1131_v15  ;;  %v1907_v12 = vshll.u32 %v4603_v5, 16  ;;  %v4604_v15 = vld [vmem:[%s5111_s30 + $0x54] sm:$0xf] }
  0x7d   : > { %v1218_v54 = vunpack.c.l.b16 %v1122_v46  ;;  %v1870_v29 = vor.u32 %v1869_v17, %v1866_v16  ;;  %v1220_v35 = vunpack.c.l.b16 %v1129_v23  ;;  %v1221_v32 = vunpack.c.l.b16 %v1132_v24  ;;  %v4605_v16 = vld [vmem:[%s5111_s30 + $0x58] sm:$0xf] }
  0x7e   : > { %v1135_v46 = vrot.slane %v5151_v20, 5  ;;  %v1138_v20 = vrot.slane %v5156_v25, 5 }
  0x7f   : > { %v1247_v63 = vpack.c.b16 %v1219_v55, %v1218_v54  ;;  %v1248_v40 = vpack.c.b16 %v1221_v32, %v1220_v35  ;;  %v1901_v54 = vshrl.u32 %v4602_v44, 16  ;;  %v4950_v55 = vld [vmem:[%s5111_s30 + $0x3c] sm:$0xff]  ;;  %v1053_v35 = vld [vmem:[%s5111_s30 + $0x48] sm:$0xe] }
  0x81   : > { %4571 = vmatmul.msk.bf16.gmra.mxu3 %vm685_vm4, %v4947_v58  ;;  %v1861_v58 = vrot.slane %v1859_v51, 5  ;;  %v1888_v51 = vshrl.u32 %v4601_v41, 16  ;;  %v1903_v3 = vrot.slane %v1901_v54, 4 }
  0x83   : > { %v1862_v61 = vsel %vm5123_vm3, %v1857_v57, %v1861_v58  ;;  %v4445_v57 = vrot.slane %v1052_v50, 9  ;;  %v1137_v58 = vrot.slane %v1135_v46, 4 }
  0x84   : > { %v2160_v11 = vunpack.c.l.b16 %v1862_v61 }
  0x85   : > { %v1136_v6 = vsel %vm5297_vm7, %v4445_v57, %v1135_v46  ;;  %v1139_v7 = vsel %vm5297_vm7, %v1137_v58, %v1138_v20 }
  0x86   : > { %4636 = vmatmul.msk.bf16.gmra.mxu0 %vm685_vm4, %v2186_v9  ;;  %v1877_v9 = vshrl.u32 %v4599_v59, 16  ;;  %v1222_v13 = vunpack.c.l.b16 %v1136_v6  ;;  %v1223_v14 = vunpack.c.l.b16 %v1139_v7 }
  0x87   : > { %4426 = vmatmul.msk.bf16.gmra.mxu1 %vm685_vm4, %v4932_v0  ;;  %v2159_v0 = vunpack.c.l.b16 %v1852_v60  ;;  %v1890_v60 = vrot.slane %v1888_v51, 4 }
  0x88   : > { %v1879_v19 = vrot.slane %v1877_v9, 4  ;;  %v1249_v23 = vpack.c.b16 %v1223_v14, %v1222_v13  ;;  %v1149_v14 = vrot.slane %v5241_v21, 5  ;;  %v1152_v21 = vrot.slane %v5246_v27, 5 }
  0x89   : > { %v2188_v26 = vpack.c.b16 %v2160_v11, %v2159_v0  ;;  %v4935_v0 = vld [vmem:[%s5111_s30 + $0x3c] sm:$0xff] }
  0x8a   : > { %v1880_v30 = vor.u32 %v1879_v19, %v1875_v28 }
  0x8c   : > { %4459 = vmatmul.msk.bf16.gmra.mxu2 %vm685_vm4, %v1246_v22  ;;  %v4600_v22 = vld [vmem:[%s5111_s30 + $0x44] sm:$0x1]  ;;  %v1881_v38 = vrot.slane %v1880_v30, 4  ;;  %v1921_v30 = vshll.u32 %v4605_v16, 16 }
  0x8d   : > { %v1883_v31 = vshll.u32 %v4600_v22, 16  ;;  %v1909_v22 = vrot.slane %v1907_v12, 5 }
  0x8f   : > { %v1885_v1 = vrot.slane %v1883_v31, 5  ;;  %v1142_v31 = vrot.slane %v5195_v47, 5  ;;  %v4446_v47 = vrot.slane %v1053_v35, 9  ;;  %v1151_v35 = vrot.slane %v1149_v14, 4 }
  0x91   : > { %4572 = vmatmul.msk.bf16.gmra.mxu3 %vm685_vm4, %v4948_v42  ;;  %v1871_v42 = vrot.slane %v1870_v29, 4  ;;  %v1886_v48 = vsel %vm5123_vm3, %v1881_v38, %v1885_v1  ;;  %v1915_v29 = vshll.u32 %v4604_v15, 16  ;;  %v1143_v58 = vsel %vm5297_vm7, %v4446_v47, %v1142_v31 }
  0x92   : > { %v2162_v59 = vunpack.c.l.b16 %v1886_v48  ;;  %v1145_v48 = vrot.slane %v5200_v56, 5 }
  0x93   : > { %v1876_v49 = vsel %vm5123_vm3, %v1871_v42, %v1875_v28 }
  0x94   : > { %v2161_v43 = vunpack.c.l.b16 %v1876_v49  ;;  %v1144_v49 = vrot.slane %v1142_v31, 4 }
  0x96   : > { %4637 = vmatmul.msk.bf16.gmra.mxu0 %vm685_vm4, %v2187_v52  ;;  %v1891_v52 = vshll.u32 %v4601_v41, 16  ;;  %v2189_v25 = vpack.c.b16 %v2162_v59, %v2161_v43  ;;  %v1923_v41 = vrot.slane %v1921_v30, 5  ;;  %v1146_v20 = vsel %vm5297_vm7, %v1144_v49, %v1145_v48  ;;  %v4952_v30 = vld [vmem:[%s5111_s30 + $0x54] sm:$0xff] }
  0x97   : > { %4427 = vmatmul.msk.bf16.gmra.mxu1 %vm685_vm4, %v4933_v53  ;;  %v1897_v53 = vshll.u32 %v4602_v44, 16  ;;  %v4951_v44 = vld [vmem:[%s5111_s30 + $0x48] sm:$0xff]  ;;  %v1153_v48 = vsel %vm5297_vm7, %v1151_v35, %v1152_v21 }
  0x98   : > { %v1893_v61 = vrot.slane %v1891_v52, 5 }
  0x99   : > { %v1899_v62 = vrot.slane %v1897_v53, 5  ;;  %v4606_v53 = vld [vmem:[%s5111_s30 + $0x5c] sm:$0x1] }
  0x9a   : > { %v1931_v43 = vshll.u32 %v4606_v53, 16  ;;  %v4937_v53 = vld [vmem:[%s5111_s30 + $0x54] sm:$0xff] }
  0x9b   : > { %v1904_v11 = vor.u32 %v1903_v3, %v1899_v62 }
  0x9c   : > { %v5395_v4 = vpop.f32.mrf.mxu1  ;;  %4460 = vmatmul.msk.bf16.gmra.mxu2 %vm685_vm4, %v1247_v63  ;;  %v1933_v7 = vrot.slane %v1931_v43, 5 }
  0x9d   : > { %v1905_v19 = vrot.slane %v1904_v11, 4 }
  0x9f   : > { %v1910_v42 = vsel %vm5123_vm3, %v1905_v19, %v1909_v22 }
  0xa0   : > { %v2164_v52 = vunpack.c.l.b16 %v1910_v42 }
  0xa1   : > { %4573 = vmatmul.msk.bf16.gmra.mxu3 %vm685_vm4, %v4949_v10  ;;  %v1894_v10 = vor.u32 %v1893_v61, %v1890_v60  ;;  %v4936_v60 = vld [vmem:[%s5111_s30 + $0x48] sm:$0xff]  ;;  %v1224_v61 = vunpack.c.l.b16 %v1143_v58 }
  0xa3   : > { %v1895_v28 = vrot.slane %v1894_v10, 4  ;;  %v4608_v10 = vld [vmem:[%s5111_s30 + $0x64] sm:$0xf] }
  0xa4   : > { %v5408_v34 = vpop.f32.mrf.mxu1  ;;  %v1945_v22 = vshll.u32 %v4608_v10, 16 }
  0xa5   : > { %v1900_v32 = vsel %vm5123_vm3, %v1895_v28, %v1899_v62  ;;  %v1225_v62 = vunpack.c.l.b16 %v1146_v20  ;;  %v1227_v20 = vunpack.c.l.b16 %v1153_v48 }
  0xa6   : > { %v5410_v37 = vpop.f32.mrf.mxu2  ;;  %4638 = vmatmul.msk.bf16.gmra.mxu0 %vm685_vm4, %v2188_v26  ;;  %v1912_v26 = vshrl.u32 %v4604_v15, 16  ;;  %v2163_v51 = vunpack.c.l.b16 %v1900_v32 }
  0xa7   : > { %4428 = vmatmul.msk.bf16.gmra.mxu1 %vm685_vm4, %v4934_v33  ;;  %v1925_v33 = vshrl.u32 %v4605_v16, 16  ;;  %v1250_v11 = vpack.c.b16 %v1225_v62, %v1224_v61  ;;  %v1054_v16 = vld [vmem:[%s5111_s30 + $0x54] sm:$0xe]  ;;  %v4610_v62 = vld [vmem:[%s5111_s30 + $0x6c] sm:$0xf] }
  0xa8   : > { %v1914_v1 = vrot.slane %v1912_v26, 4  ;;  %v2190_v59 = vpack.c.b16 %v2164_v52, %v2163_v51 }
  0xa9   : > { %v5414_v39 = vpop.f32.mrf.mxu0  ;;  %v1927_v50 = vrot.slane %v1925_v33, 4  ;;  %v4447_v33 = vrot.slane %v1054_v16, 9  ;;  %v1963_v16 = vshll.u32 %v4610_v62, 16 }
  0xaa   : > { %v5418_v45 = vpop.f32.mrf.mxu3 }
  0xab   : > { %v1928_v56 = vor.u32 %v1927_v50, %v1923_v41  ;;  %v1150_v49 = vsel %vm5297_vm7, %v4447_v33, %v1149_v14  ;;  %v1960_v14 = vshrl.u32 %v4610_v62, 16 }
  0xac   : > { %4461 = vmatmul.msk.bf16.gmra.mxu2 %vm685_vm4, %v1248_v40  ;;  %v1917_v40 = vrot.slane %v1915_v29, 5  ;;  %v1226_v58 = vunpack.c.l.b16 %v1150_v49  ;;  %v4612_v49 = vld [vmem:[%s5111_s30 + $0x74] sm:$0x1] }
  0xad   : > { %v1929_v6 = vrot.slane %v1928_v56, 4 }
  0xae   : > { %v5428_v2 = vpop.f32.mrf.mxu1  ;;  %v5431_v63 = vpop.f32.mrf.mxu2  ;;  %v1251_v61 = vpack.c.b16 %v1227_v20, %v1226_v58  ;;  %v1979_v20 = vshll.u32 %v4612_v49, 16  ;;  %v4954_v49 = vld [vmem:[%s5111_s30 + $0x6c] sm:$0xff] }
  0xaf   : > { %v1934_v13 = vsel %vm5123_vm3, %v1929_v6, %v1933_v7  ;;  %v4994_v7 = vld [vmem:[%s5111_s30 + $0x64] sm:$0xf] }
  0xb0   : > { %v2166_v31 = vunpack.c.l.b16 %v1934_v13  ;;  %v1055_v13 = vld [vmem:[%s5111_s30 + $0x60] sm:$0xe] }
  0xb1   : > { %4574 = vmatmul.msk.bf16.gmra.mxu3 %vm685_vm4, %v4950_v55  ;;  %v5439_v8 = vpop.f32.mrf.mxu0  ;;  %v1918_v55 = vor.u32 %v1917_v40, %v1914_v1  ;;  %v1947_v1 = vrot.slane %v1945_v22, 5 }
  0xb2   : > { %v5441_v9 = vpop.f32.mrf.mxu3 }
  0xb3   : > { %v1919_v5 = vrot.slane %v1918_v55, 4 }
  0xb5   : > { %v1924_v12 = vsel %vm5123_vm3, %v1919_v5, %v1923_v41  ;;  %v4611_v5 = vld [vmem:[%s5111_s30 + $0x70] sm:$0xf] }
  0xb6   : > { %4639 = vmatmul.msk.bf16.gmra.mxu0 %vm685_vm4, %v2189_v25  ;;  %v5447_v17 = vpop.f32.mrf.mxu1  ;;  %v2165_v29 = vunpack.c.l.b16 %v1924_v12 }
  0xb7   : > { %4429 = vmatmul.msk.bf16.gmra.mxu1 %vm685_vm4, %v4935_v0  ;;  %v4607_v0 = vld [vmem:[%s5111_s30 + $0x60] sm:$0xf] }
  0xb8   : > { %v1936_v28 = vshrl.u32 %v4607_v0, 16  ;;  %v1939_v19 = vshll.u32 %v4607_v0, 16  ;;  %v2191_v50 = vpack.c.b16 %v2166_v31, %v2165_v29  ;;  %v1156_v0 = vrot.slane %v4994_v7, 5 }
  0xb9   : > { %v5450_v24 = vpop.f32.mrf.mxu2  ;;  %v4448_v31 = vrot.slane %v1055_v13, 9 }
  0xba   : > { %v1938_v32 = vrot.slane %v1936_v28, 4  ;;  %v1941_v42 = vrot.slane %v1939_v19, 5  ;;  %v1969_v28 = vshll.u32 %v4611_v5, 16  ;;  %v1973_v19 = vshrl.u32 %v4611_v5, 16 }
  0xbb   : > { %v1158_v33 = vrot.slane %v1156_v0, 4  ;;  %v1157_v48 = vsel %vm5297_vm7, %v4448_v31, %v1156_v0 }
  0xbc   : > { %4462 = vmatmul.msk.bf16.gmra.mxu2 %vm685_vm4, %v1249_v23  ;;  %v1949_v23 = vshrl.u32 %v4608_v10, 16  ;;  %v1942_v27 = vor.u32 %v1941_v42, %v1938_v32  ;;  %v1962_v42 = vrot.slane %v1960_v14, 4  ;;  %v4614_v14 = vld [vmem:[%s5111_s30 + $0x7c] sm:$0xf] }
  0xbd   : > { %v5458_v38 = vpop.f32.mrf.mxu0 }
  0xbe   : > { %v5462_v46 = vpop.f32.mrf.mxu3  ;;  %v1951_v40 = vrot.slane %v1949_v23, 4  ;;  %v1943_v43 = vrot.slane %v1942_v27, 4  ;;  %v4995_v23 = vld [vmem:[%s5111_s30 + $0x68] sm:$0x1] }
  0xbf   : > { %v1159_v29 = vrot.slane %v4995_v23, 5 }
  0xc0   : > { %v5466_v54 = vpop.f32.mrf.mxu1  ;;  %v1952_v51 = vor.u32 %v1951_v40, %v1947_v1  ;;  %v1971_v40 = vrot.slane %v1969_v28, 5 }
  0xc1   : > { %4575 = vmatmul.msk.bf16.gmra.mxu3 %vm685_vm4, %v4951_v44  ;;  %v5469_v57 = vpop.f32.mrf.mxu2  ;;  %v4609_v44 = vld [vmem:[%s5111_s30 + $0x68] sm:$0x1] }
  0xc2   : > { %v1955_v52 = vshll.u32 %v4609_v44, 16  ;;  %v1975_v44 = vrot.slane %v1973_v19, 4  ;;  %v1056_v19 = vld [vmem:[%s5111_s30 + $0x6c] sm:$0xe] }
  0xc4   : > { %v1976_v58 = vor.u32 %v1975_v44, %v1971_v40 }
  0xc5   : > { %v5476_v3 = vpop.f32.mrf.mxu0 }
  0xc6   : > { %4640 = vmatmul.msk.bf16.gmra.mxu0 %vm685_vm4, %v2190_v59  ;;  %v5479_v25 = vpop.f32.mrf.mxu3  ;;  %v1953_v59 = vrot.slane %v1952_v51, 4  ;;  %v1977_v0 = vrot.slane %v1976_v58, 4 }
  0xc7   : > { %4430 = vmatmul.msk.bf16.gmra.mxu1 %vm685_vm4, %v4936_v60  ;;  %v1957_v60 = vrot.slane %v1955_v52, 5  ;;  %v4938_v52 = vld [vmem:[%s5111_s30 + $0x60] sm:$0xff] }
  0xc8   : > { %v5489_v15 = vpop.f32.mrf.mxu1 }
  0xc9   : > { %v1958_v12 = vsel %vm5123_vm3, %v1953_v59, %v1957_v60  ;;  %v1228_v60 = vunpack.c.l.b16 %v1157_v48 }
  0xca   : > { %v2168_v21 = vunpack.c.l.b16 %v1958_v12  ;;  %v4613_v12 = vld [vmem:[%s5111_s30 + $0x78] sm:$0xf] }
  0xcb   : > { %v1984_v23 = vshrl.u32 %v4613_v12, 16 }
  0xcc   : > { %v5492_v26 = vpop.f32.mrf.mxu2  ;;  %4463 = vmatmul.msk.bf16.gmra.mxu2 %vm685_vm4, %v1250_v11  ;;  %v1948_v11 = vsel %vm5123_vm3, %v1943_v43, %v1947_v1  ;;  %v1965_v1 = vrot.slane %v1963_v16, 5  ;;  %v4996_v16 = vld [vmem:[%s5111_s30 + $0x70] sm:$0xf] }
  0xcd   : > { %v2167_v35 = vunpack.c.l.b16 %v1948_v11  ;;  %v1981_v11 = vrot.slane %v1979_v20, 5  ;;  %v1163_v28 = vrot.slane %v4996_v16, 5 }
  0xcf   : > { %v5497_v41 = vpop.f32.mrf.mxu0  ;;  %v2192_v27 = vpack.c.b16 %v2168_v21, %v2167_v35  ;;  %v1982_v31 = vsel %vm5123_vm3, %v1977_v0, %v1981_v11  ;;  %v1997_v35 = vshrl.u32 %v4614_v14, 16 }
  0xd0   : > { %v5500_v47 = vpop.f32.mrf.mxu3 }
  0xd1   : > { %4576 = vmatmul.msk.bf16.gmra.mxu3 %vm685_vm4, %v4952_v30  ;;  %v4953_v30 = vld [vmem:[%s5111_s30 + $0x60] sm:$0xff] }
  0xd4   : > { %v5508_v55 = vpop.f32.mrf.mxu1  ;;  %v5510_v56 = vpop.f32.mrf.mxu2 }
  0xd6   : > { %4641 = vmatmul.msk.bf16.gmra.mxu0 %vm685_vm4, %v2191_v50  ;;  %v1160_v50 = vsel %vm5297_vm7, %v1158_v33, %v1159_v29  ;;  %v1987_v29 = vshll.u32 %v4613_v12, 16  ;;  %v1993_v33 = vshll.u32 %v4614_v14, 16  ;;  %v4939_v14 = vld [vmem:[%s5111_s30 + $0x6c] sm:$0xff] }
  0xd7   : > { %4431 = vmatmul.msk.bf16.gmra.mxu1 %vm685_vm4, %v4937_v53  ;;  %v5516_v6 = vpop.f32.mrf.mxu0  ;;  %v1966_v53 = vor.u32 %v1965_v1, %v1962_v42  ;;  %v4997_v1 = vld [vmem:[%s5111_s30 + $0x74] sm:$0x1] }
  0xd8   : > { %v5519_v10 = vpop.f32.mrf.mxu3  ;;  %v1166_v44 = vrot.slane %v4997_v1, 5  ;;  %v1989_v58 = vrot.slane %v1987_v29, 5 }
  0xd9   : > { %v1967_v7 = vrot.slane %v1966_v53, 4  ;;  %v1986_v53 = vrot.slane %v1984_v23, 4 }
  0xdb   : > { %v1990_v12 = vor.u32 %v1989_v58, %v1986_v53  ;;  %v1057_v58 = vld [vmem:[%s5111_s30 + $0x78] sm:$0xe] }
  0xdc   : > { %4464 = vmatmul.msk.bf16.gmra.mxu2 %vm685_vm4, %v1251_v61  ;;  %v5527_v22 = vpop.f32.mrf.mxu1  ;;  %v1229_v61 = vunpack.c.l.b16 %v1160_v50  ;;  %v4449_v50 = vrot.slane %v1056_v19, 9 }
  0xde   : > { %v1252_v13 = vpack.c.b16 %v1229_v61, %v1228_v60  ;;  %v1999_v60 = vrot.slane %v1997_v35, 4  ;;  %v1164_v0 = vsel %vm5297_vm7, %v4449_v50, %v1163_v28 }
  0xdf   : > { %v5531_v32 = vpop.f32.mrf.mxu2 }
  0xe1   : > { %4577 = vmatmul.msk.bf16.gmra.mxu3 %vm685_vm4, %v4953_v30  ;;  %v1972_v30 = vsel %vm5123_vm3, %v1967_v7, %v1971_v40  ;;  %v4615_v7 = vld [vmem:[%s5111_s30 + $0x80] sm:$0x1] }
  0xe2   : > { %v2169_v40 = vunpack.c.l.b16 %v1972_v30  ;;  %v2003_v19 = vshll.u32 %v4615_v7, 16 }
  0xe3   : > { %v5539_v51 = vpop.f32.mrf.mxu0 }
  0xe4   : > { %v5542_v43 = vpop.f32.mrf.mxu3  ;;  %v967_v59 = vpop.f32.mrf.mxu1  ;;  %v2005_v1 = vrot.slane %v2003_v19, 5  ;;  %v4450_v19 = vrot.slane %v1057_v58, 9 }
  0xe5   : > { %v968_v62 = vadd.f32 %v967_v59, %v5414_v39  ;;  %v1995_v59 = vrot.slane %v1993_v33, 5  ;;  %v1991_v33 = vrot.slane %v1990_v12, 4 }
  0xe6   : > { %4642 = vmatmul.msk.bf16.gmra.mxu0 %vm685_vm4, %v2192_v27  ;;  %v1165_v27 = vrot.slane %v1163_v28, 4 }
  0xe7   : > { %v5546_v5 = vpop.f32.mrf.mxu2  ;;  %4432 = vmatmul.msk.bf16.gmra.mxu1 %vm685_vm4, %v4938_v52  ;;  %v2170_v52 = vunpack.c.l.b16 %v1982_v31  ;;  %v2000_v16 = vor.u32 %v1999_v60, %v1995_v59 }
  0xe9   : > { %v2193_v11 = vpack.c.b16 %v2170_v52, %v2169_v40  ;;  %v4617_v40 = vld [vmem:[%s5111_s30 + $0x88] sm:$0xf]  ;;  %v4998_v52 = vld [vmem:[%s5111_s30 + $0x7c] sm:$0xf] }
  0xea   : > { %v1170_v53 = vrot.slane %v4998_v52, 5 }
  0xeb   : > { %v5553_v39 = vpop.f32.mrf.mxu0 }
  0xec   : > { %v5559_v21 = vpop.f32.mrf.mxu3  ;;  %4465 = vmatmul.msk.bf16.gmra.mxu2 %vm685_vm4, %v1252_v13  ;;  %v969_v42 = vpop.f32.mrf.mxu1 }
  0xed   : > { %v970_v48 = vadd.f32 %v969_v42, %v5439_v8  ;;  %v1167_v8 = vsel %vm5297_vm7, %v1165_v27, %v1166_v44  ;;  %v2001_v42 = vrot.slane %v2000_v16, 4  ;;  %v4616_v44 = vld [vmem:[%s5111_s30 + $0x84] sm:$0xf]  ;;  %v4955_v16 = vld [vmem:[%s5111_s30 + $0x78] sm:$0xff] }
  0xee   : > { %v1231_v30 = vunpack.c.l.b16 %v1167_v8  ;;  %v2011_v7 = vshll.u32 %v4616_v44, 16  ;;  %v2021_v8 = vshrl.u32 %v4617_v40, 16 }
  0xef   : > { %v1320_v20 = vpop.f32.mrf.mxu2 }
  0xf0   : > { %v1400_v61 = vadd.f32 %v1320_v20, %v968_v62  ;;  %v1230_v62 = vunpack.c.l.b16 %v1164_v0  ;;  %v2008_v20 = vshrl.u32 %v4616_v44, 16  ;;  %v2017_v0 = vshll.u32 %v4617_v40, 16 }
  0xf1   : > { %4578 = vmatmul.msk.bf16.gmra.mxu3 %vm685_vm4, %v4954_v49 }
  0xf2   : > { %v1253_v27 = vpack.c.b16 %v1231_v30, %v1230_v62  ;;  %v2010_v30 = vrot.slane %v2008_v20, 4 }
  0xf3   : > { %v2261_v13 = vpop.f32.mrf.mxu0 }
  0xf4   : > { %v1607_v23 = vpop.f32.mrf.mxu3  ;;  %v972_v29 = vpop.f32.mrf.mxu1 }
  0xf5   : > { %v1687_v31 = vadd.f32 %v1607_v23, %v1400_v61  ;;  %v973_v28 = vadd.f32 %v972_v29, %v5458_v38  ;;  %v1996_v38 = vsel %vm5123_vm3, %v1991_v33, %v1995_v59  ;;  %v2006_v61 = vsel %vm5123_vm3, %v2001_v42, %v2005_v1 }
  0xf6   : > { %4643 = vmatmul.msk.bf16.gmra.mxu0 %vm685_vm4, %v2193_v11  ;;  %v4999_v11 = vld [vmem:[%s5111_s30 + $0x80] sm:$0x1]  ;;  %v1172_v23 = vrot.slane %v1170_v53, 4  ;;  %v2171_v29 = vunpack.c.l.b16 %v1996_v38  ;;  %v2172_v62 = vunpack.c.l.b16 %v2006_v61  ;;  %v2013_v33 = vrot.slane %v2011_v7, 5  ;;  %v4940_v38 = vld [vmem:[%s5111_s30 + $0x78] sm:$0xff] }
  0xf7   : > { %v1322_v35 = vpop.f32.mrf.mxu2  ;;  %4433 = vmatmul.msk.bf16.gmra.mxu1 %vm685_vm4, %v4939_v14  ;;  %v5576_v49 = vadd.f32 %v2261_v13, %v1687_v31  ;;  %v1173_v12 = vrot.slane %v4999_v11, 5  ;;  %v2023_v42 = vrot.slane %v2021_v8, 4 }
  0xf8   : > { %v1401_v50 = vadd.f32 %v1322_v35, %v970_v48  ;;  %v2019_v35 = vrot.slane %v2017_v0, 5  ;;  %v2194_v40 = vpack.c.b16 %v2172_v62, %v2171_v29  ;;  %v2014_v58 = vor.u32 %v2013_v33, %v2010_v30  ;;  %v4620_v29 = vld [vmem:[%s5111_s30 + $0x94] sm:$0xf]  ;;  %v5000_v62 = vld [vmem:[%s5111_s30 + $0x88] sm:$0xf] }
  0xf9   : > { %v1177_v30 = vrot.slane %v5000_v62, 5 }
  0xfa   : > { %v2024_v20 = vor.u32 %v2023_v42, %v2019_v35 }
  0xfb   : > { %v2263_v60 = vpop.f32.mrf.mxu0 }
  0xfc   : > { %v1609_v48 = vpop.f32.mrf.mxu3  ;;  %4466 = vmatmul.msk.bf16.gmra.mxu2 %vm685_vm4, %v1253_v27  ;;  %v974_v13 = vpop.f32.mrf.mxu1  ;;  %v4618_v27 = vld [vmem:[%s5111_s30 + $0x8c] sm:$0x1] }
  0xfd   : > { %v1688_v14 = vadd.f32 %v1609_v48, %v1401_v50  ;;  %v975_v59 = vadd.f32 %v974_v13, %v5476_v3  ;;  %v1171_v50 = vsel %vm5297_vm7, %v4450_v19, %v1170_v53  ;;  %v1174_v3 = vsel %vm5297_vm7, %v1172_v23, %v1173_v12 }
  0xfe   : > { %v2027_v61 = vshll.u32 %v4618_v27, 16  ;;  %v1233_v0 = vunpack.c.l.b16 %v1174_v3  ;;  %v2015_v12 = vrot.slane %v2014_v58, 4  ;;  %v2025_v48 = vrot.slane %v2024_v20, 4  ;;  %v4956_v20 = vld [vmem:[%s5111_s30 + $0x84] sm:$0xff] }
  0xff   : > { %v1325_v31 = vpop.f32.mrf.mxu2  ;;  %v5589_v1 = vadd.f32 %v2263_v60, %v1688_v14  ;;  %v4619_v14 = vld [vmem:[%s5111_s30 + $0x90] sm:$0xf]  ;;  %v2045_v3 = vshrl.u32 %v4620_v29, 16 }
 0x100   : > { %v1402_v44 = vadd.f32 %v1325_v31, %v973_v28  ;;  %v1232_v28 = vunpack.c.l.b16 %v1171_v50  ;;  %v2029_v13 = vrot.slane %v2027_v61, 5  ;;  %v1058_v31 = vld [vmem:[%s5111_s30 + $0x84] sm:$0xe]  ;;  %v2035_v33 = vshll.u32 %v4619_v14, 16 }
 0x101   : > { %4579 = vmatmul.msk.bf16.gmra.mxu3 %vm685_vm4, %v4955_v16  ;;  %v2041_v50 = vshll.u32 %v4620_v29, 16 }
 0x102   : > { %v1254_v23 = vpack.c.b16 %v1233_v0, %v1232_v28  ;;  %v2030_v27 = vsel %vm5123_vm3, %v2025_v48, %v2029_v13  ;;  %v2047_v48 = vrot.slane %v2045_v3, 4 }
 0x103   : > { %v2266_v52 = vpop.f32.mrf.mxu0 }
 0x104   : > { %v1612_v7 = vpop.f32.mrf.mxu3  ;;  %v977_v60 = vpop.f32.mrf.mxu1 }
 0x105   : > { %v1689_v8 = vadd.f32 %v1612_v7, %v1402_v44  ;;  %v978_v53 = vadd.f32 %v977_v60, %v5497_v41  ;;  %v2032_v41 = vshrl.u32 %v4619_v14, 16  ;;  %v2020_v44 = vsel %vm5123_vm3, %v2015_v12, %v2019_v35 }
 0x106   : > { %4644 = vmatmul.msk.bf16.gmra.mxu0 %vm685_vm4, %v2194_v40  ;;  %v5001_v40 = vld [vmem:[%s5111_s30 + $0x8c] sm:$0x1]  ;;  %v4451_v7 = vrot.slane %v1058_v31, 9  ;;  %v1179_v60 = vrot.slane %v1177_v30, 4  ;;  %v2173_v28 = vunpack.c.l.b16 %v2020_v44  ;;  %v2174_v35 = vunpack.c.l.b16 %v2030_v27 }
 0x107   : > { %v1327_v11 = vpop.f32.mrf.mxu2  ;;  %4434 = vmatmul.msk.bf16.gmra.mxu1 %vm685_vm4, %v4940_v38  ;;  %v5602_v16 = vadd.f32 %v2266_v52, %v1689_v8  ;;  %v1180_v52 = vrot.slane %v5001_v40, 5  ;;  %v2034_v0 = vrot.slane %v2032_v41, 4  ;;  %v2037_v8 = vrot.slane %v2035_v33, 5  ;;  %v4941_v41 = vld [vmem:[%s5111_s30 + $0x84] sm:$0xff] }
 0x108   : > { %v1403_v19 = vadd.f32 %v1327_v11, %v975_v59  ;;  %v2043_v12 = vrot.slane %v2041_v50, 5  ;;  %v2195_v29 = vpack.c.b16 %v2174_v35, %v2173_v28  ;;  %v4623_v28 = vld [vmem:[%s5111_s30 + $0xa0] sm:$0xf]  ;;  %v5002_v35 = vld [vmem:[%s5111_s30 + $0x94] sm:$0xf] }
 0x109   : > { %v2038_v62 = vor.u32 %v2037_v8, %v2034_v0  ;;  %v1184_v0 = vrot.slane %v5002_v35, 5  ;;  %v1059_v8 = vld [vmem:[%s5111_s30 + $0x90] sm:$0xe] }
 0x10a   : > { %v2048_v33 = vor.u32 %v2047_v48, %v2043_v12 }
 0x10b   : > { %v2268_v42 = vpop.f32.mrf.mxu0  ;;  %v2039_v40 = vrot.slane %v2038_v62, 4 }
 0x10c   : > { %v1614_v59 = vpop.f32.mrf.mxu3  ;;  %4467 = vmatmul.msk.bf16.gmra.mxu2 %vm685_vm4, %v1254_v23  ;;  %v979_v38 = vpop.f32.mrf.mxu1  ;;  %v4621_v23 = vld [vmem:[%s5111_s30 + $0x98] sm:$0x1] }
 0x10d   : > { %v1690_v58 = vadd.f32 %v1614_v59, %v1403_v19  ;;  %v980_v61 = vadd.f32 %v979_v38, %v5516_v6  ;;  %v1178_v19 = vsel %vm5297_vm7, %v4451_v7, %v1177_v30  ;;  %v1181_v6 = vsel %vm5297_vm7, %v1179_v60, %v1180_v52 }
 0x10e   : > { %v2051_v44 = vshll.u32 %v4621_v23, 16  ;;  %v1235_v50 = vunpack.c.l.b16 %v1181_v6  ;;  %v2049_v59 = vrot.slane %v2048_v33, 4  ;;  %v2069_v6 = vshrl.u32 %v4623_v28, 16  ;;  %v4957_v33 = vld [vmem:[%s5111_s30 + $0x90] sm:$0xff] }
 0x10f   : > { %v1330_v11 = vpop.f32.mrf.mxu2  ;;  %v5615_v13 = vadd.f32 %v2268_v42, %v1690_v58  ;;  %v4622_v58 = vld [vmem:[%s5111_s30 + $0x9c] sm:$0xf] }
 0x110   : > { %v1404_v14 = vadd.f32 %v1330_v11, %v978_v53  ;;  %v1234_v53 = vunpack.c.l.b16 %v1178_v19  ;;  %v2053_v38 = vrot.slane %v2051_v44, 5  ;;  %v2056_v11 = vshrl.u32 %v4622_v58, 16 }
 0x111   : > { %4580 = vmatmul.msk.bf16.gmra.mxu3 %vm685_vm4, %v4956_v20  ;;  %v2059_v23 = vshll.u32 %v4622_v58, 16  ;;  %v2065_v19 = vshll.u32 %v4623_v28, 16  ;;  %v4452_v44 = vrot.slane %v1059_v8, 9 }
 0x112   : > { %v1255_v60 = vpack.c.b16 %v1235_v50, %v1234_v53  ;;  %v2058_v50 = vrot.slane %v2056_v11, 4 }
 0x113   : > { %v2271_v31 = vpop.f32.mrf.mxu0 }
 0x114   : > { %v1617_v27 = vpop.f32.mrf.mxu3  ;;  %v982_v42 = vpop.f32.mrf.mxu1 }
 0x115   : > { %v1691_v3 = vadd.f32 %v1617_v27, %v1404_v14  ;;  %v983_v30 = vadd.f32 %v982_v42, %v5539_v51  ;;  %v2044_v51 = vsel %vm5123_vm3, %v2039_v40, %v2043_v12  ;;  %v2054_v14 = vsel %vm5123_vm3, %v2049_v59, %v2053_v38 }
 0x116   : > { %4645 = vmatmul.msk.bf16.gmra.mxu0 %vm685_vm4, %v2195_v29  ;;  %v5003_v29 = vld [vmem:[%s5111_s30 + $0x98] sm:$0x1]  ;;  %v1186_v27 = vrot.slane %v1184_v0, 4  ;;  %v2175_v42 = vunpack.c.l.b16 %v2044_v51  ;;  %v2176_v53 = vunpack.c.l.b16 %v2054_v14  ;;  %v2061_v40 = vrot.slane %v2059_v23, 5  ;;  %v4942_v51 = vld [vmem:[%s5111_s30 + $0x90] sm:$0xff] }
 0x117   : > { %v1332_v52 = vpop.f32.mrf.mxu2  ;;  %4435 = vmatmul.msk.bf16.gmra.mxu1 %vm685_vm4, %v4941_v41  ;;  %v5628_v20 = vadd.f32 %v2271_v31, %v1691_v3  ;;  %v1187_v62 = vrot.slane %v5003_v29, 5  ;;  %v2071_v59 = vrot.slane %v2069_v6, 4  ;;  %v4625_v29 = vld [vmem:[%s5111_s30 + $0xa8] sm:$0xf] }
 0x118   : > { %v1405_v7 = vadd.f32 %v1332_v52, %v980_v61  ;;  %v2067_v52 = vrot.slane %v2065_v19, 5  ;;  %v2196_v28 = vpack.c.b16 %v2176_v53, %v2175_v42  ;;  %v2062_v8 = vor.u32 %v2061_v40, %v2058_v50  ;;  %v5004_v53 = vld [vmem:[%s5111_s30 + $0xa0] sm:$0xf]  ;;  %v1060_v40 = vld [vmem:[%s5111_s30 + $0x9c] sm:$0xe] }
 0x119   : > { %v2080_v42 = vshrl.u32 %v4625_v29, 16  ;;  %v1191_v50 = vrot.slane %v5004_v53, 5 }
 0x11a   : > { %v2072_v11 = vor.u32 %v2071_v59, %v2067_v52 }
 0x11b   : > { %v2273_v48 = vpop.f32.mrf.mxu0 }
 0x11c   : > { %v1619_v61 = vpop.f32.mrf.mxu3  ;;  %4468 = vmatmul.msk.bf16.gmra.mxu2 %vm685_vm4, %v1255_v60  ;;  %v984_v31 = vpop.f32.mrf.mxu1  ;;  %v4624_v60 = vld [vmem:[%s5111_s30 + $0xa4] sm:$0x1] }
 0x11d   : > { %v1692_v41 = vadd.f32 %v1619_v61, %v1405_v7  ;;  %v985_v12 = vadd.f32 %v984_v31, %v5553_v39  ;;  %v1185_v39 = vsel %vm5297_vm7, %v4452_v44, %v1184_v0  ;;  %v1188_v7 = vsel %vm5297_vm7, %v1186_v27, %v1187_v62  ;;  %v4626_v27 = vld [vmem:[%s5111_s30 + $0xac] sm:$0xf] }
 0x11e   : > { %v2075_v14 = vshll.u32 %v4624_v60, 16  ;;  %v1237_v19 = vunpack.c.l.b16 %v1188_v7  ;;  %v2063_v62 = vrot.slane %v2062_v8, 4  ;;  %v2073_v61 = vrot.slane %v2072_v11, 4 }
 0x11f   : > { %v1335_v3 = vpop.f32.mrf.mxu2  ;;  %v5641_v38 = vadd.f32 %v2273_v48, %v1692_v41  ;;  %v2093_v7 = vshrl.u32 %v4626_v27, 16  ;;  %v2082_v8 = vrot.slane %v2080_v42, 4 }
 0x120   : > { %v1406_v58 = vadd.f32 %v1335_v3, %v983_v30  ;;  %v1236_v30 = vunpack.c.l.b16 %v1185_v39  ;;  %v2077_v31 = vrot.slane %v2075_v14, 5  ;;  %v2083_v3 = vshll.u32 %v4625_v29, 16  ;;  %v4958_v14 = vld [vmem:[%s5111_s30 + $0x9c] sm:$0xff] }
 0x121   : > { %4581 = vmatmul.msk.bf16.gmra.mxu3 %vm685_vm4, %v4957_v33  ;;  %v2089_v39 = vshll.u32 %v4626_v27, 16 }
 0x122   : > { %v1256_v44 = vpack.c.b16 %v1237_v19, %v1236_v30  ;;  %v2078_v60 = vsel %vm5123_vm3, %v2073_v61, %v2077_v31  ;;  %v1193_v30 = vrot.slane %v1191_v50, 4  ;;  %v2085_v19 = vrot.slane %v2083_v3, 5  ;;  %v4943_v3 = vld [vmem:[%s5111_s30 + $0x9c] sm:$0xff] }
 0x123   : > { %v2276_v35 = vpop.f32.mrf.mxu0  ;;  %v2178_v29 = vunpack.c.l.b16 %v2078_v60  ;;  %v2095_v61 = vrot.slane %v2093_v7, 4 }
 0x124   : > { %v1622_v48 = vpop.f32.mrf.mxu3  ;;  %v987_v23 = vpop.f32.mrf.mxu1  ;;  %v2086_v53 = vor.u32 %v2085_v19, %v2082_v8 }
 0x125   : > { %v1693_v6 = vadd.f32 %v1622_v48, %v1406_v58  ;;  %v2068_v58 = vsel %vm5123_vm3, %v2063_v62, %v2067_v52  ;;  %v4453_v48 = vrot.slane %v1060_v40, 9  ;;  %v988_v52 = vadd.f32 %v987_v23, %v5395_v4 }
 0x126   : > { %4646 = vmatmul.msk.bf16.gmra.mxu0 %vm685_vm4, %v2196_v28  ;;  %v5005_v28 = vld [vmem:[%s5111_s30 + $0xa4] sm:$0x1]  ;;  %v2091_v62 = vrot.slane %v2089_v39, 5 }
 0x127   : > { %v1337_v0 = vpop.f32.mrf.mxu2  ;;  %4436 = vmatmul.msk.bf16.gmra.mxu1 %vm685_vm4, %v4942_v51  ;;  %v5653_v41 = vadd.f32 %v2276_v35, %v1693_v6  ;;  %v1194_v35 = vrot.slane %v5005_v28, 5  ;;  %v2177_v6 = vunpack.c.l.b16 %v2068_v58 }
 0x128   : > { %v1407_v33 = vadd.f32 %v1337_v0, %v985_v12  ;;  %v2096_v40 = vor.u32 %v2095_v61, %v2091_v62 }
 0x129   : > { %v1195_v42 = vsel %vm5297_vm7, %v1193_v30, %v1194_v35  ;;  %v2197_v4 = vpack.c.b16 %v2178_v29, %v2177_v6 }
 0x12a   : > { %v1239_v7 = vunpack.c.l.b16 %v1195_v42  ;;  %v2097_v8 = vrot.slane %v2096_v40, 4 }
 0x12b   : > { %v2278_v59 = vpop.f32.mrf.mxu0 }
 0x12c   : > { %v1624_v12 = vpop.f32.mrf.mxu3  ;;  %4469 = vmatmul.msk.bf16.gmra.mxu2 %vm685_vm4, %v1256_v44  ;;  %v989_v51 = vpop.f32.mrf.mxu1  ;;  %v4627_v44 = vld [vmem:[%s5111_s30 + $0xb0] sm:$0x1] }
 0x12d   : > { %v1694_v11 = vadd.f32 %v1624_v12, %v1407_v33  ;;  %v1192_v33 = vsel %vm5297_vm7, %v4453_v48, %v1191_v50  ;;  %v2099_v58 = vshll.u32 %v4627_v44, 16  ;;  %v2087_v12 = vrot.slane %v2086_v53, 4  ;;  %v4629_v48 = vld [vmem:[%s5111_s30 + $0xb8] sm:$0xf]  ;;  %v5007_v53 = vld [vmem:[%s5111_s30 + $0xb0] sm:$0x1] }
 0x12e   : > { %v1238_v39 = vunpack.c.l.b16 %v1192_v33  ;;  %v990_v50 = vadd.f32 %v989_v51, %v5408_v34  ;;  %v1061_v34 = vld [vmem:[%s5111_s30 + $0xa8] sm:$0xe]  ;;  %v2113_v51 = vshll.u32 %v4629_v48, 16  ;;  %v2117_v44 = vshrl.u32 %v4629_v48, 16 }
 0x12f   : > { %v1340_v0 = vpop.f32.mrf.mxu2  ;;  %v5666_v31 = vadd.f32 %v2278_v59, %v1694_v11  ;;  %v4628_v11 = vld [vmem:[%s5111_s30 + $0xb4] sm:$0xf]  ;;  %v2092_v29 = vsel %vm5123_vm3, %v2087_v12, %v2091_v62 }
 0x130   : > { %v1408_v27 = vadd.f32 %v1340_v0, %v988_v52  ;;  %v1257_v52 = vpack.c.b16 %v1239_v7, %v1238_v39  ;;  %v2104_v6 = vshrl.u32 %v4628_v11, 16  ;;  %v5006_v0 = vld [vmem:[%s5111_s30 + $0xac] sm:$0xf]  ;;  %v4454_v39 = vrot.slane %v1061_v34, 9 }
 0x131   : > { %4582 = vmatmul.msk.bf16.gmra.mxu3 %vm685_vm4, %v4958_v14  ;;  %v2101_v14 = vrot.slane %v2099_v58, 5  ;;  %v1198_v61 = vrot.slane %v5006_v0, 5  ;;  %v4944_v34 = vld [vmem:[%s5111_s30 + $0xa8] sm:$0xff] }
 0x132   : > { %v2106_v62 = vrot.slane %v2104_v6, 4 }
 0x133   : > { %v2281_v23 = vpop.f32.mrf.mxu0  ;;  %v2102_v42 = vsel %vm5123_vm3, %v2097_v8, %v2101_v14  ;;  %v1200_v7 = vrot.slane %v1198_v61, 4  ;;  %v4630_v14 = vld [vmem:[%s5111_s30 + $0xbc] sm:$0x1] }
 0x134   : > { %v1627_v59 = vpop.f32.mrf.mxu3  ;;  %v992_v60 = vpop.f32.mrf.mxu1 }
 0x135   : > { %v1695_v28 = vadd.f32 %v1627_v59, %v1408_v27  ;;  %v2107_v27 = vshll.u32 %v4628_v11, 16  ;;  %v4959_v59 = vld [vmem:[%s5111_s30 + $0xa8] sm:$0xff]  ;;  %v993_v12 = vadd.f32 %v992_v60, %v5428_v2  ;;  %v2180_v11 = vunpack.c.l.b16 %v2102_v42 }
 0x136   : > { %4647 = vmatmul.msk.bf16.gmra.mxu0 %vm685_vm4, %v2197_v4  ;;  %v1201_v4 = vrot.slane %v5007_v53, 5 }
 0x137   : > { %v1342_v35 = vpop.f32.mrf.mxu2  ;;  %4437 = vmatmul.msk.bf16.gmra.mxu1 %vm685_vm4, %v4943_v3  ;;  %v5680_v30 = vadd.f32 %v2281_v23, %v1695_v28  ;;  %v2179_v3 = vunpack.c.l.b16 %v2092_v29  ;;  %v2109_v28 = vrot.slane %v2107_v27, 5  ;;  %v2123_v29 = vshll.u32 %v4630_v14, 16 }
 0x138   : > { %v1409_v19 = vadd.f32 %v1342_v35, %v990_v50  ;;  %v2115_v50 = vrot.slane %v2113_v51, 5  ;;  %v2119_v35 = vrot.slane %v2117_v44, 4 }
 0x139   : > { %v2110_v6 = vor.u32 %v2109_v28, %v2106_v62  ;;  %v2198_v2 = vpack.c.b16 %v2180_v11, %v2179_v3  ;;  %v2125_v3 = vrot.slane %v2123_v29, 5  ;;  %v5008_v62 = vld [vmem:[%s5111_s30 + $0x10] sm:$0xf]  ;;  %v1062_v11 = vld [vmem:[%s5111_s30 + $0xb4] sm:$0xe] }
 0x13a   : > { %v2120_v60 = vor.u32 %v2119_v35, %v2115_v50  ;;  %v5009_v35 = vld [vmem:[%s5111_s30 + $0xb8] sm:$0xf] }
 0x13b   : > { %v2283_v33 = vpop.f32.mrf.mxu0 }
 0x13c   : > { %v1629_v23 = vpop.f32.mrf.mxu3  ;;  %4470 = vmatmul.msk.bf16.gmra.mxu2 %vm685_vm4, %v1257_v52  ;;  %v994_v40 = vpop.f32.mrf.mxu1  ;;  %v1202_v52 = vsel %vm5297_vm7, %v1200_v7, %v1201_v4  ;;  %v4632_v7 = vld [vmem:[%s5111_s30 + $0xc4] sm:$0xf] }
 0x13d   : > { %v1696_v58 = vadd.f32 %v1629_v23, %v1409_v19  ;;  %v1199_v19 = vsel %vm5297_vm7, %v4454_v39, %v1198_v61  ;;  %v1241_v42 = vunpack.c.l.b16 %v1202_v52  ;;  %v2111_v61 = vrot.slane %v2110_v6, 4  ;;  %v4631_v39 = vld [vmem:[%s5111_s30 + $0xc0] sm:$0xf] }
 0x13e   : > { %v995_v4 = vadd.f32 %v994_v40, %v5447_v17  ;;  %v2121_v23 = vrot.slane %v2120_v60, 4  ;;  %v2137_v52 = vshll.u32 %v4632_v7, 16 }
 0x13f   : > { %v1345_v8 = vpop.f32.mrf.mxu2  ;;  %v5693_v48 = vadd.f32 %v2283_v33, %v1696_v58  ;;  %v1240_v33 = vunpack.c.l.b16 %v1199_v19  ;;  %v2439_v58 = vrot.slane %v5008_v62, 5  ;;  %v2116_v17 = vsel %vm5123_vm3, %v2111_v61, %v2115_v50  ;;  %v4651_v61 = vld [vmem:[%s5111_s30 + $0xc] sm:$0xe] }
 0x140   : > { %v1410_v0 = vadd.f32 %v1345_v8, %v993_v12  ;;  %v1205_v8 = vrot.slane %v5009_v35, 5  ;;  %v2126_v40 = vsel %vm5123_vm3, %v2121_v23, %v2125_v3  ;;  %v2131_v19 = vshll.u32 %v4631_v39, 16  ;;  %v4960_v23 = vld [vmem:[%s5111_s30 + $0xb4] sm:$0xff] }
 0x141   : > { %4583 = vmatmul.msk.bf16.gmra.mxu3 %vm685_vm4, %v4959_v59  ;;  %v1258_v12 = vpack.c.b16 %v1241_v42, %v1240_v33  ;;  %v2441_v6 = vrot.slane %v2439_v58, 4  ;;  %v5011_v33 = vld [vmem:[%s5111_s30 + $0xbc] sm:$0x1]  ;;  %v2181_v3 = vunpack.c.l.b16 %v2116_v17  ;;  %v2182_v62 = vunpack.c.l.b16 %v2126_v40 }
 0x143   : > { %v2286_v27 = vpop.f32.mrf.mxu0 }
 0x144   : > { %v1632_v51 = vpop.f32.mrf.mxu3  ;;  %v997_v44 = vpop.f32.mrf.mxu1 }
 0x145   : > { %v1697_v53 = vadd.f32 %v1632_v51, %v1410_v0  ;;  %v2128_v0 = vshrl.u32 %v4631_v39, 16  ;;  %v2141_v51 = vshrl.u32 %v4632_v7, 16  ;;  %v998_v39 = vadd.f32 %v997_v44, %v5466_v54  ;;  %v4633_v54 = vld [vmem:[%s5111_s30 + $0xc8] sm:$0x1] }
 0x146   : > { %4648 = vmatmul.msk.bf16.gmra.mxu0 %vm685_vm4, %v2198_v2  ;;  %v5010_v2 = vld [vmem:[%s5111_s30 + $0x14] sm:$0x1]  ;;  %v2139_v7 = vrot.slane %v2137_v52, 5 }
 0x147   : > { %v1347_v59 = vpop.f32.mrf.mxu2  ;;  %4438 = vmatmul.msk.bf16.gmra.mxu1 %vm685_vm4, %v4944_v34  ;;  %v5709_v14 = vadd.f32 %v2286_v27, %v1697_v53  ;;  %v2442_v60 = vrot.slane %v5010_v2, 5  ;;  %v4455_v34 = vrot.slane %v1062_v11, 9  ;;  %v1208_v27 = vrot.slane %v5011_v33, 5 }
 0x148   : > { %v1411_v28 = vadd.f32 %v1347_v59, %v995_v4  ;;  %v1207_v53 = vrot.slane %v1205_v8, 4  ;;  %v4667_v59 = vrot.slane %v4651_v61, 9  ;;  %v2130_v35 = vrot.slane %v2128_v0, 4  ;;  %v4945_v61 = vld [vmem:[%s5111_s30 + $0xb4] sm:$0xff] }
 0x149   : > { %v2133_v11 = vrot.slane %v2131_v19, 5  ;;  %v1206_v33 = vsel %vm5297_vm7, %v4455_v34, %v1205_v8  ;;  %v2443_v17 = vsel %vm5297_vm7, %v2441_v6, %v2442_v60  ;;  %v4813_v19 = vld [vmem:[%s5111_s30 + $0x18] sm:$0xf]  ;;  %v2199_v8 = vpack.c.b16 %v2182_v62, %v2181_v3 }
 0x14a   : > { %v2552_v0 = vunpack.c.l.b16 %v2443_v17  ;;  %v1242_v6 = vunpack.c.l.b16 %v1206_v33  ;;  %v3110_v17 = vshll.u32 %v4813_v19, 16 }
 0x14b   : > { %v2288_v29 = vpop.f32.mrf.mxu0  ;;  %v2134_v52 = vor.u32 %v2133_v11, %v2130_v35 }
 0x14c   : > { %v1634_v42 = vpop.f32.mrf.mxu3  ;;  %4471 = vmatmul.msk.bf16.gmra.mxu2 %vm685_vm4, %v1258_v12  ;;  %v999_v50 = vpop.f32.mrf.mxu1  ;;  %v2143_v12 = vrot.slane %v2141_v51, 4 }
 0x14d   : > { %v1698_v4 = vadd.f32 %v1634_v42, %v1411_v28  ;;  %v2440_v28 = vsel %vm5297_vm7, %v4667_v59, %v2439_v58  ;;  %v1209_v42 = vsel %vm5297_vm7, %v1207_v53, %v1208_v27  ;;  %v5738_v27 = vld [vmem:[%s5111_s30 + $0x1c] sm:$0xf]  ;;  %v1000_v3 = vadd.f32 %v999_v50, %v5489_v15 }
 0x14e   : > { %v2551_v44 = vunpack.c.l.b16 %v2440_v28  ;;  %v1243_v60 = vunpack.c.l.b16 %v1209_v42  ;;  %v2144_v59 = vor.u32 %v2143_v12, %v2139_v7  ;;  %v3107_v28 = vshrl.u32 %v4813_v19, 16 }
 0x14f   : > { %v1350_v2 = vpop.f32.mrf.mxu2  ;;  %v5734_v51 = vadd.f32 %v2288_v29, %v1698_v4  ;;  %v2135_v62 = vrot.slane %v2134_v52, 4  ;;  %v3116_v29 = vshll.u32 %v5738_v27, 16  ;;  %v3120_v4 = vshrl.u32 %v5738_v27, 16  ;;  %v4815_v52 = vld [vmem:[%s5111_s30 + $0x20] sm:$0x1] }
 0x150   : > { %v1412_v40 = vadd.f32 %v1350_v2, %v998_v39  ;;  %v5732_v34 = vpack.c.b16 %v2552_v0, %v2551_v44  ;;  %v2147_v39 = vshll.u32 %v4633_v54, 16  ;;  %v1259_v11 = vpack.c.b16 %v1243_v60, %v1242_v6 }
 0x151   : > { %4584 = vmatmul.msk.bf16.gmra.mxu3 %vm685_vm4, %v4960_v23  ;;  %v2145_v33 = vrot.slane %v2144_v59, 4  ;;  %v3109_v54 = vrot.slane %v3107_v28, 4  ;;  %v2140_v15 = vsel %vm5123_vm3, %v2135_v62, %v2139_v7  ;;  %v3118_v50 = vrot.slane %v3116_v29, 5 }
 0x152   : > { %v2149_v12 = vrot.slane %v2147_v39, 5  ;;  %v3122_v0 = vrot.slane %v3120_v4, 4  ;;  %v2183_v39 = vunpack.c.l.b16 %v2140_v15 }
 0x153   : > { %v2291_v58 = vpop.f32.mrf.mxu0 }
 0x154   : > { %v1637_v53 = vpop.f32.mrf.mxu3  ;;  %v1002_v2 = vpop.f32.mrf.mxu1  ;;  %v3123_v28 = vor.u32 %v3122_v0, %v3118_v50  ;;  %v5012_v0 = vld [vmem:[%s5111_s30 + $0x1c] sm:$0xf] }
 0x155   : > { %v1699_v23 = vadd.f32 %v1637_v53, %v1412_v40  ;;  %v3112_v40 = vrot.slane %v3110_v17, 5  ;;  %v1003_v53 = vadd.f32 %v1002_v2, %v5508_v55  ;;  %v3126_v17 = vshll.u32 %v4815_v52, 16  ;;  %v5762_v2 = vld [vmem:[%s5111_s30 + $0x28] sm:$0xf] }
 0x156   : > { %4649 = vmatmul.msk.bf16.gmra.mxu0 %vm685_vm4, %v2199_v8  ;;  %v2150_v8 = vsel %vm5123_vm3, %v2145_v33, %v2149_v12  ;;  %v3124_v4 = vrot.slane %v3123_v28, 4  ;;  %v4816_v33 = vld [vmem:[%s5111_s30 + $0x24] sm:$0xf]  ;;  %v3778_v55 = vrot.slane %v5738_v27, 5 }
 0x157   : > { %v1352_v35 = vpop.f32.mrf.mxu2  ;;  %4439 = vmatmul.msk.bf16.gmra.mxu1 %vm685_vm4, %v4945_v61  ;;  %v5745_v44 = vadd.f32 %v2291_v58, %v1699_v23  ;;  %v3113_v60 = vor.u32 %v3112_v40, %v3109_v54  ;;  %v4961_v58 = vld [vmem:[%s5111_s30 + $0xc0] sm:$0xff]  ;;  %v2184_v7 = vunpack.c.l.b16 %v2150_v8  ;;  %v2446_v8 = vrot.slane %v5012_v0, 5 }
 0x158   : > { %v1413_v42 = vadd.f32 %v1352_v35, %v1000_v3  ;;  %v3128_v35 = vrot.slane %v3126_v17, 5 }
 0x159   : > { %6471 = vst [vmem:[#allocation2_spill] sm:$0xff] %v5745_v44  ;;  %v3114_v62 = vrot.slane %v3113_v60, 4  ;;  %v2200_v29 = vpack.c.b16 %v2184_v7, %v2183_v39  ;;  %v3131_v39 = vshrl.u32 %v4816_v33, 16  ;;  %v3144_v7 = vshrl.u32 %v5762_v2, 16 }
 0x15b   : > { %v2293_v19 = vpop.f32.mrf.mxu0  ;;  %v3119_v15 = vsel %vm5123_vm3, %v3114_v62, %v3118_v50  ;;  %v5013_v50 = vld [vmem:[%s5111_s30 + $0x20] sm:$0x1] }
 0x15c   : > { %v1639_v61 = vpop.f32.mrf.mxu3  ;;  %4472 = vmatmul.msk.bf16.gmra.mxu2 %vm685_vm4, %v1259_v11  ;;  %v1004_v6 = vpop.f32.mrf.mxu1  ;;  %v4878_v11 = vld [vmem:[%s5111_s30 + $0x18] sm:$0xe]  ;;  %v2449_v28 = vrot.slane %v5013_v50, 5 }
 0x15d   : > { %v1700_v59 = vadd.f32 %v1639_v61, %v1413_v42  ;;  %v4894_v60 = vrot.slane %v4878_v11, 9  ;;  %v1005_v27 = vadd.f32 %v1004_v6, %v5527_v22  ;;  %v2448_v22 = vrot.slane %v2446_v8, 4 }
 0x15f   : > { %v1355_v23 = vpop.f32.mrf.mxu2  ;;  %v5758_v12 = vadd.f32 %v2293_v19, %v1700_v59  ;;  %v3134_v19 = vshll.u32 %v4816_v33, 16  ;;  %v3129_v59 = vsel %vm5123_vm3, %v3124_v4, %v3128_v35  ;;  %v3492_v4 = vunpack.c.l.b16 %v3119_v15 }
 0x160   : > { %v1414_v3 = vadd.f32 %v1355_v23, %v1003_v53  ;;  %v3140_v53 = vshll.u32 %v5762_v2, 16  ;;  %v3780_v23 = vrot.slane %v3778_v55, 4  ;;  %v3493_v35 = vunpack.c.l.b16 %v3129_v59 }
 0x161   : > { %4585 = vmatmul.msk.bf16.gmra.mxu3 %vm685_vm4, %v4961_v58  ;;  %6472 = vst [vmem:[#allocation3_spill] sm:$0xff] %v5758_v12  ;;  %v4652_v58 = vld [vmem:[%s5111_s30 + $0x18] sm:$0xe]  ;;  %v3133_v33 = vrot.slane %v3131_v39, 4  ;;  %v3779_v0 = vsel %vm5297_vm7, %v4894_v60, %v3778_v55  ;;  %v3146_v12 = vrot.slane %v3144_v7, 4 }
 0x162   : > { %v4668_v11 = vrot.slane %v4652_v58, 9  ;;  %v3142_v50 = vrot.slane %v3140_v53, 5  ;;  %v3524_v60 = vpack.c.b16 %v3493_v35, %v3492_v4  ;;  %v3890_v58 = vunpack.c.l.b16 %v3779_v0  ;;  %v4819_v4 = vld [vmem:[%s5111_s30 + $0x30] sm:$0xf] }
 0x163   : > { %v2296_v42 = vpop.f32.mrf.mxu0  ;;  %v3785_v35 = vrot.slane %v5762_v2, 5 }
 0x164   : > { %v1642_v54 = vpop.f32.mrf.mxu3  ;;  %v1007_v40 = vpop.f32.mrf.mxu1  ;;  %v2447_v15 = vsel %vm5297_vm7, %v4668_v11, %v2446_v8  ;;  %v3147_v53 = vor.u32 %v3146_v12, %v3142_v50 }
 0x165   : > { %v1701_v61 = vadd.f32 %v1642_v54, %v1414_v3  ;;  %v3781_v3 = vrot.slane %v4815_v52, 5  ;;  %v3136_v54 = vrot.slane %v3134_v19, 5  ;;  %v5785_v52 = vld [vmem:[%s5111_s30 + $0x2c] sm:$0x1]  ;;  %v1008_v19 = vadd.f32 %v1007_v40, %v5410_v37 }
 0x166   : > { %4650 = vmatmul.msk.bf16.gmra.mxu0 %vm685_vm4, %v2200_v29  ;;  %v4962_v29 = vld [vmem:[%s5111_s30 + $0x18] sm:$0xff]  ;;  %v3150_v7 = vshll.u32 %v5785_v52, 16  ;;  %v3148_v11 = vrot.slane %v3147_v53, 4  ;;  %v5015_v53 = vld [vmem:[%s5111_s30 + $0x2c] sm:$0x1] }
 0x167   : > { %v1357_v17 = vpop.f32.mrf.mxu2  ;;  %4684 = vmatmul.msk.bf16.vlgmr.msra.gmra.mxu1 %vm685_vm4, %v5732_v34  ;;  %v5778_v6 = vadd.f32 %v2296_v42, %v1701_v61  ;;  %v3782_v34 = vsel %vm5297_vm7, %v3780_v23, %v3781_v3  ;;  %v2450_v61 = vsel %vm5297_vm7, %v2448_v22, %v2449_v28  ;;  %v3137_v39 = vor.u32 %v3136_v54, %v3133_v33  ;;  %v5801_v33 = vld [vmem:[%s5111_s30 + $0x34] sm:$0xf] }
 0x168   : > { %v1415_v62 = vadd.f32 %v1357_v17, %v1005_v27  ;;  %v3891_v59 = vunpack.c.l.b16 %v3782_v34  ;;  %v2553_v23 = vunpack.c.l.b16 %v2447_v15  ;;  %v2554_v3 = vunpack.c.l.b16 %v2450_v61 }
 0x169   : > { %v3138_v28 = vrot.slane %v3137_v39, 4  ;;  %v3152_v22 = vrot.slane %v3150_v7, 5  ;;  %v2456_v7 = vrot.slane %v5015_v53, 5 }
 0x16a   : > { %v2584_v40 = vpack.c.b16 %v2554_v3, %v2553_v23  ;;  %v3788_v23 = vrot.slane %v5785_v52, 5  ;;  %v5824_v52 = vld [vmem:[%s5111_s30 + $0x38] sm:$0x1] }
 0x16b   : > { %v2298_v44 = vpop.f32.mrf.mxu0  ;;  %v3153_v39 = vsel %vm5123_vm3, %v3148_v11, %v3152_v22 }
 0x16c   : > { %v1644_v27 = vpop.f32.mrf.mxu3  ;;  %4797 = vmatmul.msk.bf16.vlgmr.msra.gmra.mxu2 %vm685_vm4, %v4962_v29  ;;  %v1009_v42 = vpop.f32.mrf.mxu1  ;;  %v3922_v29 = vpack.c.b16 %v3891_v59, %v3890_v58  ;;  %v4653_v58 = vld [vmem:[%s5111_s30 + $0x24] sm:$0xe]  ;;  %v3168_v59 = vshrl.u32 %v5801_v33, 16 }
 0x16d   : > { %v1702_v55 = vadd.f32 %v1644_v27, %v1415_v62  ;;  %v4879_v62 = vld [vmem:[%s5111_s30 + $0x24] sm:$0xe]  ;;  %v5014_v27 = vld [vmem:[%s5111_s30 + $0x28] sm:$0xf]  ;;  %v1010_v2 = vadd.f32 %v1009_v42, %v5431_v63 }
 0x16e   : > { %v4895_v34 = vrot.slane %v4879_v62, 9  ;;  %v2453_v15 = vrot.slane %v5014_v27, 5  ;;  %v3170_v27 = vrot.slane %v3168_v59, 4  ;;  %v3174_v59 = vshll.u32 %v5824_v52, 16 }
 0x16f   : > { %v1360_v17 = vpop.f32.mrf.mxu2  ;;  %v5797_v37 = vadd.f32 %v2298_v44, %v1702_v55  ;;  %v3155_v44 = vshrl.u32 %v4819_v4, 16  ;;  %v3158_v55 = vshll.u32 %v4819_v4, 16 }
 0x170   : > { %v1416_v8 = vadd.f32 %v1360_v17, %v1008_v19  ;;  %v3164_v19 = vshll.u32 %v5801_v33, 16  ;;  %v2455_v63 = vrot.slane %v2453_v15, 4  ;;  %v3786_v4 = vsel %vm5297_vm7, %v4895_v34, %v3785_v35 }
 0x171   : > { %4862 = vmatmul.msk.bf16.vlgmr.msra.gmra.mxu3 %vm685_vm4, %v3524_v60  ;;  %v3143_v60 = vsel %vm5123_vm3, %v3138_v28, %v3142_v50  ;;  %v3787_v50 = vrot.slane %v3785_v35, 4  ;;  %v4669_v28 = vrot.slane %v4653_v58, 9  ;;  %v3157_v11 = vrot.slane %v3155_v44, 4 }
 0x172   : > { %v3494_v62 = vunpack.c.l.b16 %v3143_v60  ;;  %v3160_v22 = vrot.slane %v3158_v55, 5  ;;  %v2457_v60 = vsel %vm5297_vm7, %v2455_v63, %v2456_v7  ;;  %v3892_v58 = vunpack.c.l.b16 %v3786_v4 }
 0x173   : > { %v2301_v12 = vpop.f32.mrf.mxu0  ;;  %v3789_v53 = vsel %vm5297_vm7, %v3787_v50, %v3788_v23  ;;  %v2556_v23 = vunpack.c.l.b16 %v2457_v60  ;;  %v3176_v63 = vrot.slane %v3174_v59, 5 }
 0x174   : > { %v1647_v54 = vpop.f32.mrf.mxu3  ;;  %v1012_v0 = vpop.f32.mrf.mxu1  ;;  %v3161_v44 = vor.u32 %v3160_v22, %v3157_v11  ;;  %v3792_v11 = vrot.slane %v5801_v33, 5  ;;  %v5840_v22 = vld [vmem:[%s5111_s30 + $0x40] sm:$0xf] }
 0x175   : > { %v1703_v61 = vadd.f32 %v1647_v54, %v1416_v8  ;;  %v4963_v8 = vld [vmem:[%s5111_s30 + $0x24] sm:$0xff]  ;;  %v3166_v54 = vrot.slane %v3164_v19, 5  ;;  %v1013_v55 = vadd.f32 %v1012_v0, %v5450_v24 }
 0x176   : > { %4911 = vmatmul.msk.bf16.vlgmr.msra.gmra.mxu0 %vm685_vm4, %v3922_v29  ;;  %v3495_v29 = vunpack.c.l.b16 %v3153_v39  ;;  %v3893_v39 = vunpack.c.l.b16 %v3789_v53  ;;  %v3162_v7 = vrot.slane %v3161_v44, 4 }
 0x177   : > { %v1362_v17 = vpop.f32.mrf.mxu2  ;;  %4685 = vmatmul.msk.bf16.gmra.mxu1 %vm685_vm4, %v2584_v40  ;;  %v5817_v42 = vadd.f32 %v2301_v12, %v1703_v61  ;;  %v2454_v61 = vsel %vm5297_vm7, %v4669_v28, %v2453_v15  ;;  %v3171_v19 = vor.u32 %v3170_v27, %v3166_v54 }
 0x178   : > { %v1417_v3 = vadd.f32 %v1362_v17, %v1010_v2  ;;  %v3525_v34 = vpack.c.b16 %v3495_v29, %v3494_v62  ;;  %v2555_v50 = vunpack.c.l.b16 %v2454_v61  ;;  %v4822_v62 = vld [vmem:[%s5111_s30 + $0x3c] sm:$0xf] }
 0x179   : > { %v3172_v28 = vrot.slane %v3171_v19, 4  ;;  %v5017_v19 = vld [vmem:[%s5111_s30 + $0x38] sm:$0x1] }
 0x17a   : > { %v2585_v29 = vpack.c.b16 %v2556_v23, %v2555_v50  ;;  %v2463_v59 = vrot.slane %v5017_v19, 5  ;;  %v3795_v50 = vrot.slane %v5824_v52, 5  ;;  %v5863_v52 = vld [vmem:[%s5111_s30 + $0x44] sm:$0x1] }
 0x17b   : > { %v2303_v40 = vpop.f32.mrf.mxu0  ;;  %v3177_v44 = vsel %vm5123_vm3, %v3172_v28, %v3176_v63 }
 0x17c   : > { %v1649_v2 = vpop.f32.mrf.mxu3  ;;  %4798 = vmatmul.msk.bf16.gmra.mxu2 %vm685_vm4, %v4963_v8  ;;  %v1014_v12 = vpop.f32.mrf.mxu1  ;;  %v3923_v8 = vpack.c.b16 %v3893_v39, %v3892_v58  ;;  %v4654_v58 = vld [vmem:[%s5111_s30 + $0x30] sm:$0xe]  ;;  %v3192_v39 = vshrl.u32 %v5840_v22, 16 }
 0x17d   : > { %v1704_v35 = vadd.f32 %v1649_v2, %v1417_v3  ;;  %v4880_v3 = vld [vmem:[%s5111_s30 + $0x30] sm:$0xe]  ;;  %v5016_v2 = vld [vmem:[%s5111_s30 + $0x34] sm:$0xf]  ;;  %v1015_v33 = vadd.f32 %v1014_v12, %v5469_v57 }
 0x17e   : > { %v4896_v53 = vrot.slane %v4880_v3, 9  ;;  %v2460_v61 = vrot.slane %v5016_v2, 5  ;;  %v3194_v2 = vrot.slane %v3192_v39, 4  ;;  %v3198_v39 = vshll.u32 %v5863_v52, 16 }
 0x17f   : > { %v1365_v17 = vpop.f32.mrf.mxu2  ;;  %v5836_v24 = vadd.f32 %v2303_v40, %v1704_v35  ;;  %v3179_v40 = vshrl.u32 %v4822_v62, 16  ;;  %v3182_v35 = vshll.u32 %v4822_v62, 16 }
 0x180   : > { %v1418_v15 = vadd.f32 %v1365_v17, %v1013_v55  ;;  %v3188_v55 = vshll.u32 %v5840_v22, 16  ;;  %v2462_v57 = vrot.slane %v2460_v61, 4  ;;  %v3793_v62 = vsel %vm5297_vm7, %v4896_v53, %v3792_v11 }
 0x181   : > { %4863 = vmatmul.msk.bf16.gmra.mxu3 %vm685_vm4, %v3525_v34  ;;  %v3167_v34 = vsel %vm5123_vm3, %v3162_v7, %v3166_v54  ;;  %v3794_v54 = vrot.slane %v3792_v11, 4  ;;  %v4670_v7 = vrot.slane %v4654_v58, 9  ;;  %v3181_v28 = vrot.slane %v3179_v40, 4 }
 0x182   : > { %v3496_v3 = vunpack.c.l.b16 %v3167_v34  ;;  %v3184_v63 = vrot.slane %v3182_v35, 5  ;;  %v2464_v34 = vsel %vm5297_vm7, %v2462_v57, %v2463_v59  ;;  %v3894_v58 = vunpack.c.l.b16 %v3793_v62 }
 0x183   : > { %v2306_v0 = vpop.f32.mrf.mxu0  ;;  %v3796_v19 = vsel %vm5297_vm7, %v3794_v54, %v3795_v50  ;;  %v2558_v50 = vunpack.c.l.b16 %v2464_v34  ;;  %v3200_v57 = vrot.slane %v3198_v39, 5 }
 0x184   : > { %v1652_v4 = vpop.f32.mrf.mxu3  ;;  %v1017_v27 = vpop.f32.mrf.mxu1  ;;  %v3185_v40 = vor.u32 %v3184_v63, %v3181_v28  ;;  %v3799_v28 = vrot.slane %v5840_v22, 5  ;;  %v5879_v63 = vld [vmem:[%s5111_s30 + $0x4c] sm:$0xf] }
 0x185   : > { %v1705_v60 = vadd.f32 %v1652_v4, %v1418_v15  ;;  %v4964_v15 = vld [vmem:[%s5111_s30 + $0x30] sm:$0xff]  ;;  %v3190_v4 = vrot.slane %v3188_v55, 5  ;;  %v1018_v35 = vadd.f32 %v1017_v27, %v5492_v26 }
 0x186   : > { %4912 = vmatmul.msk.bf16.gmra.mxu0 %vm685_vm4, %v3923_v8  ;;  %v3497_v8 = vunpack.c.l.b16 %v3177_v44  ;;  %v3895_v44 = vunpack.c.l.b16 %v3796_v19  ;;  %v3186_v59 = vrot.slane %v3185_v40, 4 }
 0x187   : > { %v1367_v17 = vpop.f32.mrf.mxu2  ;;  %4686 = vmatmul.msk.bf16.gmra.mxu1 %vm685_vm4, %v2585_v29  ;;  %v5856_v12 = vadd.f32 %v2306_v0, %v1705_v60  ;;  %v2461_v60 = vsel %vm5297_vm7, %v4670_v7, %v2460_v61  ;;  %v3195_v55 = vor.u32 %v3194_v2, %v3190_v4 }
 0x188   : > { %v1419_v23 = vadd.f32 %v1367_v17, %v1015_v33  ;;  %v3526_v53 = vpack.c.b16 %v3497_v8, %v3496_v3  ;;  %v2557_v54 = vunpack.c.l.b16 %v2461_v60  ;;  %v4825_v3 = vld [vmem:[%s5111_s30 + $0x48] sm:$0xf] }
 0x189   : > { %v3196_v7 = vrot.slane %v3195_v55, 4  ;;  %v5019_v55 = vld [vmem:[%s5111_s30 + $0x44] sm:$0x1] }
 0x18a   : > { %v2586_v8 = vpack.c.b16 %v2558_v50, %v2557_v54  ;;  %v2470_v39 = vrot.slane %v5019_v55, 5  ;;  %v3802_v54 = vrot.slane %v5863_v52, 5  ;;  %v5902_v52 = vld [vmem:[%s5111_s30 + $0x50] sm:$0x1] }
 0x18b   : > { %v2308_v29 = vpop.f32.mrf.mxu0  ;;  %v3201_v40 = vsel %vm5123_vm3, %v3196_v7, %v3200_v57 }
 0x18c   : > { %v1654_v33 = vpop.f32.mrf.mxu3  ;;  %4799 = vmatmul.msk.bf16.gmra.mxu2 %vm685_vm4, %v4964_v15  ;;  %v1019_v0 = vpop.f32.mrf.mxu1  ;;  %v3924_v15 = vpack.c.b16 %v3895_v44, %v3894_v58  ;;  %v4655_v58 = vld [vmem:[%s5111_s30 + $0x3c] sm:$0xe]  ;;  %v3216_v44 = vshrl.u32 %v5879_v63, 16 }
 0x18d   : > { %v1706_v11 = vadd.f32 %v1654_v33, %v1419_v23  ;;  %v4881_v23 = vld [vmem:[%s5111_s30 + $0x3c] sm:$0xe]  ;;  %v5018_v33 = vld [vmem:[%s5111_s30 + $0x40] sm:$0xf]  ;;  %v1020_v22 = vadd.f32 %v1019_v0, %v5510_v56 }
 0x18e   : > { %v4897_v19 = vrot.slane %v4881_v23, 9  ;;  %v2467_v60 = vrot.slane %v5018_v33, 5  ;;  %v3218_v33 = vrot.slane %v3216_v44, 4  ;;  %v3222_v44 = vshll.u32 %v5902_v52, 16 }
 0x18f   : > { %v1370_v17 = vpop.f32.mrf.mxu2  ;;  %v5875_v26 = vadd.f32 %v2308_v29, %v1706_v11  ;;  %v3203_v29 = vshrl.u32 %v4825_v3, 16  ;;  %v3206_v11 = vshll.u32 %v4825_v3, 16 }
 0x190   : > { %v1420_v61 = vadd.f32 %v1370_v17, %v1018_v35  ;;  %v3212_v35 = vshll.u32 %v5879_v63, 16  ;;  %v2469_v56 = vrot.slane %v2467_v60, 4  ;;  %v3800_v3 = vsel %vm5297_vm7, %v4897_v19, %v3799_v28 }
 0x191   : > { %4864 = vmatmul.msk.bf16.gmra.mxu3 %vm685_vm4, %v3526_v53  ;;  %v3191_v53 = vsel %vm5123_vm3, %v3186_v59, %v3190_v4  ;;  %v3801_v4 = vrot.slane %v3799_v28, 4  ;;  %v4671_v59 = vrot.slane %v4655_v58, 9  ;;  %v3205_v7 = vrot.slane %v3203_v29, 4 }
 0x192   : > { %v3498_v23 = vunpack.c.l.b16 %v3191_v53  ;;  %v3208_v57 = vrot.slane %v3206_v11, 5  ;;  %v2471_v53 = vsel %vm5297_vm7, %v2469_v56, %v2470_v39  ;;  %v3896_v58 = vunpack.c.l.b16 %v3800_v3 }
 0x193   : > { %v2311_v27 = vpop.f32.mrf.mxu0  ;;  %v3803_v55 = vsel %vm5297_vm7, %v3801_v4, %v3802_v54  ;;  %v2560_v54 = vunpack.c.l.b16 %v2471_v53  ;;  %v3224_v56 = vrot.slane %v3222_v44, 5 }
 0x194   : > { %v1657_v62 = vpop.f32.mrf.mxu3  ;;  %v1022_v2 = vpop.f32.mrf.mxu1  ;;  %v3209_v29 = vor.u32 %v3208_v57, %v3205_v7  ;;  %v3806_v7 = vrot.slane %v5879_v63, 5  ;;  %v5918_v57 = vld [vmem:[%s5111_s30 + $0x58] sm:$0xf] }
 0x195   : > { %v1707_v34 = vadd.f32 %v1657_v62, %v1420_v61  ;;  %v4965_v61 = vld [vmem:[%s5111_s30 + $0x3c] sm:$0xff]  ;;  %v3214_v62 = vrot.slane %v3212_v35, 5  ;;  %v1023_v11 = vadd.f32 %v1022_v2, %v5531_v32 }
 0x196   : > { %4913 = vmatmul.msk.bf16.gmra.mxu0 %vm685_vm4, %v3924_v15  ;;  %v3499_v15 = vunpack.c.l.b16 %v3201_v40  ;;  %v3897_v40 = vunpack.c.l.b16 %v3803_v55  ;;  %v3210_v39 = vrot.slane %v3209_v29, 4 }
 0x197   : > { %v1372_v17 = vpop.f32.mrf.mxu2  ;;  %4687 = vmatmul.msk.bf16.gmra.mxu1 %vm685_vm4, %v2586_v8  ;;  %v5895_v0 = vadd.f32 %v2311_v27, %v1707_v34  ;;  %v2468_v34 = vsel %vm5297_vm7, %v4671_v59, %v2467_v60  ;;  %v3219_v35 = vor.u32 %v3218_v33, %v3214_v62 }
 0x198   : > { %v1421_v50 = vadd.f32 %v1372_v17, %v1020_v22  ;;  %v3527_v19 = vpack.c.b16 %v3499_v15, %v3498_v23  ;;  %v2559_v4 = vunpack.c.l.b16 %v2468_v34  ;;  %v4828_v23 = vld [vmem:[%s5111_s30 + $0x54] sm:$0xf] }
 0x199   : > { %v3220_v59 = vrot.slane %v3219_v35, 4  ;;  %v5021_v35 = vld [vmem:[%s5111_s30 + $0x50] sm:$0x1] }
 0x19a   : > { %v2587_v15 = vpack.c.b16 %v2560_v54, %v2559_v4  ;;  %v2477_v44 = vrot.slane %v5021_v35, 5  ;;  %v3809_v4 = vrot.slane %v5902_v52, 5  ;;  %v5941_v52 = vld [vmem:[%s5111_s30 + $0x5c] sm:$0x1] }
 0x19b   : > { %v2313_v8 = vpop.f32.mrf.mxu0  ;;  %v3225_v29 = vsel %vm5123_vm3, %v3220_v59, %v3224_v56 }
 0x19c   : > { %v1659_v22 = vpop.f32.mrf.mxu3  ;;  %4800 = vmatmul.msk.bf16.gmra.mxu2 %vm685_vm4, %v4965_v61  ;;  %v1024_v27 = vpop.f32.mrf.mxu1  ;;  %v3925_v61 = vpack.c.b16 %v3897_v40, %v3896_v58  ;;  %v4656_v58 = vld [vmem:[%s5111_s30 + $0x48] sm:$0xe]  ;;  %v3240_v40 = vshrl.u32 %v5918_v57, 16 }
 0x19d   : > { %v1708_v28 = vadd.f32 %v1659_v22, %v1421_v50  ;;  %v4882_v50 = vld [vmem:[%s5111_s30 + $0x48] sm:$0xe]  ;;  %v5020_v22 = vld [vmem:[%s5111_s30 + $0x4c] sm:$0xf]  ;;  %v1025_v63 = vadd.f32 %v1024_v27, %v5546_v5 }
 0x19e   : > { %v4898_v55 = vrot.slane %v4882_v50, 9  ;;  %v2474_v34 = vrot.slane %v5020_v22, 5  ;;  %v3242_v22 = vrot.slane %v3240_v40, 4  ;;  %v3246_v40 = vshll.u32 %v5941_v52, 16 }
 0x19f   : > { %v1375_v17 = vpop.f32.mrf.mxu2  ;;  %v5914_v32 = vadd.f32 %v2313_v8, %v1708_v28  ;;  %v3227_v8 = vshrl.u32 %v4828_v23, 16  ;;  %v3230_v28 = vshll.u32 %v4828_v23, 16 }
 0x1a0   : > { %v1422_v60 = vadd.f32 %v1375_v17, %v1023_v11  ;;  %v3236_v11 = vshll.u32 %v5918_v57, 16  ;;  %v2476_v5 = vrot.slane %v2474_v34, 4  ;;  %v3807_v23 = vsel %vm5297_vm7, %v4898_v55, %v3806_v7 }
 0x1a1   : > { %4865 = vmatmul.msk.bf16.gmra.mxu3 %vm685_vm4, %v3527_v19  ;;  %v3215_v19 = vsel %vm5123_vm3, %v3210_v39, %v3214_v62  ;;  %v3808_v62 = vrot.slane %v3806_v7, 4  ;;  %v4672_v39 = vrot.slane %v4656_v58, 9  ;;  %v3229_v59 = vrot.slane %v3227_v8, 4 }
 0x1a2   : > { %v3500_v50 = vunpack.c.l.b16 %v3215_v19  ;;  %v3232_v56 = vrot.slane %v3230_v28, 5  ;;  %v2478_v19 = vsel %vm5297_vm7, %v2476_v5, %v2477_v44  ;;  %v3898_v58 = vunpack.c.l.b16 %v3807_v23 }
 0x1a3   : > { %v2316_v2 = vpop.f32.mrf.mxu0  ;;  %v3810_v35 = vsel %vm5297_vm7, %v3808_v62, %v3809_v4  ;;  %v2562_v4 = vunpack.c.l.b16 %v2478_v19  ;;  %v3248_v5 = vrot.slane %v3246_v40, 5 }
 0x1a4   : > { %v1662_v3 = vpop.f32.mrf.mxu3  ;;  %v1027_v33 = vpop.f32.mrf.mxu1  ;;  %v3233_v8 = vor.u32 %v3232_v56, %v3229_v59  ;;  %v3813_v59 = vrot.slane %v5918_v57, 5  ;;  %v5957_v56 = vld [vmem:[%s5111_s30 + $0x64] sm:$0xf] }
 0x1a5   : > { %v1709_v53 = vadd.f32 %v1662_v3, %v1422_v60  ;;  %v4966_v60 = vld [vmem:[%s5111_s30 + $0x48] sm:$0xff]  ;;  %v3238_v3 = vrot.slane %v3236_v11, 5  ;;  %v1028_v28 = vadd.f32 %v1027_v33, %v5418_v45 }
 0x1a6   : > { %4914 = vmatmul.msk.bf16.gmra.mxu0 %vm685_vm4, %v3925_v61  ;;  %v3501_v61 = vunpack.c.l.b16 %v3225_v29  ;;  %v3899_v29 = vunpack.c.l.b16 %v3810_v35  ;;  %v3234_v44 = vrot.slane %v3233_v8, 4 }
 0x1a7   : > { %v1377_v17 = vpop.f32.mrf.mxu2  ;;  %4688 = vmatmul.msk.bf16.gmra.mxu1 %vm685_vm4, %v2587_v15  ;;  %v5934_v27 = vadd.f32 %v2316_v2, %v1709_v53  ;;  %v2475_v53 = vsel %vm5297_vm7, %v4672_v39, %v2474_v34  ;;  %v3243_v11 = vor.u32 %v3242_v22, %v3238_v3 }
 0x1a8   : > { %v1423_v54 = vadd.f32 %v1377_v17, %v1025_v63  ;;  %v3528_v55 = vpack.c.b16 %v3501_v61, %v3500_v50  ;;  %v2561_v62 = vunpack.c.l.b16 %v2475_v53  ;;  %v4831_v50 = vld [vmem:[%s5111_s30 + $0x60] sm:$0xf] }
 0x1a9   : > { %v3244_v39 = vrot.slane %v3243_v11, 4  ;;  %v5023_v11 = vld [vmem:[%s5111_s30 + $0x5c] sm:$0x1] }
 0x1aa   : > { %v2588_v61 = vpack.c.b16 %v2562_v4, %v2561_v62  ;;  %v2484_v40 = vrot.slane %v5023_v11, 5  ;;  %v3816_v62 = vrot.slane %v5941_v52, 5  ;;  %v5980_v52 = vld [vmem:[%s5111_s30 + $0x68] sm:$0x1] }
 0x1ab   : > { %v2318_v15 = vpop.f32.mrf.mxu0  ;;  %v3249_v8 = vsel %vm5123_vm3, %v3244_v39, %v3248_v5 }
 0x1ac   : > { %v1664_v63 = vpop.f32.mrf.mxu3  ;;  %4801 = vmatmul.msk.bf16.gmra.mxu2 %vm685_vm4, %v4966_v60  ;;  %v1029_v2 = vpop.f32.mrf.mxu1  ;;  %v3926_v60 = vpack.c.b16 %v3899_v29, %v3898_v58  ;;  %v4657_v58 = vld [vmem:[%s5111_s30 + $0x54] sm:$0xe]  ;;  %v3264_v29 = vshrl.u32 %v5957_v56, 16 }
 0x1ad   : > { %v1710_v7 = vadd.f32 %v1664_v63, %v1423_v54  ;;  %v4883_v54 = vld [vmem:[%s5111_s30 + $0x54] sm:$0xe]  ;;  %v5022_v63 = vld [vmem:[%s5111_s30 + $0x58] sm:$0xf]  ;;  %v1030_v57 = vadd.f32 %v1029_v2, %v5441_v9 }
 0x1ae   : > { %v4899_v35 = vrot.slane %v4883_v54, 9  ;;  %v2481_v53 = vrot.slane %v5022_v63, 5  ;;  %v3266_v63 = vrot.slane %v3264_v29, 4  ;;  %v3270_v29 = vshll.u32 %v5980_v52, 16 }
 0x1af   : > { %v1380_v17 = vpop.f32.mrf.mxu2  ;;  %v5953_v45 = vadd.f32 %v2318_v15, %v1710_v7  ;;  %v3251_v15 = vshrl.u32 %v4831_v50, 16  ;;  %v3254_v7 = vshll.u32 %v4831_v50, 16 }
 0x1b0   : > { %v1424_v34 = vadd.f32 %v1380_v17, %v1028_v28  ;;  %v3260_v28 = vshll.u32 %v5957_v56, 16  ;;  %v2483_v9 = vrot.slane %v2481_v53, 4  ;;  %v3814_v50 = vsel %vm5297_vm7, %v4899_v35, %v3813_v59 }
 0x1b1   : > { %4866 = vmatmul.msk.bf16.gmra.mxu3 %vm685_vm4, %v3528_v55  ;;  %v3239_v55 = vsel %vm5123_vm3, %v3234_v44, %v3238_v3  ;;  %v3815_v3 = vrot.slane %v3813_v59, 4  ;;  %v4673_v44 = vrot.slane %v4657_v58, 9  ;;  %v3253_v39 = vrot.slane %v3251_v15, 4 }
 0x1b2   : > { %v3502_v54 = vunpack.c.l.b16 %v3239_v55  ;;  %v3256_v5 = vrot.slane %v3254_v7, 5  ;;  %v2485_v55 = vsel %vm5297_vm7, %v2483_v9, %v2484_v40  ;;  %v3900_v58 = vunpack.c.l.b16 %v3814_v50 }
 0x1b3   : > { %v2321_v33 = vpop.f32.mrf.mxu0  ;;  %v3817_v11 = vsel %vm5297_vm7, %v3815_v3, %v3816_v62  ;;  %v2564_v62 = vunpack.c.l.b16 %v2485_v55  ;;  %v3272_v9 = vrot.slane %v3270_v29, 5 }
 0x1b4   : > { %v1667_v23 = vpop.f32.mrf.mxu3  ;;  %v1032_v22 = vpop.f32.mrf.mxu1  ;;  %v3257_v15 = vor.u32 %v3256_v5, %v3253_v39  ;;  %v3820_v39 = vrot.slane %v5957_v56, 5  ;;  %v5996_v5 = vld [vmem:[%s5111_s30 + $0x70] sm:$0xf] }
 0x1b5   : > { %v1711_v19 = vadd.f32 %v1667_v23, %v1424_v34  ;;  %v4967_v34 = vld [vmem:[%s5111_s30 + $0x54] sm:$0xff]  ;;  %v3262_v23 = vrot.slane %v3260_v28, 5  ;;  %v1033_v7 = vadd.f32 %v1032_v22, %v5462_v46 }
 0x1b6   : > { %4915 = vmatmul.msk.bf16.gmra.mxu0 %vm685_vm4, %v3926_v60  ;;  %v3503_v60 = vunpack.c.l.b16 %v3249_v8  ;;  %v3901_v8 = vunpack.c.l.b16 %v3817_v11  ;;  %v3258_v40 = vrot.slane %v3257_v15, 4 }
 0x1b7   : > { %v1382_v17 = vpop.f32.mrf.mxu2  ;;  %4689 = vmatmul.msk.bf16.gmra.mxu1 %vm685_vm4, %v2588_v61  ;;  %v5973_v2 = vadd.f32 %v2321_v33, %v1711_v19  ;;  %v2482_v19 = vsel %vm5297_vm7, %v4673_v44, %v2481_v53  ;;  %v3267_v28 = vor.u32 %v3266_v63, %v3262_v23 }
 0x1b8   : > { %v1425_v4 = vadd.f32 %v1382_v17, %v1030_v57  ;;  %v3529_v35 = vpack.c.b16 %v3503_v60, %v3502_v54  ;;  %v2563_v3 = vunpack.c.l.b16 %v2482_v19  ;;  %v4834_v54 = vld [vmem:[%s5111_s30 + $0x6c] sm:$0xf] }
 0x1b9   : > { %v3268_v44 = vrot.slane %v3267_v28, 4  ;;  %v5025_v28 = vld [vmem:[%s5111_s30 + $0x68] sm:$0x1] }
 0x1ba   : > { %v2589_v60 = vpack.c.b16 %v2564_v62, %v2563_v3  ;;  %v2491_v29 = vrot.slane %v5025_v28, 5  ;;  %v3823_v3 = vrot.slane %v5980_v52, 5  ;;  %v6019_v52 = vld [vmem:[%s5111_s30 + $0x74] sm:$0x1] }
 0x1bb   : > { %v2323_v61 = vpop.f32.mrf.mxu0  ;;  %v3273_v15 = vsel %vm5123_vm3, %v3268_v44, %v3272_v9 }
 0x1bc   : > { %v1669_v57 = vpop.f32.mrf.mxu3  ;;  %4802 = vmatmul.msk.bf16.gmra.mxu2 %vm685_vm4, %v4967_v34  ;;  %v1034_v33 = vpop.f32.mrf.mxu1  ;;  %v3927_v34 = vpack.c.b16 %v3901_v8, %v3900_v58  ;;  %v4658_v58 = vld [vmem:[%s5111_s30 + $0x60] sm:$0xe]  ;;  %v3288_v8 = vshrl.u32 %v5996_v5, 16 }
 0x1bd   : > { %v1712_v59 = vadd.f32 %v1669_v57, %v1425_v4  ;;  %v4884_v4 = vld [vmem:[%s5111_s30 + $0x60] sm:$0xe]  ;;  %v5024_v57 = vld [vmem:[%s5111_s30 + $0x64] sm:$0xf]  ;;  %v1035_v56 = vadd.f32 %v1034_v33, %v5479_v25 }
 0x1be   : > { %v4900_v11 = vrot.slane %v4884_v4, 9  ;;  %v2488_v19 = vrot.slane %v5024_v57, 5  ;;  %v3290_v57 = vrot.slane %v3288_v8, 4  ;;  %v3294_v8 = vshll.u32 %v6019_v52, 16 }
 0x1bf   : > { %v1385_v17 = vpop.f32.mrf.mxu2  ;;  %v5992_v46 = vadd.f32 %v2323_v61, %v1712_v59  ;;  %v3275_v61 = vshrl.u32 %v4834_v54, 16  ;;  %v3278_v59 = vshll.u32 %v4834_v54, 16 }
 0x1c0   : > { %v1426_v53 = vadd.f32 %v1385_v17, %v1033_v7  ;;  %v3284_v7 = vshll.u32 %v5996_v5, 16  ;;  %v2490_v25 = vrot.slane %v2488_v19, 4  ;;  %v3821_v54 = vsel %vm5297_vm7, %v4900_v11, %v3820_v39 }
 0x1c1   : > { %4867 = vmatmul.msk.bf16.gmra.mxu3 %vm685_vm4, %v3529_v35  ;;  %v3263_v35 = vsel %vm5123_vm3, %v3258_v40, %v3262_v23  ;;  %v3822_v23 = vrot.slane %v3820_v39, 4  ;;  %v4674_v40 = vrot.slane %v4658_v58, 9  ;;  %v3277_v44 = vrot.slane %v3275_v61, 4 }
 0x1c2   : > { %v3504_v4 = vunpack.c.l.b16 %v3263_v35  ;;  %v3280_v9 = vrot.slane %v3278_v59, 5  ;;  %v2492_v35 = vsel %vm5297_vm7, %v2490_v25, %v2491_v29  ;;  %v3902_v58 = vunpack.c.l.b16 %v3821_v54 }
 0x1c3   : > { %v2326_v22 = vpop.f32.mrf.mxu0  ;;  %v3824_v28 = vsel %vm5297_vm7, %v3822_v23, %v3823_v3  ;;  %v2566_v3 = vunpack.c.l.b16 %v2492_v35  ;;  %v3296_v25 = vrot.slane %v3294_v8, 5  ;;  %v5026_v35 = vld [vmem:[%s5111_s30 + $0x70] sm:$0xf] }
 0x1c4   : > { %v1672_v50 = vpop.f32.mrf.mxu3  ;;  %v1037_v63 = vpop.f32.mrf.mxu1  ;;  %v3281_v61 = vor.u32 %v3280_v9, %v3277_v44  ;;  %v3827_v44 = vrot.slane %v5996_v5, 5  ;;  %v6035_v9 = vld [vmem:[%s5111_s30 + $0x7c] sm:$0xf] }
 0x1c5   : > { %v1713_v55 = vadd.f32 %v1672_v50, %v1426_v53  ;;  %v4968_v53 = vld [vmem:[%s5111_s30 + $0x60] sm:$0xff]  ;;  %v3286_v50 = vrot.slane %v3284_v7, 5  ;;  %v1038_v59 = vadd.f32 %v1037_v63, %v5500_v47 }
 0x1c6   : > { %4916 = vmatmul.msk.bf16.gmra.mxu0 %vm685_vm4, %v3927_v34  ;;  %v3505_v34 = vunpack.c.l.b16 %v3273_v15  ;;  %v3903_v15 = vunpack.c.l.b16 %v3824_v28  ;;  %v3282_v29 = vrot.slane %v3281_v61, 4 }
 0x1c7   : > { %v1387_v17 = vpop.f32.mrf.mxu2  ;;  %4690 = vmatmul.msk.bf16.gmra.mxu1 %vm685_vm4, %v2589_v60  ;;  %v6012_v33 = vadd.f32 %v2326_v22, %v1713_v55  ;;  %v2489_v55 = vsel %vm5297_vm7, %v4674_v40, %v2488_v19  ;;  %v3291_v7 = vor.u32 %v3290_v57, %v3286_v50  ;;  %v4837_v19 = vld [vmem:[%s5111_s30 + $0x78] sm:$0xf] }
 0x1c8   : > { %v1427_v62 = vadd.f32 %v1387_v17, %v1035_v56  ;;  %v3530_v11 = vpack.c.b16 %v3505_v34, %v3504_v4  ;;  %v2565_v23 = vunpack.c.l.b16 %v2489_v55  ;;  %v4885_v4 = vld [vmem:[%s5111_s30 + $0x6c] sm:$0xe]  ;;  %v3299_v54 = vshrl.u32 %v4837_v19, 16 }
 0x1c9   : > { %v3292_v40 = vrot.slane %v3291_v7, 4  ;;  %v3302_v57 = vshll.u32 %v4837_v19, 16  ;;  %v4659_v55 = vld [vmem:[%s5111_s30 + $0x6c] sm:$0xe]  ;;  %v3312_v7 = vshrl.u32 %v6035_v9, 16 }
 0x1ca   : > { %v2590_v34 = vpack.c.b16 %v2566_v3, %v2565_v23  ;;  %v3301_v23 = vrot.slane %v3299_v54, 4  ;;  %v6058_v54 = vld [vmem:[%s5111_s30 + $0x80] sm:$0x1] }
 0x1cb   : > { %v2328_v60 = vpop.f32.mrf.mxu0  ;;  %v3304_v3 = vrot.slane %v3302_v57, 5 }
 0x1cc   : > { %v1674_v56 = vpop.f32.mrf.mxu3  ;;  %4803 = vmatmul.msk.bf16.gmra.mxu2 %vm685_vm4, %v4968_v53  ;;  %v1039_v22 = vpop.f32.mrf.mxu1 }
 0x1cd   : > { %v1714_v39 = vadd.f32 %v1674_v56, %v1427_v62  ;;  %v3928_v62 = vpack.c.b16 %v3903_v15, %v3902_v58  ;;  %v3287_v58 = vsel %vm5123_vm3, %v3282_v29, %v3286_v50  ;;  %v1040_v5 = vadd.f32 %v1039_v22, %v5519_v10  ;;  %v5027_v29 = vld [vmem:[%s5111_s30 + $0x74] sm:$0x1] }
 0x1ce   : > { %v3308_v15 = vshll.u32 %v6035_v9, 16  ;;  %v4675_v50 = vrot.slane %v4659_v55, 9  ;;  %v2498_v10 = vrot.slane %v5027_v29, 5  ;;  %v3305_v57 = vor.u32 %v3304_v3, %v3301_v23  ;;  %v4840_v29 = vld [vmem:[%s5111_s30 + $0x84] sm:$0xf] }
 0x1cf   : > { %v1390_v17 = vpop.f32.mrf.mxu2  ;;  %v6031_v47 = vadd.f32 %v2328_v60, %v1714_v39  ;;  %v4901_v60 = vrot.slane %v4885_v4, 9  ;;  %v3830_v39 = vrot.slane %v6019_v52, 5 }
 0x1d0   : > { %v1428_v53 = vadd.f32 %v1390_v17, %v1038_v59  ;;  %v3297_v59 = vsel %vm5123_vm3, %v3292_v40, %v3296_v25  ;;  %v3829_v17 = vrot.slane %v3827_v44, 4  ;;  %v3310_v4 = vrot.slane %v3308_v15, 5 }
 0x1d1   : > { %4868 = vmatmul.msk.bf16.gmra.mxu3 %vm685_vm4, %v3530_v11  ;;  %v2495_v11 = vrot.slane %v5026_v35, 5  ;;  %v3507_v40 = vunpack.c.l.b16 %v3297_v59  ;;  %v3828_v25 = vsel %vm5297_vm7, %v4901_v60, %v3827_v44  ;;  %v3306_v3 = vrot.slane %v3305_v57, 4 }
 0x1d2   : > { %v3831_v55 = vsel %vm5297_vm7, %v3829_v17, %v3830_v39 }
 0x1d3   : > { %v2331_v63 = vpop.f32.mrf.mxu0  ;;  %v2497_v19 = vrot.slane %v2495_v11, 4  ;;  %v3905_v59 = vunpack.c.l.b16 %v3831_v55  ;;  %v3326_v55 = vshll.u32 %v4840_v29, 16 }
 0x1d4   : > { %v1677_v28 = vpop.f32.mrf.mxu3  ;;  %v1042_v56 = vpop.f32.mrf.mxu1 }
 0x1d5   : > { %v1715_v61 = vadd.f32 %v1677_v28, %v1428_v53  ;;  %v4969_v53 = vld [vmem:[%s5111_s30 + $0x6c] sm:$0xff]  ;;  %v3314_v28 = vrot.slane %v3312_v7, 4  ;;  %v2499_v44 = vsel %vm5297_vm7, %v2497_v19, %v2498_v10  ;;  %v1043_v39 = vadd.f32 %v1042_v56, %v5542_v43 }
 0x1d6   : > { %4917 = vmatmul.msk.bf16.gmra.mxu0 %vm685_vm4, %v3928_v62  ;;  %v3506_v62 = vunpack.c.l.b16 %v3287_v58  ;;  %v3318_v7 = vshll.u32 %v6058_v54, 16  ;;  %v2568_v23 = vunpack.c.l.b16 %v2499_v44  ;;  %v3834_v43 = vrot.slane %v6035_v9, 5  ;;  %v4660_v44 = vld [vmem:[%s5111_s30 + $0x78] sm:$0xe] }
 0x1d7   : > { %v1392_v8 = vpop.f32.mrf.mxu2  ;;  %4691 = vmatmul.msk.bf16.gmra.mxu1 %vm685_vm4, %v2590_v34  ;;  %v6051_v22 = vadd.f32 %v2331_v63, %v1715_v61  ;;  %v2496_v61 = vsel %vm5297_vm7, %v4675_v50, %v2495_v11  ;;  %v3315_v15 = vor.u32 %v3314_v28, %v3310_v4  ;;  %v3311_v28 = vsel %vm5123_vm3, %v3306_v3, %v3310_v4 }
 0x1d8   : > { %v1429_v52 = vadd.f32 %v1392_v8, %v1040_v5  ;;  %v3531_v60 = vpack.c.b16 %v3507_v40, %v3506_v62  ;;  %v3904_v5 = vunpack.c.l.b16 %v3828_v25  ;;  %v2567_v17 = vunpack.c.l.b16 %v2496_v61  ;;  %v6074_v62 = vld [vmem:[%s5111_s30 + $0x88] sm:$0xf] }
 0x1d9   : > { %v3320_v19 = vrot.slane %v3318_v7, 5  ;;  %v3837_v61 = vrot.slane %v6058_v54, 5  ;;  %v3508_v7 = vunpack.c.l.b16 %v3311_v28  ;;  %v3328_v3 = vrot.slane %v3326_v55, 5  ;;  %v4842_v28 = vld [vmem:[%s5111_s30 + $0x8c] sm:$0x1] }
 0x1da   : > { %v3929_v56 = vpack.c.b16 %v3905_v59, %v3904_v5  ;;  %v2591_v25 = vpack.c.b16 %v2568_v23, %v2567_v17  ;;  %v3836_v5 = vrot.slane %v3834_v43, 4  ;;  %v3336_v59 = vshrl.u32 %v6074_v62, 16 }
 0x1db   : > { %v2333_v34 = vpop.f32.mrf.mxu0  ;;  %v4676_v17 = vrot.slane %v4660_v44, 9 }
 0x1dc   : > { %v1679_v35 = vpop.f32.mrf.mxu3  ;;  %4804 = vmatmul.msk.bf16.gmra.mxu2 %vm685_vm4, %v4969_v53  ;;  %v1044_v63 = vpop.f32.mrf.mxu1  ;;  %v4886_v53 = vld [vmem:[%s5111_s30 + $0x78] sm:$0xe] }
 0x1dd   : > { %v1716_v58 = vadd.f32 %v1679_v35, %v1429_v52  ;;  %v3316_v52 = vrot.slane %v3315_v15, 4  ;;  %v4902_v10 = vrot.slane %v4886_v53, 9  ;;  %v1045_v4 = vadd.f32 %v1044_v63, %v5559_v21 }
 0x1df   : > { %v1395_v8 = vpop.f32.mrf.mxu2  ;;  %v6068_v11 = vadd.f32 %v2333_v34, %v1716_v58  ;;  %v3323_v34 = vshrl.u32 %v4840_v29, 16  ;;  %v5028_v58 = vld [vmem:[%s5111_s30 + $0x7c] sm:$0xf]  ;;  %v3321_v15 = vsel %vm5123_vm3, %v3316_v52, %v3320_v19  ;;  %v3838_v52 = vsel %vm5297_vm7, %v3836_v5, %v3837_v61 }
 0x1e0   : > { %v1430_v50 = vadd.f32 %v1395_v8, %v1043_v39  ;;  %v2502_v9 = vrot.slane %v5028_v58, 5  ;;  %v3332_v39 = vshll.u32 %v6074_v62, 16  ;;  %v3835_v8 = vsel %vm5297_vm7, %v4902_v10, %v3834_v43 }
 0x1e1   : > { %4869 = vmatmul.msk.bf16.gmra.mxu3 %vm685_vm4, %v3531_v60  ;;  %v3325_v23 = vrot.slane %v3323_v34, 4  ;;  %v3509_v63 = vunpack.c.l.b16 %v3321_v15  ;;  %v3906_v43 = vunpack.c.l.b16 %v3835_v8  ;;  %v3907_v34 = vunpack.c.l.b16 %v3838_v52  ;;  %v4843_v52 = vld [vmem:[%s5111_s30 + $0x90] sm:$0xf] }
 0x1e2   : > { %v2504_v29 = vrot.slane %v2502_v9, 4  ;;  %v6096_v19 = vrot.slane %v3332_v39, 5 }
 0x1e3   : > { %v2336_v40 = vpop.f32.mrf.mxu0  ;;  %v3329_v44 = vor.u32 %v3328_v3, %v3325_v23  ;;  %v3532_v5 = vpack.c.b16 %v3509_v63, %v3508_v7 }
 0x1e4   : > { %v1682_v57 = vpop.f32.mrf.mxu3  ;;  %v2659_v35 = vpop.f32.mrf.mxu1 }
 0x1e5   : > { %v1717_v60 = vadd.f32 %v1682_v57, %v1430_v50  ;;  %v4970_v50 = vld [vmem:[%s5111_s30 + $0x78] sm:$0xff]  ;;  %v2739_v15 = vadd.f32 %v2659_v35, %v5576_v49  ;;  %v3347_v49 = vshrl.u32 %v4843_v52, 16 }
 0x1e6   : > { %4918 = vmatmul.msk.bf16.gmra.mxu0 %vm685_vm4, %v3929_v56  ;;  %v5029_v56 = vld [vmem:[%s5111_s30 + $0x80] sm:$0x1] }
 0x1e7   : > { %v1397_v54 = vpop.f32.mrf.mxu2  ;;  %4692 = vmatmul.msk.bf16.gmra.mxu1 %vm685_vm4, %v2591_v25  ;;  %v2505_v57 = vrot.slane %v5029_v56, 5  ;;  %v6092_v21 = vadd.f32 %v2336_v40, %v1717_v60  ;;  %v3338_v25 = vrot.slane %v3336_v59, 4  ;;  %v2503_v40 = vsel %vm5297_vm7, %v4676_v17, %v2502_v9  ;;  %v4887_v56 = vld [vmem:[%s5111_s30 + $0x84] sm:$0xe] }
 0x1e8   : > { %v1431_v53 = vadd.f32 %v1397_v54, %v1045_v4  ;;  %v3342_v59 = vshll.u32 %v4842_v28, 16  ;;  %v3841_v4 = vrot.slane %v6074_v62, 5  ;;  %v2569_v8 = vunpack.c.l.b16 %v2503_v40  ;;  %v5030_v40 = vld [vmem:[%s5111_s30 + $0x88] sm:$0xf] }
 0x1e9   : > { %6473 = vst [vmem:[#allocation4_spill] sm:$0xff] %v6092_v21  ;;  %v2506_v61 = vsel %vm5297_vm7, %v2504_v29, %v2505_v57  ;;  %v3339_v39 = vor.u32 %v3338_v25, %v6096_v19  ;;  %v3930_v9 = vpack.c.b16 %v3907_v34, %v3906_v43  ;;  %v3330_v17 = vrot.slane %v3329_v44, 4  ;;  %v6110_v21 = vld [vmem:[%s5111_s30 + $0x94] sm:$0xf] }
 0x1ea   : > { %v3344_v3 = vrot.slane %v3342_v59, 5  ;;  %v4903_v29 = vrot.slane %v4887_v56, 9  ;;  %v3843_v62 = vrot.slane %v3841_v4, 4  ;;  %v3350_v25 = vshll.u32 %v4843_v52, 16  ;;  %v6139_v56 = vld [vmem:[%s6465_s3] ss:$0 sm:$0xff] }
 0x1eb   : > { %v2338_v58 = vpop.f32.mrf.mxu0  ;;  %v3340_v23 = vrot.slane %v3339_v39, 4  ;;  %v3356_v43 = vshll.u32 %v6110_v21, 16  ;;  %v3360_v44 = vshrl.u32 %v6110_v21, 16 }
 0x1ec   : > { %v1684_v10 = vpop.f32.mrf.mxu3  ;;  %4805 = vmatmul.msk.bf16.gmra.mxu2 %vm685_vm4, %v4970_v50  ;;  %v2661_v55 = vpop.f32.mrf.mxu1  ;;  %v2570_v50 = vunpack.c.l.b16 %v2506_v61  ;;  %v2509_v61 = vrot.slane %v5030_v40, 5  ;;  %v3842_v59 = vsel %vm5297_vm7, %v4903_v29, %v3841_v4  ;;  %v3352_v52 = vrot.slane %v3350_v25, 5  ;;  %v4971_v4 = vld [vmem:[%s5111_s30 + $0x84] sm:$0xff] }
 0x1ed   : > { %v1718_v60 = vadd.f32 %v1684_v10, %v1431_v53  ;;  %v3844_v53 = vrot.slane %v4842_v28, 5  ;;  %v3335_v28 = vsel %vm5123_vm3, %v3330_v17, %v6096_v19  ;;  %v3345_v39 = vsel %vm5123_vm3, %v3340_v23, %v3344_v3  ;;  %v5031_v23 = vld [vmem:[%s5111_s30 + $0x8c] sm:$0x1] }
 0x1ee   : > { %v2592_v63 = vpack.c.b16 %v2570_v50, %v2569_v8  ;;  %v2740_v8 = vadd.f32 %v2661_v55, %v5589_v1  ;;  %v2512_v3 = vrot.slane %v5031_v23, 5  ;;  %v3510_v1 = vunpack.c.l.b16 %v3335_v28 }
 0x1ef   : > { %v2946_v54 = vpop.f32.mrf.mxu2  ;;  %v6113_v35 = vadd.f32 %v2338_v58, %v1718_v60  ;;  %v6124_v58 = vld [vmem:[%s6464_s2] ss:$0 sm:$0xff]  ;;  %v4661_v60 = vld [vmem:[%s5111_s30 + $0x84] sm:$0xe]  ;;  %v3511_v55 = vunpack.c.l.b16 %v3345_v39 }
 0x1f0   : > { %v3026_v7 = vadd.f32 %v2946_v54, %v2739_v15  ;;  %v3845_v15 = vsel %vm5297_vm7, %v3843_v62, %v3844_v53  ;;  %v3349_v54 = vrot.slane %v3347_v49, 4  ;;  %v4677_v17 = vrot.slane %v4661_v60, 9  ;;  %v6147_v49 = vld [vmem:[%s5111_s30 + $0x98] sm:$0x1] }
 0x1f1   : > { %4870 = vmatmul.msk.bf16.gmra.mxu3 %vm685_vm4, %v3532_v5  ;;  %v3362_v53 = vrot.slane %v3360_v44, 4  ;;  %v3909_v25 = vunpack.c.l.b16 %v3845_v15 }
 0x1f2   : > { %v2510_v44 = vsel %vm5297_vm7, %v4677_v17, %v2509_v61  ;;  %v3353_v28 = vor.u32 %v3352_v52, %v3349_v54  ;;  %v6160_v17 = vld [vmem:[%s5111_s30 + $0xa0] sm:$0xf] }
 0x1f3   : > { %v3998_v57 = vpop.f32.mrf.mxu0  ;;  %v2571_v23 = vunpack.c.l.b16 %v2510_v44 }
 0x1f4   : > { %v3600_v10 = vpop.f32.mrf.mxu3  ;;  %v2664_v34 = vpop.f32.mrf.mxu1  ;;  %v3354_v54 = vrot.slane %v3353_v28, 4 }
 0x1f5   : > { %v3680_v5 = vadd.f32 %v3600_v10, %v3026_v7  ;;  %v2511_v7 = vrot.slane %v2509_v61, 4  ;;  %v3908_v10 = vunpack.c.l.b16 %v3842_v59  ;;  %v3366_v59 = vshll.u32 %v6147_v49, 16  ;;  %v4846_v61 = vld [vmem:[%s5111_s30 + $0x9c] sm:$0xf] }
 0x1f6   : > { %4919 = vmatmul.msk.bf16.gmra.mxu0 %vm685_vm4, %v3930_v9  ;;  %v6141_v9 = vrot.slane %v3356_v43, 5 }
 0x1f7   : > { %v4078_v19 = vadd.f32 %v3998_v57, %v3680_v5  ;;  %v2948_v50 = vpop.f32.mrf.mxu2  ;;  %4693 = vmatmul.msk.bf16.gmra.mxu1 %vm685_vm4, %v2592_v63  ;;  %v2513_v5 = vsel %vm5297_vm7, %v2511_v7, %v2512_v3  ;;  %v3931_v7 = vpack.c.b16 %v3909_v25, %v3908_v10 }
 0x1f8   : > { %v3027_v29 = vadd.f32 %v2948_v50, %v2740_v8  ;;  %v3363_v60 = vor.u32 %v3362_v53, %v6141_v9  ;;  %v2741_v50 = vadd.f32 %v2664_v34, %v5602_v16  ;;  %v3848_v16 = vrot.slane %v6110_v21, 5  ;;  %v4662_v21 = vld [vmem:[%s5111_s30 + $0x90] sm:$0xe] }
 0x1f9   : > { %v4114_v62 = vmul.f32 %v6124_v58, %v4078_v19  ;;  %v3533_v19 = vpack.c.b16 %v3511_v55, %v3510_v1  ;;  %v4888_v1 = vld [vmem:[%s5111_s30 + $0x90] sm:$0xe]  ;;  %v3371_v34 = vshrl.u32 %v4846_v61, 16  ;;  %v3374_v55 = vshll.u32 %v4846_v61, 16 }
 0x1fa   : > { %v3364_v52 = vrot.slane %v3363_v60, 4  ;;  %v3359_v28 = vsel %vm5123_vm3, %v3354_v54, %v6141_v9  ;;  %v4904_v60 = vrot.slane %v4888_v1, 9  ;;  %v6183_v1 = vld [vmem:[%s5111_s30 + $0xa4] sm:$0x1] }
 0x1fb   : > { %v4000_v57 = vpop.f32.mrf.mxu0  ;;  %v4150_v63 = vadd.f32 %v6139_v56, %v4114_v62  ;;  %v2572_v62 = vunpack.c.l.b16 %v2513_v5 }
 0x1fc   : > { %v3602_v43 = vpop.f32.mrf.mxu3  ;;  %4806 = vmatmul.msk.bf16.gmra.mxu2 %vm685_vm4, %v4971_v4  ;;  %v2666_v40 = vpop.f32.mrf.mxu1 }
 0x1fd   : > { %v3681_v39 = vadd.f32 %v3602_v43, %v3027_v29  ;;  %v4182_v8 = vmax.f32 %v4150_v63, 0.0  ;;  %v3368_v29 = vrot.slane %v3366_v59, 5  ;;  %v3384_v63 = vshrl.u32 %v6160_v17, 16 }
 0x1fe   : > { %v2593_v43 = vpack.c.b16 %v2572_v62, %v2571_v23  ;;  %v3373_v23 = vrot.slane %v3371_v34, 4  ;;  %v3376_v62 = vrot.slane %v3374_v55, 5  ;;  %v2742_v54 = vadd.f32 %v2666_v40, %v5615_v13 }
 0x1ff   : > { %v4079_v15 = vadd.f32 %v4000_v57, %v3681_v39  ;;  %4214 = vxpose.xlu0.b32.start [1/16] (narrow) %v4182_v8, 8  ;;  %v2951_v4 = vpop.f32.mrf.mxu2  ;;  %v3380_v57 = vshll.u32 %v6160_v17, 16  ;;  %v3851_v39 = vrot.slane %v6147_v49, 5  ;;  %v3386_v61 = vrot.slane %v3384_v63, 4 }
 0x200   : > { %v3028_v3 = vadd.f32 %v2951_v4, %v2741_v50  ;;  %v3369_v50 = vsel %vm5123_vm3, %v3364_v52, %v3368_v29  ;;  %v3850_v4 = vrot.slane %v3848_v16, 4  ;;  %v4972_v52 = vld [vmem:[%s5111_s30 + $0x90] sm:$0xff]  ;;  %v3512_v29 = vunpack.c.l.b16 %v3359_v28 }
 0x201   : > { %4871 = vmatmul.msk.bf16.gmra.mxu3 %vm685_vm4, %v3533_v19  ;;  %v4115_v53 = vmul.f32 %v6124_v58, %v4079_v15  ;;  %v5032_v19 = vld [vmem:[%s5111_s30 + $0x94] sm:$0xf]  ;;  %v6178_v9 = vrot.slane %v3380_v57, 5  ;;  %v3513_v55 = vunpack.c.l.b16 %v3369_v50  ;;  %v3849_v63 = vsel %vm5297_vm7, %v4904_v60, %v3848_v16 }
 0x202   : > { %v2516_v8 = vrot.slane %v5032_v19, 5  ;;  %v3852_v13 = vsel %vm5297_vm7, %v3850_v4, %v3851_v39  ;;  %v3377_v40 = vor.u32 %v3376_v62, %v3373_v23 }
 0x203   : > { %v4003_v10 = vpop.f32.mrf.mxu0  ;;  %v4151_v25 = vadd.f32 %v6139_v56, %v4115_v53  ;;  %v3534_v50 = vpack.c.b16 %v3513_v55, %v3512_v29  ;;  %v3911_v23 = vunpack.c.l.b16 %v3852_v13 }
 0x204   : > { %v3605_v44 = vpop.f32.mrf.mxu3  ;;  %v2669_v5 = vpop.f32.mrf.mxu1 }
 0x205   : > { %v3682_v59 = vadd.f32 %v3605_v44, %v3028_v3  ;;  %v4183_v15 = vmax.f32 %v4151_v25, 0.0  ;;  %v4678_v3 = vrot.slane %v4662_v21, 9  ;;  %v2518_v25 = vrot.slane %v2516_v8, 4  ;;  %v5033_v44 = vld [vmem:[%s5111_s30 + $0x98] sm:$0x1] }
 0x206   : > { %4920 = vmatmul.msk.bf16.gmra.mxu0 %vm685_vm4, %v3931_v7  ;;  %v2519_v7 = vrot.slane %v5033_v44, 5  ;;  %v4889_v44 = vld [vmem:[%s5111_s30 + $0x9c] sm:$0xe] }
 0x207   : > { %v4080_v49 = vadd.f32 %v4003_v10, %v3682_v59  ;;  %4215 = vxpose.xlu0.b32.cont [2/16] (narrow) %v4183_v15, 8  ;;  %v2953_v53 = vpop.f32.mrf.mxu2  ;;  %4694 = vmatmul.msk.bf16.gmra.mxu1 %vm685_vm4, %v2593_v43  ;;  %v3387_v10 = vor.u32 %v3386_v61, %v6178_v9  ;;  %v3390_v43 = vshll.u32 %v6183_v1, 16  ;;  %v2517_v19 = vsel %vm5297_vm7, %v4678_v3, %v2516_v8 }
 0x208   : > { %v3029_v34 = vadd.f32 %v2953_v53, %v2742_v54  ;;  %v3910_v15 = vunpack.c.l.b16 %v3849_v63  ;;  %v2520_v60 = vsel %vm5297_vm7, %v2518_v25, %v2519_v7  ;;  %v2573_v62 = vunpack.c.l.b16 %v2517_v19  ;;  %v4849_v25 = vld [vmem:[%s5111_s30 + $0xa8] sm:$0xf] }
 0x209   : > { %v4116_v57 = vmul.f32 %v6124_v58, %v4080_v49  ;;  %v3378_v61 = vrot.slane %v3377_v40, 4  ;;  %v3388_v49 = vrot.slane %v3387_v10, 4  ;;  %v3392_v54 = vrot.slane %v3390_v43, 5 }
 0x20a   : > { %v2743_v8 = vadd.f32 %v2669_v5, %v5628_v20  ;;  %v3932_v29 = vpack.c.b16 %v3911_v23, %v3910_v15  ;;  %v4905_v5 = vrot.slane %v4889_v44, 9  ;;  %v3858_v63 = vrot.slane %v6183_v1, 5 }
 0x20b   : > { %v4005_v21 = vpop.f32.mrf.mxu0  ;;  %v4152_v28 = vadd.f32 %v6139_v56, %v4116_v57  ;;  %v3855_v57 = vrot.slane %v6160_v17, 5  ;;  %v3383_v55 = vsel %vm5123_vm3, %v3378_v61, %v6178_v9  ;;  %v3393_v20 = vsel %vm5123_vm3, %v3388_v49, %v3392_v54  ;;  %v6213_v17 = vld [vmem:[%s5111_s30 + $0xac] sm:$0xf] }
 0x20c   : > { %v3607_v59 = vpop.f32.mrf.mxu3  ;;  %4807 = vmatmul.msk.bf16.gmra.mxu2 %vm685_vm4, %v4972_v52  ;;  %v2671_v16 = vpop.f32.mrf.mxu1  ;;  %v2574_v52 = vunpack.c.l.b16 %v2520_v60  ;;  %v3398_v9 = vshll.u32 %v4849_v25, 16  ;;  %v3408_v1 = vshrl.u32 %v6213_v17, 16  ;;  %v3514_v23 = vunpack.c.l.b16 %v3383_v55 }
 0x20d   : > { %v3683_v39 = vadd.f32 %v3607_v59, %v3029_v34  ;;  %v4184_v4 = vmax.f32 %v4152_v28, 0.0  ;;  %v3857_v43 = vrot.slane %v3855_v57, 4  ;;  %v5034_v59 = vld [vmem:[%s5111_s30 + $0xa0] sm:$0xf]  ;;  %v3856_v61 = vsel %vm5297_vm7, %v4905_v5, %v3855_v57 }
 0x20e   : > { %v2594_v10 = vpack.c.b16 %v2574_v52, %v2573_v62  ;;  %v2523_v15 = vrot.slane %v5034_v59, 5  ;;  %v3515_v62 = vunpack.c.l.b16 %v3393_v20  ;;  %v2744_v54 = vadd.f32 %v2671_v16, %v5641_v38  ;;  %v4973_v52 = vld [vmem:[%s5111_s30 + $0x9c] sm:$0xff]  ;;  %v6233_v16 = vld [vmem:[%s5111_s30 + $0xb0] sm:$0x1] }
 0x20f   : > { %v4081_v53 = vadd.f32 %v4005_v21, %v3683_v39  ;;  %4216 = vxpose.xlu0.b32.cont [3/16] (narrow) %v4184_v4, 8  ;;  %v2956_v3 = vpop.f32.mrf.mxu2  ;;  %v3395_v21 = vshrl.u32 %v4849_v25, 16  ;;  %v3404_v4 = vshll.u32 %v6213_v17, 16  ;;  %v3410_v38 = vrot.slane %v3408_v1, 4 }
 0x210   : > { %v3030_v7 = vadd.f32 %v2956_v3, %v2743_v8  ;;  %v3859_v8 = vsel %vm5297_vm7, %v3857_v43, %v3858_v63  ;;  %v2525_v25 = vrot.slane %v2523_v15, 4  ;;  %v3912_v63 = vunpack.c.l.b16 %v3856_v61 }
 0x211   : > { %4872 = vmatmul.msk.bf16.gmra.mxu3 %vm685_vm4, %v3534_v50  ;;  %v4117_v34 = vmul.f32 %v6124_v58, %v4081_v53  ;;  %v4663_v50 = vld [vmem:[%s5111_s30 + $0x9c] sm:$0xe]  ;;  %v3397_v3 = vrot.slane %v3395_v21, 4  ;;  %v6230_v20 = vrot.slane %v3404_v4, 5  ;;  %v3913_v43 = vunpack.c.l.b16 %v3859_v8 }
 0x212   : > { %v4679_v44 = vrot.slane %v4663_v50, 9  ;;  %v3414_v4 = vshll.u32 %v6233_v16, 16 }
 0x213   : > { %v4008_v13 = vpop.f32.mrf.mxu0  ;;  %v4153_v40 = vadd.f32 %v6139_v56, %v4117_v34  ;;  %v3400_v34 = vrot.slane %v3398_v9, 5  ;;  %v3411_v50 = vor.u32 %v3410_v38, %v6230_v20 }
 0x214   : > { %v3610_v28 = vpop.f32.mrf.mxu3  ;;  %v2674_v19 = vpop.f32.mrf.mxu1 }
 0x215   : > { %v3684_v60 = vadd.f32 %v3610_v28, %v3030_v7  ;;  %v4185_v39 = vmax.f32 %v4153_v40, 0.0  ;;  %v2524_v28 = vsel %vm5297_vm7, %v4679_v44, %v2523_v15  ;;  %v3401_v9 = vor.u32 %v3400_v34, %v3397_v3  ;;  %v6246_v15 = vld [vmem:[%s5111_s30 + $0xb8] sm:$0xf] }
 0x216   : > { %4921 = vmatmul.msk.bf16.gmra.mxu0 %vm685_vm4, %v3932_v29  ;;  %v5035_v29 = vld [vmem:[%s5111_s30 + $0xa4] sm:$0x1]  ;;  %v2575_v61 = vunpack.c.l.b16 %v2524_v28  ;;  %v3412_v44 = vrot.slane %v3411_v50, 4  ;;  %v3432_v34 = vshrl.u32 %v6246_v15, 16 }
 0x217   : > { %v4082_v49 = vadd.f32 %v4008_v13, %v3684_v60  ;;  %4217 = vxpose.xlu0.b32.cont [4/16] (narrow) %v4185_v39, 8  ;;  %v2958_v53 = vpop.f32.mrf.mxu2  ;;  %4695 = vmatmul.msk.bf16.gmra.mxu1 %vm685_vm4, %v2594_v10  ;;  %v2526_v7 = vrot.slane %v5035_v29, 5  ;;  %v3535_v13 = vpack.c.b16 %v3515_v62, %v3514_v23  ;;  %v2745_v23 = vadd.f32 %v2674_v19, %v5653_v41  ;;  %v4890_v29 = vld [vmem:[%s5111_s30 + $0xa8] sm:$0xe] }
 0x218   : > { %v3031_v55 = vadd.f32 %v2958_v53, %v2744_v54  ;;  %v4852_v54 = vld [vmem:[%s5111_s30 + $0xb4] sm:$0xf]  ;;  %v3933_v53 = vpack.c.b16 %v3913_v43, %v3912_v63  ;;  %v3402_v8 = vrot.slane %v3401_v9, 4  ;;  %v3428_v19 = vshll.u32 %v6246_v15, 16 }
 0x219   : > { %v4118_v57 = vmul.f32 %v6124_v58, %v4082_v49  ;;  %v2527_v59 = vsel %vm5297_vm7, %v2525_v25, %v2526_v7  ;;  %v3416_v25 = vrot.slane %v3414_v4, 5  ;;  %v3419_v7 = vshrl.u32 %v4852_v54, 16 }
 0x21a   : > { %v2576_v49 = vunpack.c.l.b16 %v2527_v59  ;;  %v3422_v41 = vshll.u32 %v4852_v54, 16  ;;  %v4906_v63 = vrot.slane %v4890_v29, 9  ;;  %v3407_v9 = vsel %vm5123_vm3, %v3402_v8, %v6230_v20  ;;  %v6269_v54 = vld [vmem:[%s5111_s30 + $0xbc] sm:$0x1]  ;;  %v4974_v8 = vld [vmem:[%s5111_s30 + $0xa8] sm:$0xff] }
 0x21b   : > { %v4010_v5 = vpop.f32.mrf.mxu0  ;;  %v4154_v40 = vadd.f32 %v6139_v56, %v4118_v57  ;;  %v6263_v4 = vrot.slane %v3428_v19, 5  ;;  %v3516_v29 = vunpack.c.l.b16 %v3407_v9 }
 0x21c   : > { %v3612_v10 = vpop.f32.mrf.mxu3  ;;  %4808 = vmatmul.msk.bf16.gmra.mxu2 %vm685_vm4, %v4973_v52  ;;  %v2676_v21 = vpop.f32.mrf.mxu1  ;;  %v2595_v38 = vpack.c.b16 %v2576_v49, %v2575_v61  ;;  %v3424_v50 = vrot.slane %v3422_v41, 5  ;;  %v3865_v49 = vrot.slane %v6233_v16, 5  ;;  %v3438_v16 = vshll.u32 %v6269_v54, 16 }
 0x21d   : > { %v3685_v60 = vadd.f32 %v3612_v10, %v3031_v55  ;;  %v4186_v39 = vmax.f32 %v4154_v40, 0.0  ;;  %v5036_v10 = vld [vmem:[%s5111_s30 + $0xac] sm:$0xf] }
 0x21e   : > { %v2530_v43 = vrot.slane %v5036_v10, 5 }
 0x21f   : > { %v4083_v1 = vadd.f32 %v4010_v5, %v3685_v60  ;;  %4218 = vxpose.xlu0.b32.cont [5/16] (narrow) %v4186_v39, 8  ;;  %v2961_v62 = vpop.f32.mrf.mxu2  ;;  %v3862_v5 = vrot.slane %v6213_v17, 5  ;;  %v3417_v60 = vsel %vm5123_vm3, %v3412_v44, %v3416_v25  ;;  %v4664_v39 = vld [vmem:[%s5111_s30 + $0xa8] sm:$0xe]  ;;  %v3421_v17 = vrot.slane %v3419_v7, 4 }
 0x220   : > { %v3032_v3 = vadd.f32 %v2961_v62, %v2745_v23  ;;  %v2746_v62 = vadd.f32 %v2676_v21, %v5666_v31  ;;  %v3517_v7 = vunpack.c.l.b16 %v3417_v60 }
 0x221   : > { %4873 = vmatmul.msk.bf16.gmra.mxu3 %vm685_vm4, %v3535_v13  ;;  %v4119_v52 = vmul.f32 %v6124_v58, %v4083_v1  ;;  %v3434_v1 = vrot.slane %v3432_v34, 4  ;;  %v3864_v20 = vrot.slane %v3862_v5, 4  ;;  %v3863_v31 = vsel %vm5297_vm7, %v4906_v63, %v3862_v5 }
 0x222   : > { %v3425_v21 = vor.u32 %v3424_v50, %v3421_v17  ;;  %v3914_v9 = vunpack.c.l.b16 %v3863_v31  ;;  %v3440_v50 = vrot.slane %v3438_v16, 5 }
 0x223   : > { %v4013_v55 = vpop.f32.mrf.mxu0  ;;  %v4155_v57 = vadd.f32 %v6139_v56, %v4119_v52  ;;  %v5037_v52 = vld [vmem:[%s5111_s30 + $0xb0] sm:$0x1]  ;;  %v3435_v19 = vor.u32 %v3434_v1, %v6263_v4 }
 0x224   : > { %v3615_v13 = vpop.f32.mrf.mxu3  ;;  %v2679_v40 = vpop.f32.mrf.mxu1  ;;  %v2533_v44 = vrot.slane %v5037_v52, 5 }
 0x225   : > { %v3686_v28 = vadd.f32 %v3615_v13, %v3032_v3  ;;  %v4187_v59 = vmax.f32 %v4155_v57, 0.0  ;;  %v2532_v3 = vrot.slane %v2530_v43, 4  ;;  %v3866_v57 = vsel %vm5297_vm7, %v3864_v20, %v3865_v49  ;;  %v4855_v20 = vld [vmem:[%s5111_s30 + $0xc0] sm:$0xf] }
 0x226   : > { %4922 = vmatmul.msk.bf16.gmra.mxu0 %vm685_vm4, %v3933_v53  ;;  %v4680_v53 = vrot.slane %v4664_v39, 9  ;;  %v3915_v60 = vunpack.c.l.b16 %v3866_v57  ;;  %v3426_v39 = vrot.slane %v3425_v21, 4  ;;  %v3436_v17 = vrot.slane %v3435_v19, 4  ;;  %v5038_v19 = vld [vmem:[%s5111_s30 + $0xb8] sm:$0xf] }
 0x227   : > { %v4084_v23 = vadd.f32 %v4013_v55, %v3686_v28  ;;  %4219 = vxpose.xlu0.b32.cont [6/16] (narrow) %v4187_v59, 8  ;;  %v2963_v61 = vpop.f32.mrf.mxu2  ;;  %4696 = vmatmul.msk.bf16.gmra.mxu1 %vm685_vm4, %v2595_v38  ;;  %v2534_v5 = vsel %vm5297_vm7, %v2532_v3, %v2533_v44  ;;  %v3536_v28 = vpack.c.b16 %v3517_v7, %v3516_v29  ;;  %v4891_v29 = vld [vmem:[%s5111_s30 + $0xb4] sm:$0xe]  ;;  %v3869_v7 = vrot.slane %v6246_v15, 5 }
 0x228   : > { %v3033_v25 = vadd.f32 %v2963_v61, %v2746_v62  ;;  %v2531_v10 = vsel %vm5297_vm7, %v4680_v53, %v2530_v43  ;;  %v2578_v61 = vunpack.c.l.b16 %v2534_v5  ;;  %v3934_v53 = vpack.c.b16 %v3915_v60, %v3914_v9  ;;  %v4665_v57 = vld [vmem:[%s5111_s30 + $0xb4] sm:$0xe] }
 0x229   : > { %v4120_v41 = vmul.f32 %v6124_v58, %v4084_v23  ;;  %v2747_v23 = vadd.f32 %v2679_v40, %v5680_v30  ;;  %v2577_v43 = vunpack.c.l.b16 %v2531_v10  ;;  %v3431_v3 = vsel %vm5123_vm3, %v3426_v39, %v6263_v4  ;;  %v6296_v40 = vld [vmem:[%s5111_s30 + $0xc4] sm:$0xf] }
 0x22a   : > { %v3441_v30 = vsel %vm5123_vm3, %v3436_v17, %v3440_v50  ;;  %v2537_v16 = vrot.slane %v5038_v19, 5  ;;  %v3456_v10 = vshrl.u32 %v6296_v40, 16  ;;  %v3518_v5 = vunpack.c.l.b16 %v3431_v3  ;;  %v4975_v50 = vld [vmem:[%s5111_s30 + $0xb4] sm:$0xff] }
 0x22b   : > { %v4015_v34 = vpop.f32.mrf.mxu0  ;;  %v4156_v55 = vadd.f32 %v6139_v56, %v4120_v41  ;;  %v3443_v41 = vshrl.u32 %v4855_v20, 16  ;;  %v4907_v15 = vrot.slane %v4891_v29, 9  ;;  %v3871_v39 = vrot.slane %v3869_v7, 4 }
 0x22c   : > { %v3617_v38 = vpop.f32.mrf.mxu3  ;;  %4809 = vmatmul.msk.bf16.gmra.mxu2 %vm685_vm4, %v4974_v8  ;;  %v2681_v13 = vpop.f32.mrf.mxu1 }
 0x22d   : > { %v3687_v63 = vadd.f32 %v3617_v38, %v3033_v25  ;;  %v4188_v59 = vmax.f32 %v4156_v55, 0.0  ;;  %v2596_v25 = vpack.c.b16 %v2578_v61, %v2577_v43  ;;  %v3452_v38 = vshll.u32 %v6296_v40, 16 }
 0x22e   : > { %v2748_v9 = vadd.f32 %v2681_v13, %v5693_v48  ;;  %v3445_v17 = vrot.slane %v3443_v41, 4  ;;  %v6315_v48 = vld [vmem:[%s5111_s30 + $0xc8] sm:$0x1]  ;;  %v3870_v3 = vsel %vm5297_vm7, %v4907_v15, %v3869_v7 }
 0x22f   : > { %v4085_v1 = vadd.f32 %v4015_v34, %v3687_v63  ;;  %4220 = vxpose.xlu0.b32.cont [7/16] (narrow) %v4188_v59, 8  ;;  %v2966_v62 = vpop.f32.mrf.mxu2  ;;  %v3446_v34 = vshll.u32 %v4855_v20, 16  ;;  %v3519_v63 = vunpack.c.l.b16 %v3441_v30  ;;  %v3462_v7 = vshll.u32 %v6315_v48, 16 }
 0x230   : > { %v3034_v49 = vadd.f32 %v2966_v62, %v2747_v23  ;;  %v2539_v23 = vrot.slane %v2537_v16, 4  ;;  %v5039_v62 = vld [vmem:[%s5111_s30 + $0xbc] sm:$0x1] }
 0x231   : > { %4874 = vmatmul.msk.bf16.gmra.mxu3 %vm685_vm4, %v3536_v28  ;;  %v4121_v8 = vmul.f32 %v6124_v58, %v4085_v1  ;;  %v3872_v28 = vrot.slane %v6269_v54, 5  ;;  %v4681_v1 = vrot.slane %v4665_v57, 9  ;;  %v2540_v43 = vrot.slane %v5039_v62, 5  ;;  %v6337_v62 = vld [vmem:[%s5111_s30 + $0xd0] sm:$0xf] }
 0x232   : > { %v3448_v61 = vrot.slane %v3446_v34, 5  ;;  %v6312_v54 = vrot.slane %v3452_v38, 5 }
 0x233   : > { %v4018_v52 = vpop.f32.mrf.mxu0  ;;  %v4157_v44 = vadd.f32 %v6139_v56, %v4121_v8  ;;  %v3458_v8 = vrot.slane %v3456_v10, 4  ;;  %v3873_v30 = vsel %vm5297_vm7, %v3871_v39, %v3872_v28  ;;  %v2538_v29 = vsel %vm5297_vm7, %v4681_v1, %v2537_v16  ;;  %v4892_v39 = vld [vmem:[%s5111_s30 + $0xc0] sm:$0xe] }
 0x234   : > { %v3620_v31 = vpop.f32.mrf.mxu3  ;;  %v2684_v21 = vpop.f32.mrf.mxu1  ;;  %v2541_v41 = vsel %vm5297_vm7, %v2539_v23, %v2540_v43  ;;  %v3917_v57 = vunpack.c.l.b16 %v3873_v30  ;;  %v2579_v16 = vunpack.c.l.b16 %v2538_v29  ;;  %v3876_v1 = vrot.slane %v6296_v40, 5  ;;  %v4858_v23 = vld [vmem:[%s5111_s30 + $0xcc] sm:$0xf] }
 0x235   : > { %v3688_v4 = vadd.f32 %v3620_v31, %v3034_v49  ;;  %v4189_v55 = vmax.f32 %v4157_v44, 0.0  ;;  %v3537_v44 = vpack.c.b16 %v3519_v63, %v3518_v5  ;;  %v3449_v31 = vor.u32 %v3448_v61, %v3445_v17 }
 0x236   : > { %4923 = vmatmul.msk.bf16.gmra.mxu0 %vm685_vm4, %v3934_v53  ;;  %v2749_v10 = vadd.f32 %v2684_v21, %v5709_v14  ;;  %v2580_v63 = vunpack.c.l.b16 %v2541_v41  ;;  %v3467_v40 = vshrl.u32 %v4858_v23, 16  ;;  %v3476_v29 = vshll.u32 %v6337_v62, 16 }
 0x237   : > { %v4086_v59 = vadd.f32 %v4018_v52, %v3688_v4  ;;  %4221 = vxpose.xlu0.b32.cont [8/16] (narrow) %v4189_v55, 8  ;;  %v2968_v60 = vpop.f32.mrf.mxu2  ;;  %4697 = vmatmul.msk.bf16.gmra.mxu1 %vm685_vm4, %v2596_v25  ;;  %v3459_v4 = vor.u32 %v3458_v8, %v6312_v54  ;;  %v3916_v55 = vunpack.c.l.b16 %v3870_v3  ;;  %v3450_v15 = vrot.slane %v3449_v31, 4 }
 0x238   : > { %v3035_v20 = vadd.f32 %v2968_v60, %v2748_v9  ;;  %v3464_v60 = vrot.slane %v3462_v7, 5  ;;  %v2597_v21 = vpack.c.b16 %v2580_v63, %v2579_v16  ;;  %v3480_v41 = vshrl.u32 %v6337_v62, 16  ;;  %v4976_v7 = vld [vmem:[%s5111_s30 + $0xc0] sm:$0xff] }
 0x239   : > { %v4122_v49 = vmul.f32 %v6124_v58, %v4086_v59  ;;  %v3460_v9 = vrot.slane %v3459_v4, 4  ;;  %v3935_v17 = vpack.c.b16 %v3917_v57, %v3916_v55  ;;  %v3455_v3 = vsel %vm5123_vm3, %v3450_v15, %v6312_v54 }
 0x23a   : > { %v3878_v54 = vrot.slane %v3876_v1, 4  ;;  %v3879_v4 = vrot.slane %v6315_v48, 5  ;;  %v3520_v55 = vunpack.c.l.b16 %v3455_v3 }
 0x23b   : > { %v4020_v13 = vpop.f32.mrf.mxu0  ;;  %v4158_v53 = vadd.f32 %v6139_v56, %v4122_v49  ;;  %v5040_v49 = vld [vmem:[%s5111_s30 + $0xc4] sm:$0xf]  ;;  %v3465_v30 = vsel %vm5123_vm3, %v3460_v9, %v3464_v60  ;;  %v3482_v9 = vrot.slane %v3480_v41, 4 }
 0x23c   : > { %v3622_v52 = vpop.f32.mrf.mxu3  ;;  %4810 = vmatmul.msk.bf16.gmra.mxu2 %vm685_vm4, %v4975_v50  ;;  %v2686_v25 = vpop.f32.mrf.mxu1  ;;  %v2544_v8 = vrot.slane %v5040_v49, 5  ;;  %v3521_v63 = vunpack.c.l.b16 %v3465_v30 }
 0x23d   : > { %v3689_v19 = vadd.f32 %v3622_v52, %v3035_v20  ;;  %v4190_v34 = vmax.f32 %v4158_v53, 0.0  ;;  %v4908_v20 = vrot.slane %v4892_v39, 9  ;;  %v4666_v52 = vld [vmem:[%s5111_s30 + $0xc0] sm:$0xe]  ;;  %v3880_v39 = vsel %vm5297_vm7, %v3878_v54, %v3879_v4 }
 0x23e   : > { %v4682_v57 = vrot.slane %v4666_v52, 9 }
 0x23f   : > { %v4087_v38 = vadd.f32 %v4020_v13, %v3689_v19  ;;  %4222 = vxpose.xlu0.b32.cont [9/16] (narrow) %v4190_v34, 8  ;;  %v2971_v5 = vpop.f32.mrf.mxu2  ;;  %v2750_v19 = vadd.f32 %v2686_v25, %v5734_v51  ;;  %v3877_v51 = vsel %vm5297_vm7, %v4908_v20, %v3876_v1  ;;  %v3469_v25 = vrot.slane %v3467_v40, 4  ;;  %v6474_v40 = vld [vmem:[#allocation2_spill] sm:$0xff] }
 0x240   : > { %v3036_v28 = vadd.f32 %v2971_v5, %v2749_v10  ;;  %v5041_v10 = vld [vmem:[%s5111_s30 + $0xc8] sm:$0x1]  ;;  %v3918_v49 = vunpack.c.l.b16 %v3877_v51 }
 0x241   : > { %4875 = vmatmul.msk.bf16.gmra.mxu3 %vm685_vm4, %v3537_v44  ;;  %v4123_v59 = vmul.f32 %v6124_v58, %v4087_v38  ;;  %v3470_v44 = vshll.u32 %v4858_v23, 16  ;;  %v2546_v38 = vrot.slane %v2544_v8, 4  ;;  %v2547_v5 = vrot.slane %v5041_v10, 5  ;;  %v4893_v10 = vld [vmem:[%s5111_s30 + $0xcc] sm:$0xe] }
 0x243   : > { %v4023_v50 = vpop.f32.mrf.mxu0  ;;  %v4159_v14 = vadd.f32 %v6139_v56, %v4123_v59  ;;  %v3478_v59 = vrot.slane %v3476_v29, 5  ;;  %v2548_v1 = vsel %vm5297_vm7, %v2546_v38, %v2547_v5 }
 0x244   : > { %v3625_v43 = vpop.f32.mrf.mxu3  ;;  %v2689_v61 = vpop.f32.mrf.mxu1 }
 0x245   : > { %v3690_v13 = vadd.f32 %v3625_v43, %v3036_v28  ;;  %v4191_v53 = vmax.f32 %v4159_v14, 0.0  ;;  %v3472_v28 = vrot.slane %v3470_v44, 5  ;;  %v3538_v43 = vpack.c.b16 %v3521_v63, %v3520_v55 }
 0x246   : > { %4924 = vmatmul.msk.bf16.gmra.mxu0 %vm685_vm4, %v3935_v17  ;;  %v4860_v17 = vld [vmem:[%s5111_s30 + $0xd4] sm:$0x1]  ;;  %v3483_v3 = vor.u32 %v3482_v9, %v3478_v59  ;;  %v2751_v44 = vadd.f32 %v2689_v61, %v6474_v40  ;;  %v3883_v61 = vrot.slane %v6337_v62, 5 }
 0x247   : > { %v4088_v31 = vadd.f32 %v4023_v50, %v3690_v13  ;;  %4223 = vxpose.xlu0.b32.cont [10/16] (narrow) %v4191_v53, 8  ;;  %v2973_v34 = vpop.f32.mrf.mxu2  ;;  %4698 = vmatmul.msk.bf16.gmra.mxu1 %vm685_vm4, %v2597_v21  ;;  %v2545_v21 = vsel %vm5297_vm7, %v4682_v57, %v2544_v8  ;;  %v3919_v13 = vunpack.c.l.b16 %v3880_v39  ;;  %v3473_v53 = vor.u32 %v3472_v28, %v3469_v25 }
 0x248   : > { %v3037_v16 = vadd.f32 %v2973_v34, %v2750_v19  ;;  %v3486_v30 = vshll.u32 %v4860_v17, 16  ;;  %v2581_v41 = vunpack.c.l.b16 %v2545_v21  ;;  %v3484_v4 = vrot.slane %v3483_v3, 4  ;;  %v4977_v21 = vld [vmem:[%s5111_s30 + $0xcc] sm:$0xff] }
 0x249   : > { %v4124_v15 = vmul.f32 %v6124_v58, %v4088_v31  ;;  %v2582_v31 = vunpack.c.l.b16 %v2548_v1  ;;  %v3936_v34 = vpack.c.b16 %v3919_v13, %v3918_v49  ;;  %v3474_v54 = vrot.slane %v3473_v53, 4 }
 0x24a   : > { %v4909_v28 = vrot.slane %v4893_v10, 9  ;;  %v3885_v62 = vrot.slane %v3883_v61, 4 }
 0x24b   : > { %v4025_v60 = vpop.f32.mrf.mxu0  ;;  %v4160_v48 = vadd.f32 %v6139_v56, %v4124_v15  ;;  %v2598_v38 = vpack.c.b16 %v2582_v31, %v2581_v41  ;;  %v3479_v51 = vsel %vm5123_vm3, %v3474_v54, %v3478_v59 }
 0x24c   : > { %v3627_v50 = vpop.f32.mrf.mxu3  ;;  %4811 = vmatmul.msk.bf16.gmra.mxu2 %vm685_vm4, %v4976_v7  ;;  %v2691_v14 = vpop.f32.mrf.mxu1  ;;  %v3488_v7 = vrot.slane %v3486_v30, 5  ;;  %v3884_v49 = vsel %vm5297_vm7, %v4909_v28, %v3883_v61 }
 0x24d   : > { %v3691_v23 = vadd.f32 %v3627_v50, %v3037_v16  ;;  %v4192_v20 = vmax.f32 %v4160_v48, 0.0  ;;  %v3886_v50 = vrot.slane %v4860_v17, 5 }
 0x24e   : > { %v3489_v25 = vsel %vm5123_vm3, %v3484_v4, %v3488_v7 }
 0x24f   : > { %v4089_v52 = vadd.f32 %v4025_v60, %v3691_v23  ;;  %4224 = vxpose.xlu0.b32.cont [11/16] (narrow) %v4192_v20, 8  ;;  %v2976_v29 = vpop.f32.mrf.mxu2  ;;  %v6475_v60 = vld [vmem:[#allocation3_spill] sm:$0xff]  ;;  %v3522_v23 = vunpack.c.l.b16 %v3479_v51 }
 0x250   : > { %v3038_v8 = vadd.f32 %v2976_v29, %v2751_v44  ;;  %v2752_v48 = vadd.f32 %v2691_v14, %v6475_v60  ;;  %v3887_v14 = vsel %vm5297_vm7, %v3885_v62, %v3886_v50 }
 0x251   : > { %4876 = vmatmul.msk.bf16.gmra.mxu3 %vm685_vm4, %v3538_v43  ;;  %v4125_v19 = vmul.f32 %v6124_v58, %v4089_v52  ;;  %v3523_v43 = vunpack.c.l.b16 %v3489_v25  ;;  %v3920_v52 = vunpack.c.l.b16 %v3884_v49  ;;  %v3921_v40 = vunpack.c.l.b16 %v3887_v14 }
 0x253   : > { %v4028_v55 = vpop.f32.mrf.mxu0  ;;  %v4161_v57 = vadd.f32 %v6139_v56, %v4125_v19  ;;  %v3539_v3 = vpack.c.b16 %v3523_v43, %v3522_v23 }
 0x254   : > { %v3630_v5 = vpop.f32.mrf.mxu3  ;;  %v2694_v16 = vpop.f32.mrf.mxu1 }
 0x255   : > { %v3692_v63 = vadd.f32 %v3630_v5, %v3038_v8  ;;  %v4193_v15 = vmax.f32 %v4161_v57, 0.0  ;;  %v2753_v29 = vadd.f32 %v2694_v16, %v5778_v6  ;;  %v3937_v8 = vpack.c.b16 %v3921_v40, %v3920_v52 }
 0x256   : > { %4925 = vmatmul.msk.bf16.gmra.mxu0 %vm685_vm4, %v3936_v34 }
 0x257   : > { %v4090_v9 = vadd.f32 %v4028_v55, %v3692_v63  ;;  %4225 = vxpose.xlu0.b32.cont [12/16] (narrow) %v4193_v15, 8  ;;  %v2978_v39 = vpop.f32.mrf.mxu2  ;;  %4699 = vmatmul.msk.bf16.gmra.mxu1 %vm685_vm4, %v2598_v38 }
 0x258   : > { %v3039_v1 = vadd.f32 %v2978_v39, %v2752_v48 }
 0x259   : > { %v4126_v20 = vmul.f32 %v6124_v58, %v4090_v9 }
 0x25b   : > { %v4030_v59 = vpop.f32.mrf.mxu0  ;;  %v4162_v36 = vadd.f32 %v6139_v56, %v4126_v20 }
 0x25c   : > { %v3632_v13 = vpop.f32.mrf.mxu3  ;;  %4812 = vmatmul.msk.bf16.gmra.mxu2 %vm685_vm4, %v4977_v21  ;;  %v2696_v53 = vpop.f32.mrf.mxu1 }
 0x25d   : > { %v3693_v17 = vadd.f32 %v3632_v13, %v3039_v1  ;;  %v4194_v30 = vmax.f32 %v4162_v36, 0.0  ;;  %v2754_v6 = vadd.f32 %v2696_v53, %v5797_v37 }
 0x25f   : > { %v4091_v44 = vadd.f32 %v4030_v59, %v3693_v17  ;;  %4226 = vxpose.xlu0.b32.cont [13/16] (narrow) %v4194_v30, 8  ;;  %v2981_v41 = vpop.f32.mrf.mxu2 }
 0x260   : > { %v3040_v31 = vadd.f32 %v2981_v41, %v2753_v29 }
 0x261   : > { %4877 = vmatmul.msk.bf16.gmra.mxu3 %vm685_vm4, %v3539_v3  ;;  %v4127_v18 = vmul.f32 %v6124_v58, %v4091_v44 }
 0x263   : > { %v4033_v19 = vpop.f32.mrf.mxu0  ;;  %v4163_v34 = vadd.f32 %v6139_v56, %v4127_v18 }
 0x264   : > { %v3635_v54 = vpop.f32.mrf.mxu3  ;;  %v2699_v4 = vpop.f32.mrf.mxu1 }
 0x265   : > { %v3694_v7 = vadd.f32 %v3635_v54, %v3040_v31  ;;  %v4195_v55 = vmax.f32 %v4163_v34, 0.0  ;;  %v2755_v9 = vadd.f32 %v2699_v4, %v5817_v42 }
 0x266   : > { %4926 = vmatmul.msk.bf16.gmra.mxu0 %vm685_vm4, %v3937_v8 }
 0x267   : > { %v4092_v57 = vadd.f32 %v4033_v19, %v3694_v7  ;;  %4227 = vxpose.xlu0.b32.cont [14/16] (narrow) %v4195_v55, 8  ;;  %v2983_v38 = vpop.f32.mrf.mxu2 }
 0x268   : > { %v3041_v10 = vadd.f32 %v2983_v38, %v2754_v6 }
 0x269   : > { %v4128_v61 = vmul.f32 %v6124_v58, %v4092_v57 }
 0x26b   : > { %v4035_v5 = vpop.f32.mrf.mxu0  ;;  %v4164_v16 = vadd.f32 %v6139_v56, %v4128_v61 }
 0x26c   : > { %v3637_v63 = vpop.f32.mrf.mxu3  ;;  %v2701_v15 = vpop.f32.mrf.mxu1 }
 0x26d   : > { %v3695_v51 = vadd.f32 %v3637_v63, %v3041_v10  ;;  %v4196_v25 = vmax.f32 %v4164_v16, 0.0  ;;  %v2756_v20 = vadd.f32 %v2701_v15, %v5836_v24 }
 0x26f   : > { %v4093_v28 = vadd.f32 %v4035_v5, %v3695_v51  ;;  %4228 = vxpose.xlu0.b32.cont [15/16] (narrow) %v4196_v25, 8  ;;  %v2986_v60 = vpop.f32.mrf.mxu2  ;;  %v6417_v25 = vld [vmem:[%s6465_s3] ss:$0 sm:$0xff] }
 0x270   : > { %v3042_v48 = vadd.f32 %v2986_v60, %v2755_v9 }
 0x271   : > { %v4129_v37 = vmul.f32 %v6124_v58, %v4093_v28 }
 0x273   : > { %v4038_v39 = vpop.f32.mrf.mxu0  ;;  %v4165_v62 = vadd.f32 %v6139_v56, %v4129_v37 }
 0x274   : > { %v3640_v50 = vpop.f32.mrf.mxu3  ;;  %v2704_v21 = vpop.f32.mrf.mxu1 }
 0x275   : > { %v3696_v1 = vadd.f32 %v3640_v50, %v3042_v48  ;;  %v4197_v23 = vmax.f32 %v4165_v62, 0.0  ;;  %v2757_v52 = vadd.f32 %v2704_v21, %v5856_v12  ;;  %v6408_v12 = vld [vmem:[%s6464_s2] ss:$0 sm:$0xff] }
 0x277   : > { %v4094_v43 = vadd.f32 %v4038_v39, %v3696_v1  ;;  %4229 = vxpose.xlu0.b32.end [16/16] (narrow) %v4197_v23, 8  ;;  %v2988_v59 = vpop.f32.mrf.mxu2 }
 0x278   : > { %v3043_v36 = vadd.f32 %v2988_v59, %v2756_v20 }
 0x279   : > { %v4130_v42 = vmul.f32 %v6124_v58, %v4094_v43 }
 0x27b   : > { %v4040_v49 = vpop.f32.mrf.mxu0  ;;  %v4166_v14 = vadd.f32 %v6139_v56, %v4130_v42 }
 0x27c   : > { %v3642_v13 = vpop.f32.mrf.mxu3  ;;  %v2706_v53 = vpop.f32.mrf.mxu1 }
 0x27d   : > { %v3697_v17 = vadd.f32 %v3642_v13, %v3043_v36  ;;  %v4198_v3 = vmax.f32 %v4166_v14, 0.0  ;;  %v2758_v54 = vadd.f32 %v2706_v53, %v5875_v26 }
 0x27f   : > { %v4095_v30 = vadd.f32 %v4040_v49, %v3697_v17  ;;  %4246 = vxpose.xlu1.b32.start [1/16] (narrow) %v4198_v3, 8  ;;  %v2991_v40 = vpop.f32.mrf.mxu2 }
 0x280   : > { %v3044_v44 = vadd.f32 %v2991_v40, %v2757_v52 }
 0x281   : > { %v4131_v24 = vmul.f32 %v6124_v58, %v4095_v30 }
 0x283   : > { %v4043_v29 = vpop.f32.mrf.mxu0  ;;  %v4167_v41 = vadd.f32 %v6139_v56, %v4131_v24 }
 0x284   : > { %v3645_v31 = vpop.f32.mrf.mxu3  ;;  %v2709_v18 = vpop.f32.mrf.mxu1 }
 0x285   : > { %v3698_v8 = vadd.f32 %v3645_v31, %v3044_v44  ;;  %v4199_v19 = vmax.f32 %v4167_v41, 0.0  ;;  %v2759_v26 = vadd.f32 %v2709_v18, %v5895_v0 }
 0x287   : > { %v4096_v34 = vadd.f32 %v4043_v29, %v3698_v8  ;;  %4247 = vxpose.xlu1.b32.cont [2/16] (narrow) %v4199_v19, 8  ;;  %v2993_v4 = vpop.f32.mrf.mxu2 }
 0x288   : > { %v3045_v7 = vadd.f32 %v2993_v4, %v2758_v54 }
 0x289   : > { %v4132_v58 = vmul.f32 %v6408_v12, %v4096_v34 }
 0x28b   : > { %v4045_v55 = vpop.f32.mrf.mxu0  ;;  %v4168_v57 = vadd.f32 %v6139_v56, %v4132_v58 }
 0x28c   : > { %v3647_v6 = vpop.f32.mrf.mxu3  ;;  %v2711_v38 = vpop.f32.mrf.mxu1 }
 0x28d   : > { %v3699_v10 = vadd.f32 %v3647_v6, %v3045_v7  ;;  %v4200_v61 = vmax.f32 %v4168_v57, 0.0  ;;  %v2760_v0 = vadd.f32 %v2711_v38, %v5914_v32 }
 0x28f   : > { %v4097_v5 = vadd.f32 %v4045_v55, %v3699_v10  ;;  %4248 = vxpose.xlu1.b32.cont [3/16] (narrow) %v4200_v61, 8  ;;  %v2996_v16 = vpop.f32.mrf.mxu2 }
 0x290   : > { %v3046_v63 = vadd.f32 %v2996_v16, %v2759_v26 }
 0x291   : > { %v4133_v15 = vmul.f32 %v6408_v12, %v4097_v5 }
 0x293   : > { %v4048_v51 = vpop.f32.mrf.mxu0  ;;  %v4169_v56 = vadd.f32 %v6417_v25, %v4133_v15 }
 0x294   : > { %v3650_v28 = vpop.f32.mrf.mxu3  ;;  %v2714_v9 = vpop.f32.mrf.mxu1 }
 0x295   : > { %v3700_v60 = vadd.f32 %v3650_v28, %v3046_v63  ;;  %v4201_v48 = vmax.f32 %v4169_v56, 0.0  ;;  %v2761_v42 = vadd.f32 %v2714_v9, %v5934_v27 }
 0x297   : > { %v4098_v37 = vadd.f32 %v4048_v51, %v3700_v60  ;;  %4249 = vxpose.xlu1.b32.cont [4/16] (narrow) %v4201_v48, 8  ;;  %v2998_v39 = vpop.f32.mrf.mxu2 }
 0x298   : > { %v3047_v62 = vadd.f32 %v2998_v39, %v2760_v0 }
 0x299   : > { %v4134_v50 = vmul.f32 %v6408_v12, %v4098_v37 }
 0x29b   : > { %v4050_v21 = vpop.f32.mrf.mxu0  ;;  %v4170_v1 = vadd.f32 %v6417_v25, %v4134_v50 }
 0x29c   : > { %v3652_v23 = vpop.f32.mrf.mxu3  ;;  %v2716_v43 = vpop.f32.mrf.mxu1 }
 0x29d   : > { %v3701_v20 = vadd.f32 %v3652_v23, %v3047_v62  ;;  %v4202_v59 = vmax.f32 %v4170_v1, 0.0  ;;  %v2762_v44 = vadd.f32 %v2716_v43, %v5953_v45 }
 0x29f   : > { %v4099_v36 = vadd.f32 %v4050_v21, %v3701_v20  ;;  %4250 = vxpose.xlu1.b32.cont [5/16] (narrow) %v4202_v59, 8  ;;  %v3001_v49 = vpop.f32.mrf.mxu2 }
 0x2a0   : > { %v3048_v14 = vadd.f32 %v3001_v49, %v2761_v42 }
 0x2a1   : > { %v4135_v32 = vmul.f32 %v6408_v12, %v4099_v36 }
 0x2a3   : > { %v4053_v13 = vpop.f32.mrf.mxu0  ;;  %v4171_v53 = vadd.f32 %v6417_v25, %v4135_v32 }
 0x2a4   : > { %v3655_v17 = vpop.f32.mrf.mxu3  ;;  %v2719_v3 = vpop.f32.mrf.mxu1 }
 0x2a5   : > { %v3702_v30 = vadd.f32 %v3655_v17, %v3048_v14  ;;  %v4203_v52 = vmax.f32 %v4171_v53, 0.0  ;;  %v2763_v4 = vadd.f32 %v2719_v3, %v5973_v2 }
 0x2a7   : > { %v4100_v40 = vadd.f32 %v4053_v13, %v3702_v30  ;;  %4251 = vxpose.xlu1.b32.cont [6/16] (narrow) %v4203_v52, 8  ;;  %v3003_v24 = vpop.f32.mrf.mxu2 }
 0x2a8   : > { %v3049_v29 = vadd.f32 %v3003_v24, %v2762_v44 }
 0x2a9   : > { %v4136_v27 = vmul.f32 %v6408_v12, %v4100_v40 }
 0x2ab   : > { %v4055_v41 = vpop.f32.mrf.mxu0  ;;  %v4172_v31 = vadd.f32 %v6417_v25, %v4136_v27 }
 0x2ac   : > { %v3657_v18 = vpop.f32.mrf.mxu3  ;;  %v2721_v8 = vpop.f32.mrf.mxu1 }
 0x2ad   : > { %v3703_v19 = vadd.f32 %v3657_v18, %v3049_v29  ;;  %v4204_v34 = vmax.f32 %v4172_v31, 0.0  ;;  %v2764_v26 = vadd.f32 %v2721_v8, %v5992_v46 }
 0x2af   : > { %v4101_v54 = vadd.f32 %v4055_v41, %v3703_v19  ;;  %4252 = vxpose.xlu1.b32.cont [7/16] (narrow) %v4204_v34, 8  ;;  %v3006_v7 = vpop.f32.mrf.mxu2 }
 0x2b0   : > { %v3050_v58 = vadd.f32 %v3006_v7, %v2763_v4 }
 0x2b1   : > { %v4137_v45 = vmul.f32 %v6408_v12, %v4101_v54 }
 0x2b3   : > { %v4058_v55 = vpop.f32.mrf.mxu0  ;;  %v4173_v57 = vadd.f32 %v6417_v25, %v4137_v45 }
 0x2b4   : > { %v3660_v6 = vpop.f32.mrf.mxu3  ;;  %v2724_v38 = vpop.f32.mrf.mxu1 }
 0x2b5   : > { %v3704_v10 = vadd.f32 %v3660_v6, %v3050_v58  ;;  %v4205_v61 = vmax.f32 %v4173_v57, 0.0  ;;  %v2765_v37 = vadd.f32 %v2724_v38, %v6012_v33  ;;  %v6476_v57 = vld [vmem:[#allocation4_spill] sm:$0xff] }
 0x2b7   : > { %v4102_v5 = vadd.f32 %v4058_v55, %v3704_v10  ;;  %4253 = vxpose.xlu1.b32.cont [8/16] (narrow) %v4205_v61, 8  ;;  %v3008_v16 = vpop.f32.mrf.mxu2 }
 0x2b8   : > { %v3051_v63 = vadd.f32 %v3008_v16, %v2764_v26 }
 0x2b9   : > { %v4138_v2 = vmul.f32 %v6408_v12, %v4102_v5 }
 0x2bb   : > { %v4060_v15 = vpop.f32.mrf.mxu0  ;;  %v4174_v51 = vadd.f32 %v6417_v25, %v4138_v2 }
 0x2bc   : > { %v3662_v56 = vpop.f32.mrf.mxu3  ;;  %v2726_v28 = vpop.f32.mrf.mxu1 }
 0x2bd   : > { %v3705_v9 = vadd.f32 %v3662_v56, %v3051_v63  ;;  %v4206_v60 = vmax.f32 %v4174_v51, 0.0  ;;  %v2766_v59 = vadd.f32 %v2726_v28, %v6031_v47 }
 0x2bf   : > { %v4103_v48 = vadd.f32 %v4060_v15, %v3705_v9  ;;  %4254 = vxpose.xlu1.b32.cont [9/16] (narrow) %v4206_v60, 8  ;;  %v3011_v0 = vpop.f32.mrf.mxu2 }
 0x2c0   : > { %v3052_v39 = vadd.f32 %v3011_v0, %v2765_v37 }
 0x2c1   : > { %v4139_v46 = vmul.f32 %v6408_v12, %v4103_v48 }
 0x2c3   : > { %v4063_v62 = vpop.f32.mrf.mxu0  ;;  %v4175_v50 = vadd.f32 %v6417_v25, %v4139_v46 }
 0x2c4   : > { %v3665_v21 = vpop.f32.mrf.mxu3  ;;  %v2729_v43 = vpop.f32.mrf.mxu1 }
 0x2c5   : > { %v3706_v1 = vadd.f32 %v3665_v21, %v3052_v39  ;;  %v4207_v23 = vmax.f32 %v4175_v50, 0.0  ;;  %v2767_v3 = vadd.f32 %v2729_v43, %v6051_v22 }
 0x2c7   : > { %v4104_v20 = vadd.f32 %v4063_v62, %v3706_v1  ;;  %4255 = vxpose.xlu1.b32.cont [10/16] (narrow) %v4207_v23, 8  ;;  %v3013_v36 = vpop.f32.mrf.mxu2 }
 0x2c8   : > { %v3053_v42 = vadd.f32 %v3013_v36, %v2766_v59 }
 0x2c9   : > { %v4140_v33 = vmul.f32 %v6408_v12, %v4104_v20 }
 0x2cb   : > { %v4065_v49 = vpop.f32.mrf.mxu0  ;;  %v4176_v14 = vadd.f32 %v6417_v25, %v4140_v33 }
 0x2cc   : > { %v3667_v32 = vpop.f32.mrf.mxu3  ;;  %v2731_v52 = vpop.f32.mrf.mxu1 }
 0x2cd   : > { %v3707_v13 = vadd.f32 %v3667_v32, %v3053_v42  ;;  %v4208_v53 = vmax.f32 %v4176_v14, 0.0  ;;  %v2768_v18 = vadd.f32 %v2731_v52, %v6068_v11 }
 0x2cf   : > { %v4105_v17 = vadd.f32 %v4065_v49, %v3707_v13  ;;  %4256 = vxpose.xlu1.b32.cont [11/16] (narrow) %v4208_v53, 8  ;;  %v3016_v30 = vpop.f32.mrf.mxu2 }
 0x2d0   : > { %v3054_v40 = vadd.f32 %v3016_v30, %v2767_v3 }
 0x2d1   : > { %v4141_v47 = vmul.f32 %v6408_v12, %v4105_v17 }
 0x2d3   : > { %v4068_v44 = vpop.f32.mrf.mxu0  ;;  %v4177_v24 = vadd.f32 %v6417_v25, %v4141_v47 }
 0x2d4   : > { %v3670_v29 = vpop.f32.mrf.mxu3  ;;  %v2734_v34 = vpop.f32.mrf.mxu1 }
 0x2d5   : > { %v3708_v27 = vadd.f32 %v3670_v29, %v3054_v40  ;;  %v4209_v41 = vmax.f32 %v4177_v24, 0.0  ;;  %v2769_v6 = vadd.f32 %v2734_v34, %v6476_v57 }
 0x2d7   : > { %v4106_v31 = vadd.f32 %v4068_v44, %v3708_v27  ;;  %4257 = vxpose.xlu1.b32.cont [12/16] (narrow) %v4209_v41, 8  ;;  %v3018_v8 = vpop.f32.mrf.mxu2 }
 0x2d8   : > { %v3055_v19 = vadd.f32 %v3018_v8, %v2768_v18 }
 0x2d9   : > { %v4142_v22 = vmul.f32 %v6408_v12, %v4106_v31 }
 0x2db   : > { %v4070_v54 = vpop.f32.mrf.mxu0  ;;  %v4178_v4 = vadd.f32 %v6417_v25, %v4142_v22 }
 0x2dc   : > { %v3672_v7 = vpop.f32.mrf.mxu3  ;;  %v2736_v61 = vpop.f32.mrf.mxu1 }
 0x2dd   : > { %v3709_v58 = vadd.f32 %v3672_v7, %v3055_v19  ;;  %v4210_v45 = vmax.f32 %v4178_v4, 0.0  ;;  %v2770_v51 = vadd.f32 %v2736_v61, %v6113_v35  ;;  %v4230_v35 = vpop.trf.xlu0 }
 0x2de   : > { %4278 = vst [vmem:[%s197_s26] sm:$0xff] %v4230_v35 }
 0x2df   : > { %v4107_v55 = vadd.f32 %v4070_v54, %v3709_v58  ;;  %4258 = vxpose.xlu1.b32.cont [13/16] (narrow) %v4210_v45, 8  ;;  %v3021_v38 = vpop.f32.mrf.mxu2 }
 0x2e0   : > { %v3056_v10 = vadd.f32 %v3021_v38, %v2769_v6 }
 0x2e1   : > { %v4143_v11 = vmul.f32 %v6408_v12, %v4107_v55 }
 0x2e3   : > { %v4179_v5 = vadd.f32 %v6417_v25, %v4143_v11  ;;  %v4073_v26 = vpop.f32.mrf.mxu0 }
 0x2e4   : > { %v3675_v16 = vpop.f32.mrf.mxu3 }
 0x2e5   : > { %v3710_v63 = vadd.f32 %v3675_v16, %v3056_v10  ;;  %v4211_v2 = vmax.f32 %v4179_v5, 0.0 }
 0x2e7   : > { %v4108_v15 = vadd.f32 %v4073_v26, %v3710_v63  ;;  %4259 = vxpose.xlu1.b32.cont [14/16] (narrow) %v4211_v2, 8  ;;  %v3023_v56 = vpop.f32.mrf.mxu2 }
 0x2e8   : > { %v3057_v28 = vadd.f32 %v3023_v56, %v2770_v51 }
 0x2e9   : > { %v4144_v9 = vmul.f32 %v6408_v12, %v4108_v15 }
 0x2eb   : > { %v4180_v60 = vadd.f32 %v6417_v25, %v4144_v9  ;;  %v4075_v39 = vpop.f32.mrf.mxu0 }
 0x2ec   : > { %v3677_v48 = vpop.f32.mrf.mxu3 }
 0x2ed   : > { %v3711_v37 = vadd.f32 %v3677_v48, %v3057_v28  ;;  %v4212_v0 = vmax.f32 %v4180_v60, 0.0 }
 0x2ef   : > { %v4109_v46 = vadd.f32 %v4075_v39, %v3711_v37  ;;  %4260 = vxpose.xlu1.b32.cont [15/16] (narrow) %v4212_v0, 8 }
 0x2f1   : > { %v4145_v62 = vmul.f32 %v6408_v12, %v4109_v46 }
 0x2f3   : > { %v4181_v50 = vadd.f32 %v6417_v25, %v4145_v62 }
 0x2f5   : > { %v4213_v21 = vmax.f32 %v4181_v50, 0.0 }
 0x2f7   : > { %4261 = vxpose.xlu1.b32.end [16/16] (narrow) %v4213_v21, 8 }
 0x323   : > { %v4262_v1 = vpop.trf.xlu1 }
 0x324   : > { %4279 = vst [vmem:[%s197_s26 + $0x8] sm:$0xff] %v4262_v1 }
 0x325 PF: > { %s14_s15 = sadd.s32 1, %s5050_s15  }
 0x326   : > { %p11_p4 = scmp.ge.s32.totalorder %s14_s15, 4  }
 0x328   :  { %13 = sbr.rel (!%p11_p4) target bundleno = 1 (0x1), region = 76 }

</bundles_post_ra>
